<compile_context>
chip_gen: v5e
topology: v5e:2x2
jax: 0.10.0
libtpu: 0.0.40
codegen_flags: <defaults>
</compile_context>

<pallas_src>
import functools

import jax
import jax.numpy as jnp
from jax import lax
from jax.experimental import pallas as pl
from jax.experimental.pallas import tpu as pltpu

LANE = 128
SUBLANE = 8


def _rup(n, m=LANE):
    return ((n + m - 1) // m) * m


def _pad_axis(x, axis, target):
    pad = target - x.shape[axis]
    if pad <= 0:
        return x
    widths = [(0, 0)] * x.ndim
    widths[axis] = (0, pad)
    return jnp.pad(x, widths)


# ---------------------------------------------------------------------------
# Generic dense kernel: y = [relu](x @ w + b).  Used for everything that is not
# part of the sequential recurrence (conv stand-in, att1 precompute, emb@w_ih_emb,
# init h/c, post-hoc vocab projection).  bf16 MXU operands, f32 accumulation.
# ---------------------------------------------------------------------------
def _dense_kernel(x_ref, w_ref, b_ref, o_ref, *, relu):
    y = jnp.dot(x_ref[...].astype(jnp.bfloat16), w_ref[...],
                preferred_element_type=jnp.float32) + b_ref[...]
    if relu:
        y = jnp.maximum(y, 0.0)
    o_ref[...] = y


def dense(x, w, b=None, *, relu=False, tile_m=256):
    M, K = x.shape
    N = w.shape[1]
    Mp = _rup(M, SUBLANE)                       # sublane-dense rows
    xp = _pad_axis(x, 0, Mp)
    tm = tile_m if Mp % tile_m == 0 else Mp
    if b is None:
        b = jnp.zeros((1, N), jnp.float32)
    out = pl.pallas_call(
        functools.partial(_dense_kernel, relu=relu),
        out_shape=jax.ShapeDtypeStruct((Mp, N), jnp.float32),
        grid=(Mp // tm,),
        in_specs=[
            pl.BlockSpec((tm, K), lambda i: (i, 0)),
            pl.BlockSpec((K, N), lambda i: (0, 0)),      # resident weight (bf16)
            pl.BlockSpec((1, N), lambda i: (0, 0)),      # bias (f32)
        ],
        out_specs=pl.BlockSpec((tm, N), lambda i: (i, 0)),
        compiler_params=pltpu.CompilerParams(
            dimension_semantics=("parallel",)),
    )(xp, w, b)
    return out[:M]


# ---------------------------------------------------------------------------
# Encoder stand-in: 3x3 valid conv + ReLU.  im2col is done in the wrapper
# (layout plumbing) so the kernel only sees one lane-dense matmul.
# ---------------------------------------------------------------------------
def conv3x3_relu(x, w, b):
    B, H, W, C = x.shape
    Ho, Wo = H - 2, W - 2
    cols = [x[:, kh:kh + Ho, kw:kw + Wo, :] for kh in range(3) for kw in range(3)]
    patches = jnp.concatenate(cols, axis=-1).reshape(B * Ho * Wo, 9 * C)
    y = dense(patches, w, b, relu=True)                  # (B*Ho*Wo, Cout_p)
    return y.reshape(B, Ho, Wo, w.shape[1])


def encoder_forward(params_p, images_nchw):
    # NCHW (PyTorch) -> NHWC; channels padded lane-dense once.
    x = jnp.transpose(images_nchw, (0, 2, 3, 1)).astype(jnp.float32)
    x = _pad_axis(x, 3, _rup(x.shape[3]))
    y = conv3x3_relu(x, params_p["conv1_w"], params_p["conv1_b"])
    feats = conv3x3_relu(y, params_p["conv2_w"], params_p["conv2_b"])
    B, Ho, Wo, E_p = feats.shape
    return feats.reshape(B, Ho * Wo, E_p)                # (B, P, E_p)


# ---------------------------------------------------------------------------
# Recurrent decoder kernel: one pallas_call, grid = (batch tiles, T).
# Only the h-dependent per-step work lives here; h/c carried in VMEM scratch.
# ---------------------------------------------------------------------------
def _decoder_step_kernel(
        emb_proj_ref, feat_ref, att1_ref, hc0_ref,
        hproj_w_ref, hproj_b_ref, full_w_ref, full_b_ref, w_ih_att_ref,
        h_out_ref, alpha_ref,
        h_sc, c_sc, *, num_pixels):
    t = pl.program_id(1)
    Bb, P_p, E_p = feat_ref.shape
    A_p = att1_ref.shape[2]
    D_p = h_sc.shape[1]

    # ---- t == 0: seed h/c from the hoisted init_hidden_state result ----
    @pl.when(t == 0)
    def _():
        h_sc[...] = hc0_ref[:, :D_p]
        c_sc[...] = hc0_ref[:, D_p:]

    h = h_sc[...]
    c = c_sc[...]

    # ---- fused h projections: [decoder_att | f_beta | w_hh] in one bf16 matmul ----
    hp = jnp.dot(h.astype(jnp.bfloat16), hproj_w_ref[...],
                 preferred_element_type=jnp.float32) + hproj_b_ref[...]
    att2 = hp[:, :A_p]                                   # (Bb, A_p)
    gate = jax.nn.sigmoid(hp[:, A_p:A_p + E_p])          # (Bb, E_p)
    hh = hp[:, A_p + E_p:]                               # h@w_hh + (b_ih + b_hh)

    # ---- attention (att1 precomputed outside the recurrence) ----
    e = jnp.maximum(att1_ref[...] + att2[:, None, :], 0.0)
    scores = jnp.sum(e * full_w_ref[...][None], axis=-1) + full_b_ref[0, 0]
    pix = lax.broadcasted_iota(jnp.int32, (Bb, P_p), 1)
    scores = jnp.where(pix < num_pixels, scores, -1e30)  # mask padded pixels
    m = jnp.max(scores, axis=1, keepdims=True)
    ex = jnp.exp(scores - m)
    alpha = ex * pl.reciprocal(jnp.sum(ex, axis=1, keepdims=True), approx=True)

    # Gated context: VPU multiply + sublane reduce (q=1 MXU matmul avoided).
    weighted = jnp.sum(feat_ref[...] * alpha[:, :, None], axis=1)    # (Bb, E_p)
    aw = gate * weighted

    # ---- LSTM cell: emb@w_ih_emb precomputed for all T; only aw@w_ih_att here ----
    gates = (emb_proj_ref[t]
             + jnp.dot(aw.astype(jnp.bfloat16), w_ih_att_ref[...],
                       preferred_element_type=jnp.float32)
             + hh)
    i_g = jax.nn.sigmoid(gates[:, 0 * D_p:1 * D_p])
    f_g = jax.nn.sigmoid(gates[:, 1 * D_p:2 * D_p])
    g_g = jnp.tanh(gates[:, 2 * D_p:3 * D_p])
    o_g = jax.nn.sigmoid(gates[:, 3 * D_p:4 * D_p])
    # Padded D lanes stay exactly 0: padded gate-weight/bias columns are 0, so
    # c_new_pad = 0.5*0 + 0.5*tanh(0) = 0 and h_new_pad = 0.5*tanh(0) = 0.
    c_new = f_g * c + i_g * g_g
    h_new = o_g * jnp.tanh(c_new)
    h_sc[...] = h_new
    c_sc[...] = c_new

    h_out_ref[0] = h_new
    alpha_ref[0] = alpha


def decoder_forward(params_p, feats, captions):
    B, P, E_p = feats.shape
    T = captions.shape[1]
    P_p = _rup(P)
    M_p = params_p["embedding"].shape[1]
    D_p = params_p["fc_w"].shape[0]
    V_p = params_p["fc_w"].shape[1]
    A_p = params_p["enc_att_b"].shape[1]
    HP = params_p["hproj_w"].shape[1]

    feats_pad = _pad_axis(feats, 1, P_p)                              # (B, P_p, E_p)

    # ---- hoisted, h-independent matmuls (loop-invariant / batched over T) ----
    mean = jnp.mean(feats, axis=1)                                    # true-pixel mean
    hc0 = dense(mean, params_p["init_w"], params_p["init_b"])         # (B, 2*D_p)
    att1 = dense(feats_pad.reshape(B * P_p, E_p),
                 params_p["enc_att_w"], params_p["enc_att_b"]
                 ).reshape(B, P_p, A_p)                               # (B, P_p, A_p)
    emb = params_p["embedding"][captions.T]                           # (T, B, M_p)
    emb_proj = dense(emb.reshape(T * B, M_p),
                     params_p["w_ih_emb"]).reshape(T, B, 4 * D_p)     # no bias here

    # ---- batch tiling: "parallel" batch axis feeds v7x's two TensorCores ----
    Bb = 8 if (B % 8 == 0 and B >= 16) else B
    Bg = B // Bb

    operands = (emb_proj, feats_pad, att1, hc0,
                params_p["hproj_w"], params_p["hproj_b"],
                params_p["full_att_w"], params_p["full_att_b"],
                params_p["w_ih_att"])
    out_bytes = T * B * (D_p + P_p) * 4
    resident_bytes = sum(int(a.size) * a.dtype.itemsize for a in operands)
    # Re-derived from the resident set; stays well under v7x's 64 MiB VMEM and
    # above v5e's 16 MiB scoped default.
    vmem_limit = int(min(48 << 20,
                         max(16 << 20, 2 * (resident_bytes + out_bytes) + (4 << 20))))

    kernel = functools.partial(_decoder_step_kernel, num_pixels=P)

    h_all, alpha_all = pl.pallas_call(
        kernel,
        out_shape=(jax.ShapeDtypeStruct((T, B, D_p), jnp.float32),
                   jax.ShapeDtypeStruct((T, B, P_p), jnp.float32)),
        grid=(Bg, T),
        in_specs=[
            # whole precomputed emb projection is resident -> no per-step input DMA
            pl.BlockSpec((T, Bb, 4 * D_p), lambda b, t: (0, b, 0)),
            pl.BlockSpec((Bb, P_p, E_p), lambda b, t: (b, 0, 0)),     # features
            pl.BlockSpec((Bb, P_p, A_p), lambda b, t: (b, 0, 0)),     # att1 (precomputed)
            pl.BlockSpec((Bb, 2 * D_p), lambda b, t: (b, 0)),         # h0|c0 (precomputed)
            pl.BlockSpec((D_p, HP), lambda b, t: (0, 0)),             # fused h-proj W (bf16)
            pl.BlockSpec((1, HP), lambda b, t: (0, 0)),               # fused h-proj b
            pl.BlockSpec((1, A_p), lambda b, t: (0, 0)),              # full_att weight
            pl.BlockSpec(memory_space=pltpu.MemorySpace.SMEM),        # full_att bias scalar
            pl.BlockSpec((E_p, 4 * D_p), lambda b, t: (0, 0)),        # w_ih_att (bf16)
        ],
        out_specs=(pl.BlockSpec((1, Bb, D_p), lambda b, t: (t, b, 0)),
                   pl.BlockSpec((1, Bb, P_p), lambda b, t: (t, b, 0))),
        scratch_shapes=[pltpu.VMEM((Bb, D_p), jnp.float32),           # h carry
                        pltpu.VMEM((Bb, D_p), jnp.float32)],          # c carry
        compiler_params=pltpu.CompilerParams(
            dimension_semantics=("parallel", "arbitrary"),            # never T-parallel
            vmem_limit_bytes=vmem_limit),
    )(*operands)

    # ---- vocab projection batched over all timesteps (dropout = identity) ----
    logits = dense(h_all.reshape(T * B, D_p),
                   params_p["fc_w"], params_p["fc_b"]).reshape(T, B, V_p)

    return (jnp.transpose(logits, (1, 0, 2)),             # (B, T, V_p)
            jnp.transpose(alpha_all, (1, 0, 2)))           # (B, T, P_p)


def encoder_decoder_forward(params_p, images, captions, vocab_size):
    feats = encoder_forward(params_p, images)              # (B, P, E_p)
    P = feats.shape[1]
    logits, alphas = decoder_forward(params_p, feats, captions)
    return logits[:, :, :vocab_size], alphas[:, :, :P]


# ---------------------------------------------------------------------------
# Parameters: created at the "true" model dims, then padded / fused / bf16'ed.
# ---------------------------------------------------------------------------
def make_params(key, in_ch, mid_ch, encoder_dim, embed_dim, attention_dim,
                decoder_dim, vocab_size):
    ks = iter(jax.random.split(key, 32))

    def rnd(shape, scale=0.05):
        return jax.random.normal(next(ks), shape, jnp.float32) * scale

    M, E, A, D, V = embed_dim, encoder_dim, attention_dim, decoder_dim, vocab_size
    return {
        "conv1_w": rnd((3, 3, in_ch, mid_ch)), "conv1_b": rnd((1, mid_ch)),
        "conv2_w": rnd((3, 3, mid_ch, E)), "conv2_b": rnd((1, E)),
        "embedding": rnd((V, M)),
        "enc_att_w": rnd((E, A)), "enc_att_b": rnd((1, A)),
        "dec_att_w": rnd((D, A)), "dec_att_b": rnd((1, A)),
        "full_att_w": rnd((1, A)), "full_att_b": rnd((1, 1)),
        "f_beta_w": rnd((D, E)), "f_beta_b": rnd((1, E)),
        "w_ih_emb": rnd((M, 4 * D)), "w_ih_att": rnd((E, 4 * D)),
        "w_hh": rnd((D, 4 * D)), "b_lstm": rnd((1, 4 * D)),   # b_ih + b_hh
        "fc_w": rnd((D, V)), "fc_b": rnd((1, V)),
        "init_h_w": rnd((E, D)), "init_h_b": rnd((1, D)),
        "init_c_w": rnd((E, D)), "init_c_b": rnd((1, D)),
    }


def _pad_gate_cols(w, d, d_p):
    # (K, 4*d) -> (K, 4*d_p): zero-pad each gate block (i|f|g|o) separately.
    # Padded columns MUST stay exactly zero (the kernel's h/c padding invariant).
    k = w.shape[0]
    return _pad_axis(w.reshape(k, 4, d), 2, d_p).reshape(k, 4 * d_p)


def prepare_params(params, embed_dim, attention_dim, decoder_dim,
                   encoder_dim, vocab_size):
    M, E, A, D, V = embed_dim, encoder_dim, attention_dim, decoder_dim, vocab_size
    Mp, Ep, Ap, Dp, Vp = _rup(M), _rup(E), _rup(A), _rup(D), _rup(V)
    bf = lambda x: x.astype(jnp.bfloat16)      # matmul weights in bf16, biases f32

    def conv_w(w):                             # (3,3,cin,cout) -> (9*cin_p, cout_p)
        cin_p, cout_p = _rup(w.shape[2]), _rup(w.shape[3])
        w = _pad_axis(_pad_axis(w, 2, cin_p), 3, cout_p)
        return bf(w.reshape(9 * cin_p, cout_p))

    # Fuse every h-sourced projection along the output dim (N = Ap+Ep+4Dp, 256-multiple).
    hproj_w = jnp.concatenate([
        _pad_axis(_pad_axis(params["dec_att_w"], 0, Dp), 1, Ap),
        _pad_axis(_pad_axis(params["f_beta_w"], 0, Dp), 1, Ep),
        _pad_axis(_pad_gate_cols(params["w_hh"], D, Dp), 0, Dp),
    ], axis=1)
    hproj_b = jnp.concatenate([
        _pad_axis(params["dec_att_b"], 1, Ap),
        _pad_axis(params["f_beta_b"], 1, Ep),
        _pad_gate_cols(params["b_lstm"], D, Dp),
    ], axis=1)

    init_w = jnp.concatenate([
        _pad_axis(_pad_axis(params["init_h_w"], 0, Ep), 1, Dp),
        _pad_axis(_pad_axis(params["init_c_w"], 0, Ep), 1, Dp),
    ], axis=1)
    init_b = jnp.concatenate([
        _pad_axis(params["init_h_b"], 1, Dp),
        _pad_axis(params["init_c_b"], 1, Dp),
    ], axis=1)

    return {
        "conv1_w": conv_w(params["conv1_w"]),
        "conv1_b": _pad_axis(params["conv1_b"], 1, _rup(params["conv1_b"].shape[1])),
        "conv2_w": conv_w(params["conv2_w"]),
        "conv2_b": _pad_axis(params["conv2_b"], 1, _rup(params["conv2_b"].shape[1])),
        "embedding": _pad_axis(params["embedding"], 1, Mp),
        "enc_att_w": bf(_pad_axis(_pad_axis(params["enc_att_w"], 0, Ep), 1, Ap)),
        "enc_att_b": _pad_axis(params["enc_att_b"], 1, Ap),
        "hproj_w": bf(hproj_w), "hproj_b": hproj_b,
        "full_att_w": _pad_axis(params["full_att_w"], 1, Ap),
        "full_att_b": params["full_att_b"],
        "w_ih_emb": bf(_pad_axis(_pad_gate_cols(params["w_ih_emb"], D, Dp), 0, Mp)),
        "w_ih_att": bf(_pad_axis(_pad_gate_cols(params["w_ih_att"], D, Dp), 0, Ep)),
        "fc_w": bf(_pad_axis(_pad_axis(params["fc_w"], 0, Dp), 1, Vp)),
        "fc_b": _pad_axis(params["fc_b"], 1, Vp),
        "init_w": bf(init_w), "init_b": init_b,
    }


if __name__ == "__main__":
    B, in_ch, H, W = 2, 4, 16, 16
    mid_ch, encoder_dim = 16, 32
    embed_dim, attention_dim, decoder_dim, vocab_size = 32, 32, 32, 64
    T = 8

    key = jax.random.PRNGKey(0)
    k_img, k_cap, k_par = jax.random.split(key, 3)
    images = jax.random.normal(k_img, (B, in_ch, H, W), jnp.float32)     # NCHW
    captions = jax.random.randint(k_cap, (B, T), 0, vocab_size, jnp.int32)
    params = make_params(k_par, in_ch, mid_ch, encoder_dim, embed_dim,
                         attention_dim, decoder_dim, vocab_size)
    params_p = prepare_params(params, embed_dim, attention_dim, decoder_dim,
                              encoder_dim, vocab_size)

    @jax.jit
    def fwd(pp, imgs, caps):
        return encoder_decoder_forward(pp, imgs, caps, vocab_size)

    logits, alphas = fwd(params_p, images, captions)
    jax.block_until_ready((logits, alphas))

    assert logits.shape == (B, T, vocab_size)
    assert alphas.shape == (B, T, (H - 4) * (W - 4))   # 12*12 = 144 pixels
    print("KERNEL_OK")
</pallas_src>

<mosaic_0001>
module attributes {stable_mosaic.version = 11 : i64} {
  func.func @_dense_kernel(%arg0: i32, %arg1: memref<392x1152xf32, #tpu.memory_space<vmem>>, %arg2: memref<1152x128xbf16, #tpu.memory_space<vmem>>, %arg3: memref<1x128xf32, #tpu.memory_space<vmem>>, %arg4: memref<392x128xf32, #tpu.memory_space<vmem>>) attributes {dimension_semantics = [#tpu.dimension_semantics<parallel>], iteration_bounds = array<i64: 1>, scalar_prefetch = 0 : i64, scratch_operands = 0 : i64, tpu.core_type = #tpu.core_type<tc>, window_params = [{transform_indices = @transform_0, window_bounds = array<i64: 392, 1152>}, {pipeline_mode = #tpu.pipeline_mode<synchronous>, transform_indices = @transform_1, window_bounds = array<i64: 1152, 128>}, {pipeline_mode = #tpu.pipeline_mode<synchronous>, transform_indices = @transform_2, window_bounds = array<i64: 1, 128>}, {transform_indices = @transform_3, window_bounds = array<i64: 392, 128>}]} {
    %c0 = arith.constant 0 : index
    %c0_0 = arith.constant 0 : index
    %0 = vector.load %arg1[%c0, %c0_0] : memref<392x1152xf32, #tpu.memory_space<vmem>>, vector<392x1152xf32>
    %1 = arith.truncf %0 : vector<392x1152xf32> to vector<392x1152xbf16>
    %c0_1 = arith.constant 0 : index
    %c0_2 = arith.constant 0 : index
    %2 = vector.load %arg2[%c0_1, %c0_2] : memref<1152x128xbf16, #tpu.memory_space<vmem>>, vector<1152x128xbf16>
    %cst = arith.constant dense<0.000000e+00> : vector<392x128xf32>
    %3 = tpu.matmul %1, %2, %cst {dimension_numbers = #tpu.dot_dimension_numbers<[1], [0], [0], [1], [0, 0, 1, 1], [], []>} : vector<392x1152xbf16>, vector<1152x128xbf16>, vector<392x128xf32> -> vector<392x128xf32>
    %c0_3 = arith.constant 0 : index
    %c0_4 = arith.constant 0 : index
    %4 = vector.load %arg3[%c0_3, %c0_4] : memref<1x128xf32, #tpu.memory_space<vmem>>, vector<1x128xf32>
    %5 = vector.broadcast %4 : vector<1x128xf32> to vector<392x128xf32>
    %6 = arith.addf %3, %5 : vector<392x128xf32>
    %cst_5 = arith.constant 0.000000e+00 : f32
    %7 = vector.broadcast %cst_5 : f32 to vector<392x128xf32>
    %8 = arith.maximumf %6, %7 : vector<392x128xf32>
    %c0_6 = arith.constant 0 : index
    %c0_7 = arith.constant 0 : index
    %9 = vector.load %arg4[%c0_6, %c0_7] : memref<392x128xf32, #tpu.memory_space<vmem>>, vector<392x128xf32>
    tpu.vector_store %arg4[%c0_6, %c0_7], %8 {strides = array<i32>} : memref<392x128xf32, #tpu.memory_space<vmem>>, vector<392x128xf32>,
    return
  }
  func.func @transform_0(%arg0: i32) -> (i32, i32) {
    %c0_i32 = arith.constant 0 : i32
    %c0_i32_0 = arith.constant 0 : i32
    return %arg0, %c0_i32 : i32, i32
  }
  func.func @transform_1(%arg0: i32) -> (i32, i32) {
    %c0_i32 = arith.constant 0 : i32
    %c0_i32_0 = arith.constant 0 : i32
    %c0_i32_1 = arith.constant 0 : i32
    return %c0_i32, %c0_i32_0 : i32, i32
  }
  func.func @transform_2(%arg0: i32) -> (i32, i32) {
    %c0_i32 = arith.constant 0 : i32
    %c0_i32_0 = arith.constant 0 : i32
    %c0_i32_1 = arith.constant 0 : i32
    return %c0_i32, %c0_i32_0 : i32, i32
  }
  func.func @transform_3(%arg0: i32) -> (i32, i32) {
    %c0_i32 = arith.constant 0 : i32
    %c0_i32_0 = arith.constant 0 : i32
    return %arg0, %c0_i32 : i32, i32
  }
}

module attributes {stable_mosaic.version = 11 : i64} {
  func.func @_dense_kernel(%arg0: i32, %arg1: memref<288x1152xf32, #tpu.memory_space<vmem>>, %arg2: memref<1152x128xbf16, #tpu.memory_space<vmem>>, %arg3: memref<1x128xf32, #tpu.memory_space<vmem>>, %arg4: memref<288x128xf32, #tpu.memory_space<vmem>>) attributes {dimension_semantics = [#tpu.dimension_semantics<parallel>], iteration_bounds = array<i64: 1>, scalar_prefetch = 0 : i64, scratch_operands = 0 : i64, tpu.core_type = #tpu.core_type<tc>, window_params = [{transform_indices = @transform_0, window_bounds = array<i64: 288, 1152>}, {pipeline_mode = #tpu.pipeline_mode<synchronous>, transform_indices = @transform_1, window_bounds = array<i64: 1152, 128>}, {pipeline_mode = #tpu.pipeline_mode<synchronous>, transform_indices = @transform_2, window_bounds = array<i64: 1, 128>}, {transform_indices = @transform_3, window_bounds = array<i64: 288, 128>}]} {
    %c0 = arith.constant 0 : index
    %c0_0 = arith.constant 0 : index
    %0 = vector.load %arg1[%c0, %c0_0] : memref<288x1152xf32, #tpu.memory_space<vmem>>, vector<288x1152xf32>
    %1 = arith.truncf %0 : vector<288x1152xf32> to vector<288x1152xbf16>
    %c0_1 = arith.constant 0 : index
    %c0_2 = arith.constant 0 : index
    %2 = vector.load %arg2[%c0_1, %c0_2] : memref<1152x128xbf16, #tpu.memory_space<vmem>>, vector<1152x128xbf16>
    %cst = arith.constant dense<0.000000e+00> : vector<288x128xf32>
    %3 = tpu.matmul %1, %2, %cst {dimension_numbers = #tpu.dot_dimension_numbers<[1], [0], [0], [1], [0, 0, 1, 1], [], []>} : vector<288x1152xbf16>, vector<1152x128xbf16>, vector<288x128xf32> -> vector<288x128xf32>
    %c0_3 = arith.constant 0 : index
    %c0_4 = arith.constant 0 : index
    %4 = vector.load %arg3[%c0_3, %c0_4] : memref<1x128xf32, #tpu.memory_space<vmem>>, vector<1x128xf32>
    %5 = vector.broadcast %4 : vector<1x128xf32> to vector<288x128xf32>
    %6 = arith.addf %3, %5 : vector<288x128xf32>
    %cst_5 = arith.constant 0.000000e+00 : f32
    %7 = vector.broadcast %cst_5 : f32 to vector<288x128xf32>
    %8 = arith.maximumf %6, %7 : vector<288x128xf32>
    %c0_6 = arith.constant 0 : index
    %c0_7 = arith.constant 0 : index
    %9 = vector.load %arg4[%c0_6, %c0_7] : memref<288x128xf32, #tpu.memory_space<vmem>>, vector<288x128xf32>
    tpu.vector_store %arg4[%c0_6, %c0_7], %8 {strides = array<i32>} : memref<288x128xf32, #tpu.memory_space<vmem>>, vector<288x128xf32>,
    return
  }
  func.func @transform_0(%arg0: i32) -> (i32, i32) {
    %c0_i32 = arith.constant 0 : i32
    %c0_i32_0 = arith.constant 0 : i32
    return %arg0, %c0_i32 : i32, i32
  }
  func.func @transform_1(%arg0: i32) -> (i32, i32) {
    %c0_i32 = arith.constant 0 : i32
    %c0_i32_0 = arith.constant 0 : i32
    %c0_i32_1 = arith.constant 0 : i32
    return %c0_i32, %c0_i32_0 : i32, i32
  }
  func.func @transform_2(%arg0: i32) -> (i32, i32) {
    %c0_i32 = arith.constant 0 : i32
    %c0_i32_0 = arith.constant 0 : i32
    %c0_i32_1 = arith.constant 0 : i32
    return %c0_i32, %c0_i32_0 : i32, i32
  }
  func.func @transform_3(%arg0: i32) -> (i32, i32) {
    %c0_i32 = arith.constant 0 : i32
    %c0_i32_0 = arith.constant 0 : i32
    return %arg0, %c0_i32 : i32, i32
  }
}

module attributes {stable_mosaic.version = 11 : i64} {
  func.func @_dense_kernel(%arg0: i32, %arg1: memref<256x128xf32, #tpu.memory_space<vmem>>, %arg2: memref<128x128xbf16, #tpu.memory_space<vmem>>, %arg3: memref<1x128xf32, #tpu.memory_space<vmem>>, %arg4: memref<256x128xf32, #tpu.memory_space<vmem>>) attributes {dimension_semantics = [#tpu.dimension_semantics<parallel>], iteration_bounds = array<i64: 2>, scalar_prefetch = 0 : i64, scratch_operands = 0 : i64, tpu.core_type = #tpu.core_type<tc>, window_params = [{transform_indices = @transform_0, window_bounds = array<i64: 256, 128>}, {pipeline_mode = #tpu.pipeline_mode<synchronous>, transform_indices = @transform_1, window_bounds = array<i64: 128, 128>}, {pipeline_mode = #tpu.pipeline_mode<synchronous>, transform_indices = @transform_2, window_bounds = array<i64: 1, 128>}, {transform_indices = @transform_3, window_bounds = array<i64: 256, 128>}]} {
    %c0 = arith.constant 0 : index
    %c0_0 = arith.constant 0 : index
    %0 = vector.load %arg1[%c0, %c0_0] : memref<256x128xf32, #tpu.memory_space<vmem>>, vector<256x128xf32>
    %1 = arith.truncf %0 : vector<256x128xf32> to vector<256x128xbf16>
    %c0_1 = arith.constant 0 : index
    %c0_2 = arith.constant 0 : index
    %2 = vector.load %arg2[%c0_1, %c0_2] : memref<128x128xbf16, #tpu.memory_space<vmem>>, vector<128x128xbf16>
    %cst = arith.constant dense<0.000000e+00> : vector<256x128xf32>
    %3 = tpu.matmul %1, %2, %cst {dimension_numbers = #tpu.dot_dimension_numbers<[1], [0], [0], [1], [0, 0, 1, 1], [], []>} : vector<256x128xbf16>, vector<128x128xbf16>, vector<256x128xf32> -> vector<256x128xf32>
    %c0_3 = arith.constant 0 : index
    %c0_4 = arith.constant 0 : index
    %4 = vector.load %arg3[%c0_3, %c0_4] : memref<1x128xf32, #tpu.memory_space<vmem>>, vector<1x128xf32>
    %5 = vector.broadcast %4 : vector<1x128xf32> to vector<256x128xf32>
    %6 = arith.addf %3, %5 : vector<256x128xf32>
    %c0_5 = arith.constant 0 : index
    %c0_6 = arith.constant 0 : index
    %7 = vector.load %arg4[%c0_5, %c0_6] : memref<256x128xf32, #tpu.memory_space<vmem>>, vector<256x128xf32>
    tpu.vector_store %arg4[%c0_5, %c0_6], %6 {strides = array<i32>} : memref<256x128xf32, #tpu.memory_space<vmem>>, vector<256x128xf32>,
    return
  }
  func.func @transform_0(%arg0: i32) -> (i32, i32) {
    %c0_i32 = arith.constant 0 : i32
    %c0_i32_0 = arith.constant 0 : i32
    return %arg0, %c0_i32 : i32, i32
  }
  func.func @transform_1(%arg0: i32) -> (i32, i32) {
    %c0_i32 = arith.constant 0 : i32
    %c0_i32_0 = arith.constant 0 : i32
    %c0_i32_1 = arith.constant 0 : i32
    return %c0_i32, %c0_i32_0 : i32, i32
  }
  func.func @transform_2(%arg0: i32) -> (i32, i32) {
    %c0_i32 = arith.constant 0 : i32
    %c0_i32_0 = arith.constant 0 : i32
    %c0_i32_1 = arith.constant 0 : i32
    return %c0_i32, %c0_i32_0 : i32, i32
  }
  func.func @transform_3(%arg0: i32) -> (i32, i32) {
    %c0_i32 = arith.constant 0 : i32
    %c0_i32_0 = arith.constant 0 : i32
    return %arg0, %c0_i32 : i32, i32
  }
}

module attributes {stable_mosaic.version = 11 : i64} {
  func.func @_dense_kernel(%arg0: i32, %arg1: memref<8x128xf32, #tpu.memory_space<vmem>>, %arg2: memref<128x256xbf16, #tpu.memory_space<vmem>>, %arg3: memref<1x256xf32, #tpu.memory_space<vmem>>, %arg4: memref<8x256xf32, #tpu.memory_space<vmem>>) attributes {dimension_semantics = [#tpu.dimension_semantics<parallel>], iteration_bounds = array<i64: 1>, scalar_prefetch = 0 : i64, scratch_operands = 0 : i64, tpu.core_type = #tpu.core_type<tc>, window_params = [{transform_indices = @transform_0, window_bounds = array<i64: 8, 128>}, {pipeline_mode = #tpu.pipeline_mode<synchronous>, transform_indices = @transform_1, window_bounds = array<i64: 128, 256>}, {pipeline_mode = #tpu.pipeline_mode<synchronous>, transform_indices = @transform_2, window_bounds = array<i64: 1, 256>}, {transform_indices = @transform_3, window_bounds = array<i64: 8, 256>}]} {
    %c0 = arith.constant 0 : index
    %c0_0 = arith.constant 0 : index
    %0 = vector.load %arg1[%c0, %c0_0] : memref<8x128xf32, #tpu.memory_space<vmem>>, vector<8x128xf32>
    %1 = arith.truncf %0 : vector<8x128xf32> to vector<8x128xbf16>
    %c0_1 = arith.constant 0 : index
    %c0_2 = arith.constant 0 : index
    %2 = vector.load %arg2[%c0_1, %c0_2] : memref<128x256xbf16, #tpu.memory_space<vmem>>, vector<128x256xbf16>
    %cst = arith.constant dense<0.000000e+00> : vector<8x256xf32>
    %3 = tpu.matmul %1, %2, %cst {dimension_numbers = #tpu.dot_dimension_numbers<[1], [0], [0], [1], [0, 0, 1, 1], [], []>} : vector<8x128xbf16>, vector<128x256xbf16>, vector<8x256xf32> -> vector<8x256xf32>
    %c0_3 = arith.constant 0 : index
    %c0_4 = arith.constant 0 : index
    %4 = vector.load %arg3[%c0_3, %c0_4] : memref<1x256xf32, #tpu.memory_space<vmem>>, vector<1x256xf32>
    %5 = vector.broadcast %4 : vector<1x256xf32> to vector<8x256xf32>
    %6 = arith.addf %3, %5 : vector<8x256xf32>
    %c0_5 = arith.constant 0 : index
    %c0_6 = arith.constant 0 : index
    %7 = vector.load %arg4[%c0_5, %c0_6] : memref<8x256xf32, #tpu.memory_space<vmem>>, vector<8x256xf32>
    tpu.vector_store %arg4[%c0_5, %c0_6], %6 {strides = array<i32>} : memref<8x256xf32, #tpu.memory_space<vmem>>, vector<8x256xf32>,
    return
  }
  func.func @transform_0(%arg0: i32) -> (i32, i32) {
    %c0_i32 = arith.constant 0 : i32
    %c0_i32_0 = arith.constant 0 : i32
    return %arg0, %c0_i32 : i32, i32
  }
  func.func @transform_1(%arg0: i32) -> (i32, i32) {
    %c0_i32 = arith.constant 0 : i32
    %c0_i32_0 = arith.constant 0 : i32
    %c0_i32_1 = arith.constant 0 : i32
    return %c0_i32, %c0_i32_0 : i32, i32
  }
  func.func @transform_2(%arg0: i32) -> (i32, i32) {
    %c0_i32 = arith.constant 0 : i32
    %c0_i32_0 = arith.constant 0 : i32
    %c0_i32_1 = arith.constant 0 : i32
    return %c0_i32, %c0_i32_0 : i32, i32
  }
  func.func @transform_3(%arg0: i32) -> (i32, i32) {
    %c0_i32 = arith.constant 0 : i32
    %c0_i32_0 = arith.constant 0 : i32
    return %arg0, %c0_i32 : i32, i32
  }
}

module attributes {stable_mosaic.version = 11 : i64} {
  func.func @_dense_kernel(%arg0: i32, %arg1: memref<16x128xf32, #tpu.memory_space<vmem>>, %arg2: memref<128x512xbf16, #tpu.memory_space<vmem>>, %arg3: memref<1x512xf32, #tpu.memory_space<vmem>>, %arg4: memref<16x512xf32, #tpu.memory_space<vmem>>) attributes {dimension_semantics = [#tpu.dimension_semantics<parallel>], iteration_bounds = array<i64: 1>, scalar_prefetch = 0 : i64, scratch_operands = 0 : i64, tpu.core_type = #tpu.core_type<tc>, window_params = [{transform_indices = @transform_0, window_bounds = array<i64: 16, 128>}, {pipeline_mode = #tpu.pipeline_mode<synchronous>, transform_indices = @transform_1, window_bounds = array<i64: 128, 512>}, {pipeline_mode = #tpu.pipeline_mode<synchronous>, transform_indices = @transform_2, window_bounds = array<i64: 1, 512>}, {transform_indices = @transform_3, window_bounds = array<i64: 16, 512>}]} {
    %c0 = arith.constant 0 : index
    %c0_0 = arith.constant 0 : index
    %0 = vector.load %arg1[%c0, %c0_0] : memref<16x128xf32, #tpu.memory_space<vmem>>, vector<16x128xf32>
    %1 = arith.truncf %0 : vector<16x128xf32> to vector<16x128xbf16>
    %c0_1 = arith.constant 0 : index
    %c0_2 = arith.constant 0 : index
    %2 = vector.load %arg2[%c0_1, %c0_2] : memref<128x512xbf16, #tpu.memory_space<vmem>>, vector<128x512xbf16>
    %cst = arith.constant dense<0.000000e+00> : vector<16x512xf32>
    %3 = tpu.matmul %1, %2, %cst {dimension_numbers = #tpu.dot_dimension_numbers<[1], [0], [0], [1], [0, 0, 1, 1], [], []>} : vector<16x128xbf16>, vector<128x512xbf16>, vector<16x512xf32> -> vector<16x512xf32>
    %c0_3 = arith.constant 0 : index
    %c0_4 = arith.constant 0 : index
    %4 = vector.load %arg3[%c0_3, %c0_4] : memref<1x512xf32, #tpu.memory_space<vmem>>, vector<1x512xf32>
    %5 = vector.broadcast %4 : vector<1x512xf32> to vector<16x512xf32>
    %6 = arith.addf %3, %5 : vector<16x512xf32>
    %c0_5 = arith.constant 0 : index
    %c0_6 = arith.constant 0 : index
    %7 = vector.load %arg4[%c0_5, %c0_6] : memref<16x512xf32, #tpu.memory_space<vmem>>, vector<16x512xf32>
    tpu.vector_store %arg4[%c0_5, %c0_6], %6 {strides = array<i32>} : memref<16x512xf32, #tpu.memory_space<vmem>>, vector<16x512xf32>,
    return
  }
  func.func @transform_0(%arg0: i32) -> (i32, i32) {
    %c0_i32 = arith.constant 0 : i32
    %c0_i32_0 = arith.constant 0 : i32
    return %arg0, %c0_i32 : i32, i32
  }
  func.func @transform_1(%arg0: i32) -> (i32, i32) {
    %c0_i32 = arith.constant 0 : i32
    %c0_i32_0 = arith.constant 0 : i32
    %c0_i32_1 = arith.constant 0 : i32
    return %c0_i32, %c0_i32_0 : i32, i32
  }
  func.func @transform_2(%arg0: i32) -> (i32, i32) {
    %c0_i32 = arith.constant 0 : i32
    %c0_i32_0 = arith.constant 0 : i32
    %c0_i32_1 = arith.constant 0 : i32
    return %c0_i32, %c0_i32_0 : i32, i32
  }
  func.func @transform_3(%arg0: i32) -> (i32, i32) {
    %c0_i32 = arith.constant 0 : i32
    %c0_i32_0 = arith.constant 0 : i32
    return %arg0, %c0_i32 : i32, i32
  }
}

module attributes {stable_mosaic.version = 11 : i64} {
  func.func @_decoder_step_kernel(%arg0: i32, %arg1: i32, %arg2: memref<8x2x512xf32, #tpu.memory_space<vmem>>, %arg3: memref<2x256x128xf32, #tpu.memory_space<vmem>>, %arg4: memref<2x256x128xf32, #tpu.memory_space<vmem>>, %arg5: memref<2x256xf32, #tpu.memory_space<vmem>>, %arg6: memref<128x768xbf16, #tpu.memory_space<vmem>>, %arg7: memref<1x768xf32, #tpu.memory_space<vmem>>, %arg8: memref<1x128xf32, #tpu.memory_space<vmem>>, %arg9: memref<1x1xf32, #tpu.memory_space<smem>>, %arg10: memref<128x512xbf16, #tpu.memory_space<vmem>>, %arg11: memref<1x2x128xf32, #tpu.memory_space<vmem>>, %arg12: memref<1x2x256xf32, #tpu.memory_space<vmem>>, %arg13: memref<2x128xf32, #tpu.memory_space<vmem>>, %arg14: memref<2x128xf32, #tpu.memory_space<vmem>>) attributes {dimension_semantics = [#tpu.dimension_semantics<parallel>, #tpu.dimension_semantics<arbitrary>], iteration_bounds = array<i64: 1, 8>, scalar_prefetch = 0 : i64, scratch_operands = 2 : i64, tpu.core_type = #tpu.core_type<tc>, window_params = [{transform_indices = @transform_0, window_bounds = array<i64: 8, 2, 512>}, {transform_indices = @transform_1, window_bounds = array<i64: 2, 256, 128>}, {transform_indices = @transform_2, window_bounds = array<i64: 2, 256, 128>}, {transform_indices = @transform_3, window_bounds = array<i64: 2, 256>}, {pipeline_mode = #tpu.pipeline_mode<synchronous>, transform_indices = @transform_4, window_bounds = array<i64: 128, 768>}, {pipeline_mode = #tpu.pipeline_mode<synchronous>, transform_indices = @transform_5, window_bounds = array<i64: 1, 768>}, {pipeline_mode = #tpu.pipeline_mode<synchronous>, transform_indices = @transform_6, window_bounds = array<i64: 1, 128>}, {transform_indices = @transform_7, window_bounds = array<i64: 1, 1>}, {pipeline_mode = #tpu.pipeline_mode<synchronous>, transform_indices = @transform_8, window_bounds = array<i64: 128, 512>}, {transform_indices = @transform_9, window_bounds = array<i64: 1, 2, 128>}, {transform_indices = @transform_10, window_bounds = array<i64: 1, 2, 256>}]} {
    %c0_i32 = arith.constant 0 : i32
    %0 = arith.cmpi eq, %arg1, %c0_i32 : i32
    %1 = arith.extui %0 : i1 to i32
    %c0_i32_0 = arith.constant 0 : i32
    %2 = arith.cmpi ne, %1, %c0_i32_0 : i32
    scf.if %2 {
      %c0_43 = arith.constant 0 : index
      %c0_44 = arith.constant 0 : index
      %95 = vector.load %arg5[%c0_43, %c0_44] : memref<2x256xf32, #tpu.memory_space<vmem>>, vector<2x128xf32>
      %c0_45 = arith.constant 0 : index
      %c0_46 = arith.constant 0 : index
      %96 = vector.load %arg13[%c0_45, %c0_46] : memref<2x128xf32, #tpu.memory_space<vmem>>, vector<2x128xf32>
      tpu.vector_store %arg13[%c0_45, %c0_46], %95 {strides = array<i32>} : memref<2x128xf32, #tpu.memory_space<vmem>>, vector<2x128xf32>,
      %c0_47 = arith.constant 0 : index
      %c128 = arith.constant 128 : index
      %97 = vector.load %arg5[%c0_47, %c128] : memref<2x256xf32, #tpu.memory_space<vmem>>, vector<2x128xf32>
      %c0_48 = arith.constant 0 : index
      %c0_49 = arith.constant 0 : index
      %98 = vector.load %arg14[%c0_48, %c0_49] : memref<2x128xf32, #tpu.memory_space<vmem>>, vector<2x128xf32>
      tpu.vector_store %arg14[%c0_48, %c0_49], %97 {strides = array<i32>} : memref<2x128xf32, #tpu.memory_space<vmem>>, vector<2x128xf32>,
    } else {
    }
    %c0 = arith.constant 0 : index
    %c0_1 = arith.constant 0 : index
    %3 = vector.load %arg13[%c0, %c0_1] : memref<2x128xf32, #tpu.memory_space<vmem>>, vector<2x128xf32>
    %c0_2 = arith.constant 0 : index
    %c0_3 = arith.constant 0 : index
    %4 = vector.load %arg14[%c0_2, %c0_3] : memref<2x128xf32, #tpu.memory_space<vmem>>, vector<2x128xf32>
    %5 = arith.truncf %3 : vector<2x128xf32> to vector<2x128xbf16>
    %c0_4 = arith.constant 0 : index
    %c0_5 = arith.constant 0 : index
    %6 = vector.load %arg6[%c0_4, %c0_5] : memref<128x768xbf16, #tpu.memory_space<vmem>>, vector<128x768xbf16>
    %cst = arith.constant dense<0.000000e+00> : vector<2x768xf32>
    %7 = tpu.matmul %5, %6, %cst {dimension_numbers = #tpu.dot_dimension_numbers<[1], [0], [0], [1], [0, 0, 1, 1], [], []>} : vector<2x128xbf16>, vector<128x768xbf16>, vector<2x768xf32> -> vector<2x768xf32>
    %c0_6 = arith.constant 0 : index
    %c0_7 = arith.constant 0 : index
    %8 = vector.load %arg7[%c0_6, %c0_7] : memref<1x768xf32, #tpu.memory_space<vmem>>, vector<1x768xf32>
    %9 = vector.broadcast %8 : vector<1x768xf32> to vector<2x768xf32>
    %10 = arith.addf %7, %9 : vector<2x768xf32>
    %11 = vector.extract_strided_slice %10 {offsets = [0, 0], sizes = [2, 128], strides = [1, 1]} : vector<2x768xf32> to vector<2x128xf32>
    %12 = vector.extract_strided_slice %10 {offsets = [0, 128], sizes = [2, 128], strides = [1, 1]} : vector<2x768xf32> to vector<2x128xf32>
    %13 = arith.negf %12 : vector<2x128xf32>
    %14 = math.exp %13 : vector<2x128xf32>
    %cst_8 = arith.constant 1.000000e+00 : f32
    %15 = vector.broadcast %cst_8 : f32 to vector<2x128xf32>
    %16 = arith.addf %15, %14 : vector<2x128xf32>
    %17 = arith.divf %15, %16 : vector<2x128xf32>
    %18 = vector.extract_strided_slice %10 {offsets = [0, 256], sizes = [2, 512], strides = [1, 1]} : vector<2x768xf32> to vector<2x512xf32>
    %c0_9 = arith.constant 0 : index
    %c0_10 = arith.constant 0 : index
    %c0_11 = arith.constant 0 : index
    %19 = vector.load %arg4[%c0_9, %c0_10, %c0_11] : memref<2x256x128xf32, #tpu.memory_space<vmem>>, vector<2x256x128xf32>
    %20 = vector.shape_cast %11 : vector<2x128xf32> to vector<2x1x128xf32>
    %21 = vector.broadcast %20 : vector<2x1x128xf32> to vector<2x256x128xf32>
    %22 = arith.addf %19, %21 : vector<2x256x128xf32>
    %cst_12 = arith.constant 0.000000e+00 : f32
    %23 = vector.broadcast %cst_12 : f32 to vector<2x256x128xf32>
    %24 = arith.maximumf %22, %23 : vector<2x256x128xf32>
    %c0_13 = arith.constant 0 : index
    %c0_14 = arith.constant 0 : index
    %25 = vector.load %arg8[%c0_13, %c0_14] : memref<1x128xf32, #tpu.memory_space<vmem>>, vector<1x128xf32>
    %26 = vector.shape_cast %25 : vector<1x128xf32> to vector<1x1x128xf32>
    %27 = vector.broadcast %26 : vector<1x1x128xf32> to vector<2x256x128xf32>
    %28 = arith.mulf %24, %27 : vector<2x256x128xf32>
    %cst_15 = arith.constant dense<0.000000e+00> : vector<2x256xf32>
    %29 = vector.multi_reduction <add>, %28, %cst_15 [2] : vector<2x256x128xf32> to vector<2x256xf32>
    %c0_16 = arith.constant 0 : index
    %c0_17 = arith.constant 0 : index
    %30 = memref.load %arg9[%c0_16, %c0_17] : memref<1x1xf32, #tpu.memory_space<smem>>
    %31 = vector.broadcast %30 : f32 to vector<2x256xf32>
    %32 = arith.addf %29, %31 : vector<2x256xf32>
    %33 = tpu.iota {dimensions = array<i32: 1>} : vector<2x256xi32>
    %c144_i32 = arith.constant 144 : i32
    %34 = vector.broadcast %c144_i32 : i32 to vector<2x256xi32>
    %35 = arith.cmpi slt, %33, %34 : vector<2x256xi32>
    %cst_18 = arith.constant -1.000000e+30 : f32
    %36 = vector.broadcast %cst_18 : f32 to vector<2x256xf32>
    %37 = arith.select %35, %32, %36 : vector<2x256xi1>, vector<2x256xf32>
    %cst_19 = arith.constant dense<0xFF800000> : vector<2xf32>
    %38 = vector.multi_reduction <maximumf>, %37, %cst_19 [1] : vector<2x256xf32> to vector<2xf32>
    %39 = vector.shape_cast %38 : vector<2xf32> to vector<2x1xf32>
    %40 = vector.broadcast %39 : vector<2x1xf32> to vector<2x256xf32>
    %41 = arith.subf %37, %40 : vector<2x256xf32>
    %42 = math.exp %41 : vector<2x256xf32>
    %cst_20 = arith.constant dense<0.000000e+00> : vector<2xf32>
    %43 = vector.multi_reduction <add>, %42, %cst_20 [1] : vector<2x256xf32> to vector<2xf32>
    %44 = vector.shape_cast %43 : vector<2xf32> to vector<2x1xf32>
    %45 = tpu.reciprocal %44 {approx = true} : vector<2x1xf32> -> vector<2x1xf32>
    %46 = vector.broadcast %45 : vector<2x1xf32> to vector<2x256xf32>
    %47 = arith.mulf %42, %46 : vector<2x256xf32>
    %c0_21 = arith.constant 0 : index
    %c0_22 = arith.constant 0 : index
    %c0_23 = arith.constant 0 : index
    %48 = vector.load %arg3[%c0_21, %c0_22, %c0_23] : memref<2x256x128xf32, #tpu.memory_space<vmem>>, vector<2x256x128xf32>
    %49 = vector.shape_cast %47 : vector<2x256xf32> to vector<2x256x1xf32>
    %50 = vector.broadcast %49 : vector<2x256x1xf32> to vector<2x256x128xf32>
    %51 = arith.mulf %48, %50 : vector<2x256x128xf32>
    %cst_24 = arith.constant dense<0.000000e+00> : vector<2x128xf32>
    %52 = vector.multi_reduction <add>, %51, %cst_24 [1] : vector<2x256x128xf32> to vector<2x128xf32>
    %53 = arith.mulf %17, %52 : vector<2x128xf32>
    %54 = arith.index_cast %arg1 : i32 to index
    %c0_25 = arith.constant 0 : index
    %c0_26 = arith.constant 0 : index
    %55 = vector.load %arg2[%54, %c0_25, %c0_26] : memref<8x2x512xf32, #tpu.memory_space<vmem>>, vector<1x2x512xf32>
    %56 = vector.shape_cast %55 : vector<1x2x512xf32> to vector<2x512xf32>
    %57 = arith.truncf %53 : vector<2x128xf32> to vector<2x128xbf16>
    %c0_27 = arith.constant 0 : index
    %c0_28 = arith.constant 0 : index
    %58 = vector.load %arg10[%c0_27, %c0_28] : memref<128x512xbf16, #tpu.memory_space<vmem>>, vector<128x512xbf16>
    %cst_29 = arith.constant dense<0.000000e+00> : vector<2x512xf32>
    %59 = tpu.matmul %57, %58, %cst_29 {dimension_numbers = #tpu.dot_dimension_numbers<[1], [0], [0], [1], [0, 0, 1, 1], [], []>} : vector<2x128xbf16>, vector<128x512xbf16>, vector<2x512xf32> -> vector<2x512xf32>
    %60 = arith.addf %56, %59 : vector<2x512xf32>
    %61 = arith.addf %60, %18 : vector<2x512xf32>
    %62 = vector.extract_strided_slice %61 {offsets = [0, 0], sizes = [2, 128], strides = [1, 1]} : vector<2x512xf32> to vector<2x128xf32>
    %63 = arith.negf %62 : vector<2x128xf32>
    %64 = math.exp %63 : vector<2x128xf32>
    %cst_30 = arith.constant 1.000000e+00 : f32
    %65 = vector.broadcast %cst_30 : f32 to vector<2x128xf32>
    %66 = arith.addf %65, %64 : vector<2x128xf32>
    %67 = arith.divf %65, %66 : vector<2x128xf32>
    %68 = vector.extract_strided_slice %61 {offsets = [0, 128], sizes = [2, 128], strides = [1, 1]} : vector<2x512xf32> to vector<2x128xf32>
    %69 = arith.negf %68 : vector<2x128xf32>
    %70 = math.exp %69 : vector<2x128xf32>
    %cst_31 = arith.constant 1.000000e+00 : f32
    %71 = vector.broadcast %cst_31 : f32 to vector<2x128xf32>
    %72 = arith.addf %71, %70 : vector<2x128xf32>
    %73 = arith.divf %71, %72 : vector<2x128xf32>
    %74 = vector.extract_strided_slice %61 {offsets = [0, 256], sizes = [2, 128], strides = [1, 1]} : vector<2x512xf32> to vector<2x128xf32>
    %75 = math.tanh %74 : vector<2x128xf32>
    %76 = vector.extract_strided_slice %61 {offsets = [0, 384], sizes = [2, 128], strides = [1, 1]} : vector<2x512xf32> to vector<2x128xf32>
    %77 = arith.negf %76 : vector<2x128xf32>
    %78 = math.exp %77 : vector<2x128xf32>
    %cst_32 = arith.constant 1.000000e+00 : f32
    %79 = vector.broadcast %cst_32 : f32 to vector<2x128xf32>
    %80 = arith.addf %79, %78 : vector<2x128xf32>
    %81 = arith.divf %79, %80 : vector<2x128xf32>
    %82 = arith.mulf %73, %4 : vector<2x128xf32>
    %83 = arith.mulf %67, %75 : vector<2x128xf32>
    %84 = arith.addf %82, %83 : vector<2x128xf32>
    %85 = math.tanh %84 : vector<2x128xf32>
    %86 = arith.mulf %81, %85 : vector<2x128xf32>
    %c0_33 = arith.constant 0 : index
    %c0_34 = arith.constant 0 : index
    %87 = vector.load %arg13[%c0_33, %c0_34] : memref<2x128xf32, #tpu.memory_space<vmem>>, vector<2x128xf32>
    tpu.vector_store %arg13[%c0_33, %c0_34], %86 {strides = array<i32>} : memref<2x128xf32, #tpu.memory_space<vmem>>, vector<2x128xf32>,
    %c0_35 = arith.constant 0 : index
    %c0_36 = arith.constant 0 : index
    %88 = vector.load %arg14[%c0_35, %c0_36] : memref<2x128xf32, #tpu.memory_space<vmem>>, vector<2x128xf32>
    tpu.vector_store %arg14[%c0_35, %c0_36], %84 {strides = array<i32>} : memref<2x128xf32, #tpu.memory_space<vmem>>, vector<2x128xf32>,
    %c0_37 = arith.constant 0 : index
    %c0_38 = arith.constant 0 : index
    %c0_39 = arith.constant 0 : index
    %89 = vector.load %arg11[%c0_37, %c0_38, %c0_39] : memref<1x2x128xf32, #tpu.memory_space<vmem>>, vector<1x2x128xf32>
    %90 = vector.shape_cast %89 : vector<1x2x128xf32> to vector<2x128xf32>
    %91 = vector.shape_cast %86 : vector<2x128xf32> to vector<1x2x128xf32>
    tpu.vector_store %arg11[%c0_37, %c0_38, %c0_39], %91 {strides = array<i32>} : memref<1x2x128xf32, #tpu.memory_space<vmem>>, vector<1x2x128xf32>,
    %c0_40 = arith.constant 0 : index
    %c0_41 = arith.constant 0 : index
    %c0_42 = arith.constant 0 : index
    %92 = vector.load %arg12[%c0_40, %c0_41, %c0_42] : memref<1x2x256xf32, #tpu.memory_space<vmem>>, vector<1x2x256xf32>
    %93 = vector.shape_cast %92 : vector<1x2x256xf32> to vector<2x256xf32>
    %94 = vector.shape_cast %47 : vector<2x256xf32> to vector<1x2x256xf32>
    tpu.vector_store %arg12[%c0_40, %c0_41, %c0_42], %94 {strides = array<i32>} : memref<1x2x256xf32, #tpu.memory_space<vmem>>, vector<1x2x256xf32>,
    return
  }
  func.func @transform_0(%arg0: i32, %arg1: i32) -> (i32, i32, i32) {
    %c0_i32 = arith.constant 0 : i32
    %c0_i32_0 = arith.constant 0 : i32
    %c0_i32_1 = arith.constant 0 : i32
    return %c0_i32, %arg0, %c0_i32_0 : i32, i32, i32
  }
  func.func @transform_1(%arg0: i32, %arg1: i32) -> (i32, i32, i32) {
    %c0_i32 = arith.constant 0 : i32
    %c0_i32_0 = arith.constant 0 : i32
    %c0_i32_1 = arith.constant 0 : i32
    return %arg0, %c0_i32, %c0_i32_0 : i32, i32, i32
  }
  func.func @transform_2(%arg0: i32, %arg1: i32) -> (i32, i32, i32) {
    %c0_i32 = arith.constant 0 : i32
    %c0_i32_0 = arith.constant 0 : i32
    %c0_i32_1 = arith.constant 0 : i32
    return %arg0, %c0_i32, %c0_i32_0 : i32, i32, i32
  }
  func.func @transform_3(%arg0: i32, %arg1: i32) -> (i32, i32) {
    %c0_i32 = arith.constant 0 : i32
    %c0_i32_0 = arith.constant 0 : i32
    return %arg0, %c0_i32 : i32, i32
  }
  func.func @transform_4(%arg0: i32, %arg1: i32) -> (i32, i32) {
    %c0_i32 = arith.constant 0 : i32
    %c0_i32_0 = arith.constant 0 : i32
    %c0_i32_1 = arith.constant 0 : i32
    return %c0_i32, %c0_i32_0 : i32, i32
  }
  func.func @transform_5(%arg0: i32, %arg1: i32) -> (i32, i32) {
    %c0_i32 = arith.constant 0 : i32
    %c0_i32_0 = arith.constant 0 : i32
    %c0_i32_1 = arith.constant 0 : i32
    return %c0_i32, %c0_i32_0 : i32, i32
  }
  func.func @transform_6(%arg0: i32, %arg1: i32) -> (i32, i32) {
    %c0_i32 = arith.constant 0 : i32
    %c0_i32_0 = arith.constant 0 : i32
    %c0_i32_1 = arith.constant 0 : i32
    return %c0_i32, %c0_i32_0 : i32, i32
  }
  func.func @transform_7(%arg0: i32, %arg1: i32) -> (i32, i32) {
    %c0_i32 = arith.constant 0 : i32
    %c0_i32_0 = arith.constant 0 : i32
    %c0_i32_1 = arith.constant 0 : i32
    return %c0_i32, %c0_i32_0 : i32, i32
  }
  func.func @transform_8(%arg0: i32, %arg1: i32) -> (i32, i32) {
    %c0_i32 = arith.constant 0 : i32
    %c0_i32_0 = arith.constant 0 : i32
    %c0_i32_1 = arith.constant 0 : i32
    return %c0_i32, %c0_i32_0 : i32, i32
  }
  func.func @transform_9(%arg0: i32, %arg1: i32) -> (i32, i32, i32) {
    %c0_i32 = arith.constant 0 : i32
    %c0_i32_0 = arith.constant 0 : i32
    return %arg1, %arg0, %c0_i32 : i32, i32, i32
  }
  func.func @transform_10(%arg0: i32, %arg1: i32) -> (i32, i32, i32) {
    %c0_i32 = arith.constant 0 : i32
    %c0_i32_0 = arith.constant 0 : i32
    return %arg1, %arg0, %c0_i32 : i32, i32, i32
  }
}

module attributes {stable_mosaic.version = 11 : i64} {
  func.func @_dense_kernel(%arg0: i32, %arg1: memref<16x128xf32, #tpu.memory_space<vmem>>, %arg2: memref<128x128xbf16, #tpu.memory_space<vmem>>, %arg3: memref<1x128xf32, #tpu.memory_space<vmem>>, %arg4: memref<16x128xf32, #tpu.memory_space<vmem>>) attributes {dimension_semantics = [#tpu.dimension_semantics<parallel>], iteration_bounds = array<i64: 1>, scalar_prefetch = 0 : i64, scratch_operands = 0 : i64, tpu.core_type = #tpu.core_type<tc>, window_params = [{transform_indices = @transform_0, window_bounds = array<i64: 16, 128>}, {pipeline_mode = #tpu.pipeline_mode<synchronous>, transform_indices = @transform_1, window_bounds = array<i64: 128, 128>}, {pipeline_mode = #tpu.pipeline_mode<synchronous>, transform_indices = @transform_2, window_bounds = array<i64: 1, 128>}, {transform_indices = @transform_3, window_bounds = array<i64: 16, 128>}]} {
    %c0 = arith.constant 0 : index
    %c0_0 = arith.constant 0 : index
    %0 = vector.load %arg1[%c0, %c0_0] : memref<16x128xf32, #tpu.memory_space<vmem>>, vector<16x128xf32>
    %1 = arith.truncf %0 : vector<16x128xf32> to vector<16x128xbf16>
    %c0_1 = arith.constant 0 : index
    %c0_2 = arith.constant 0 : index
    %2 = vector.load %arg2[%c0_1, %c0_2] : memref<128x128xbf16, #tpu.memory_space<vmem>>, vector<128x128xbf16>
    %cst = arith.constant dense<0.000000e+00> : vector<16x128xf32>
    %3 = tpu.matmul %1, %2, %cst {dimension_numbers = #tpu.dot_dimension_numbers<[1], [0], [0], [1], [0, 0, 1, 1], [], []>} : vector<16x128xbf16>, vector<128x128xbf16>, vector<16x128xf32> -> vector<16x128xf32>
    %c0_3 = arith.constant 0 : index
    %c0_4 = arith.constant 0 : index
    %4 = vector.load %arg3[%c0_3, %c0_4] : memref<1x128xf32, #tpu.memory_space<vmem>>, vector<1x128xf32>
    %5 = vector.broadcast %4 : vector<1x128xf32> to vector<16x128xf32>
    %6 = arith.addf %3, %5 : vector<16x128xf32>
    %c0_5 = arith.constant 0 : index
    %c0_6 = arith.constant 0 : index
    %7 = vector.load %arg4[%c0_5, %c0_6] : memref<16x128xf32, #tpu.memory_space<vmem>>, vector<16x128xf32>
    tpu.vector_store %arg4[%c0_5, %c0_6], %6 {strides = array<i32>} : memref<16x128xf32, #tpu.memory_space<vmem>>, vector<16x128xf32>,
    return
  }
  func.func @transform_0(%arg0: i32) -> (i32, i32) {
    %c0_i32 = arith.constant 0 : i32
    %c0_i32_0 = arith.constant 0 : i32
    return %arg0, %c0_i32 : i32, i32
  }
  func.func @transform_1(%arg0: i32) -> (i32, i32) {
    %c0_i32 = arith.constant 0 : i32
    %c0_i32_0 = arith.constant 0 : i32
    %c0_i32_1 = arith.constant 0 : i32
    return %c0_i32, %c0_i32_0 : i32, i32
  }
  func.func @transform_2(%arg0: i32) -> (i32, i32) {
    %c0_i32 = arith.constant 0 : i32
    %c0_i32_0 = arith.constant 0 : i32
    %c0_i32_1 = arith.constant 0 : i32
    return %c0_i32, %c0_i32_0 : i32, i32
  }
  func.func @transform_3(%arg0: i32) -> (i32, i32) {
    %c0_i32 = arith.constant 0 : i32
    %c0_i32_0 = arith.constant 0 : i32
    return %arg0, %c0_i32 : i32, i32
  }
}

</mosaic_0001>

<bundles_post_ra>
// kernel: fwd.10
= control target key start
LH: loop header
LB: loop body
LE: loop exit
PB: predicated region body
PF: predicated region fallthrough
CT: control target
= control target key end

     0   :  { %s579_s12 = smov 0   ;;  %s732_s0 = inlined_call_operand.vmem [shape: f32[512,128], index: 0, kind: input, shape index: {}]   ;;  %s733_s1 = inlined_call_operand.vmem [shape: bf16[128,128], index: 1, kind: input, shape index: {}]   ;;  %s734_s2 = inlined_call_operand.vmem [shape: f32[1,128], index: 2, kind: input, shape index: {}]   ;;  %s735_s3 = inlined_call_operand.vmem [shape: f32[512,128], index: 3, kind: output, shape index: {}]  }
   0x1 LB: > { %s467_s13 = sadd.s32 4294967295, %s557_s12   ;;  %p471_p0 = scmp.ge.s32.totalorder %s557_s12, 1  ;;  %s557_s12 = sphi %s579_s12, %s13_s12  }
   0x2   : > { %p138_p1 = scmp.lt.s32.totalorder %s557_s12, 3 }
   0x4   : > { %p139_p2 = pnand %p471_p0, %p138_p1 }
   0x5   : > { %s472_s20 = sshll.u32 (!%p139_p2), %s467_s13, 5 }
   0x6   : > { %142 = sbr.rel (%p139_p2) target bundleno = 236 (0xec), region = 32  ;;  %p163_p3 = scmp.lt.s32.totalorder (!%p139_p2), %s472_s20, 63 }
   0xb   : > { %v517_v0 = vld [vmem:[%s733_s1 + $0x38] sm:$0xff]  ;;  %v516_v1 = vld [vmem:[%s733_s1 + $0x30] sm:$0xff]  ;;  %v515_v2 = vld [vmem:[%s733_s1 + $0x28] sm:$0xff]  ;;  %s737_s20 = smov (!%p163_p3, %s472_s20), 63 }
   0xc   : > { %290 = vmatpush.bf16.msra.mxu0 %v517_v0  ;;  %518 = vmatpush.bf16.msra.mxu1 %v517_v0  ;;  %v514_v3 = vld [vmem:[%s733_s1 + $0x20] sm:$0xff]  ;;  %v513_v4 = vld [vmem:[%s733_s1 + $0x18] sm:$0xff]  ;;  %v512_v5 = vld [vmem:[%s733_s1 + $0x10] sm:$0xff]  ;;  %s473_s27 = sshll.u32 %s737_s20, 3 }
   0xd   : > { %519 = vmatpush.bf16.msra.mxu2 %v517_v0  ;;  %520 = vmatpush.bf16.msra.mxu3 %v517_v0  ;;  %v511_v6 = vld [vmem:[%s733_s1 + $0x8] sm:$0xff]  ;;  %s616_s5 = scalar_lea.vmem %s732_s0, %s473_s27  ;;  %v510_v7 = vld [vmem:[%s733_s1] sm:$0xff]  ;;  %s663_s13 = scalar_lea.vmem %s735_s3, %s473_s27 }
   0xe   : > { %v174_v8 = vld [vmem:[%s616_s5] sm:$0xff]  ;;  %v175_v9 = vld [vmem:[%s616_s5 + $0x8] sm:$0xff]  ;;  %v176_v20 = vld [vmem:[%s616_s5 + $0x10] sm:$0xff] }
   0xf   : > { %v182_v10 = vld [vmem:[%s616_s5 + $0x40] sm:$0xff]  ;;  %v183_v11 = vld [vmem:[%s616_s5 + $0x48] sm:$0xff]  ;;  %v206_v16 = vpack.c.bf16 %v175_v9, %v174_v8  ;;  %v177_v21 = vld [vmem:[%s616_s5 + $0x18] sm:$0xff] }
  0x10   : > { %291 = vmatpush.bf16.msra.mxu0 %v516_v1  ;;  %521 = vmatpush.bf16.msra.mxu1 %v516_v1  ;;  %v190_v12 = vld [vmem:[%s616_s5 + $0x80] sm:$0xff]  ;;  %v191_v13 = vld [vmem:[%s616_s5 + $0x88] sm:$0xff]  ;;  %v210_v17 = vpack.c.bf16 %v183_v11, %v182_v10  ;;  %v184_v22 = vld [vmem:[%s616_s5 + $0x50] sm:$0xff]  ;;  %v207_v28 = vpack.c.bf16 %v177_v21, %v176_v20 }
  0x11   : > { %522 = vmatpush.bf16.msra.mxu2 %v516_v1  ;;  %523 = vmatpush.bf16.msra.mxu3 %v516_v1  ;;  %v198_v14 = vld [vmem:[%s616_s5 + $0xc0] sm:$0xff]  ;;  %v199_v15 = vld [vmem:[%s616_s5 + $0xc8] sm:$0xff]  ;;  %v214_v18 = vpack.c.bf16 %v191_v13, %v190_v12  ;;  %v185_v23 = vld [vmem:[%s616_s5 + $0x58] sm:$0xff] }
  0x12   : > { %v218_v19 = vpack.c.bf16 %v199_v15, %v198_v14  ;;  %v192_v24 = vld [vmem:[%s616_s5 + $0x90] sm:$0xff]  ;;  %v193_v25 = vld [vmem:[%s616_s5 + $0x98] sm:$0xff]  ;;  %v211_v29 = vpack.c.bf16 %v185_v23, %v184_v22  ;;  %v178_v32 = vld [vmem:[%s616_s5 + $0x20] sm:$0xff] }
  0x13   : > { %v200_v26 = vld [vmem:[%s616_s5 + $0xd0] sm:$0xff]  ;;  %v201_v27 = vld [vmem:[%s616_s5 + $0xd8] sm:$0xff]  ;;  %v215_v30 = vpack.c.bf16 %v193_v25, %v192_v24  ;;  %v179_v33 = vld [vmem:[%s616_s5 + $0x28] sm:$0xff] }
  0x14   : > { %292 = vmatpush.bf16.msra.mxu0 %v515_v2  ;;  %524 = vmatpush.bf16.msra.mxu1 %v515_v2  ;;  %v219_v31 = vpack.c.bf16 %v201_v27, %v200_v26  ;;  %v186_v34 = vld [vmem:[%s616_s5 + $0x60] sm:$0xff]  ;;  %v187_v35 = vld [vmem:[%s616_s5 + $0x68] sm:$0xff]  ;;  %v208_v40 = vpack.c.bf16 %v179_v33, %v178_v32  ;;  %v180_v44 = vld [vmem:[%s616_s5 + $0x30] sm:$0xff] }
  0x15   : > { %525 = vmatpush.bf16.msra.mxu2 %v515_v2  ;;  %526 = vmatpush.bf16.msra.mxu3 %v515_v2  ;;  %v194_v36 = vld [vmem:[%s616_s5 + $0xa0] sm:$0xff]  ;;  %v195_v37 = vld [vmem:[%s616_s5 + $0xa8] sm:$0xff]  ;;  %v212_v41 = vpack.c.bf16 %v187_v35, %v186_v34  ;;  %v181_v45 = vld [vmem:[%s616_s5 + $0x38] sm:$0xff] }
  0x16   : > { %v202_v38 = vld [vmem:[%s616_s5 + $0xe0] sm:$0xff]  ;;  %v203_v39 = vld [vmem:[%s616_s5 + $0xe8] sm:$0xff]  ;;  %v216_v42 = vpack.c.bf16 %v195_v37, %v194_v36  ;;  %v188_v46 = vld [vmem:[%s616_s5 + $0x70] sm:$0xff]  ;;  %v209_v52 = vpack.c.bf16 %v181_v45, %v180_v44 }
  0x17   : > { %v220_v43 = vpack.c.bf16 %v203_v39, %v202_v38  ;;  %v189_v47 = vld [vmem:[%s616_s5 + $0x78] sm:$0xff]  ;;  %v196_v48 = vld [vmem:[%s616_s5 + $0xb0] sm:$0xff]  ;;  %v656_v56 = vld [vmem:[%s734_s2] ss:$0 sm:$0xff] }
  0x18   : > { %293 = vmatpush.bf16.msra.mxu0 %v514_v3  ;;  %527 = vmatpush.bf16.msra.mxu1 %v514_v3  ;;  %v197_v49 = vld [vmem:[%s616_s5 + $0xb8] sm:$0xff]  ;;  %v204_v50 = vld [vmem:[%s616_s5 + $0xf0] sm:$0xff]  ;;  %v213_v53 = vpack.c.bf16 %v189_v47, %v188_v46 }
  0x19   : > { %528 = vmatpush.bf16.msra.mxu2 %v514_v3  ;;  %529 = vmatpush.bf16.msra.mxu3 %v514_v3  ;;  %v205_v51 = vld [vmem:[%s616_s5 + $0xf8] sm:$0xff]  ;;  %v217_v54 = vpack.c.bf16 %v197_v49, %v196_v48 }
  0x1a   : > { %v221_v55 = vpack.c.bf16 %v205_v51, %v204_v50 }
  0x1c   : > { %294 = vmatpush.bf16.msra.mxu0 %v513_v4  ;;  %530 = vmatpush.bf16.msra.mxu1 %v513_v4 }
  0x1d   : > { %531 = vmatpush.bf16.msra.mxu2 %v513_v4  ;;  %532 = vmatpush.bf16.msra.mxu3 %v513_v4 }
  0x20   : > { %295 = vmatpush.bf16.msra.mxu0 %v512_v5  ;;  %533 = vmatpush.bf16.msra.mxu1 %v512_v5 }
  0x21   : > { %534 = vmatpush.bf16.msra.mxu2 %v512_v5  ;;  %535 = vmatpush.bf16.msra.mxu3 %v512_v5 }
  0x24   : > { %296 = vmatpush.bf16.msra.mxu0 %v511_v6  ;;  %536 = vmatpush.bf16.msra.mxu1 %v511_v6 }
  0x25   : > { %537 = vmatpush.bf16.msra.mxu2 %v511_v6  ;;  %538 = vmatpush.bf16.msra.mxu3 %v511_v6 }
  0x28   : > { %297 = vmatpush.bf16.msra.mxu0 %v510_v7  ;;  %539 = vmatpush.bf16.msra.mxu1 %v510_v7 }
  0x29   : > { %540 = vmatpush.bf16.msra.mxu2 %v510_v7  ;;  %541 = vmatpush.bf16.msra.mxu3 %v510_v7 }
  0x2b   : > { %298 = vmatmul.bf16.vlgmr.msra.gmra.mxu0 %v206_v16  ;;  %318 = vmatmul.bf16.vlgmr.msra.gmra.mxu1 %v210_v17 }
  0x2c   : > { %338 = vmatmul.bf16.vlgmr.msra.gmra.mxu2 %v214_v18  ;;  %358 = vmatmul.bf16.vlgmr.msra.gmra.mxu3 %v218_v19 }
  0x3b   : > { %303 = vmatmul.bf16.gmra.mxu0 %v207_v28  ;;  %323 = vmatmul.bf16.gmra.mxu1 %v211_v29 }
  0x3c   : > { %343 = vmatmul.bf16.gmra.mxu2 %v215_v30  ;;  %363 = vmatmul.bf16.gmra.mxu3 %v219_v31 }
  0x4b   : > { %308 = vmatmul.bf16.gmra.mxu0 %v208_v40  ;;  %328 = vmatmul.bf16.gmra.mxu1 %v212_v41 }
  0x4c   : > { %348 = vmatmul.bf16.gmra.mxu2 %v216_v42  ;;  %368 = vmatmul.bf16.gmra.mxu3 %v220_v43 }
  0x5b   : > { %313 = vmatmul.bf16.gmra.mxu0 %v209_v52  ;;  %333 = vmatmul.bf16.gmra.mxu1 %v213_v53 }
  0x5c   : > { %353 = vmatmul.bf16.gmra.mxu2 %v217_v54  ;;  %373 = vmatmul.bf16.gmra.mxu3 %v221_v55 }
  0xa8   : > { %v299_v57 = vpop.f32.mrf.mxu0  ;;  %v319_v58 = vpop.f32.mrf.mxu1 }
  0xa9   : > { %v300_v59 = vadd.f32 %v656_v56, %v299_v57  ;;  %v320_v60 = vadd.f32 %v656_v56, %v319_v58 }
  0xab   : > { %379 = vst [vmem:[%s663_s13] sm:$0xff] %v300_v59 }
  0xac   : > { %387 = vst [vmem:[%s663_s13 + $0x40] sm:$0xff] %v320_v60 }
  0xaf   : > { %v339_v61 = vpop.f32.mrf.mxu2  ;;  %v359_v62 = vpop.f32.mrf.mxu3 }
  0xb0   : > { %v340_v63 = vadd.f32 %v656_v56, %v339_v61  ;;  %v360_v0 = vadd.f32 %v656_v56, %v359_v62  ;;  %v301_v1 = vpop.f32.mrf.mxu0  ;;  %v321_v2 = vpop.f32.mrf.mxu1 }
  0xb1   : > { %v302_v3 = vadd.f32 %v656_v56, %v301_v1  ;;  %v322_v4 = vadd.f32 %v656_v56, %v321_v2 }
  0xb2   : > { %395 = vst [vmem:[%s663_s13 + $0x80] sm:$0xff] %v340_v63 }
  0xb3   : > { %403 = vst [vmem:[%s663_s13 + $0xc0] sm:$0xff] %v360_v0 }
  0xb4   : > { %380 = vst [vmem:[%s663_s13 + $0x8] sm:$0xff] %v302_v3 }
  0xb5   : > { %388 = vst [vmem:[%s663_s13 + $0x48] sm:$0xff] %v322_v4 }
  0xb7   : > { %v341_v5 = vpop.f32.mrf.mxu2  ;;  %v361_v6 = vpop.f32.mrf.mxu3 }
  0xb8   : > { %v342_v7 = vadd.f32 %v656_v56, %v341_v5  ;;  %v362_v8 = vadd.f32 %v656_v56, %v361_v6  ;;  %v304_v9 = vpop.f32.mrf.mxu0  ;;  %v324_v10 = vpop.f32.mrf.mxu1 }
  0xb9   : > { %v305_v11 = vadd.f32 %v656_v56, %v304_v9  ;;  %v325_v12 = vadd.f32 %v656_v56, %v324_v10 }
  0xba   : > { %396 = vst [vmem:[%s663_s13 + $0x88] sm:$0xff] %v342_v7 }
  0xbb   : > { %404 = vst [vmem:[%s663_s13 + $0xc8] sm:$0xff] %v362_v8 }
  0xbc   : > { %381 = vst [vmem:[%s663_s13 + $0x10] sm:$0xff] %v305_v11 }
  0xbd   : > { %389 = vst [vmem:[%s663_s13 + $0x50] sm:$0xff] %v325_v12 }
  0xbf   : > { %v344_v13 = vpop.f32.mrf.mxu2  ;;  %v364_v14 = vpop.f32.mrf.mxu3 }
  0xc0   : > { %v345_v15 = vadd.f32 %v656_v56, %v344_v13  ;;  %v365_v16 = vadd.f32 %v656_v56, %v364_v14  ;;  %v306_v17 = vpop.f32.mrf.mxu0  ;;  %v326_v18 = vpop.f32.mrf.mxu1 }
  0xc1   : > { %v307_v19 = vadd.f32 %v656_v56, %v306_v17  ;;  %v327_v20 = vadd.f32 %v656_v56, %v326_v18 }
  0xc2   : > { %397 = vst [vmem:[%s663_s13 + $0x90] sm:$0xff] %v345_v15 }
  0xc3   : > { %405 = vst [vmem:[%s663_s13 + $0xd0] sm:$0xff] %v365_v16 }
  0xc4   : > { %382 = vst [vmem:[%s663_s13 + $0x18] sm:$0xff] %v307_v19 }
  0xc5   : > { %390 = vst [vmem:[%s663_s13 + $0x58] sm:$0xff] %v327_v20 }
  0xc7   : > { %v346_v21 = vpop.f32.mrf.mxu2  ;;  %v366_v22 = vpop.f32.mrf.mxu3 }
  0xc8   : > { %v347_v23 = vadd.f32 %v656_v56, %v346_v21  ;;  %v367_v24 = vadd.f32 %v656_v56, %v366_v22  ;;  %v309_v25 = vpop.f32.mrf.mxu0  ;;  %v329_v26 = vpop.f32.mrf.mxu1 }
  0xc9   : > { %v310_v27 = vadd.f32 %v656_v56, %v309_v25  ;;  %v330_v28 = vadd.f32 %v656_v56, %v329_v26 }
  0xca   : > { %398 = vst [vmem:[%s663_s13 + $0x98] sm:$0xff] %v347_v23 }
  0xcb   : > { %406 = vst [vmem:[%s663_s13 + $0xd8] sm:$0xff] %v367_v24 }
  0xcc   : > { %383 = vst [vmem:[%s663_s13 + $0x20] sm:$0xff] %v310_v27 }
  0xcd   : > { %391 = vst [vmem:[%s663_s13 + $0x60] sm:$0xff] %v330_v28 }
  0xcf   : > { %v349_v29 = vpop.f32.mrf.mxu2  ;;  %v369_v30 = vpop.f32.mrf.mxu3 }
  0xd0   : > { %v350_v31 = vadd.f32 %v656_v56, %v349_v29  ;;  %v370_v32 = vadd.f32 %v656_v56, %v369_v30  ;;  %v311_v33 = vpop.f32.mrf.mxu0  ;;  %v331_v34 = vpop.f32.mrf.mxu1 }
  0xd1   : > { %v312_v35 = vadd.f32 %v656_v56, %v311_v33  ;;  %v332_v36 = vadd.f32 %v656_v56, %v331_v34 }
  0xd2   : > { %399 = vst [vmem:[%s663_s13 + $0xa0] sm:$0xff] %v350_v31 }
  0xd3   : > { %407 = vst [vmem:[%s663_s13 + $0xe0] sm:$0xff] %v370_v32 }
  0xd4   : > { %384 = vst [vmem:[%s663_s13 + $0x28] sm:$0xff] %v312_v35 }
  0xd5   : > { %392 = vst [vmem:[%s663_s13 + $0x68] sm:$0xff] %v332_v36 }
  0xd7   : > { %v351_v37 = vpop.f32.mrf.mxu2  ;;  %v371_v38 = vpop.f32.mrf.mxu3 }
  0xd8   : > { %v352_v39 = vadd.f32 %v656_v56, %v351_v37  ;;  %v372_v40 = vadd.f32 %v656_v56, %v371_v38  ;;  %v314_v41 = vpop.f32.mrf.mxu0  ;;  %v334_v42 = vpop.f32.mrf.mxu1 }
  0xd9   : > { %v315_v43 = vadd.f32 %v656_v56, %v314_v41  ;;  %v335_v44 = vadd.f32 %v656_v56, %v334_v42 }
  0xda   : > { %400 = vst [vmem:[%s663_s13 + $0xa8] sm:$0xff] %v352_v39 }
  0xdb   : > { %408 = vst [vmem:[%s663_s13 + $0xe8] sm:$0xff] %v372_v40 }
  0xdc   : > { %385 = vst [vmem:[%s663_s13 + $0x30] sm:$0xff] %v315_v43 }
  0xdd   : > { %393 = vst [vmem:[%s663_s13 + $0x70] sm:$0xff] %v335_v44 }
  0xdf   : > { %v354_v45 = vpop.f32.mrf.mxu2  ;;  %v374_v46 = vpop.f32.mrf.mxu3 }
  0xe0   : > { %v355_v47 = vadd.f32 %v656_v56, %v354_v45  ;;  %v375_v48 = vadd.f32 %v656_v56, %v374_v46  ;;  %v316_v49 = vpop.f32.mrf.mxu0  ;;  %v336_v50 = vpop.f32.mrf.mxu1 }
  0xe1   : > { %v317_v51 = vadd.f32 %v656_v56, %v316_v49  ;;  %v337_v52 = vadd.f32 %v656_v56, %v336_v50 }
  0xe2   : > { %401 = vst [vmem:[%s663_s13 + $0xb0] sm:$0xff] %v355_v47 }
  0xe3   : > { %409 = vst [vmem:[%s663_s13 + $0xf0] sm:$0xff] %v375_v48 }
  0xe4   : > { %386 = vst [vmem:[%s663_s13 + $0x38] sm:$0xff] %v317_v51 }
  0xe5   : > { %394 = vst [vmem:[%s663_s13 + $0x78] sm:$0xff] %v337_v52 }
  0xe7   : > { %v356_v53 = vpop.f32.mrf.mxu2  ;;  %v376_v54 = vpop.f32.mrf.mxu3 }
  0xe8   : > { %v357_v55 = vadd.f32 %v656_v56, %v356_v53  ;;  %v377_v57 = vadd.f32 %v656_v56, %v376_v54 }
  0xea   : > { %402 = vst [vmem:[%s663_s13 + $0xb8] sm:$0xff] %v357_v55 }
  0xeb   : > { %410 = vst [vmem:[%s663_s13 + $0xf8] sm:$0xff] %v377_v57 }
  0xec PF: > { %s13_s12 = sadd.s32 1, %s557_s12  }
  0xed   : > { %p10_p4 = scmp.ge.s32.totalorder %s13_s12, 4  }
  0xef   :  { %12 = sbr.rel (!%p10_p4) target bundleno = 1 (0x1), region = 62 }

// kernel: fwd.7
= control target key start
LH: loop header
LB: loop body
LE: loop exit
PB: predicated region body
PF: predicated region fallthrough
CT: control target
= control target key end

     0   :  { %s5256_s1 = inlined_call_operand.vmem [shape: bf16[1152,128], index: 1, kind: input, shape index: {}]   ;;  %s5257_s2 = inlined_call_operand.vmem [shape: f32[1,128], index: 2, kind: input, shape index: {}]   ;;  %s5258_s0 = inlined_call_operand.vmem [shape: f32[392,1152], index: 0, kind: input, shape index: {}]   ;;  %s5259_s3 = inlined_call_operand.vmem [shape: f32[392,128], index: 3, kind: output, shape index: {}]  }
   0x1   :  { %v2854_v0 = vld [vmem:[%s5256_s1 + $0x38] sm:$0xff]  ;;  %v2853_v1 = vld [vmem:[%s5256_s1 + $0x30] sm:$0xff]  ;;  %v2852_v2 = vld [vmem:[%s5256_s1 + $0x28] sm:$0xff] }
   0x2   :  { %1260 = vmatpush.bf16.msra.mxu0 %v2854_v0  ;;  %2919 = vmatpush.bf16.msra.mxu1 %v2854_v0  ;;  %v2851_v3 = vld [vmem:[%s5256_s1 + $0x20] sm:$0xff]  ;;  %v2850_v4 = vld [vmem:[%s5256_s1 + $0x18] sm:$0xff]  ;;  %v2849_v5 = vld [vmem:[%s5256_s1 + $0x10] sm:$0xff] }
   0x3   :  { %2920 = vmatpush.bf16.msra.mxu2 %v2854_v0  ;;  %2921 = vmatpush.bf16.msra.mxu3 %v2854_v0  ;;  %v2848_v6 = vld [vmem:[%s5256_s1 + $0x8] sm:$0xff]  ;;  %v2847_v7 = vld [vmem:[%s5256_s1] sm:$0xff]  ;;  %v140_v10 = vld [vmem:[%s5258_s0 + $0x3f0] sm:$0xff] }
   0x4   :  { %v14_v8 = vld [vmem:[%s5258_s0] sm:$0xff]  ;;  %v23_v9 = vld [vmem:[%s5258_s0 + $0x48] sm:$0xff]  ;;  %v149_v11 = vld [vmem:[%s5258_s0 + $0x438] sm:$0xff] }
   0x5   :  { %v266_v12 = vld [vmem:[%s5258_s0 + $0x7e0] sm:$0xff]  ;;  %v275_v13 = vld [vmem:[%s5258_s0 + $0x828] sm:$0xff]  ;;  %v2862_v14 = vld [vmem:[%s5256_s1 + $0x78] sm:$0xff]  ;;  %v455_v17 = vpack.c.bf16 %v23_v9, %v14_v8  ;;  %v518_v18 = vpack.c.bf16 %v149_v11, %v140_v10 }
   0x6   :  { %1261 = vmatpush.bf16.msra.mxu0 %v2853_v1  ;;  %2922 = vmatpush.bf16.msra.mxu1 %v2853_v1  ;;  %v2870_v15 = vld [vmem:[%s5256_s1 + $0xb8] sm:$0xff]  ;;  %v581_v19 = vpack.c.bf16 %v275_v13, %v266_v12  ;;  %v2861_v20 = vld [vmem:[%s5256_s1 + $0x70] sm:$0xff]  ;;  %v2860_v24 = vld [vmem:[%s5256_s1 + $0x68] sm:$0xff] }
   0x7   :  { %2923 = vmatpush.bf16.msra.mxu2 %v2853_v1  ;;  %2924 = vmatpush.bf16.msra.mxu3 %v2853_v1  ;;  %v2886_v16 = vld [vmem:[%s5256_s1 + $0x138] sm:$0xff]  ;;  %v2869_v21 = vld [vmem:[%s5256_s1 + $0xb0] sm:$0xff]  ;;  %v2868_v26 = vld [vmem:[%s5256_s1 + $0xa8] sm:$0xff] }
   0x8   :  { %v2885_v22 = vld [vmem:[%s5256_s1 + $0x130] sm:$0xff]  ;;  %v401_v25 = vld [vmem:[%s5258_s0 + $0xc18] sm:$0xff]  ;;  %v2884_v27 = vld [vmem:[%s5256_s1 + $0x128] sm:$0xff] }
   0x9   :  { %v392_v23 = vld [vmem:[%s5258_s0 + $0xbd0] sm:$0xff]  ;;  %v2859_v29 = vld [vmem:[%s5256_s1 + $0x60] sm:$0xff]  ;;  %v41_v32 = vld [vmem:[%s5258_s0 + $0xd8] sm:$0xff] }
   0xa   :  { %1262 = vmatpush.bf16.msra.mxu0 %v2852_v2  ;;  %2925 = vmatpush.bf16.msra.mxu1 %v2852_v2  ;;  %v644_v28 = vpack.c.bf16 %v401_v25, %v392_v23  ;;  %v2867_v30 = vld [vmem:[%s5256_s1 + $0xa0] sm:$0xff]  ;;  %v32_v31 = vld [vmem:[%s5258_s0 + $0x90] sm:$0xff]  ;;  %v167_v34 = vld [vmem:[%s5258_s0 + $0x4c8] sm:$0xff] }
   0xb   :  { %2926 = vmatpush.bf16.msra.mxu2 %v2852_v2  ;;  %2927 = vmatpush.bf16.msra.mxu3 %v2852_v2  ;;  %v158_v33 = vld [vmem:[%s5258_s0 + $0x480] sm:$0xff]  ;;  %v284_v35 = vld [vmem:[%s5258_s0 + $0x870] sm:$0xff]  ;;  %v293_v36 = vld [vmem:[%s5258_s0 + $0x8b8] sm:$0xff]  ;;  %v464_v37 = vpack.c.bf16 %v41_v32, %v32_v31 }
   0xc   :  { %v527_v38 = vpack.c.bf16 %v167_v34, %v158_v33  ;;  %v590_v39 = vpack.c.bf16 %v293_v36, %v284_v35  ;;  %v2878_v40 = vld [vmem:[%s5256_s1 + $0xf8] sm:$0xff]  ;;  %v2883_v41 = vld [vmem:[%s5256_s1 + $0x120] sm:$0xff]  ;;  %v419_v44 = vld [vmem:[%s5258_s0 + $0xca8] sm:$0xff] }
   0xd   :  { %v2866_v42 = vld [vmem:[%s5256_s1 + $0x98] sm:$0xff]  ;;  %v410_v43 = vld [vmem:[%s5258_s0 + $0xc60] sm:$0xff]  ;;  %v2877_v46 = vld [vmem:[%s5256_s1 + $0xf0] sm:$0xff] }
   0xe   :  { %1263 = vmatpush.bf16.msra.mxu0 %v2851_v3  ;;  %2928 = vmatpush.bf16.msra.mxu1 %v2851_v3  ;;  %v653_v45 = vpack.c.bf16 %v419_v44, %v410_v43  ;;  %v2858_v47 = vld [vmem:[%s5256_s1 + $0x58] sm:$0xff]  ;;  %v50_v49 = vld [vmem:[%s5258_s0 + $0x120] sm:$0xff]  ;;  %v59_v50 = vld [vmem:[%s5258_s0 + $0x168] sm:$0xff] }
   0xf   :  { %2929 = vmatpush.bf16.msra.mxu2 %v2851_v3  ;;  %2930 = vmatpush.bf16.msra.mxu3 %v2851_v3  ;;  %v2882_v48 = vld [vmem:[%s5256_s1 + $0x118] sm:$0xff]  ;;  %v176_v51 = vld [vmem:[%s5258_s0 + $0x510] sm:$0xff]  ;;  %v302_v53 = vld [vmem:[%s5258_s0 + $0x900] sm:$0xff]  ;;  %v473_v55 = vpack.c.bf16 %v59_v50, %v50_v49 }
  0x10   :  { %v185_v52 = vld [vmem:[%s5258_s0 + $0x558] sm:$0xff]  ;;  %v311_v54 = vld [vmem:[%s5258_s0 + $0x948] sm:$0xff]  ;;  %v2865_v59 = vld [vmem:[%s5256_s1 + $0x90] sm:$0xff] }
  0x11   :  { %v536_v56 = vpack.c.bf16 %v185_v52, %v176_v51  ;;  %v599_v57 = vpack.c.bf16 %v311_v54, %v302_v53  ;;  %v2876_v58 = vld [vmem:[%s5256_s1 + $0xe8] sm:$0xff]  ;;  %v428_v60 = vld [vmem:[%s5258_s0 + $0xcf0] sm:$0xff]  ;;  %v437_v61 = vld [vmem:[%s5258_s0 + $0xd38] sm:$0xff] }
  0x12   :  { %1264 = vmatpush.bf16.msra.mxu0 %v2850_v4  ;;  %2931 = vmatpush.bf16.msra.mxu1 %v2850_v4  ;;  %v2857_v62 = vld [vmem:[%s5256_s1 + $0x50] sm:$0xff]  ;;  %v662_v63 = vpack.c.bf16 %v437_v61, %v428_v60  ;;  %v2875_v0 = vld [vmem:[%s5256_s1 + $0xe0] sm:$0xff]  ;;  %v77_v3 = vld [vmem:[%s5258_s0 + $0x1f8] sm:$0xff] }
  0x13   :  { %2932 = vmatpush.bf16.msra.mxu2 %v2850_v4  ;;  %2933 = vmatpush.bf16.msra.mxu3 %v2850_v4  ;;  %v2881_v1 = vld [vmem:[%s5256_s1 + $0x110] sm:$0xff]  ;;  %v194_v4 = vld [vmem:[%s5258_s0 + $0x5a0] sm:$0xff]  ;;  %v2874_v11 = vld [vmem:[%s5256_s1 + $0xd8] sm:$0xff] }
  0x14   :  { %v68_v2 = vld [vmem:[%s5258_s0 + $0x1b0] sm:$0xff]  ;;  %v2864_v12 = vld [vmem:[%s5256_s1 + $0x88] sm:$0xff]  ;;  %v17_v31 = vld [vmem:[%s5258_s0 + $0x18] sm:$0xff] }
  0x15   :  { %v482_v8 = vpack.c.bf16 %v77_v3, %v68_v2  ;;  %v2856_v13 = vld [vmem:[%s5256_s1 + $0x48] sm:$0xff]  ;;  %v26_v32 = vld [vmem:[%s5258_s0 + $0x60] sm:$0xff]  ;;  %v104_v35 = vld [vmem:[%s5258_s0 + $0x2d0] sm:$0xff] }
  0x16   :  { %1265 = vmatpush.bf16.msra.mxu0 %v2849_v5  ;;  %2934 = vmatpush.bf16.msra.mxu1 %v2849_v5  ;;  %v347_v23 = vld [vmem:[%s5258_s0 + $0xa68] sm:$0xff]  ;;  %v2879_v33 = vld [vmem:[%s5256_s1 + $0x100] sm:$0xff]  ;;  %v458_v34 = vpack.c.bf16 %v26_v32, %v17_v31  ;;  %v113_v36 = vld [vmem:[%s5258_s0 + $0x318] sm:$0xff] }
  0x17   :  { %2935 = vmatpush.bf16.msra.mxu2 %v2849_v5  ;;  %2936 = vmatpush.bf16.msra.mxu3 %v2849_v5  ;;  %v203_v5 = vld [vmem:[%s5258_s0 + $0x5e8] sm:$0xff]  ;;  %v2902_v44 = vld [vmem:[%s5256_s1 + $0x1b8] sm:$0xff]  ;;  %v44_v49 = vld [vmem:[%s5258_s0 + $0xf0] sm:$0xff] }
  0x18   :  { %v545_v9 = vpack.c.bf16 %v203_v5, %v194_v4  ;;  %v122_v51 = vld [vmem:[%s5258_s0 + $0x360] sm:$0xff]  ;;  %v131_v52 = vld [vmem:[%s5258_s0 + $0x3a8] sm:$0xff]  ;;  %v248_v53 = vld [vmem:[%s5258_s0 + $0x750] sm:$0xff] }
  0x19   :  { %v257_v54 = vld [vmem:[%s5258_s0 + $0x798] sm:$0xff]  ;;  %v62_v61 = vld [vmem:[%s5258_s0 + $0x180] sm:$0xff]  ;;  %v27_v2 = vld [vmem:[%s5258_s0 + $0x68] sm:$0xff] }
  0x1a   :  { %1266 = vmatpush.bf16.msra.mxu0 %v2848_v6  ;;  %2937 = vmatpush.bf16.msra.mxu1 %v2848_v6  ;;  %v53_v60 = vld [vmem:[%s5258_s0 + $0x138] sm:$0xff]  ;;  %v16_v3 = vld [vmem:[%s5258_s0 + $0x10] sm:$0xff]  ;;  %v51_v32 = vld [vmem:[%s5258_s0 + $0x128] sm:$0xff] }
  0x1b   :  { %2938 = vmatpush.bf16.msra.mxu2 %v2848_v6  ;;  %2939 = vmatpush.bf16.msra.mxu3 %v2848_v6  ;;  %v320_v6 = vld [vmem:[%s5258_s0 + $0x990] sm:$0xff]  ;;  %v25_v4 = vld [vmem:[%s5258_s0 + $0x58] sm:$0xff] }
  0x1c   :  { %v2917_v31 = vld [vmem:[%s5256_s1 + $0x230] sm:$0xff] }
  0x1e   :  { %1267 = vmatpush.bf16.msra.mxu0 %v2847_v7  ;;  %2940 = vmatpush.bf16.msra.mxu1 %v2847_v7 }
  0x1f   :  { %2941 = vmatpush.bf16.msra.mxu2 %v2847_v7  ;;  %2942 = vmatpush.bf16.msra.mxu3 %v2847_v7  ;;  %v329_v7 = vld [vmem:[%s5258_s0 + $0x9d8] sm:$0xff] }
  0x20   :  { %v608_v10 = vpack.c.bf16 %v329_v7, %v320_v6  ;;  %v457_v7 = vpack.c.bf16 %v25_v4, %v16_v3 }
  0x21   :  { %1268 = vmatmul.bf16.vlgmr.msra.gmra.mxu0 %v455_v17  ;;  %1303 = vmatmul.bf16.vlgmr.msra.gmra.mxu1 %v518_v18  ;;  %v2873_v17 = vld [vmem:[%s5256_s1 + $0xd0] sm:$0xff]  ;;  %v86_v18 = vld [vmem:[%s5258_s0 + $0x240] sm:$0xff] }
  0x22   :  { %1393 = vmatpush.bf16.msrb.mxu1 %v2862_v14  ;;  %1792 = vmatpush.bf16.msrb.mxu0 %v2886_v16  ;;  %v446_v14 = vld [vmem:[%s5258_s0 + $0xd80] sm:$0xff] }
  0x23   :  { %1526 = vmatpush.bf16.msrb.mxu2 %v2870_v15  ;;  %1373 = vmatmul.bf16.vlgmr.msra.gmra.mxu3 %v644_v28  ;;  %v2880_v15 = vld [vmem:[%s5256_s1 + $0x108] sm:$0xff]  ;;  %v671_v16 = vpack.c.bf16 %v446_v14, %v446_v14  ;;  %v2863_v28 = vld [vmem:[%s5256_s1 + $0x80] sm:$0xff]  ;;  %v45_v14 = vld [vmem:[%s5258_s0 + $0xf8] sm:$0xff] }
  0x24   :  { %1338 = vmatmul.bf16.vlgmr.msra.gmra.mxu2 %v581_v19  ;;  %1659 = vmatpush.bf16.msrb.mxu3 %v2878_v40  ;;  %v95_v19 = vld [vmem:[%s5258_s0 + $0x288] sm:$0xff]  ;;  %v365_v40 = vld [vmem:[%s5258_s0 + $0xaf8] sm:$0xff] }
  0x26   :  { %1394 = vmatpush.bf16.msrb.mxu1 %v2861_v20  ;;  %1793 = vmatpush.bf16.msrb.mxu0 %v2885_v22  ;;  %v212_v20 = vld [vmem:[%s5258_s0 + $0x630] sm:$0xff]  ;;  %v338_v22 = vld [vmem:[%s5258_s0 + $0xa20] sm:$0xff] }
  0x27   :  { %1527 = vmatpush.bf16.msrb.mxu2 %v2869_v21  ;;  %v221_v21 = vld [vmem:[%s5258_s0 + $0x678] sm:$0xff] }
  0x28   :  { %1660 = vmatpush.bf16.msrb.mxu3 %v2877_v46  ;;  %v554_v25 = vpack.c.bf16 %v221_v21, %v212_v20  ;;  %v2894_v46 = vld [vmem:[%s5256_s1 + $0x178] sm:$0xff] }
  0x2a   :  { %1395 = vmatpush.bf16.msrb.mxu1 %v2860_v24  ;;  %1794 = vmatpush.bf16.msrb.mxu0 %v2884_v27  ;;  %v491_v24 = vpack.c.bf16 %v95_v19, %v86_v18  ;;  %v2872_v27 = vld [vmem:[%s5256_s1 + $0xc8] sm:$0xff] }
  0x2b   :  { %1528 = vmatpush.bf16.msrb.mxu2 %v2868_v26  ;;  %v617_v26 = vpack.c.bf16 %v347_v23, %v338_v22  ;;  %v2901_v22 = vld [vmem:[%s5256_s1 + $0x1b0] sm:$0xff] }
  0x2c   :  { %1661 = vmatpush.bf16.msrb.mxu3 %v2876_v58  ;;  %v572_v58 = vpack.c.bf16 %v257_v54, %v248_v53  ;;  %v78_v53 = vld [vmem:[%s5258_s0 + $0x200] sm:$0xff]  ;;  %v72_v54 = vld [vmem:[%s5258_s0 + $0x1d0] sm:$0xff] }
  0x2e   :  { %1396 = vmatpush.bf16.msrb.mxu1 %v2859_v29  ;;  %1795 = vmatpush.bf16.msrb.mxu0 %v2883_v41  ;;  %v2855_v29 = vld [vmem:[%s5256_s1 + $0x40] sm:$0xff]  ;;  %v500_v41 = vpack.c.bf16 %v113_v36, %v104_v35  ;;  %v63_v35 = vld [vmem:[%s5258_s0 + $0x188] sm:$0xff]  ;;  %v52_v36 = vld [vmem:[%s5258_s0 + $0x130] sm:$0xff] }
  0x2f   :  { %1529 = vmatpush.bf16.msrb.mxu2 %v2867_v30  ;;  %v2871_v30 = vld [vmem:[%s5256_s1 + $0xc0] sm:$0xff] }
  0x30   :  { %1662 = vmatpush.bf16.msrb.mxu3 %v2875_v0  ;;  %v24_v0 = vld [vmem:[%s5258_s0 + $0x50] sm:$0xff] }
  0x31   :  { %1273 = vmatmul.bf16.gmra.mxu0 %v464_v37  ;;  %1308 = vmatmul.bf16.gmra.mxu1 %v527_v38  ;;  %v230_v37 = vld [vmem:[%s5258_s0 + $0x6c0] sm:$0xff]  ;;  %v239_v38 = vld [vmem:[%s5258_s0 + $0x708] sm:$0xff] }
  0x32   :  { %1397 = vmatpush.bf16.msrb.mxu1 %v2858_v47  ;;  %1796 = vmatpush.bf16.msrb.mxu0 %v2882_v48  ;;  %v2918_v47 = vld [vmem:[%s5256_s1 + $0x238] sm:$0xff]  ;;  %v35_v48 = vld [vmem:[%s5258_s0 + $0xa8] sm:$0xff] }
  0x33   :  { %1530 = vmatpush.bf16.msrb.mxu2 %v2866_v42  ;;  %1378 = vmatmul.bf16.gmra.mxu3 %v653_v45  ;;  %v563_v42 = vpack.c.bf16 %v239_v38, %v230_v37  ;;  %v2910_v45 = vld [vmem:[%s5256_s1 + $0x1f8] sm:$0xff]  ;;  %v467_v50 = vpack.c.bf16 %v44_v49, %v35_v48  ;;  %v107_v49 = vld [vmem:[%s5258_s0 + $0x2e8] sm:$0xff] }
  0x34   :  { %1343 = vmatmul.bf16.gmra.mxu2 %v590_v39  ;;  %1663 = vmatpush.bf16.msrb.mxu3 %v2874_v11  ;;  %v356_v39 = vld [vmem:[%s5258_s0 + $0xab0] sm:$0xff]  ;;  %v33_v11 = vld [vmem:[%s5258_s0 + $0x98] sm:$0xff] }
  0x35   :  { %v626_v43 = vpack.c.bf16 %v365_v40, %v356_v39  ;;  %v61_v37 = vld [vmem:[%s5258_s0 + $0x178] sm:$0xff] }
  0x36   :  { %1398 = vmatpush.bf16.msrb.mxu1 %v2857_v62  ;;  %1797 = vmatpush.bf16.msrb.mxu0 %v2881_v1  ;;  %v476_v62 = vpack.c.bf16 %v62_v61, %v53_v60  ;;  %v18_v1 = vld [vmem:[%s5258_s0 + $0x20] sm:$0xff] }
  0x37   :  { %1531 = vmatpush.bf16.msrb.mxu2 %v2865_v59  ;;  %v459_v6 = vpack.c.bf16 %v27_v2, %v18_v1 }
  0x38   :  { %1664 = vmatpush.bf16.msrb.mxu3 %v2873_v17 }
  0x3a   :  { %1399 = vmatpush.bf16.msrb.mxu1 %v2856_v13  ;;  %1798 = vmatpush.bf16.msrb.mxu0 %v2880_v15  ;;  %v36_v13 = vld [vmem:[%s5258_s0 + $0xb0] sm:$0xff]  ;;  %v34_v15 = vld [vmem:[%s5258_s0 + $0xa0] sm:$0xff] }
  0x3b   :  { %1532 = vmatpush.bf16.msrb.mxu2 %v2864_v12  ;;  %v42_v12 = vld [vmem:[%s5258_s0 + $0xe0] sm:$0xff]  ;;  %v468_v18 = vpack.c.bf16 %v45_v14, %v36_v13  ;;  %v97_v13 = vld [vmem:[%s5258_s0 + $0x298] sm:$0xff] }
  0x3c   :  { %1665 = vmatpush.bf16.msrb.mxu3 %v2872_v27  ;;  %v465_v17 = vpack.c.bf16 %v42_v12, %v33_v11  ;;  %v2893_v27 = vld [vmem:[%s5256_s1 + $0x170] sm:$0xff]  ;;  %v99_v11 = vld [vmem:[%s5258_s0 + $0x2a8] sm:$0xff] }
  0x3d   :  { %v88_v12 = vld [vmem:[%s5258_s0 + $0x250] sm:$0xff] }
  0x3e   :  { %1400 = vmatpush.bf16.msrb.mxu1 %v2855_v29  ;;  %1799 = vmatpush.bf16.msrb.mxu0 %v2879_v33  ;;  %v98_v29 = vld [vmem:[%s5258_s0 + $0x2a0] sm:$0xff]  ;;  %v60_v33 = vld [vmem:[%s5258_s0 + $0x170] sm:$0xff] }
  0x3f   :  { %1533 = vmatpush.bf16.msrb.mxu2 %v2863_v28  ;;  %v89_v28 = vld [vmem:[%s5258_s0 + $0x258] sm:$0xff]  ;;  %v474_v39 = vpack.c.bf16 %v60_v33, %v51_v32  ;;  %v2892_v32 = vld [vmem:[%s5256_s1 + $0x168] sm:$0xff] }
  0x40   :  { %1666 = vmatpush.bf16.msrb.mxu3 %v2871_v30  ;;  %v494_v30 = vpack.c.bf16 %v98_v29, %v89_v28  ;;  %v2900_v29 = vld [vmem:[%s5256_s1 + $0x1a8] sm:$0xff] }
  0x41   :  { %1278 = vmatmul.bf16.gmra.mxu0 %v473_v55  ;;  %1313 = vmatmul.bf16.gmra.mxu1 %v536_v56  ;;  %v374_v55 = vld [vmem:[%s5258_s0 + $0xb40] sm:$0xff]  ;;  %v383_v56 = vld [vmem:[%s5258_s0 + $0xb88] sm:$0xff] }
  0x42   :  { %1925 = vmatpush.bf16.msra.mxu1 %v2894_v46  ;;  %2324 = vmatpush.bf16.msra.mxu0 %v2918_v47  ;;  %v635_v59 = vpack.c.bf16 %v383_v56, %v374_v55  ;;  %v81_v55 = vld [vmem:[%s5258_s0 + $0x218] sm:$0xff]  ;;  %v70_v56 = vld [vmem:[%s5258_s0 + $0x1c0] sm:$0xff]  ;;  %v143_v33 = vld [vmem:[%s5258_s0 + $0x408] sm:$0xff] }
  0x43   :  { %1383 = vmatmul.bf16.gmra.mxu3 %v662_v63  ;;  %2058 = vmatpush.bf16.msra.mxu2 %v2902_v44  ;;  %v15_v63 = vld [vmem:[%s5258_s0 + $0x8] sm:$0xff]  ;;  %v486_v60 = vpack.c.bf16 %v81_v55, %v72_v54 }
  0x44   :  { %1348 = vmatmul.bf16.gmra.mxu2 %v599_v57  ;;  %2191 = vmatpush.bf16.msra.mxu3 %v2910_v45  ;;  %v509_v57 = vpack.c.bf16 %v131_v52, %v122_v51  ;;  %v456_v5 = vpack.c.bf16 %v24_v0, %v15_v63  ;;  %v69_v52 = vld [vmem:[%s5258_s0 + $0x1b8] sm:$0xff] }
  0x46   :  { %1926 = vmatpush.bf16.msra.mxu1 %v2893_v27  ;;  %2325 = vmatpush.bf16.msra.mxu0 %v2917_v31  ;;  %v2908_v31 = vld [vmem:[%s5256_s1 + $0x1e8] sm:$0xff] }
  0x47   :  { %2059 = vmatpush.bf16.msra.mxu2 %v2901_v22 }
  0x4a   :  { %1927 = vmatpush.bf16.msra.mxu1 %v2892_v32 }
  0x4b   :  { %2060 = vmatpush.bf16.msra.mxu2 %v2900_v29 }
  0x51   :  { %1283 = vmatmul.bf16.gmra.mxu0 %v482_v8  ;;  %1318 = vmatmul.bf16.gmra.mxu1 %v545_v9  ;;  %v71_v8 = vld [vmem:[%s5258_s0 + $0x1c8] sm:$0xff]  ;;  %v80_v9 = vld [vmem:[%s5258_s0 + $0x210] sm:$0xff] }
  0x53   :  { %1388 = vmatmul.bf16.gmra.mxu3 %v671_v16  ;;  %v43_v16 = vld [vmem:[%s5258_s0 + $0xe8] sm:$0xff] }
  0x54   :  { %1353 = vmatmul.bf16.gmra.mxu2 %v608_v10  ;;  %v485_v10 = vpack.c.bf16 %v80_v9, %v71_v8  ;;  %v466_v21 = vpack.c.bf16 %v43_v16, %v34_v15  ;;  %v87_v8 = vld [vmem:[%s5258_s0 + $0x248] sm:$0xff]  ;;  %v96_v9 = vld [vmem:[%s5258_s0 + $0x290] sm:$0xff] }
  0x55   :  { %v492_v15 = vpack.c.bf16 %v96_v9, %v87_v8  ;;  %v123_v9 = vld [vmem:[%s5258_s0 + $0x368] sm:$0xff] }
  0x61   :  { %1288 = vmatmul.bf16.gmra.mxu0 %v491_v24  ;;  %1323 = vmatmul.bf16.gmra.mxu1 %v554_v25 }
  0x63   :  { %1667 = vmatmul.bf16.vlgmr.msrb.gmra.mxu3 %v458_v34  ;;  %v54_v34 = vld [vmem:[%s5258_s0 + $0x140] sm:$0xff] }
  0x64   :  { %1358 = vmatmul.bf16.gmra.mxu2 %v617_v26  ;;  %v2909_v26 = vld [vmem:[%s5256_s1 + $0x1f0] sm:$0xff]  ;;  %v477_v40 = vpack.c.bf16 %v63_v35, %v54_v34  ;;  %v105_v35 = vld [vmem:[%s5258_s0 + $0x2d8] sm:$0xff] }
  0x65   :  { %2192 = vmatpush.bf16.msra.mxu3 %v2909_v26  ;;  %v152_v34 = vld [vmem:[%s5258_s0 + $0x450] sm:$0xff] }
  0x69   :  { %2193 = vmatpush.bf16.msra.mxu3 %v2908_v31 }
  0x71   :  { %1293 = vmatmul.bf16.gmra.mxu0 %v500_v41  ;;  %1328 = vmatmul.bf16.gmra.mxu1 %v563_v42 }
  0x73   :  { %1672 = vmatmul.bf16.gmra.mxu3 %v467_v50  ;;  %v116_v50 = vld [vmem:[%s5258_s0 + $0x330] sm:$0xff] }
  0x74   :  { %1363 = vmatmul.bf16.gmra.mxu2 %v626_v43  ;;  %v475_v43 = vpack.c.bf16 %v61_v37, %v52_v36  ;;  %v503_v51 = vpack.c.bf16 %v116_v50, %v107_v49  ;;  %v521_v36 = vpack.c.bf16 %v152_v34, %v143_v33  ;;  %v114_v37 = vld [vmem:[%s5258_s0 + $0x320] sm:$0xff]  ;;  %v115_v49 = vld [vmem:[%s5258_s0 + $0x328] sm:$0xff] }
  0x81   :  { %1298 = vmatmul.bf16.gmra.mxu0 %v509_v57  ;;  %1333 = vmatmul.bf16.gmra.mxu1 %v572_v58  ;;  %v79_v57 = vld [vmem:[%s5258_s0 + $0x208] sm:$0xff] }
  0x82   :  { %v484_v63 = vpack.c.bf16 %v79_v57, %v70_v56  ;;  %v2916_v56 = vld [vmem:[%s5256_s1 + $0x228] sm:$0xff] }
  0x83   :  { %1677 = vmatmul.bf16.gmra.mxu3 %v476_v62  ;;  %2326 = vmatpush.bf16.msra.mxu0 %v2916_v56  ;;  %v153_v56 = vld [vmem:[%s5258_s0 + $0x458] sm:$0xff] }
  0x84   :  { %1368 = vmatmul.bf16.gmra.mxu2 %v635_v59  ;;  %v483_v59 = vpack.c.bf16 %v78_v53, %v69_v52 }
  0x91   :  { %1401 = vmatmul.bf16.vlgmr.msrb.gmra.mxu1 %v456_v5  ;;  %1800 = vmatmul.bf16.vlgmr.msrb.gmra.mxu0 %v459_v6  ;;  %v125_v5 = vld [vmem:[%s5258_s0 + $0x378] sm:$0xff]  ;;  %v134_v6 = vld [vmem:[%s5258_s0 + $0x3c0] sm:$0xff] }
  0x93   :  { %1682 = vmatmul.bf16.gmra.mxu3 %v485_v10  ;;  %v90_v10 = vld [vmem:[%s5258_s0 + $0x260] sm:$0xff] }
  0x94   :  { %1534 = vmatmul.bf16.vlgmr.msrb.gmra.mxu2 %v457_v7  ;;  %v512_v7 = vpack.c.bf16 %v134_v6, %v125_v5  ;;  %v495_v16 = vpack.c.bf16 %v99_v11, %v90_v10  ;;  %v161_v6 = vld [vmem:[%s5258_s0 + $0x498] sm:$0xff]  ;;  %v132_v10 = vld [vmem:[%s5258_s0 + $0x3b0] sm:$0xff]  ;;  %v126_v11 = vld [vmem:[%s5258_s0 + $0x380] sm:$0xff] }
  0x9e   :  { %v3304_v19 = vpop.f32.mrf.mxu0  ;;  %v3306_v20 = vpop.f32.mrf.mxu1 }
  0xa1   :  { %1406 = vmatmul.bf16.gmra.mxu1 %v465_v17  ;;  %1805 = vmatmul.bf16.gmra.mxu0 %v468_v18 }
  0xa3   :  { %1687 = vmatmul.bf16.gmra.mxu3 %v494_v30 }
  0xa4   :  { %1539 = vmatmul.bf16.gmra.mxu2 %v466_v21  ;;  %v493_v21 = vpack.c.bf16 %v97_v13, %v88_v12  ;;  %v135_v12 = vld [vmem:[%s5258_s0 + $0x3c8] sm:$0xff]  ;;  %v124_v13 = vld [vmem:[%s5258_s0 + $0x370] sm:$0xff] }
  0xa5   :  { %v513_v29 = vpack.c.bf16 %v135_v12, %v126_v11 }
  0xa6   :  { %v3313_v24 = vpop.f32.mrf.mxu0  ;;  %v3315_v25 = vpop.f32.mrf.mxu1 }
  0xa7   :  { %v3311_v23 = vpop.f32.mrf.mxu2  ;;  %v3356_v44 = vpop.f32.mrf.mxu3 }
  0xa8   :  { %5260 = vst [vmem:[#allocation2_spill] sm:$0xff] %v3356_v44  ;;  %v2915_v44 = vld [vmem:[%s5256_s1 + $0x220] sm:$0xff] }
  0xa9   :  { %2327 = vmatpush.bf16.msra.mxu0 %v2915_v44  ;;  %v224_v44 = vld [vmem:[%s5258_s0 + $0x690] sm:$0xff] }
  0xae   :  { %v3352_v41 = vpop.f32.mrf.mxu0  ;;  %v3354_v42 = vpop.f32.mrf.mxu1 }
  0xaf   :  { %v3350_v38 = vpop.f32.mrf.mxu2  ;;  %v3364_v48 = vpop.f32.mrf.mxu3 }
  0xb0   :  { %5261 = vst [vmem:[#allocation3_spill] sm:$0xff] %v3364_v48 }
  0xb1   :  { %1411 = vmatmul.bf16.gmra.mxu1 %v474_v39  ;;  %1810 = vmatmul.bf16.gmra.mxu0 %v477_v40  ;;  %v108_v39 = vld [vmem:[%s5258_s0 + $0x2f0] sm:$0xff]  ;;  %v117_v40 = vld [vmem:[%s5258_s0 + $0x338] sm:$0xff] }
  0xb2   :  { %v504_v52 = vpack.c.bf16 %v117_v40, %v108_v39  ;;  %v179_v40 = vld [vmem:[%s5258_s0 + $0x528] sm:$0xff] }
  0xb3   :  { %1692 = vmatmul.bf16.gmra.mxu3 %v503_v51  ;;  %v501_v51 = vpack.c.bf16 %v114_v37, %v105_v35 }
  0xb4   :  { %1544 = vmatmul.bf16.gmra.mxu2 %v475_v43  ;;  %v106_v43 = vld [vmem:[%s5258_s0 + $0x2e0] sm:$0xff] }
  0xb5   :  { %v502_v55 = vpack.c.bf16 %v115_v49, %v106_v43  ;;  %v188_v43 = vld [vmem:[%s5258_s0 + $0x570] sm:$0xff]  ;;  %v141_v49 = vld [vmem:[%s5258_s0 + $0x3f8] sm:$0xff] }
  0xb6   :  { %v3360_v46 = vpop.f32.mrf.mxu0  ;;  %v3362_v47 = vpop.f32.mrf.mxu1 }
  0xb7   :  { %v3358_v45 = vpop.f32.mrf.mxu2  ;;  %v3396_v0 = vpop.f32.mrf.mxu3 }
  0xb8   :  { %5262 = vst [vmem:[#allocation4_spill] sm:$0xff] %v3396_v0 }
  0xbe   :  { %v3392_v61 = vpop.f32.mrf.mxu0  ;;  %v3394_v62 = vpop.f32.mrf.mxu1 }
  0xbf   :  { %v3390_v58 = vpop.f32.mrf.mxu2  ;;  %v3404_v4 = vpop.f32.mrf.mxu3 }
  0xc0   :  { %5263 = vst [vmem:[#allocation5_spill] sm:$0xff] %v3404_v4 }
  0xc1   :  { %1416 = vmatmul.bf16.gmra.mxu1 %v483_v59  ;;  %1815 = vmatmul.bf16.gmra.mxu0 %v486_v60 }
  0xc3   :  { %1697 = vmatmul.bf16.gmra.mxu3 %v512_v7  ;;  %v170_v7 = vld [vmem:[%s5258_s0 + $0x4e0] sm:$0xff] }
  0xc4   :  { %1549 = vmatmul.bf16.gmra.mxu2 %v484_v63  ;;  %v530_v8 = vpack.c.bf16 %v170_v7, %v161_v6  ;;  %v151_v6 = vld [vmem:[%s5258_s0 + $0x448] sm:$0xff] }
  0xc6   :  { %v3400_v2 = vpop.f32.mrf.mxu0  ;;  %v3402_v3 = vpop.f32.mrf.mxu1 }
  0xc7   :  { %v3398_v1 = vpop.f32.mrf.mxu2  ;;  %v3436_v22 = vpop.f32.mrf.mxu3 }
  0xc8   :  { %5264 = vst [vmem:[#allocation6_spill] sm:$0xff] %v3436_v22 }
  0xce   :  { %v3432_v17 = vpop.f32.mrf.mxu0  ;;  %v3434_v18 = vpop.f32.mrf.mxu1 }
  0xcf   :  { %v3430_v14 = vpop.f32.mrf.mxu2  ;;  %v3447_v30 = vpop.f32.mrf.mxu3 }
  0xd0   :  { %5265 = vst [vmem:[#allocation7_spill] sm:$0xff] %v3447_v30 }
  0xd1   :  { %1421 = vmatmul.bf16.gmra.mxu1 %v492_v15  ;;  %1820 = vmatmul.bf16.gmra.mxu0 %v495_v16  ;;  %v133_v15 = vld [vmem:[%s5258_s0 + $0x3b8] sm:$0xff] }
  0xd2   :  { %v511_v33 = vpack.c.bf16 %v133_v15, %v124_v13 }
  0xd3   :  { %1702 = vmatmul.bf16.gmra.mxu3 %v521_v36 }
  0xd4   :  { %1554 = vmatmul.bf16.gmra.mxu2 %v493_v21  ;;  %v510_v21 = vpack.c.bf16 %v132_v10, %v123_v9 }
  0xd6   :  { %v3440_v27 = vpop.f32.mrf.mxu0  ;;  %v3442_v28 = vpop.f32.mrf.mxu1 }
  0xd7   :  { %v3438_v26 = vpop.f32.mrf.mxu2  ;;  %v3488_v57 = vpop.f32.mrf.mxu3 }
  0xd8   :  { %5266 = vst [vmem:[#allocation8_spill] sm:$0xff] %v3488_v57  ;;  %v169_v57 = vld [vmem:[%s5258_s0 + $0x4d8] sm:$0xff] }
  0xde   :  { %v3481_v53 = vpop.f32.mrf.mxu0  ;;  %v3483_v54 = vpop.f32.mrf.mxu1 }
  0xdf   :  { %v3479_v50 = vpop.f32.mrf.mxu2  ;;  %v1391_v5 = vpop.f32.mrf.mxu3 }
  0xe0   :  { %v142_v5 = vld [vmem:[%s5258_s0 + $0x400] sm:$0xff] }
  0xe1   :  { %1426 = vmatmul.bf16.gmra.mxu1 %v501_v51  ;;  %1825 = vmatmul.bf16.gmra.mxu0 %v504_v52  ;;  %v539_v51 = vpack.c.bf16 %v188_v43, %v179_v40  ;;  %v150_v52 = vld [vmem:[%s5258_s0 + $0x440] sm:$0xff]  ;;  %v520_v12 = vpack.c.bf16 %v151_v6, %v142_v5  ;;  %v171_v6 = vld [vmem:[%s5258_s0 + $0x4e8] sm:$0xff] }
  0xe2   :  { %v2899_v40 = vld [vmem:[%s5256_s1 + $0x1a0] sm:$0xff] }
  0xe3   :  { %1707 = vmatmul.bf16.gmra.mxu3 %v530_v8  ;;  %v519_v8 = vpack.c.bf16 %v150_v52, %v141_v49  ;;  %v2907_v43 = vld [vmem:[%s5256_s1 + $0x1e0] sm:$0xff]  ;;  %v197_v49 = vld [vmem:[%s5258_s0 + $0x5b8] sm:$0xff]  ;;  %2061 = vmatpush.bf16.msra.mxu2 %v2899_v40 }
  0xe4   :  { %1559 = vmatmul.bf16.gmra.mxu2 %v502_v55  ;;  %v144_v55 = vld [vmem:[%s5258_s0 + $0x410] sm:$0xff]  ;;  %v206_v52 = vld [vmem:[%s5258_s0 + $0x600] sm:$0xff]  ;;  %2194 = vmatpush.bf16.msra.mxu3 %v2907_v43 }
  0xe5   :  { %v522_v9 = vpack.c.bf16 %v153_v56, %v144_v55  ;;  %v2891_v55 = vld [vmem:[%s5256_s1 + $0x160] sm:$0xff]  ;;  %v168_v56 = vld [vmem:[%s5258_s0 + $0x4d0] sm:$0xff] }
  0xe6   :  { %v3492_v60 = vpop.f32.mrf.mxu0  ;;  %v3494_v63 = vpop.f32.mrf.mxu1  ;;  %v162_v5 = vld [vmem:[%s5258_s0 + $0x4a0] sm:$0xff]  ;;  %1928 = vmatpush.bf16.msra.mxu1 %v2891_v55 }
  0xe7   :  { %v3490_v59 = vpop.f32.mrf.mxu2  ;;  %v3526_v34 = vpop.f32.mrf.mxu3 }
  0xee   :  { %v3522_v31 = vpop.f32.mrf.mxu0  ;;  %v3524_v32 = vpop.f32.mrf.mxu1 }
  0xef   :  { %v3520_v16 = vpop.f32.mrf.mxu2  ;;  %v3534_v39 = vpop.f32.mrf.mxu3 }
  0xf1   :  { %1431 = vmatmul.bf16.gmra.mxu1 %v510_v21  ;;  %1830 = vmatmul.bf16.gmra.mxu0 %v513_v29 }
  0xf3   :  { %1712 = vmatmul.bf16.gmra.mxu3 %v539_v51  ;;  %v159_v51 = vld [vmem:[%s5258_s0 + $0x488] sm:$0xff] }
  0xf4   :  { %1564 = vmatmul.bf16.gmra.mxu2 %v511_v33 }
  0xf6   :  { %v3530_v36 = vpop.f32.mrf.mxu0  ;;  %v3532_v37 = vpop.f32.mrf.mxu1 }
  0xf7   :  { %v3528_v35 = vpop.f32.mrf.mxu2  ;;  %v3566_v13 = vpop.f32.mrf.mxu3 }
  0xfe   :  { %v3562_v10 = vpop.f32.mrf.mxu0  ;;  %v3564_v11 = vpop.f32.mrf.mxu1 }
  0xff   :  { %v3560_v7 = vpop.f32.mrf.mxu2  ;;  %v3574_v33 = vpop.f32.mrf.mxu3 }
 0x100   :  { %5267 = vst [vmem:[#allocation9_spill] sm:$0xff] %v3560_v7 }
 0x101   :  { %1436 = vmatmul.bf16.gmra.mxu1 %v519_v8  ;;  %1835 = vmatmul.bf16.gmra.mxu0 %v522_v9  ;;  %v548_v8 = vpack.c.bf16 %v206_v52, %v197_v49  ;;  %v3606_v9 = vld [vmem:[%s5257_s2] ss:$0 sm:$0xff]  ;;  %v528_v49 = vpack.c.bf16 %v168_v56, %v159_v51  ;;  %v531_v52 = vpack.c.bf16 %v171_v6, %v162_v5 }
 0x102   :  { %v1270_v40 = vadd.f32 %v3606_v9, %v3304_v19  ;;  %v1272_v19 = vadd.f32 %v3606_v9, %v3313_v24  ;;  %v177_v24 = vld [vmem:[%s5258_s0 + $0x518] sm:$0xff] }
 0x103   :  { %1717 = vmatmul.bf16.gmra.mxu3 %v548_v8  ;;  %v215_v8 = vld [vmem:[%s5258_s0 + $0x648] sm:$0xff] }
 0x104   :  { %1569 = vmatmul.bf16.gmra.mxu2 %v520_v12  ;;  %v160_v12 = vld [vmem:[%s5258_s0 + $0x490] sm:$0xff] }
 0x105   :  { %v529_v4 = vpack.c.bf16 %v169_v57, %v160_v12  ;;  %v189_v12 = vld [vmem:[%s5258_s0 + $0x578] sm:$0xff] }
 0x106   :  { %v3570_v21 = vpop.f32.mrf.mxu0  ;;  %v3572_v29 = vpop.f32.mrf.mxu1 }
 0x107   :  { %v3568_v15 = vpop.f32.mrf.mxu2  ;;  %v3618_v48 = vpop.f32.mrf.mxu3 }
 0x108   :  { %5268 = vst [vmem:[#allocation10_spill] sm:$0xff] %v3568_v15 }
 0x10e   :  { %v1402_v30 = vpop.f32.mrf.mxu1  ;;  %v1801_v22 = vpop.f32.mrf.mxu0 }
 0x10f   :  { %v3616_v43 = vpop.f32.mrf.mxu2  ;;  %v1403_v0 = vadd.f32 %v1402_v30, %v1270_v40  ;;  %v3625_v57 = vpop.f32.mrf.mxu3 }
 0x110   :  { %5269 = vst [vmem:[#allocation11_spill] sm:$0xff] %v3616_v43 }
 0x111   :  { %1441 = vmatmul.bf16.gmra.mxu1 %v528_v49  ;;  %1840 = vmatmul.bf16.gmra.mxu0 %v531_v52  ;;  %v178_v49 = vld [vmem:[%s5258_s0 + $0x520] sm:$0xff]  ;;  %v187_v52 = vld [vmem:[%s5258_s0 + $0x568] sm:$0xff] }
 0x114   :  { %1574 = vmatmul.bf16.gmra.mxu2 %v529_v4  ;;  %v186_v4 = vld [vmem:[%s5258_s0 + $0x560] sm:$0xff] }
 0x116   :  { %v1404_v56 = vpop.f32.mrf.mxu1  ;;  %v1803_v5 = vpop.f32.mrf.mxu0 }
 0x117   :  { %v1535_v55 = vpop.f32.mrf.mxu2  ;;  %v1405_v6 = vadd.f32 %v1404_v56, %v1272_v19  ;;  %v1275_v19 = vadd.f32 %v3606_v9, %v3352_v41  ;;  %v1277_v41 = vadd.f32 %v3606_v9, %v3360_v46  ;;  %v195_v46 = vld [vmem:[%s5258_s0 + $0x5a8] sm:$0xff] }
 0x118   :  { %v1536_v51 = vadd.f32 %v1535_v55, %v1403_v0  ;;  %v557_v0 = vpack.c.bf16 %v224_v44, %v215_v8 }
 0x11a   :  { %v1669_v30 = vadd.f32 %v3526_v34, %v1536_v51  ;;  %v180_v34 = vld [vmem:[%s5258_s0 + $0x530] sm:$0xff]  ;;  %1722 = vmatmul.bf16.gmra.mxu3 %v557_v0  ;;  %v537_v51 = vpack.c.bf16 %v186_v4, %v177_v24 }
 0x11b   :  { %v540_v56 = vpack.c.bf16 %v189_v12, %v180_v34 }
 0x11c   :  { %v3646_v40 = vadd.f32 %v1801_v22, %v1669_v30  ;;  %v538_v22 = vpack.c.bf16 %v187_v52, %v178_v49  ;;  %v204_v52 = vld [vmem:[%s5258_s0 + $0x5f0] sm:$0xff] }
 0x11e   :  { %5270 = vst [vmem:[#allocation12_spill] sm:$0xff] %v3646_v40  ;;  %v1407_v44 = vpop.f32.mrf.mxu1  ;;  %v1806_v43 = vpop.f32.mrf.mxu0 }
 0x11f   :  { %v1537_v55 = vpop.f32.mrf.mxu2  ;;  %v1408_v30 = vadd.f32 %v1407_v44, %v1275_v19  ;;  %v3656_v40 = vpop.f32.mrf.mxu3  ;;  %v207_v19 = vld [vmem:[%s5258_s0 + $0x608] sm:$0xff] }
 0x120   :  { %v1538_v8 = vadd.f32 %v1537_v55, %v1405_v6 }
 0x121   :  { %1446 = vmatmul.bf16.gmra.mxu1 %v537_v51  ;;  %1845 = vmatmul.bf16.gmra.mxu0 %v540_v56  ;;  %v196_v51 = vld [vmem:[%s5258_s0 + $0x5b0] sm:$0xff]  ;;  %v205_v56 = vld [vmem:[%s5258_s0 + $0x5f8] sm:$0xff] }
 0x122   :  { %v1671_v15 = vadd.f32 %v3534_v39, %v1538_v8  ;;  %v233_v39 = vld [vmem:[%s5258_s0 + $0x6d8] sm:$0xff]  ;;  %v1280_v8 = vadd.f32 %v3606_v9, %v3392_v61  ;;  %v1282_v61 = vadd.f32 %v3606_v9, %v3400_v2  ;;  %v260_v2 = vld [vmem:[%s5258_s0 + $0x7b0] sm:$0xff] }
 0x124   :  { %1579 = vmatmul.bf16.gmra.mxu2 %v538_v22  ;;  %v3659_v7 = vadd.f32 %v1803_v5, %v1671_v15  ;;  %v242_v15 = vld [vmem:[%s5258_s0 + $0x720] sm:$0xff]  ;;  %v546_v22 = vpack.c.bf16 %v204_v52, %v195_v46 }
 0x125   :  { %v566_v5 = vpack.c.bf16 %v242_v15, %v233_v39 }
 0x126   :  { %v1409_v4 = vpop.f32.mrf.mxu1  ;;  %v1808_v6 = vpop.f32.mrf.mxu0 }
 0x127   :  { %v1540_v0 = vpop.f32.mrf.mxu2  ;;  %v1410_v34 = vadd.f32 %v1409_v4, %v1277_v41  ;;  %v3663_v12 = vpop.f32.mrf.mxu3 }
 0x128   :  { %v1541_v24 = vadd.f32 %v1540_v0, %v1408_v30 }
 0x12a   :  { %v1674_v49 = vadd.f32 %v3566_v13, %v1541_v24  ;;  %v198_v13 = vld [vmem:[%s5258_s0 + $0x5c0] sm:$0xff]  ;;  %1727 = vmatmul.bf16.gmra.mxu3 %v566_v5 }
 0x12b   :  { %v549_v30 = vpack.c.bf16 %v207_v19, %v198_v13 }
 0x12c   :  { %v3684_v55 = vadd.f32 %v1806_v43, %v1674_v49  ;;  %v547_v43 = vpack.c.bf16 %v205_v56, %v196_v51  ;;  %v213_v56 = vld [vmem:[%s5258_s0 + $0x638] sm:$0xff] }
 0x12e   :  { %v1412_v0 = vpop.f32.mrf.mxu1  ;;  %v1811_v24 = vpop.f32.mrf.mxu0 }
 0x12f   :  { %v1542_v44 = vpop.f32.mrf.mxu2  ;;  %v1413_v4 = vadd.f32 %v1412_v0, %v1280_v8  ;;  %v3694_v49 = vpop.f32.mrf.mxu3  ;;  %v214_v0 = vld [vmem:[%s5258_s0 + $0x640] sm:$0xff] }
 0x130   :  { %v1543_v41 = vadd.f32 %v1542_v44, %v1410_v34  ;;  %v222_v44 = vld [vmem:[%s5258_s0 + $0x680] sm:$0xff] }
 0x131   :  { %1451 = vmatmul.bf16.gmra.mxu1 %v546_v22  ;;  %1850 = vmatmul.bf16.gmra.mxu0 %v549_v30  ;;  %v216_v22 = vld [vmem:[%s5258_s0 + $0x650] sm:$0xff]  ;;  %v225_v30 = vld [vmem:[%s5258_s0 + $0x698] sm:$0xff] }
 0x132   :  { %v1676_v39 = vadd.f32 %v3574_v33, %v1543_v41  ;;  %v2898_v33 = vld [vmem:[%s5256_s1 + $0x198] sm:$0xff] }
 0x133   :  { %2062 = vmatpush.bf16.msra.mxu2 %v2898_v33 }
 0x134   :  { %1584 = vmatmul.bf16.gmra.mxu2 %v547_v43  ;;  %v3697_v15 = vadd.f32 %v1808_v6, %v1676_v39  ;;  %v251_v6 = vld [vmem:[%s5258_s0 + $0x768] sm:$0xff] }
 0x135   :  { %v575_v8 = vpack.c.bf16 %v260_v2, %v251_v6  ;;  %v223_v43 = vld [vmem:[%s5258_s0 + $0x688] sm:$0xff] }
 0x136   :  { %v1414_v52 = vpop.f32.mrf.mxu1  ;;  %v1813_v34 = vpop.f32.mrf.mxu0 }
 0x137   :  { %v1545_v5 = vpop.f32.mrf.mxu2  ;;  %v1415_v13 = vadd.f32 %v1414_v52, %v1282_v61  ;;  %v3701_v19 = vpop.f32.mrf.mxu3  ;;  %v555_v61 = vpack.c.bf16 %v222_v44, %v213_v56  ;;  %v1287_v56 = vadd.f32 %v3606_v9, %v3440_v27  ;;  %v231_v27 = vld [vmem:[%s5258_s0 + $0x6c8] sm:$0xff] }
 0x138   :  { %v1546_v46 = vadd.f32 %v1545_v5, %v1413_v4  ;;  %v1285_v4 = vadd.f32 %v3606_v9, %v3432_v17  ;;  %v558_v5 = vpack.c.bf16 %v225_v30, %v216_v22  ;;  %v2914_v17 = vld [vmem:[%s5256_s1 + $0x218] sm:$0xff] }
 0x139   :  { %2328 = vmatpush.bf16.msra.mxu0 %v2914_v17 }
 0x13a   :  { %v1679_v51 = vadd.f32 %v3618_v48, %v1546_v46  ;;  %v2906_v48 = vld [vmem:[%s5256_s1 + $0x1d8] sm:$0xff]  ;;  %1732 = vmatmul.bf16.gmra.mxu3 %v575_v8 }
 0x13b   :  { %2195 = vmatpush.bf16.msra.mxu3 %v2906_v48  ;;  %v2890_v48 = vld [vmem:[%s5256_s1 + $0x158] sm:$0xff] }
 0x13c   :  { %v3728_v41 = vadd.f32 %v1811_v24, %v1679_v51  ;;  %v556_v51 = vpack.c.bf16 %v223_v43, %v214_v0  ;;  %1929 = vmatpush.bf16.msra.mxu1 %v2890_v48 }
 0x13e   :  { %v1417_v52 = vpop.f32.mrf.mxu1  ;;  %v1816_v24 = vpop.f32.mrf.mxu0 }
 0x13f   :  { %v1547_v39 = vpop.f32.mrf.mxu2  ;;  %v1418_v33 = vadd.f32 %v1417_v52, %v1285_v4  ;;  %v3738_v6 = vpop.f32.mrf.mxu3  ;;  %v269_v4 = vld [vmem:[%s5258_s0 + $0x7f8] sm:$0xff]  ;;  %v232_v52 = vld [vmem:[%s5258_s0 + $0x6d0] sm:$0xff] }
 0x140   :  { %v1548_v46 = vadd.f32 %v1547_v39, %v1415_v13 }
 0x141   :  { %1456 = vmatmul.bf16.gmra.mxu1 %v555_v61  ;;  %1855 = vmatmul.bf16.gmra.mxu0 %v558_v5  ;;  %v240_v61 = vld [vmem:[%s5258_s0 + $0x710] sm:$0xff]  ;;  %v243_v5 = vld [vmem:[%s5258_s0 + $0x728] sm:$0xff] }
 0x142   :  { %v1681_v2 = vadd.f32 %v3625_v57, %v1548_v46  ;;  %v564_v48 = vpack.c.bf16 %v240_v61, %v231_v27 }
 0x144   :  { %1589 = vmatmul.bf16.gmra.mxu2 %v556_v51  ;;  %v3747_v13 = vadd.f32 %v1813_v34, %v1681_v2  ;;  %v278_v34 = vld [vmem:[%s5258_s0 + $0x840] sm:$0xff]  ;;  %v241_v51 = vld [vmem:[%s5258_s0 + $0x718] sm:$0xff] }
 0x145   :  { %v584_v39 = vpack.c.bf16 %v278_v34, %v269_v4 }
 0x146   :  { %v1419_v44 = vpop.f32.mrf.mxu1  ;;  %v1818_v22 = vpop.f32.mrf.mxu0 }
 0x147   :  { %v1550_v8 = vpop.f32.mrf.mxu2  ;;  %v1420_v30 = vadd.f32 %v1419_v44, %v1287_v56  ;;  %v3751_v0 = vpop.f32.mrf.mxu3 }
 0x148   :  { %v1551_v57 = vadd.f32 %v1550_v8, %v1418_v33  ;;  %v1290_v33 = vadd.f32 %v3606_v9, %v3481_v53  ;;  %v1292_v53 = vadd.f32 %v3606_v9, %v3492_v60  ;;  %v249_v60 = vld [vmem:[%s5258_s0 + $0x758] sm:$0xff] }
 0x14a   :  { %v1684_v43 = vadd.f32 %v3656_v40, %v1551_v57  ;;  %v234_v40 = vld [vmem:[%s5258_s0 + $0x6e0] sm:$0xff]  ;;  %1737 = vmatmul.bf16.gmra.mxu3 %v584_v39 }
 0x14b   :  { %v567_v17 = vpack.c.bf16 %v243_v5, %v234_v40 }
 0x14c   :  { %v3772_v46 = vadd.f32 %v1816_v24, %v1684_v43  ;;  %v565_v24 = vpack.c.bf16 %v241_v51, %v232_v52 }
 0x14e   :  { %v1422_v8 = vpop.f32.mrf.mxu1  ;;  %v1821_v57 = vpop.f32.mrf.mxu0 }
 0x14f   :  { %v1552_v2 = vpop.f32.mrf.mxu2  ;;  %v1423_v44 = vadd.f32 %v1422_v8, %v1290_v33  ;;  %v3782_v43 = vpop.f32.mrf.mxu3  ;;  %v258_v33 = vld [vmem:[%s5258_s0 + $0x7a0] sm:$0xff]  ;;  %v1295_v8 = vadd.f32 %v3606_v9, %v3522_v31  ;;  %v1297_v31 = vadd.f32 %v3606_v9, %v3530_v36  ;;  %v2897_v36 = vld [vmem:[%s5256_s1 + $0x190] sm:$0xff] }
 0x150   :  { %v1553_v56 = vadd.f32 %v1552_v2, %v1420_v30  ;;  %v261_v2 = vld [vmem:[%s5258_s0 + $0x7b8] sm:$0xff]  ;;  %2063 = vmatpush.bf16.msra.mxu2 %v2897_v36  ;;  %v2905_v36 = vld [vmem:[%s5256_s1 + $0x1d0] sm:$0xff] }
 0x151   :  { %1461 = vmatmul.bf16.gmra.mxu1 %v564_v48  ;;  %1860 = vmatmul.bf16.gmra.mxu0 %v567_v17  ;;  %v250_v17 = vld [vmem:[%s5258_s0 + $0x760] sm:$0xff] }
 0x152   :  { %v1686_v4 = vadd.f32 %v3663_v12, %v1553_v56  ;;  %v287_v12 = vld [vmem:[%s5258_s0 + $0x888] sm:$0xff]  ;;  %2196 = vmatpush.bf16.msra.mxu3 %v2905_v36 }
 0x153   :  { %v259_v56 = vld [vmem:[%s5258_s0 + $0x7a8] sm:$0xff] }
 0x154   :  { %1594 = vmatmul.bf16.gmra.mxu2 %v565_v24  ;;  %v3785_v34 = vadd.f32 %v1818_v22, %v1686_v4  ;;  %v296_v22 = vld [vmem:[%s5258_s0 + $0x8d0] sm:$0xff] }
 0x155   :  { %v593_v51 = vpack.c.bf16 %v296_v22, %v287_v12 }
 0x156   :  { %v1424_v61 = vpop.f32.mrf.mxu1  ;;  %v1823_v30 = vpop.f32.mrf.mxu0 }
 0x157   :  { %v1555_v39 = vpop.f32.mrf.mxu2  ;;  %v1425_v40 = vadd.f32 %v1424_v61, %v1292_v53  ;;  %v3789_v5 = vpop.f32.mrf.mxu3 }
 0x158   :  { %v1556_v27 = vadd.f32 %v1555_v39, %v1423_v44  ;;  %v573_v44 = vpack.c.bf16 %v258_v33, %v249_v60 }
 0x15a   :  { %v1689_v52 = vadd.f32 %v3694_v49, %v1556_v27  ;;  %v252_v49 = vld [vmem:[%s5258_s0 + $0x770] sm:$0xff]  ;;  %1742 = vmatmul.bf16.gmra.mxu3 %v593_v51 }
 0x15b   :  { %v576_v4 = vpack.c.bf16 %v261_v2, %v252_v49 }
 0x15c   :  { %v3810_v48 = vadd.f32 %v1821_v57, %v1689_v52  ;;  %v574_v57 = vpack.c.bf16 %v259_v56, %v250_v17  ;;  %v267_v56 = vld [vmem:[%s5258_s0 + $0x7e8] sm:$0xff] }
 0x15e   :  { %v1427_v39 = vpop.f32.mrf.mxu1  ;;  %v1826_v27 = vpop.f32.mrf.mxu0 }
 0x15f   :  { %v1557_v24 = vpop.f32.mrf.mxu2  ;;  %v1428_v61 = vadd.f32 %v1427_v39, %v1295_v8  ;;  %v3820_v52 = vpop.f32.mrf.mxu3  ;;  %v277_v39 = vld [vmem:[%s5258_s0 + $0x838] sm:$0xff] }
 0x160   :  { %v1558_v53 = vadd.f32 %v1557_v24, %v1425_v40  ;;  %v270_v24 = vld [vmem:[%s5258_s0 + $0x800] sm:$0xff] }
 0x161   :  { %1466 = vmatmul.bf16.gmra.mxu1 %v573_v44  ;;  %1865 = vmatmul.bf16.gmra.mxu0 %v576_v4  ;;  %v279_v44 = vld [vmem:[%s5258_s0 + $0x848] sm:$0xff] }
 0x162   :  { %v1691_v12 = vadd.f32 %v3701_v19, %v1558_v53  ;;  %v305_v19 = vld [vmem:[%s5258_s0 + $0x918] sm:$0xff]  ;;  %v268_v53 = vld [vmem:[%s5258_s0 + $0x7f0] sm:$0xff] }
 0x164   :  { %1599 = vmatmul.bf16.gmra.mxu2 %v574_v57  ;;  %v3823_v22 = vadd.f32 %v1823_v30, %v1691_v12  ;;  %v314_v30 = vld [vmem:[%s5258_s0 + $0x960] sm:$0xff]  ;;  %v1300_v57 = vadd.f32 %v3606_v9, %v3562_v10  ;;  %v2889_v10 = vld [vmem:[%s5256_s1 + $0x150] sm:$0xff] }
 0x165   :  { %v602_v8 = vpack.c.bf16 %v314_v30, %v305_v19  ;;  %1930 = vmatpush.bf16.msra.mxu1 %v2889_v10 }
 0x166   :  { %v1429_v33 = vpop.f32.mrf.mxu1  ;;  %v1828_v40 = vpop.f32.mrf.mxu0 }
 0x167   :  { %v1560_v51 = vpop.f32.mrf.mxu2  ;;  %v1430_v49 = vadd.f32 %v1429_v33, %v1297_v31  ;;  %v3827_v2 = vpop.f32.mrf.mxu3  ;;  %v585_v31 = vpack.c.bf16 %v279_v44, %v270_v24 }
 0x168   :  { %v1561_v60 = vadd.f32 %v1560_v51, %v1428_v61 }
 0x16a   :  { %v1694_v17 = vadd.f32 %v3738_v6, %v1561_v60  ;;  %v276_v6 = vld [vmem:[%s5258_s0 + $0x830] sm:$0xff]  ;;  %1747 = vmatmul.bf16.gmra.mxu3 %v602_v8 }
 0x16b   :  { %v582_v12 = vpack.c.bf16 %v276_v6, %v267_v56 }
 0x16c   :  { %v3851_v4 = vadd.f32 %v1826_v27, %v1694_v17  ;;  %v583_v27 = vpack.c.bf16 %v277_v39, %v268_v53 }
 0x16e   :  { %v1432_v60 = vpop.f32.mrf.mxu1  ;;  %v1831_v33 = vpop.f32.mrf.mxu0 }
 0x16f   :  { %v1562_v61 = vpop.f32.mrf.mxu2  ;;  %v1433_v17 = vadd.f32 %v1432_v60, %v1300_v57  ;;  %v3861_v19 = vpop.f32.mrf.mxu3 }
 0x170   :  { %v1563_v51 = vadd.f32 %v1562_v61, %v1430_v49  ;;  %v2913_v49 = vld [vmem:[%s5256_s1 + $0x210] sm:$0xff]  ;;  %v323_v61 = vld [vmem:[%s5258_s0 + $0x9a8] sm:$0xff] }
 0x171   :  { %1471 = vmatmul.bf16.gmra.mxu1 %v582_v12  ;;  %1870 = vmatmul.bf16.gmra.mxu0 %v585_v31  ;;  %v294_v31 = vld [vmem:[%s5258_s0 + $0x8c0] sm:$0xff] }
 0x172   :  { %v1696_v30 = vadd.f32 %v3751_v0, %v1563_v51  ;;  %2329 = vmatpush.bf16.msra.mxu0 %v2913_v49  ;;  %v1302_v0 = vadd.f32 %v3606_v9, %v3570_v21  ;;  %v285_v21 = vld [vmem:[%s5258_s0 + $0x878] sm:$0xff] }
 0x173   :  { %v297_v51 = vld [vmem:[%s5258_s0 + $0x8d8] sm:$0xff]  ;;  %v591_v10 = vpack.c.bf16 %v294_v31, %v285_v21 }
 0x174   :  { %1604 = vmatmul.bf16.gmra.mxu2 %v583_v27  ;;  %v3873_v56 = vadd.f32 %v1828_v40, %v1696_v30  ;;  %v332_v40 = vld [vmem:[%s5258_s0 + $0x9f0] sm:$0xff]  ;;  %v286_v27 = vld [vmem:[%s5258_s0 + $0x880] sm:$0xff]  ;;  %v1305_v30 = vadd.f32 %v3606_v9, %v3306_v20  ;;  %v1307_v20 = vadd.f32 %v3606_v9, %v3315_v25  ;;  %v303_v25 = vld [vmem:[%s5258_s0 + $0x908] sm:$0xff] }
 0x175   :  { %v611_v12 = vpack.c.bf16 %v332_v40, %v323_v61 }
 0x176   :  { %v1434_v24 = vpop.f32.mrf.mxu1  ;;  %v1833_v44 = vpop.f32.mrf.mxu0 }
 0x177   :  { %v1565_v8 = vpop.f32.mrf.mxu2  ;;  %v1435_v53 = vadd.f32 %v1434_v24, %v1302_v0  ;;  %v3877_v39 = vpop.f32.mrf.mxu3 }
 0x178   :  { %v1566_v6 = vadd.f32 %v1565_v8, %v1433_v17  ;;  %v295_v17 = vld [vmem:[%s5258_s0 + $0x8c8] sm:$0xff] }
 0x17a   :  { %v1699_v57 = vadd.f32 %v3782_v43, %v1566_v6  ;;  %v288_v43 = vld [vmem:[%s5258_s0 + $0x890] sm:$0xff]  ;;  %1752 = vmatmul.bf16.gmra.mxu3 %v611_v12 }
 0x17b   :  { %v594_v49 = vpack.c.bf16 %v297_v51, %v288_v43 }
 0x17c   :  { %v3898_v60 = vadd.f32 %v1831_v33, %v1699_v57  ;;  %v592_v33 = vpack.c.bf16 %v295_v17, %v286_v27 }
 0x17e   :  { %v1437_v8 = vpop.f32.mrf.mxu1  ;;  %v1836_v6 = vpop.f32.mrf.mxu0 }
 0x17f   :  { %v1567_v36 = vpop.f32.mrf.mxu2  ;;  %v1438_v24 = vadd.f32 %v1437_v8, %v1305_v30  ;;  %v3908_v57 = vpop.f32.mrf.mxu3  ;;  %v312_v30 = vld [vmem:[%s5258_s0 + $0x950] sm:$0xff]  ;;  %v1310_v8 = vadd.f32 %v3606_v9, %v3354_v42  ;;  %v1312_v42 = vadd.f32 %v3606_v9, %v3362_v47  ;;  %v321_v47 = vld [vmem:[%s5258_s0 + $0x998] sm:$0xff] }
 0x180   :  { %v1568_v0 = vadd.f32 %v1567_v36, %v1435_v53  ;;  %v315_v36 = vld [vmem:[%s5258_s0 + $0x968] sm:$0xff] }
 0x181   :  { %1476 = vmatmul.bf16.gmra.mxu1 %v591_v10  ;;  %1875 = vmatmul.bf16.gmra.mxu0 %v594_v49  ;;  %v304_v49 = vld [vmem:[%s5258_s0 + $0x910] sm:$0xff] }
 0x182   :  { %v1701_v61 = vadd.f32 %v3789_v5, %v1568_v0  ;;  %v341_v5 = vld [vmem:[%s5258_s0 + $0xa38] sm:$0xff] }
 0x183   :  { %v313_v0 = vld [vmem:[%s5258_s0 + $0x958] sm:$0xff] }
 0x184   :  { %1609 = vmatmul.bf16.gmra.mxu2 %v592_v33  ;;  %v3911_v40 = vadd.f32 %v1833_v44, %v1701_v61  ;;  %v350_v44 = vld [vmem:[%s5258_s0 + $0xa80] sm:$0xff] }
 0x185   :  { %v620_v17 = vpack.c.bf16 %v350_v44, %v341_v5 }
 0x186   :  { %v1439_v31 = vpop.f32.mrf.mxu1  ;;  %v1838_v53 = vpop.f32.mrf.mxu0 }
 0x187   :  { %v1570_v12 = vpop.f32.mrf.mxu2  ;;  %v1440_v43 = vadd.f32 %v1439_v31, %v1307_v20  ;;  %v3915_v51 = vpop.f32.mrf.mxu3 }
 0x188   :  { %v1571_v21 = vadd.f32 %v1570_v12, %v1438_v24  ;;  %v600_v24 = vpack.c.bf16 %v312_v30, %v303_v25 }
 0x18a   :  { %v1704_v27 = vadd.f32 %v3820_v52, %v1571_v21  ;;  %v306_v52 = vld [vmem:[%s5258_s0 + $0x920] sm:$0xff]  ;;  %1757 = vmatmul.bf16.gmra.mxu3 %v620_v17 }
 0x18b   :  { %v603_v61 = vpack.c.bf16 %v315_v36, %v306_v52 }
 0x18c   :  { %v3936_v10 = vadd.f32 %v1836_v6, %v1704_v27  ;;  %v601_v6 = vpack.c.bf16 %v313_v0, %v304_v49 }
 0x18e   :  { %v1442_v12 = vpop.f32.mrf.mxu1  ;;  %v1841_v21 = vpop.f32.mrf.mxu0 }
 0x18f   :  { %v1572_v33 = vpop.f32.mrf.mxu2  ;;  %v1443_v31 = vadd.f32 %v1442_v12, %v1310_v8  ;;  %v3946_v27 = vpop.f32.mrf.mxu3  ;;  %v330_v8 = vld [vmem:[%s5258_s0 + $0x9e0] sm:$0xff]  ;;  %v1315_v12 = vadd.f32 %v3606_v9, %v3394_v62  ;;  %v2904_v62 = vld [vmem:[%s5256_s1 + $0x1c8] sm:$0xff] }
 0x190   :  { %v1573_v20 = vadd.f32 %v1572_v33, %v1440_v43  ;;  %v333_v33 = vld [vmem:[%s5258_s0 + $0x9f8] sm:$0xff]  ;;  %2197 = vmatpush.bf16.msra.mxu3 %v2904_v62 }
 0x191   :  { %1481 = vmatmul.bf16.gmra.mxu1 %v600_v24  ;;  %1880 = vmatmul.bf16.gmra.mxu0 %v603_v61  ;;  %v322_v61 = vld [vmem:[%s5258_s0 + $0x9a0] sm:$0xff] }
 0x192   :  { %v1706_v5 = vadd.f32 %v3827_v2, %v1573_v20  ;;  %v359_v2 = vld [vmem:[%s5258_s0 + $0xac8] sm:$0xff] }
 0x193   :  { %v331_v20 = vld [vmem:[%s5258_s0 + $0x9e8] sm:$0xff] }
 0x194   :  { %1614 = vmatmul.bf16.gmra.mxu2 %v601_v6  ;;  %v3949_v44 = vadd.f32 %v1838_v53, %v1706_v5  ;;  %v368_v53 = vld [vmem:[%s5258_s0 + $0xb10] sm:$0xff] }
 0x195   :  { %v629_v0 = vpack.c.bf16 %v368_v53, %v359_v2  ;;  %v2896_v53 = vld [vmem:[%s5256_s1 + $0x188] sm:$0xff] }
 0x196   :  { %v1444_v30 = vpop.f32.mrf.mxu1  ;;  %v1843_v43 = vpop.f32.mrf.mxu0  ;;  %2064 = vmatpush.bf16.msra.mxu2 %v2896_v53  ;;  %v1320_v53 = vadd.f32 %v3606_v9, %v3434_v18  ;;  %v1322_v18 = vadd.f32 %v3606_v9, %v3442_v28  ;;  %v357_v28 = vld [vmem:[%s5258_s0 + $0xab8] sm:$0xff] }
 0x197   :  { %v1575_v17 = vpop.f32.mrf.mxu2  ;;  %v1445_v52 = vadd.f32 %v1444_v30, %v1312_v42  ;;  %v3953_v36 = vpop.f32.mrf.mxu3 }
 0x198   :  { %v1576_v25 = vadd.f32 %v1575_v17, %v1443_v31  ;;  %v609_v31 = vpack.c.bf16 %v330_v8, %v321_v47 }
 0x19a   :  { %v1709_v49 = vadd.f32 %v3861_v19, %v1576_v25  ;;  %v324_v19 = vld [vmem:[%s5258_s0 + $0x9b0] sm:$0xff]  ;;  %1762 = vmatmul.bf16.gmra.mxu3 %v629_v0 }
 0x19b   :  { %v612_v5 = vpack.c.bf16 %v333_v33, %v324_v19 }
 0x19c   :  { %v3974_v24 = vadd.f32 %v1841_v21, %v1709_v49  ;;  %v610_v21 = vpack.c.bf16 %v331_v20, %v322_v61 }
 0x19e   :  { %v1447_v17 = vpop.f32.mrf.mxu1  ;;  %v1846_v25 = vpop.f32.mrf.mxu0 }
 0x19f   :  { %v1577_v6 = vpop.f32.mrf.mxu2  ;;  %v1448_v30 = vadd.f32 %v1447_v17, %v1315_v12  ;;  %v3984_v49 = vpop.f32.mrf.mxu3  ;;  %v351_v17 = vld [vmem:[%s5258_s0 + $0xa88] sm:$0xff] }
 0x1a0   :  { %v1578_v42 = vadd.f32 %v1577_v6, %v1445_v52  ;;  %v2888_v52 = vld [vmem:[%s5256_s1 + $0x148] sm:$0xff] }
 0x1a1   :  { %1486 = vmatmul.bf16.gmra.mxu1 %v609_v31  ;;  %1885 = vmatmul.bf16.gmra.mxu0 %v612_v5  ;;  %v2912_v6 = vld [vmem:[%s5256_s1 + $0x208] sm:$0xff] }
 0x1a2   :  { %v1711_v2 = vadd.f32 %v3877_v39, %v1578_v42  ;;  %1931 = vmatpush.bf16.msra.mxu1 %v2888_v52  ;;  %v1317_v39 = vadd.f32 %v3606_v9, %v3402_v3  ;;  %v386_v3 = vld [vmem:[%s5258_s0 + $0xba0] sm:$0xff]  ;;  %v339_v31 = vld [vmem:[%s5258_s0 + $0xa28] sm:$0xff]  ;;  %2330 = vmatpush.bf16.msra.mxu0 %v2912_v6 }
 0x1a3   :  { %v342_v42 = vld [vmem:[%s5258_s0 + $0xa40] sm:$0xff] }
 0x1a4   :  { %1619 = vmatmul.bf16.gmra.mxu2 %v610_v21  ;;  %v3996_v47 = vadd.f32 %v1843_v43, %v1711_v2  ;;  %v377_v43 = vld [vmem:[%s5258_s0 + $0xb58] sm:$0xff] }
 0x1a5   :  { %v638_v5 = vpack.c.bf16 %v386_v3, %v377_v43  ;;  %v349_v2 = vld [vmem:[%s5258_s0 + $0xa78] sm:$0xff] }
 0x1a6   :  { %v1449_v19 = vpop.f32.mrf.mxu1  ;;  %v1848_v33 = vpop.f32.mrf.mxu0 }
 0x1a7   :  { %v1580_v0 = vpop.f32.mrf.mxu2  ;;  %v1450_v61 = vadd.f32 %v1449_v19, %v1317_v39  ;;  %v4000_v20 = vpop.f32.mrf.mxu3  ;;  %v621_v39 = vpack.c.bf16 %v351_v17, %v342_v42 }
 0x1a8   :  { %v1581_v8 = vadd.f32 %v1580_v0, %v1448_v30  ;;  %v340_v30 = vld [vmem:[%s5258_s0 + $0xa30] sm:$0xff] }
 0x1aa   :  { %v1714_v12 = vadd.f32 %v3908_v57, %v1581_v8  ;;  %v348_v57 = vld [vmem:[%s5258_s0 + $0xa70] sm:$0xff]  ;;  %1767 = vmatmul.bf16.gmra.mxu3 %v638_v5 }
 0x1ab   :  { %v618_v52 = vpack.c.bf16 %v348_v57, %v339_v31 }
 0x1ac   :  { %v4024_v21 = vadd.f32 %v1846_v25, %v1714_v12  ;;  %v619_v25 = vpack.c.bf16 %v349_v2, %v340_v30 }
 0x1ae   :  { %v1452_v8 = vpop.f32.mrf.mxu1  ;;  %v1851_v19 = vpop.f32.mrf.mxu0 }
 0x1af   :  { %v1582_v62 = vpop.f32.mrf.mxu2  ;;  %v1453_v12 = vadd.f32 %v1452_v8, %v1320_v53  ;;  %v4034_v6 = vpop.f32.mrf.mxu3  ;;  %v366_v53 = vld [vmem:[%s5258_s0 + $0xb00] sm:$0xff]  ;;  %v1325_v8 = vadd.f32 %v3606_v9, %v3483_v54  ;;  %v1327_v54 = vadd.f32 %v3606_v9, %v3494_v63  ;;  %v375_v63 = vld [vmem:[%s5258_s0 + $0xb48] sm:$0xff] }
 0x1b0   :  { %v1583_v0 = vadd.f32 %v1582_v62, %v1450_v61  ;;  %v369_v62 = vld [vmem:[%s5258_s0 + $0xb18] sm:$0xff] }
 0x1b1   :  { %1491 = vmatmul.bf16.gmra.mxu1 %v618_v52  ;;  %1890 = vmatmul.bf16.gmra.mxu0 %v621_v39  ;;  %v358_v39 = vld [vmem:[%s5258_s0 + $0xac0] sm:$0xff] }
 0x1b2   :  { %v1716_v43 = vadd.f32 %v3915_v51, %v1583_v0  ;;  %v395_v51 = vld [vmem:[%s5258_s0 + $0xbe8] sm:$0xff] }
 0x1b3   :  { %v367_v0 = vld [vmem:[%s5258_s0 + $0xb08] sm:$0xff] }
 0x1b4   :  { %1624 = vmatmul.bf16.gmra.mxu2 %v619_v25  ;;  %v4037_v3 = vadd.f32 %v1848_v33, %v1716_v43  ;;  %v404_v33 = vld [vmem:[%s5258_s0 + $0xc30] sm:$0xff] }
 0x1b5   :  { %v647_v2 = vpack.c.bf16 %v404_v33, %v395_v51 }
 0x1b6   :  { %v1454_v57 = vpop.f32.mrf.mxu1  ;;  %v1853_v61 = vpop.f32.mrf.mxu0 }
 0x1b7   :  { %v1585_v5 = vpop.f32.mrf.mxu2  ;;  %v1455_v42 = vadd.f32 %v1454_v57, %v1322_v18  ;;  %v4041_v17 = vpop.f32.mrf.mxu3 }
 0x1b8   :  { %v1586_v31 = vadd.f32 %v1585_v5, %v1453_v12  ;;  %v627_v12 = vpack.c.bf16 %v366_v53, %v357_v28 }
 0x1ba   :  { %v1719_v30 = vadd.f32 %v3946_v27, %v1586_v31  ;;  %v360_v27 = vld [vmem:[%s5258_s0 + $0xad0] sm:$0xff]  ;;  %1772 = vmatmul.bf16.gmra.mxu3 %v647_v2 }
 0x1bb   :  { %v630_v43 = vpack.c.bf16 %v369_v62, %v360_v27 }
 0x1bc   :  { %v4062_v52 = vadd.f32 %v1851_v19, %v1719_v30  ;;  %v628_v19 = vpack.c.bf16 %v367_v0, %v358_v39 }
 0x1be   :  { %v1457_v5 = vpop.f32.mrf.mxu1  ;;  %v1856_v31 = vpop.f32.mrf.mxu0 }
 0x1bf   :  { %v1587_v25 = vpop.f32.mrf.mxu2  ;;  %v1458_v57 = vadd.f32 %v1457_v5, %v1325_v8  ;;  %v4072_v30 = vpop.f32.mrf.mxu3  ;;  %v384_v8 = vld [vmem:[%s5258_s0 + $0xb90] sm:$0xff]  ;;  %v1330_v5 = vadd.f32 %v3606_v9, %v3524_v32  ;;  %v2903_v32 = vld [vmem:[%s5256_s1 + $0x1c0] sm:$0xff] }
 0x1c0   :  { %v1588_v18 = vadd.f32 %v1587_v25, %v1455_v42  ;;  %v387_v25 = vld [vmem:[%s5258_s0 + $0xba8] sm:$0xff]  ;;  %2198 = vmatpush.bf16.msra.mxu3 %v2903_v32 }
 0x1c1   :  { %1496 = vmatmul.bf16.gmra.mxu1 %v627_v12  ;;  %1895 = vmatmul.bf16.gmra.mxu0 %v630_v43  ;;  %v376_v43 = vld [vmem:[%s5258_s0 + $0xb50] sm:$0xff] }
 0x1c2   :  { %v1721_v51 = vadd.f32 %v3953_v36, %v1588_v18  ;;  %v413_v36 = vld [vmem:[%s5258_s0 + $0xc78] sm:$0xff] }
 0x1c3   :  { %v385_v18 = vld [vmem:[%s5258_s0 + $0xb98] sm:$0xff] }
 0x1c4   :  { %1629 = vmatmul.bf16.gmra.mxu2 %v628_v19  ;;  %v4075_v33 = vadd.f32 %v1853_v61, %v1721_v51  ;;  %v422_v61 = vld [vmem:[%s5258_s0 + $0xcc0] sm:$0xff] }
 0x1c5   :  { %v656_v0 = vpack.c.bf16 %v422_v61, %v413_v36  ;;  %v2895_v61 = vld [vmem:[%s5256_s1 + $0x180] sm:$0xff] }
 0x1c6   :  { %v1459_v53 = vpop.f32.mrf.mxu1  ;;  %v1858_v42 = vpop.f32.mrf.mxu0  ;;  %2065 = vmatpush.bf16.msra.mxu2 %v2895_v61  ;;  %v1335_v61 = vadd.f32 %v3606_v9, %v3564_v11  ;;  %v1337_v11 = vadd.f32 %v3606_v9, %v3572_v29  ;;  %v420_v29 = vld [vmem:[%s5258_s0 + $0xcb0] sm:$0xff] }
 0x1c7   :  { %v1590_v2 = vpop.f32.mrf.mxu2  ;;  %v1460_v27 = vadd.f32 %v1459_v53, %v1327_v54  ;;  %v4079_v62 = vpop.f32.mrf.mxu3 }
 0x1c8   :  { %v1591_v28 = vadd.f32 %v1590_v2, %v1458_v57  ;;  %v636_v57 = vpack.c.bf16 %v384_v8, %v375_v63 }
 0x1ca   :  { %v1724_v39 = vadd.f32 %v3984_v49, %v1591_v28  ;;  %v378_v49 = vld [vmem:[%s5258_s0 + $0xb60] sm:$0xff]  ;;  %1777 = vmatmul.bf16.gmra.mxu3 %v656_v0 }
 0x1cb   :  { %v639_v51 = vpack.c.bf16 %v387_v25, %v378_v49 }
 0x1cc   :  { %v4100_v12 = vadd.f32 %v1856_v31, %v1724_v39  ;;  %v637_v31 = vpack.c.bf16 %v385_v18, %v376_v43 }
 0x1ce   :  { %v1462_v2 = vpop.f32.mrf.mxu1  ;;  %v1861_v28 = vpop.f32.mrf.mxu0 }
 0x1cf   :  { %v1592_v19 = vpop.f32.mrf.mxu2  ;;  %v1463_v53 = vadd.f32 %v1462_v2, %v1330_v5  ;;  %v4110_v39 = vpop.f32.mrf.mxu3  ;;  %v405_v2 = vld [vmem:[%s5258_s0 + $0xc38] sm:$0xff] }
 0x1d0   :  { %v1593_v54 = vadd.f32 %v1592_v19, %v1460_v27  ;;  %v2887_v27 = vld [vmem:[%s5256_s1 + $0x140] sm:$0xff] }
 0x1d1   :  { %1501 = vmatmul.bf16.gmra.mxu1 %v636_v57  ;;  %1900 = vmatmul.bf16.gmra.mxu0 %v639_v51  ;;  %v2911_v19 = vld [vmem:[%s5256_s1 + $0x200] sm:$0xff]  ;;  %v393_v57 = vld [vmem:[%s5258_s0 + $0xbd8] sm:$0xff] }
 0x1d2   :  { %v1726_v36 = vadd.f32 %v4000_v20, %v1593_v54  ;;  %1932 = vmatpush.bf16.msra.mxu1 %v2887_v27  ;;  %v1332_v20 = vadd.f32 %v3606_v9, %v3532_v37  ;;  %v440_v37 = vld [vmem:[%s5258_s0 + $0xd50] sm:$0xff]  ;;  %2331 = vmatpush.bf16.msra.mxu0 %v2911_v19 }
 0x1d3   :  { %v396_v54 = vld [vmem:[%s5258_s0 + $0xbf0] sm:$0xff] }
 0x1d4   :  { %1634 = vmatmul.bf16.gmra.mxu2 %v637_v31  ;;  %v4122_v63 = vadd.f32 %v1858_v42, %v1726_v36  ;;  %v431_v42 = vld [vmem:[%s5258_s0 + $0xd08] sm:$0xff] }
 0x1d5   :  { %v665_v51 = vpack.c.bf16 %v440_v37, %v431_v42  ;;  %v403_v36 = vld [vmem:[%s5258_s0 + $0xc28] sm:$0xff] }
 0x1d6   :  { %v1464_v49 = vpop.f32.mrf.mxu1  ;;  %v1863_v25 = vpop.f32.mrf.mxu0 }
 0x1d7   :  { %v1595_v0 = vpop.f32.mrf.mxu2  ;;  %v1465_v43 = vadd.f32 %v1464_v49, %v1332_v20  ;;  %v4126_v18 = vpop.f32.mrf.mxu3  ;;  %v648_v20 = vpack.c.bf16 %v405_v2, %v396_v54 }
 0x1d8   :  { %v1596_v8 = vadd.f32 %v1595_v0, %v1463_v53  ;;  %v394_v53 = vld [vmem:[%s5258_s0 + $0xbe0] sm:$0xff] }
 0x1da   :  { %v1729_v5 = vadd.f32 %v4034_v6, %v1596_v8  ;;  %v402_v6 = vld [vmem:[%s5258_s0 + $0xc20] sm:$0xff]  ;;  %1782 = vmatmul.bf16.gmra.mxu3 %v665_v51 }
 0x1db   :  { %v645_v27 = vpack.c.bf16 %v402_v6, %v393_v57 }
 0x1dc   :  { %v4150_v31 = vadd.f32 %v1861_v28, %v1729_v5  ;;  %v646_v28 = vpack.c.bf16 %v403_v36, %v394_v53 }
 0x1de   :  { %v1467_v8 = vpop.f32.mrf.mxu1  ;;  %v1866_v49 = vpop.f32.mrf.mxu0 }
 0x1df   :  { %v1597_v32 = vpop.f32.mrf.mxu2  ;;  %v1468_v5 = vadd.f32 %v1467_v8, %v1335_v61  ;;  %v4160_v19 = vpop.f32.mrf.mxu3  ;;  %v414_v61 = vld [vmem:[%s5258_s0 + $0xc80] sm:$0xff] }
 0x1e0   :  { %v1598_v0 = vadd.f32 %v1597_v32, %v1465_v43 }
 0x1e1   :  { %1506 = vmatmul.bf16.gmra.mxu1 %v645_v27  ;;  %1905 = vmatmul.bf16.gmra.mxu0 %v648_v20  ;;  %v412_v27 = vld [vmem:[%s5258_s0 + $0xc70] sm:$0xff]  ;;  %v421_v20 = vld [vmem:[%s5258_s0 + $0xcb8] sm:$0xff] }
 0x1e2   :  { %v1731_v42 = vadd.f32 %v4041_v17, %v1598_v0  ;;  %v449_v17 = vld [vmem:[%s5258_s0 + $0xd98] sm:$0xff]  ;;  %v1340_v0 = vadd.f32 %v3606_v9, %v3311_v23  ;;  %v4203_v23 = vld [vmem:[%s5257_s2] ss:$0 sm:$0xff] }
 0x1e3   :  { %v674_v36 = vpack.c.bf16 %v449_v17, %v449_v17  ;;  %v1342_v9 = vadd.f32 %v4203_v23, %v3350_v38  ;;  %v429_v38 = vld [vmem:[%s5258_s0 + $0xcf8] sm:$0xff] }
 0x1e4   :  { %1639 = vmatmul.bf16.gmra.mxu2 %v646_v28  ;;  %v4163_v37 = vadd.f32 %v1863_v25, %v1731_v42  ;;  %v411_v25 = vld [vmem:[%s5258_s0 + $0xc68] sm:$0xff] }
 0x1e5   :  { %v654_v28 = vpack.c.bf16 %v420_v29, %v411_v25 }
 0x1e6   :  { %v1469_v6 = vpop.f32.mrf.mxu1  ;;  %v1868_v43 = vpop.f32.mrf.mxu0 }
 0x1e7   :  { %v1600_v51 = vpop.f32.mrf.mxu2  ;;  %v1470_v54 = vadd.f32 %v1469_v6, %v1337_v11  ;;  %v4167_v2 = vpop.f32.mrf.mxu3 }
 0x1e8   :  { %v1601_v57 = vadd.f32 %v1600_v51, %v1468_v5 }
 0x1ea   :  { %v1734_v53 = vadd.f32 %v4072_v30, %v1601_v57  ;;  %v423_v30 = vld [vmem:[%s5258_s0 + $0xcc8] sm:$0xff]  ;;  %1787 = vmatmul.bf16.gmra.mxu3 %v674_v36 }
 0x1eb   :  { %v657_v5 = vpack.c.bf16 %v423_v30, %v414_v61 }
 0x1ec   :  { %v4185_v32 = vadd.f32 %v1866_v49, %v1734_v53  ;;  %v655_v49 = vpack.c.bf16 %v421_v20, %v412_v27  ;;  %v30_v27 = vld [vmem:[%s5258_s0 + $0x80] sm:$0xff] }
 0x1ee   :  { %v1472_v11 = vpop.f32.mrf.mxu1  ;;  %v1871_v51 = vpop.f32.mrf.mxu0 }
 0x1ef   :  { %v1602_v8 = vpop.f32.mrf.mxu2  ;;  %v1473_v57 = vadd.f32 %v1472_v11, %v1340_v0  ;;  %v4195_v6 = vpop.f32.mrf.mxu3  ;;  %v438_v0 = vld [vmem:[%s5258_s0 + $0xd40] sm:$0xff]  ;;  %v1345_v11 = vadd.f32 %v4203_v23, %v3358_v45  ;;  %v1347_v45 = vadd.f32 %v4203_v23, %v3390_v58  ;;  %v447_v58 = vld [vmem:[%s5258_s0 + $0xd88] sm:$0xff] }
 0x1f0   :  { %v1603_v42 = vadd.f32 %v1602_v8, %v1470_v54  ;;  %v441_v8 = vld [vmem:[%s5258_s0 + $0xd58] sm:$0xff] }
 0x1f1   :  { %1511 = vmatmul.bf16.gmra.mxu1 %v654_v28  ;;  %1910 = vmatmul.bf16.gmra.mxu0 %v657_v5  ;;  %v430_v5 = vld [vmem:[%s5258_s0 + $0xd00] sm:$0xff] }
 0x1f2   :  { %v1736_v53 = vadd.f32 %v4079_v62, %v1603_v42  ;;  %v439_v42 = vld [vmem:[%s5258_s0 + $0xd48] sm:$0xff] }
 0x1f4   :  { %1644 = vmatmul.bf16.gmra.mxu2 %v655_v49  ;;  %v4198_v17 = vadd.f32 %v1868_v43, %v1736_v53  ;;  %v21_v43 = vld [vmem:[%s5258_s0 + $0x38] sm:$0xff] }
 0x1f5   :  { %v462_v20 = vpack.c.bf16 %v30_v27, %v21_v43 }
 0x1f6   :  { %v1474_v36 = vpop.f32.mrf.mxu1  ;;  %v1873_v29 = vpop.f32.mrf.mxu0 }
 0x1f7   :  { %v1605_v54 = vpop.f32.mrf.mxu2  ;;  %v1475_v61 = vadd.f32 %v1474_v36, %v1342_v9  ;;  %v4207_v30 = vpop.f32.mrf.mxu3 }
 0x1f8   :  { %v1606_v25 = vadd.f32 %v1605_v54, %v1473_v57  ;;  %v663_v57 = vpack.c.bf16 %v438_v0, %v429_v38 }
 0x1fa   :  { %v1739_v62 = vadd.f32 %v4110_v39, %v1606_v25  ;;  %v432_v39 = vld [vmem:[%s5258_s0 + $0xd10] sm:$0xff]  ;;  %2199 = vmatmul.bf16.vlgmr.msra.gmra.mxu3 %v462_v20 }
 0x1fb   :  { %v666_v53 = vpack.c.bf16 %v441_v8, %v432_v39 }
 0x1fc   :  { %v4228_v28 = vadd.f32 %v1871_v51, %v1739_v62  ;;  %v664_v51 = vpack.c.bf16 %v439_v42, %v430_v5 }
 0x1fe   :  { %v1477_v54 = vpop.f32.mrf.mxu1  ;;  %v1876_v25 = vpop.f32.mrf.mxu0 }
 0x1ff   :  { %v1607_v49 = vpop.f32.mrf.mxu2  ;;  %v1478_v36 = vadd.f32 %v1477_v54, %v1345_v11  ;;  %v4238_v62 = vpop.f32.mrf.mxu3  ;;  %v450_v11 = vld [vmem:[%s5258_s0 + $0xda0] sm:$0xff] }
 0x200   :  { %v1608_v9 = vadd.f32 %v1607_v49, %v1475_v61  ;;  %v675_v54 = vpack.c.bf16 %v450_v11, %v450_v11 }
 0x201   :  { %1516 = vmatmul.bf16.gmra.mxu1 %v663_v57  ;;  %1915 = vmatmul.bf16.gmra.mxu0 %v666_v53  ;;  %v1350_v57 = vadd.f32 %v4203_v23, %v3398_v1  ;;  %v1352_v1 = vadd.f32 %v4203_v23, %v3430_v14  ;;  %v19_v14 = vld [vmem:[%s5258_s0 + $0x28] sm:$0xff] }
 0x202   :  { %v1741_v43 = vadd.f32 %v4126_v18, %v1608_v9  ;;  %v39_v18 = vld [vmem:[%s5258_s0 + $0xc8] sm:$0xff]  ;;  %v672_v9 = vpack.c.bf16 %v447_v58, %v447_v58 }
 0x204   :  { %1649 = vmatmul.bf16.gmra.mxu2 %v664_v51  ;;  %v4241_v27 = vadd.f32 %v1873_v29, %v1741_v43  ;;  %v48_v29 = vld [vmem:[%s5258_s0 + $0x110] sm:$0xff] }
 0x205   :  { %v471_v42 = vpack.c.bf16 %v48_v29, %v39_v18 }
 0x206   :  { %v1479_v0 = vpop.f32.mrf.mxu1  ;;  %v1878_v61 = vpop.f32.mrf.mxu0 }
 0x207   :  { %v1610_v20 = vpop.f32.mrf.mxu2  ;;  %v1480_v39 = vadd.f32 %v1479_v0, %v1347_v45  ;;  %v4245_v8 = vpop.f32.mrf.mxu3 }
 0x208   :  { %v1611_v38 = vadd.f32 %v1610_v20, %v1478_v36 }
 0x20a   :  { %v1744_v5 = vadd.f32 %v4160_v19, %v1611_v38  ;;  %v448_v19 = vld [vmem:[%s5258_s0 + $0xd90] sm:$0xff]  ;;  %2204 = vmatmul.bf16.gmra.mxu3 %v471_v42 }
 0x20b   :  { %v673_v45 = vpack.c.bf16 %v448_v19, %v448_v19 }
 0x20c   :  { %v4260_v49 = vadd.f32 %v1876_v25, %v1744_v5 }
 0x20e   :  { %v1482_v36 = vpop.f32.mrf.mxu1  ;;  %v1881_v43 = vpop.f32.mrf.mxu0 }
 0x20f   :  { %v1612_v53 = vpop.f32.mrf.mxu2  ;;  %v1483_v20 = vadd.f32 %v1482_v36, %v1350_v57  ;;  %v4267_v38 = vpop.f32.mrf.mxu3  ;;  %v28_v57 = vld [vmem:[%s5258_s0 + $0x70] sm:$0xff]  ;;  %v1355_v36 = vadd.f32 %v4203_v23, %v3438_v26  ;;  %v1357_v26 = vadd.f32 %v4203_v23, %v3479_v50  ;;  %v37_v50 = vld [vmem:[%s5258_s0 + $0xb8] sm:$0xff] }
 0x210   :  { %v1613_v51 = vadd.f32 %v1612_v53, %v1480_v39  ;;  %v31_v53 = vld [vmem:[%s5258_s0 + $0x88] sm:$0xff] }
 0x211   :  { %1521 = vmatmul.bf16.gmra.mxu1 %v672_v9  ;;  %1920 = vmatmul.bf16.gmra.mxu0 %v675_v54  ;;  %v20_v54 = vld [vmem:[%s5258_s0 + $0x30] sm:$0xff] }
 0x212   :  { %v1746_v25 = vadd.f32 %v4167_v2, %v1613_v51  ;;  %v57_v2 = vld [vmem:[%s5258_s0 + $0x158] sm:$0xff] }
 0x213   :  { %v29_v51 = vld [vmem:[%s5258_s0 + $0x78] sm:$0xff] }
 0x214   :  { %1654 = vmatmul.bf16.gmra.mxu2 %v673_v45  ;;  %v4270_v0 = vadd.f32 %v1878_v61, %v1746_v25  ;;  %v66_v61 = vld [vmem:[%s5258_s0 + $0x1a0] sm:$0xff] }
 0x215   :  { %v480_v19 = vpack.c.bf16 %v66_v61, %v57_v2 }
 0x216   :  { %v1484_v29 = vpop.f32.mrf.mxu1  ;;  %v1883_v39 = vpop.f32.mrf.mxu0 }
 0x217   :  { %v1615_v5 = vpop.f32.mrf.mxu2  ;;  %v1485_v42 = vadd.f32 %v1484_v29, %v1352_v1  ;;  %v4274_v58 = vpop.f32.mrf.mxu3 }
 0x218   :  { %v1616_v18 = vadd.f32 %v1615_v5, %v1483_v20  ;;  %v460_v20 = vpack.c.bf16 %v28_v57, %v19_v14 }
 0x21a   :  { %v1749_v11 = vadd.f32 %v4195_v6, %v1616_v18  ;;  %v22_v6 = vld [vmem:[%s5258_s0 + $0x40] sm:$0xff]  ;;  %2209 = vmatmul.bf16.gmra.mxu3 %v480_v19 }
 0x21b   :  { %v463_v25 = vpack.c.bf16 %v31_v53, %v22_v6 }
 0x21c   :  { %v4295_v9 = vadd.f32 %v1881_v43, %v1749_v11  ;;  %v461_v43 = vpack.c.bf16 %v29_v51, %v20_v54 }
 0x21e   :  { %v1487_v5 = vpop.f32.mrf.mxu1  ;;  %v1886_v18 = vpop.f32.mrf.mxu0 }
 0x21f   :  { %v1617_v45 = vpop.f32.mrf.mxu2  ;;  %v1488_v29 = vadd.f32 %v1487_v5, %v1355_v36  ;;  %v4305_v11 = vpop.f32.mrf.mxu3  ;;  %v46_v36 = vld [vmem:[%s5258_s0 + $0x100] sm:$0xff]  ;;  %v1360_v5 = vadd.f32 %v4203_v23, %v3490_v59  ;;  %v1362_v59 = vadd.f32 %v4203_v23, %v3520_v16  ;;  %v55_v16 = vld [vmem:[%s5258_s0 + $0x148] sm:$0xff] }
 0x220   :  { %v1618_v1 = vadd.f32 %v1617_v45, %v1485_v42  ;;  %v49_v45 = vld [vmem:[%s5258_s0 + $0x118] sm:$0xff] }
 0x221   :  { %1933 = vmatmul.bf16.vlgmr.msra.gmra.mxu1 %v460_v20  ;;  %2332 = vmatmul.bf16.vlgmr.msra.gmra.mxu0 %v463_v25  ;;  %v38_v25 = vld [vmem:[%s5258_s0 + $0xc0] sm:$0xff] }
 0x222   :  { %v1751_v2 = vadd.f32 %v4207_v30, %v1618_v1  ;;  %v75_v30 = vld [vmem:[%s5258_s0 + $0x1e8] sm:$0xff] }
 0x223   :  { %v47_v1 = vld [vmem:[%s5258_s0 + $0x108] sm:$0xff] }
 0x224   :  { %2066 = vmatmul.bf16.vlgmr.msra.gmra.mxu2 %v461_v43  ;;  %v4308_v61 = vadd.f32 %v1883_v39, %v1751_v2  ;;  %v84_v39 = vld [vmem:[%s5258_s0 + $0x230] sm:$0xff] }
 0x225   :  { %v489_v51 = vpack.c.bf16 %v84_v39, %v75_v30 }
 0x226   :  { %v1489_v57 = vpop.f32.mrf.mxu1  ;;  %v1888_v42 = vpop.f32.mrf.mxu0 }
 0x227   :  { %v1620_v19 = vpop.f32.mrf.mxu2  ;;  %v1490_v6 = vadd.f32 %v1489_v57, %v1357_v26  ;;  %v4312_v53 = vpop.f32.mrf.mxu3 }
 0x228   :  { %v1621_v14 = vadd.f32 %v1620_v19, %v1488_v29  ;;  %v469_v29 = vpack.c.bf16 %v46_v36, %v37_v50 }
 0x22a   :  { %v1754_v54 = vadd.f32 %v4238_v62, %v1621_v14  ;;  %v40_v62 = vld [vmem:[%s5258_s0 + $0xd0] sm:$0xff]  ;;  %2214 = vmatmul.bf16.gmra.mxu3 %v489_v51 }
 0x22b   :  { %v472_v2 = vpack.c.bf16 %v49_v45, %v40_v62 }
 0x22c   :  { %v4333_v20 = vadd.f32 %v1886_v18, %v1754_v54  ;;  %v470_v18 = vpack.c.bf16 %v47_v1, %v38_v25 }
 0x22e   :  { %v1492_v19 = vpop.f32.mrf.mxu1  ;;  %v1891_v14 = vpop.f32.mrf.mxu0 }
 0x22f   :  { %v1622_v43 = vpop.f32.mrf.mxu2  ;;  %v1493_v57 = vadd.f32 %v1492_v19, %v1360_v5  ;;  %v4343_v54 = vpop.f32.mrf.mxu3  ;;  %v64_v5 = vld [vmem:[%s5258_s0 + $0x190] sm:$0xff]  ;;  %v1365_v19 = vadd.f32 %v4203_v23, %v3528_v35 }
 0x230   :  { %v1623_v26 = vadd.f32 %v1622_v43, %v1490_v6  ;;  %v67_v43 = vld [vmem:[%s5258_s0 + $0x1a8] sm:$0xff] }
 0x231   :  { %1938 = vmatmul.bf16.gmra.mxu1 %v469_v29  ;;  %2337 = vmatmul.bf16.gmra.mxu0 %v472_v2  ;;  %v56_v2 = vld [vmem:[%s5258_s0 + $0x150] sm:$0xff] }
 0x232   :  { %v1756_v30 = vadd.f32 %v4245_v8, %v1623_v26  ;;  %v93_v8 = vld [vmem:[%s5258_s0 + $0x278] sm:$0xff] }
 0x233   :  { %v65_v26 = vld [vmem:[%s5258_s0 + $0x198] sm:$0xff] }
 0x234   :  { %2071 = vmatmul.bf16.gmra.mxu2 %v470_v18  ;;  %v4346_v39 = vadd.f32 %v1888_v42, %v1756_v30  ;;  %v102_v42 = vld [vmem:[%s5258_s0 + $0x2c0] sm:$0xff] }
 0x235   :  { %v498_v1 = vpack.c.bf16 %v102_v42, %v93_v8 }
 0x236   :  { %v1494_v36 = vpop.f32.mrf.mxu1  ;;  %v1893_v6 = vpop.f32.mrf.mxu0 }
 0x237   :  { %v1625_v51 = vpop.f32.mrf.mxu2  ;;  %v1495_v62 = vadd.f32 %v1494_v36, %v1362_v59  ;;  %v4350_v45 = vpop.f32.mrf.mxu3 }
 0x238   :  { %v1626_v50 = vadd.f32 %v1625_v51, %v1493_v57  ;;  %v478_v57 = vpack.c.bf16 %v64_v5, %v55_v16 }
 0x23a   :  { %v1759_v25 = vadd.f32 %v4267_v38, %v1626_v50  ;;  %v58_v38 = vld [vmem:[%s5258_s0 + $0x160] sm:$0xff]  ;;  %2219 = vmatmul.bf16.gmra.mxu3 %v498_v1  ;;  %v5273_v1 = vld [vmem:[#allocation9_spill] sm:$0xff] }
 0x23b   :  { %v481_v30 = vpack.c.bf16 %v67_v43, %v58_v38  ;;  %v1367_v35 = vadd.f32 %v4203_v23, %v5273_v1 }
 0x23c   :  { %v4371_v29 = vadd.f32 %v1891_v14, %v1759_v25  ;;  %v479_v14 = vpack.c.bf16 %v65_v26, %v56_v2  ;;  %v73_v26 = vld [vmem:[%s5258_s0 + $0x1d8] sm:$0xff] }
 0x23e   :  { %5271 = vst [vmem:[#allocation13_spill] sm:$0xff] %v4371_v29  ;;  %v1497_v51 = vpop.f32.mrf.mxu1  ;;  %v1896_v50 = vpop.f32.mrf.mxu0 }
 0x23f   :  { %v1627_v18 = vpop.f32.mrf.mxu2  ;;  %v1498_v36 = vadd.f32 %v1497_v51, %v1365_v19  ;;  %v4381_v25 = vpop.f32.mrf.mxu3  ;;  %v82_v19 = vld [vmem:[%s5258_s0 + $0x220] sm:$0xff] }
 0x240   :  { %v1628_v59 = vadd.f32 %v1627_v18, %v1495_v62  ;;  %v85_v18 = vld [vmem:[%s5258_s0 + $0x238] sm:$0xff]  ;;  %v5275_v51 = vld [vmem:[#allocation10_spill] sm:$0xff] }
 0x241   :  { %1943 = vmatmul.bf16.gmra.mxu1 %v478_v57  ;;  %2342 = vmatmul.bf16.gmra.mxu0 %v481_v30  ;;  %v74_v30 = vld [vmem:[%s5258_s0 + $0x1e0] sm:$0xff] }
 0x242   :  { %v1761_v8 = vadd.f32 %v4274_v58, %v1628_v59  ;;  %v111_v58 = vld [vmem:[%s5258_s0 + $0x308] sm:$0xff] }
 0x243   :  { %v83_v59 = vld [vmem:[%s5258_s0 + $0x228] sm:$0xff] }
 0x244   :  { %2076 = vmatmul.bf16.gmra.mxu2 %v479_v14  ;;  %v4384_v42 = vadd.f32 %v1893_v6, %v1761_v8  ;;  %v120_v6 = vld [vmem:[%s5258_s0 + $0x350] sm:$0xff]  ;;  %v1370_v14 = vadd.f32 %v4203_v23, %v5275_v51  ;;  %v487_v8 = vpack.c.bf16 %v82_v19, %v73_v26 }
 0x246   :  { %5272 = vst [vmem:[#allocation14_spill] sm:$0xff] %v4384_v42  ;;  %v1499_v5 = vpop.f32.mrf.mxu1  ;;  %v1898_v62 = vpop.f32.mrf.mxu0 }
 0x247   :  { %v1630_v29 = vpop.f32.mrf.mxu2  ;;  %v1500_v38 = vadd.f32 %v1499_v5, %v1367_v35  ;;  %v4388_v43 = vpop.f32.mrf.mxu3 }
 0x248   :  { %v1631_v16 = vadd.f32 %v1630_v29, %v1498_v36  ;;  %v507_v29 = vpack.c.bf16 %v120_v6, %v111_v58 }
 0x24a   :  { %v1764_v2 = vadd.f32 %v4305_v11, %v1631_v16  ;;  %v76_v11 = vld [vmem:[%s5258_s0 + $0x1f0] sm:$0xff]  ;;  %2224 = vmatmul.bf16.gmra.mxu3 %v507_v29  ;;  %v5277_v29 = vld [vmem:[#allocation11_spill] sm:$0xff] }
 0x24b   :  { %v490_v1 = vpack.c.bf16 %v85_v18, %v76_v11  ;;  %v1372_v51 = vadd.f32 %v4203_v23, %v5277_v29 }
 0x24c   :  { %v4409_v57 = vadd.f32 %v1896_v50, %v1764_v2  ;;  %v488_v50 = vpack.c.bf16 %v83_v59, %v74_v30  ;;  %v91_v59 = vld [vmem:[%s5258_s0 + $0x268] sm:$0xff] }
 0x24e   :  { %5274 = vst [vmem:[#allocation9_spill] sm:$0xff] %v4409_v57  ;;  %v1502_v16 = vpop.f32.mrf.mxu1  ;;  %v1901_v5 = vpop.f32.mrf.mxu0 }
 0x24f   :  { %v1632_v36 = vpop.f32.mrf.mxu2  ;;  %v1503_v2 = vadd.f32 %v1502_v16, %v1370_v14  ;;  %v4419_v58 = vpop.f32.mrf.mxu3  ;;  %v100_v14 = vld [vmem:[%s5258_s0 + $0x2b0] sm:$0xff]  ;;  %v5279_v16 = vld [vmem:[#allocation2_spill] sm:$0xff] }
 0x250   :  { %v1633_v35 = vadd.f32 %v1632_v36, %v1500_v38  ;;  %v103_v36 = vld [vmem:[%s5258_s0 + $0x2c8] sm:$0xff] }
 0x251   :  { %1948 = vmatmul.bf16.gmra.mxu1 %v487_v8  ;;  %2347 = vmatmul.bf16.gmra.mxu0 %v490_v1  ;;  %v92_v1 = vld [vmem:[%s5258_s0 + $0x270] sm:$0xff] }
 0x252   :  { %v1766_v6 = vadd.f32 %v4312_v53, %v1633_v35  ;;  %v129_v53 = vld [vmem:[%s5258_s0 + $0x398] sm:$0xff] }
 0x253   :  { %v101_v35 = vld [vmem:[%s5258_s0 + $0x2b8] sm:$0xff] }
 0x254   :  { %2081 = vmatmul.bf16.gmra.mxu2 %v488_v50  ;;  %v4422_v57 = vadd.f32 %v1898_v62, %v1766_v6  ;;  %v138_v62 = vld [vmem:[%s5258_s0 + $0x3e0] sm:$0xff]  ;;  %v1375_v50 = vadd.f32 %v4203_v23, %v5279_v16  ;;  %v496_v6 = vpack.c.bf16 %v100_v14, %v91_v59 }
 0x256   :  { %5276 = vst [vmem:[#allocation10_spill] sm:$0xff] %v4422_v57  ;;  %v1504_v19 = vpop.f32.mrf.mxu1  ;;  %v1903_v38 = vpop.f32.mrf.mxu0 }
 0x257   :  { %v1635_v42 = vpop.f32.mrf.mxu2  ;;  %v1505_v11 = vadd.f32 %v1504_v19, %v1372_v51  ;;  %v4426_v18 = vpop.f32.mrf.mxu3 }
 0x258   :  { %v1636_v26 = vadd.f32 %v1635_v42, %v1503_v2  ;;  %v516_v42 = vpack.c.bf16 %v138_v62, %v129_v53 }
 0x25a   :  { %v1769_v30 = vadd.f32 %v4343_v54, %v1636_v26  ;;  %v94_v54 = vld [vmem:[%s5258_s0 + $0x280] sm:$0xff]  ;;  %2229 = vmatmul.bf16.gmra.mxu3 %v516_v42  ;;  %v5281_v42 = vld [vmem:[#allocation3_spill] sm:$0xff] }
 0x25b   :  { %v499_v29 = vpack.c.bf16 %v103_v36, %v94_v54  ;;  %v1377_v16 = vadd.f32 %v4203_v23, %v5281_v42 }
 0x25c   :  { %v4447_v8 = vadd.f32 %v1901_v5, %v1769_v30  ;;  %v497_v5 = vpack.c.bf16 %v101_v35, %v92_v1  ;;  %v109_v35 = vld [vmem:[%s5258_s0 + $0x2f8] sm:$0xff] }
 0x25e   :  { %5278 = vst [vmem:[#allocation11_spill] sm:$0xff] %v4447_v8  ;;  %v1507_v26 = vpop.f32.mrf.mxu1  ;;  %v1906_v19 = vpop.f32.mrf.mxu0 }
 0x25f   :  { %v1637_v2 = vpop.f32.mrf.mxu2  ;;  %v1508_v30 = vadd.f32 %v1507_v26, %v1375_v50  ;;  %v4457_v53 = vpop.f32.mrf.mxu3  ;;  %v118_v50 = vld [vmem:[%s5258_s0 + $0x340] sm:$0xff]  ;;  %v5283_v26 = vld [vmem:[#allocation4_spill] sm:$0xff] }
 0x260   :  { %v1638_v51 = vadd.f32 %v1637_v2, %v1505_v11  ;;  %v121_v2 = vld [vmem:[%s5258_s0 + $0x358] sm:$0xff] }
 0x261   :  { %1953 = vmatmul.bf16.gmra.mxu1 %v496_v6  ;;  %2352 = vmatmul.bf16.gmra.mxu0 %v499_v29  ;;  %v110_v29 = vld [vmem:[%s5258_s0 + $0x300] sm:$0xff] }
 0x262   :  { %v1771_v62 = vadd.f32 %v4350_v45, %v1638_v51  ;;  %v147_v45 = vld [vmem:[%s5258_s0 + $0x428] sm:$0xff] }
 0x263   :  { %v119_v51 = vld [vmem:[%s5258_s0 + $0x348] sm:$0xff] }
 0x264   :  { %2086 = vmatmul.bf16.gmra.mxu2 %v497_v5  ;;  %v4460_v8 = vadd.f32 %v1903_v38, %v1771_v62  ;;  %v156_v38 = vld [vmem:[%s5258_s0 + $0x470] sm:$0xff]  ;;  %v1380_v5 = vadd.f32 %v4203_v23, %v5283_v26  ;;  %v505_v62 = vpack.c.bf16 %v118_v50, %v109_v35 }
 0x266   :  { %5280 = vst [vmem:[#allocation2_spill] sm:$0xff] %v4460_v8  ;;  %v1509_v14 = vpop.f32.mrf.mxu1  ;;  %v1908_v11 = vpop.f32.mrf.mxu0 }
 0x267   :  { %v1640_v57 = vpop.f32.mrf.mxu2  ;;  %v1510_v54 = vadd.f32 %v1509_v14, %v1377_v16  ;;  %v4464_v36 = vpop.f32.mrf.mxu3 }
 0x268   :  { %v1641_v59 = vadd.f32 %v1640_v57, %v1508_v30  ;;  %v525_v57 = vpack.c.bf16 %v156_v38, %v147_v45 }
 0x26a   :  { %v1774_v1 = vadd.f32 %v4381_v25, %v1641_v59  ;;  %v112_v25 = vld [vmem:[%s5258_s0 + $0x310] sm:$0xff]  ;;  %2234 = vmatmul.bf16.gmra.mxu3 %v525_v57  ;;  %v5284_v57 = vld [vmem:[#allocation5_spill] sm:$0xff] }
 0x26b   :  { %v508_v42 = vpack.c.bf16 %v121_v2, %v112_v25  ;;  %v1382_v26 = vadd.f32 %v4203_v23, %v5284_v57 }
 0x26c   :  { %v4485_v6 = vadd.f32 %v1906_v19, %v1774_v1  ;;  %v506_v19 = vpack.c.bf16 %v119_v51, %v110_v29  ;;  %v127_v51 = vld [vmem:[%s5258_s0 + $0x388] sm:$0xff] }
 0x26e   :  { %5282 = vst [vmem:[#allocation3_spill] sm:$0xff] %v4485_v6  ;;  %v1512_v59 = vpop.f32.mrf.mxu1  ;;  %v1911_v14 = vpop.f32.mrf.mxu0 }
 0x26f   :  { %v1642_v30 = vpop.f32.mrf.mxu2  ;;  %v1513_v1 = vadd.f32 %v1512_v59, %v1380_v5  ;;  %v4495_v45 = vpop.f32.mrf.mxu3  ;;  %v5286_v59 = vld [vmem:[#allocation6_spill] sm:$0xff] }
 0x270   :  { %v1643_v16 = vadd.f32 %v1642_v30, %v1510_v54  ;;  %v139_v30 = vld [vmem:[%s5258_s0 + $0x3e8] sm:$0xff] }
 0x271   :  { %1958 = vmatmul.bf16.gmra.mxu1 %v505_v62  ;;  %2357 = vmatmul.bf16.gmra.mxu0 %v508_v42  ;;  %v128_v42 = vld [vmem:[%s5258_s0 + $0x390] sm:$0xff] }
 0x272   :  { %v1776_v38 = vadd.f32 %v4388_v43, %v1643_v16  ;;  %v165_v43 = vld [vmem:[%s5258_s0 + $0x4b8] sm:$0xff] }
 0x273   :  { %v137_v16 = vld [vmem:[%s5258_s0 + $0x3d8] sm:$0xff] }
 0x274   :  { %2091 = vmatmul.bf16.gmra.mxu2 %v506_v19  ;;  %v4498_v6 = vadd.f32 %v1908_v11, %v1776_v38  ;;  %v174_v11 = vld [vmem:[%s5258_s0 + $0x500] sm:$0xff]  ;;  %v1385_v19 = vadd.f32 %v4203_v23, %v5286_v59 }
 0x275   :  { %v534_v5 = vpack.c.bf16 %v174_v11, %v165_v43 }
 0x276   :  { %v1514_v50 = vpop.f32.mrf.mxu1  ;;  %v1913_v54 = vpop.f32.mrf.mxu0 }
 0x277   :  { %v1645_v8 = vpop.f32.mrf.mxu2  ;;  %v1515_v25 = vadd.f32 %v1514_v50, %v1382_v26  ;;  %v1790_v2 = vpop.f32.mrf.mxu3 }
 0x278   :  { %v1646_v35 = vadd.f32 %v1645_v8, %v1513_v1  ;;  %v136_v8 = vld [vmem:[%s5258_s0 + $0x3d0] sm:$0xff] }
 0x279   :  { %v514_v38 = vpack.c.bf16 %v136_v8, %v127_v51 }
 0x27a   :  { %v1779_v29 = vadd.f32 %v4419_v58, %v1646_v35  ;;  %v130_v58 = vld [vmem:[%s5258_s0 + $0x3a0] sm:$0xff]  ;;  %2239 = vmatmul.bf16.gmra.mxu3 %v534_v5  ;;  %v5288_v5 = vld [vmem:[#allocation7_spill] sm:$0xff] }
 0x27b   :  { %v517_v57 = vpack.c.bf16 %v139_v30, %v130_v58  ;;  %v1387_v59 = vadd.f32 %v4203_v23, %v5288_v5 }
 0x27c   :  { %v4521_v62 = vadd.f32 %v1911_v14, %v1779_v29  ;;  %v515_v14 = vpack.c.bf16 %v137_v16, %v128_v42  ;;  %v145_v16 = vld [vmem:[%s5258_s0 + $0x418] sm:$0xff] }
 0x27e   :  { %5285 = vst [vmem:[#allocation4_spill] sm:$0xff] %v4521_v62  ;;  %v1517_v35 = vpop.f32.mrf.mxu1  ;;  %v1916_v50 = vpop.f32.mrf.mxu0 }
 0x27f   :  { %v1647_v1 = vpop.f32.mrf.mxu2  ;;  %v1518_v2 = vadd.f32 %v1517_v35, %v1385_v19  ;;  %v4531_v29 = vpop.f32.mrf.mxu3  ;;  %v154_v19 = vld [vmem:[%s5258_s0 + $0x460] sm:$0xff]  ;;  %v5290_v35 = vld [vmem:[#allocation8_spill] sm:$0xff] }
 0x280   :  { %v1648_v26 = vadd.f32 %v1647_v1, %v1515_v25  ;;  %v157_v1 = vld [vmem:[%s5258_s0 + $0x478] sm:$0xff] }
 0x281   :  { %1963 = vmatmul.bf16.gmra.mxu1 %v514_v38  ;;  %2362 = vmatmul.bf16.gmra.mxu0 %v517_v57  ;;  %v146_v57 = vld [vmem:[%s5258_s0 + $0x420] sm:$0xff] }
 0x282   :  { %v1781_v43 = vadd.f32 %v4426_v18, %v1648_v26  ;;  %v183_v18 = vld [vmem:[%s5258_s0 + $0x548] sm:$0xff] }
 0x283   :  { %v155_v26 = vld [vmem:[%s5258_s0 + $0x468] sm:$0xff] }
 0x284   :  { %2096 = vmatmul.bf16.gmra.mxu2 %v515_v14  ;;  %v4534_v11 = vadd.f32 %v1913_v54, %v1781_v43  ;;  %v192_v54 = vld [vmem:[%s5258_s0 + $0x590] sm:$0xff]  ;;  %v1390_v14 = vadd.f32 %v4203_v23, %v5290_v35  ;;  %v523_v43 = vpack.c.bf16 %v154_v19, %v145_v16  ;;  %v201_v19 = vld [vmem:[%s5258_s0 + $0x5d8] sm:$0xff] }
 0x286   :  { %5287 = vst [vmem:[#allocation5_spill] sm:$0xff] %v4534_v11  ;;  %v1519_v8 = vpop.f32.mrf.mxu1  ;;  %v1918_v25 = vpop.f32.mrf.mxu0 }
 0x287   :  { %v1650_v62 = vpop.f32.mrf.mxu2  ;;  %v1520_v58 = vadd.f32 %v1519_v8, %v1387_v59  ;;  %v4538_v30 = vpop.f32.mrf.mxu3 }
 0x288   :  { %v1651_v51 = vadd.f32 %v1650_v62, %v1518_v2  ;;  %v543_v62 = vpack.c.bf16 %v192_v54, %v183_v18 }
 0x28a   :  { %v1784_v42 = vadd.f32 %v4457_v53, %v1651_v51  ;;  %v148_v53 = vld [vmem:[%s5258_s0 + $0x430] sm:$0xff]  ;;  %2244 = vmatmul.bf16.gmra.mxu3 %v543_v62 }
 0x28b   :  { %v526_v5 = vpack.c.bf16 %v157_v1, %v148_v53  ;;  %v172_v1 = vld [vmem:[%s5258_s0 + $0x4f0] sm:$0xff] }
 0x28c   :  { %v4559_v38 = vadd.f32 %v1916_v50, %v1784_v42  ;;  %v524_v50 = vpack.c.bf16 %v155_v26, %v146_v57  ;;  %v164_v26 = vld [vmem:[%s5258_s0 + $0x4b0] sm:$0xff] }
 0x28e   :  { %5289 = vst [vmem:[#allocation6_spill] sm:$0xff] %v4559_v38  ;;  %v1522_v51 = vpop.f32.mrf.mxu1  ;;  %v1921_v8 = vpop.f32.mrf.mxu0 }
 0x28f   :  { %v1652_v2 = vpop.f32.mrf.mxu2  ;;  %v1523_v42 = vadd.f32 %v1522_v51, %v1390_v14  ;;  %v4569_v18 = vpop.f32.mrf.mxu3  ;;  %v173_v14 = vld [vmem:[%s5258_s0 + $0x4f8] sm:$0xff] }
 0x290   :  { %v1653_v59 = vadd.f32 %v1652_v2, %v1520_v58 }
 0x291   :  { %1968 = vmatmul.bf16.gmra.mxu1 %v523_v43  ;;  %2367 = vmatmul.bf16.gmra.mxu0 %v526_v5 }
 0x292   :  { %v1786_v54 = vadd.f32 %v4464_v36, %v1653_v59  ;;  %v210_v36 = vld [vmem:[%s5258_s0 + $0x620] sm:$0xff] }
 0x293   :  { %v552_v53 = vpack.c.bf16 %v210_v36, %v201_v19 }
 0x294   :  { %2101 = vmatmul.bf16.gmra.mxu2 %v524_v50  ;;  %v4572_v38 = vadd.f32 %v1918_v25, %v1786_v54  ;;  %v163_v25 = vld [vmem:[%s5258_s0 + $0x4a8] sm:$0xff]  ;;  %v533_v50 = vpack.c.bf16 %v173_v14, %v164_v26  ;;  %v190_v26 = vld [vmem:[%s5258_s0 + $0x580] sm:$0xff]  ;;  %v193_v14 = vld [vmem:[%s5258_s0 + $0x598] sm:$0xff] }
 0x295   :  { %v532_v43 = vpack.c.bf16 %v172_v1, %v163_v25  ;;  %v219_v25 = vld [vmem:[%s5258_s0 + $0x668] sm:$0xff]  ;;  %v181_v1 = vld [vmem:[%s5258_s0 + $0x538] sm:$0xff] }
 0x296   :  { %v1524_v23 = vpop.f32.mrf.mxu1  ;;  %v1923_v35 = vpop.f32.mrf.mxu0 }
 0x297   :  { %v1655_v62 = vpop.f32.mrf.mxu2  ;;  %v4574_v16 = vpop.f32.mrf.mxu3 }
 0x298   :  { %v1656_v11 = vadd.f32 %v1655_v62, %v1523_v42 }
 0x29a   :  { %v1789_v58 = vadd.f32 %v4495_v45, %v1656_v11  ;;  %v166_v45 = vld [vmem:[%s5258_s0 + $0x4c0] sm:$0xff]  ;;  %v175_v11 = vld [vmem:[%s5258_s0 + $0x508] sm:$0xff]  ;;  %2249 = vmatmul.bf16.gmra.mxu3 %v552_v53  ;;  %v228_v53 = vld [vmem:[%s5258_s0 + $0x6b0] sm:$0xff] }
 0x29b   :  { %v535_v5 = vpack.c.bf16 %v175_v11, %v166_v45  ;;  %v561_v45 = vpack.c.bf16 %v228_v53, %v219_v25 }
 0x29c   :  { %v4595_v57 = vadd.f32 %v1921_v8, %v1789_v58  ;;  %v5291_v8 = vld [vmem:[#allocation12_spill] sm:$0xff] }
 0x29e   :  { %v1934_v59 = vpop.f32.mrf.mxu1  ;;  %v2333_v51 = vpop.f32.mrf.mxu0 }
 0x29f   :  { %v1657_v2 = vpop.f32.mrf.mxu2  ;;  %v4603_v42 = vpop.f32.mrf.mxu3  ;;  %v1935_v54 = vadd.f32 %v1934_v59, %v5291_v8 }
 0x2a0   :  { %v182_v2 = vld [vmem:[%s5258_s0 + $0x540] sm:$0xff] }
 0x2a1   :  { %1973 = vmatmul.bf16.gmra.mxu1 %v532_v43  ;;  %2372 = vmatmul.bf16.gmra.mxu0 %v535_v5  ;;  %v191_v43 = vld [vmem:[%s5258_s0 + $0x588] sm:$0xff] }
 0x2a4   :  { %2106 = vmatmul.bf16.gmra.mxu2 %v533_v50  ;;  %v541_v50 = vpack.c.bf16 %v190_v26, %v181_v1 }
 0x2a6   :  { %v1936_v35 = vpop.f32.mrf.mxu1  ;;  %v2335_v58 = vpop.f32.mrf.mxu0 }
 0x2a7   :  { %v2067_v62 = vpop.f32.mrf.mxu2  ;;  %v4606_v19 = vpop.f32.mrf.mxu3  ;;  %v1937_v59 = vadd.f32 %v1936_v35, %v3659_v7 }
 0x2a8   :  { %v2068_v23 = vadd.f32 %v2067_v62, %v1935_v54 }
 0x2aa   :  { %v2201_v36 = vadd.f32 %v4531_v29, %v2068_v23  ;;  %v184_v29 = vld [vmem:[%s5258_s0 + $0x550] sm:$0xff]  ;;  %2254 = vmatmul.bf16.gmra.mxu3 %v561_v45 }
 0x2ab   :  { %v544_v8 = vpack.c.bf16 %v193_v14, %v184_v29 }
 0x2ac   :  { %v2334_v11 = vadd.f32 %v2333_v51, %v2201_v36  ;;  %v542_v36 = vpack.c.bf16 %v191_v43, %v182_v2 }
 0x2ae   :  { %v2457_v5 = vmax.f32 %v2334_v11, 0.0  ;;  %v1939_v62 = vpop.f32.mrf.mxu1  ;;  %v2338_v23 = vpop.f32.mrf.mxu0 }
 0x2af   :  { %v2069_v51 = vpop.f32.mrf.mxu2  ;;  %v4637_v25 = vpop.f32.mrf.mxu3  ;;  %v1940_v35 = vadd.f32 %v1939_v62, %v3684_v55  ;;  %v246_v55 = vld [vmem:[%s5258_s0 + $0x740] sm:$0xff] }
 0x2b0   :  { %2506 = vst [vmem:[%s5259_s3] sm:$0xff] %v2457_v5  ;;  %v2070_v54 = vadd.f32 %v2069_v51, %v1937_v59  ;;  %v208_v59 = vld [vmem:[%s5258_s0 + $0x610] sm:$0xff]  ;;  %v211_v51 = vld [vmem:[%s5258_s0 + $0x628] sm:$0xff] }
 0x2b1   :  { %1978 = vmatmul.bf16.gmra.mxu1 %v541_v50  ;;  %2377 = vmatmul.bf16.gmra.mxu0 %v544_v8  ;;  %v200_v50 = vld [vmem:[%s5258_s0 + $0x5d0] sm:$0xff]  ;;  %v209_v8 = vld [vmem:[%s5258_s0 + $0x618] sm:$0xff] }
 0x2b2   :  { %v2203_v53 = vadd.f32 %v4538_v30, %v2070_v54  ;;  %v237_v30 = vld [vmem:[%s5258_s0 + $0x6f8] sm:$0xff] }
 0x2b3   :  { %v570_v43 = vpack.c.bf16 %v246_v55, %v237_v30 }
 0x2b4   :  { %v2336_v11 = vadd.f32 %v2335_v58, %v2203_v53  ;;  %2111 = vmatmul.bf16.gmra.mxu2 %v542_v36  ;;  %v199_v58 = vld [vmem:[%s5258_s0 + $0x5c8] sm:$0xff] }
 0x2b5   :  { %v550_v36 = vpack.c.bf16 %v208_v59, %v199_v58 }
 0x2b6   :  { %v2458_v7 = vmax.f32 %v2336_v11, 0.0  ;;  %v1941_v26 = vpop.f32.mrf.mxu1  ;;  %v2340_v29 = vpop.f32.mrf.mxu0 }
 0x2b7   :  { %v2072_v1 = vpop.f32.mrf.mxu2  ;;  %v4644_v14 = vpop.f32.mrf.mxu3  ;;  %v1942_v62 = vadd.f32 %v1941_v26, %v3697_v15 }
 0x2b8   :  { %2507 = vst [vmem:[%s5259_s3 + $0x8] sm:$0xff] %v2458_v7  ;;  %v2073_v45 = vadd.f32 %v2072_v1, %v1940_v35  ;;  %v551_v1 = vpack.c.bf16 %v209_v8, %v200_v50  ;;  %v226_v8 = vld [vmem:[%s5258_s0 + $0x6a0] sm:$0xff] }
 0x2ba   :  { %v2206_v2 = vadd.f32 %v4569_v18, %v2073_v45  ;;  %v202_v18 = vld [vmem:[%s5258_s0 + $0x5e0] sm:$0xff]  ;;  %2259 = vmatmul.bf16.gmra.mxu3 %v570_v43 }
 0x2bb   :  { %v553_v53 = vpack.c.bf16 %v211_v51, %v202_v18 }
 0x2bc   :  { %v2339_v5 = vadd.f32 %v2338_v23, %v2206_v2 }
 0x2be   :  { %v2459_v54 = vmax.f32 %v2339_v5, 0.0  ;;  %v1944_v7 = vpop.f32.mrf.mxu1  ;;  %v2343_v35 = vpop.f32.mrf.mxu0 }
 0x2bf   :  { %v2074_v23 = vpop.f32.mrf.mxu2  ;;  %v4675_v45 = vpop.f32.mrf.mxu3  ;;  %v1945_v26 = vadd.f32 %v1944_v7, %v3728_v41  ;;  %v264_v41 = vld [vmem:[%s5258_s0 + $0x7d0] sm:$0xff] }
 0x2c0   :  { %2508 = vst [vmem:[%s5259_s3 + $0x10] sm:$0xff] %v2459_v54  ;;  %v2075_v11 = vadd.f32 %v2074_v23, %v1942_v62  ;;  %v229_v54 = vld [vmem:[%s5258_s0 + $0x6b8] sm:$0xff]  ;;  %v218_v62 = vld [vmem:[%s5258_s0 + $0x660] sm:$0xff]  ;;  %v227_v23 = vld [vmem:[%s5258_s0 + $0x6a8] sm:$0xff] }
 0x2c1   :  { %1983 = vmatmul.bf16.gmra.mxu1 %v550_v36  ;;  %2382 = vmatmul.bf16.gmra.mxu0 %v553_v53 }
 0x2c2   :  { %v2208_v2 = vadd.f32 %v4574_v16, %v2075_v11  ;;  %v255_v16 = vld [vmem:[%s5258_s0 + $0x788] sm:$0xff] }
 0x2c3   :  { %v579_v51 = vpack.c.bf16 %v264_v41, %v255_v16 }
 0x2c4   :  { %v2341_v30 = vadd.f32 %v2340_v29, %v2208_v2  ;;  %2116 = vmatmul.bf16.gmra.mxu2 %v551_v1  ;;  %v217_v29 = vld [vmem:[%s5258_s0 + $0x658] sm:$0xff] }
 0x2c5   :  { %v559_v7 = vpack.c.bf16 %v226_v8, %v217_v29 }
 0x2c6   :  { %v2460_v15 = vmax.f32 %v2341_v30, 0.0  ;;  %v1946_v43 = vpop.f32.mrf.mxu1  ;;  %v2345_v5 = vpop.f32.mrf.mxu0 }
 0x2c7   :  { %v2077_v55 = vpop.f32.mrf.mxu2  ;;  %v4682_v59 = vpop.f32.mrf.mxu3  ;;  %v1947_v53 = vadd.f32 %v1946_v43, %v3747_v13 }
 0x2c8   :  { %2509 = vst [vmem:[%s5259_s3 + $0x18] sm:$0xff] %v2460_v15  ;;  %v2078_v58 = vadd.f32 %v2077_v55, %v1945_v26  ;;  %v560_v15 = vpack.c.bf16 %v227_v23, %v218_v62  ;;  %v247_v62 = vld [vmem:[%s5258_s0 + $0x748] sm:$0xff]  ;;  %v236_v23 = vld [vmem:[%s5258_s0 + $0x6f0] sm:$0xff] }
 0x2ca   :  { %v2211_v18 = vadd.f32 %v4603_v42, %v2078_v58  ;;  %v220_v42 = vld [vmem:[%s5258_s0 + $0x670] sm:$0xff]  ;;  %2264 = vmatmul.bf16.gmra.mxu3 %v579_v51 }
 0x2cc   :  { %v2344_v50 = vadd.f32 %v2343_v35, %v2211_v18  ;;  %v562_v35 = vpack.c.bf16 %v229_v54, %v220_v42  ;;  %v244_v54 = vld [vmem:[%s5258_s0 + $0x730] sm:$0xff] }
 0x2ce   :  { %v2461_v36 = vmax.f32 %v2344_v50, 0.0  ;;  %v1949_v2 = vpop.f32.mrf.mxu1  ;;  %v2348_v30 = vpop.f32.mrf.mxu0 }
 0x2cf   :  { %v2079_v11 = vpop.f32.mrf.mxu2  ;;  %v4713_v26 = vpop.f32.mrf.mxu3  ;;  %v1950_v43 = vadd.f32 %v1949_v2, %v3772_v46  ;;  %v282_v46 = vld [vmem:[%s5258_s0 + $0x860] sm:$0xff] }
 0x2d0   :  { %2510 = vst [vmem:[%s5259_s3 + $0x20] sm:$0xff] %v2461_v36  ;;  %v2080_v1 = vadd.f32 %v2079_v11, %v1947_v53  ;;  %v245_v36 = vld [vmem:[%s5258_s0 + $0x738] sm:$0xff] }
 0x2d1   :  { %1988 = vmatmul.bf16.gmra.mxu1 %v559_v7  ;;  %2387 = vmatmul.bf16.gmra.mxu0 %v562_v35 }
 0x2d2   :  { %v2213_v55 = vadd.f32 %v4606_v19, %v2080_v1  ;;  %v273_v19 = vld [vmem:[%s5258_s0 + $0x818] sm:$0xff] }
 0x2d3   :  { %v588_v8 = vpack.c.bf16 %v282_v46, %v273_v19 }
 0x2d4   :  { %v2346_v58 = vadd.f32 %v2345_v5, %v2213_v55  ;;  %2121 = vmatmul.bf16.gmra.mxu2 %v560_v15  ;;  %v235_v5 = vld [vmem:[%s5258_s0 + $0x6e8] sm:$0xff]  ;;  %v569_v55 = vpack.c.bf16 %v245_v36, %v236_v23 }
 0x2d5   :  { %v568_v35 = vpack.c.bf16 %v244_v54, %v235_v5  ;;  %v262_v54 = vld [vmem:[%s5258_s0 + $0x7c0] sm:$0xff]  ;;  %v263_v23 = vld [vmem:[%s5258_s0 + $0x7c8] sm:$0xff] }
 0x2d6   :  { %v2462_v13 = vmax.f32 %v2346_v58, 0.0  ;;  %v1951_v41 = vpop.f32.mrf.mxu1  ;;  %v2350_v29 = vpop.f32.mrf.mxu0 }
 0x2d7   :  { %v2082_v18 = vpop.f32.mrf.mxu2  ;;  %v4720_v51 = vpop.f32.mrf.mxu3  ;;  %v1952_v11 = vadd.f32 %v1951_v41, %v3785_v34 }
 0x2d8   :  { %2511 = vst [vmem:[%s5259_s3 + $0x28] sm:$0xff] %v2462_v13  ;;  %v2083_v16 = vadd.f32 %v2082_v18, %v1950_v43 }
 0x2da   :  { %v2216_v50 = vadd.f32 %v4637_v25, %v2083_v16  ;;  %v238_v25 = vld [vmem:[%s5258_s0 + $0x700] sm:$0xff]  ;;  %2269 = vmatmul.bf16.gmra.mxu3 %v588_v8 }
 0x2db   :  { %v571_v1 = vpack.c.bf16 %v247_v62, %v238_v25  ;;  %v265_v25 = vld [vmem:[%s5258_s0 + $0x7d8] sm:$0xff]  ;;  %v254_v62 = vld [vmem:[%s5258_s0 + $0x780] sm:$0xff] }
 0x2dc   :  { %v2349_v42 = vadd.f32 %v2348_v30, %v2216_v50 }
 0x2de   :  { %v2463_v53 = vmax.f32 %v2349_v42, 0.0  ;;  %v1954_v30 = vpop.f32.mrf.mxu1  ;;  %v2353_v15 = vpop.f32.mrf.mxu0 }
 0x2df   :  { %v2084_v7 = vpop.f32.mrf.mxu2  ;;  %v4751_v58 = vpop.f32.mrf.mxu3  ;;  %v1955_v18 = vadd.f32 %v1954_v30, %v3810_v48  ;;  %v300_v48 = vld [vmem:[%s5258_s0 + $0x8f0] sm:$0xff] }
 0x2e0   :  { %2512 = vst [vmem:[%s5259_s3 + $0x30] sm:$0xff] %v2463_v53  ;;  %v2085_v2 = vadd.f32 %v2084_v7, %v1952_v11 }
 0x2e1   :  { %1993 = vmatmul.bf16.gmra.mxu1 %v568_v35  ;;  %2392 = vmatmul.bf16.gmra.mxu0 %v571_v1 }
 0x2e2   :  { %v2218_v13 = vadd.f32 %v4644_v14, %v2085_v2  ;;  %v291_v14 = vld [vmem:[%s5258_s0 + $0x8a8] sm:$0xff] }
 0x2e3   :  { %v597_v8 = vpack.c.bf16 %v300_v48, %v291_v14 }
 0x2e4   :  { %v2351_v43 = vadd.f32 %v2350_v29, %v2218_v13  ;;  %2126 = vmatmul.bf16.gmra.mxu2 %v569_v55  ;;  %v253_v29 = vld [vmem:[%s5258_s0 + $0x778] sm:$0xff] }
 0x2e5   :  { %v577_v7 = vpack.c.bf16 %v262_v54, %v253_v29  ;;  %v272_v54 = vld [vmem:[%s5258_s0 + $0x810] sm:$0xff] }
 0x2e6   :  { %v2464_v34 = vmax.f32 %v2351_v43, 0.0  ;;  %v1956_v50 = vpop.f32.mrf.mxu1  ;;  %v2355_v19 = vpop.f32.mrf.mxu0 }
 0x2e7   :  { %v2087_v16 = vpop.f32.mrf.mxu2  ;;  %v4758_v46 = vpop.f32.mrf.mxu3  ;;  %v1957_v53 = vadd.f32 %v1956_v50, %v3823_v22 }
 0x2e8   :  { %2513 = vst [vmem:[%s5259_s3 + $0x38] sm:$0xff] %v2464_v34  ;;  %v2088_v41 = vadd.f32 %v2087_v16, %v1955_v18 }
 0x2ea   :  { %v2221_v5 = vadd.f32 %v4675_v45, %v2088_v41  ;;  %v256_v45 = vld [vmem:[%s5258_s0 + $0x790] sm:$0xff]  ;;  %2274 = vmatmul.bf16.gmra.mxu3 %v597_v8 }
 0x2eb   :  { %v580_v35 = vpack.c.bf16 %v265_v25, %v256_v45  ;;  %v280_v8 = vld [vmem:[%s5258_s0 + $0x850] sm:$0xff]  ;;  %v281_v45 = vld [vmem:[%s5258_s0 + $0x858] sm:$0xff] }
 0x2ec   :  { %v2354_v42 = vadd.f32 %v2353_v15, %v2221_v5  ;;  %v578_v15 = vpack.c.bf16 %v263_v23, %v254_v62 }
 0x2ee   :  { %v2465_v36 = vmax.f32 %v2354_v42, 0.0  ;;  %v1959_v2 = vpop.f32.mrf.mxu1  ;;  %v2358_v30 = vpop.f32.mrf.mxu0  ;;  %v283_v42 = vld [vmem:[%s5258_s0 + $0x868] sm:$0xff] }
 0x2ef   :  { %v2089_v11 = vpop.f32.mrf.mxu2  ;;  %v4789_v55 = vpop.f32.mrf.mxu3  ;;  %v1960_v34 = vadd.f32 %v1959_v2, %v3851_v4  ;;  %v318_v4 = vld [vmem:[%s5258_s0 + $0x980] sm:$0xff] }
 0x2f0   :  { %2514 = vst [vmem:[%s5259_s3 + $0x40] sm:$0xff] %v2465_v36  ;;  %v2090_v1 = vadd.f32 %v2089_v11, %v1957_v53 }
 0x2f1   :  { %1998 = vmatmul.bf16.gmra.mxu1 %v577_v7  ;;  %2397 = vmatmul.bf16.gmra.mxu0 %v580_v35 }
 0x2f2   :  { %v2223_v13 = vadd.f32 %v4682_v59, %v2090_v1  ;;  %v309_v59 = vld [vmem:[%s5258_s0 + $0x938] sm:$0xff]  ;;  %v587_v1 = vpack.c.bf16 %v281_v45, %v272_v54 }
 0x2f3   :  { %v606_v48 = vpack.c.bf16 %v318_v4, %v309_v59  ;;  %v298_v4 = vld [vmem:[%s5258_s0 + $0x8e0] sm:$0xff] }
 0x2f4   :  { %v2356_v43 = vadd.f32 %v2355_v19, %v2223_v13  ;;  %2131 = vmatmul.bf16.gmra.mxu2 %v578_v15  ;;  %v271_v19 = vld [vmem:[%s5258_s0 + $0x808] sm:$0xff] }
 0x2f5   :  { %v586_v36 = vpack.c.bf16 %v280_v8, %v271_v19  ;;  %v301_v19 = vld [vmem:[%s5258_s0 + $0x8f8] sm:$0xff] }
 0x2f6   :  { %v2466_v22 = vmax.f32 %v2356_v43, 0.0  ;;  %v1961_v41 = vpop.f32.mrf.mxu1  ;;  %v2360_v50 = vpop.f32.mrf.mxu0 }
 0x2f7   :  { %v2092_v18 = vpop.f32.mrf.mxu2  ;;  %v4796_v5 = vpop.f32.mrf.mxu3  ;;  %v1962_v62 = vadd.f32 %v1961_v41, %v3873_v56 }
 0x2f8   :  { %2515 = vst [vmem:[%s5259_s3 + $0x48] sm:$0xff] %v2466_v22  ;;  %v2093_v16 = vadd.f32 %v2092_v18, %v1960_v34 }
 0x2fa   :  { %v2226_v14 = vadd.f32 %v4713_v26, %v2093_v16  ;;  %v274_v26 = vld [vmem:[%s5258_s0 + $0x820] sm:$0xff]  ;;  %2279 = vmatmul.bf16.gmra.mxu3 %v606_v48 }
 0x2fb   :  { %v589_v53 = vpack.c.bf16 %v283_v42, %v274_v26  ;;  %v290_v48 = vld [vmem:[%s5258_s0 + $0x8a0] sm:$0xff] }
 0x2fc   :  { %v2359_v29 = vadd.f32 %v2358_v30, %v2226_v14 }
 0x2fe   :  { %v2467_v25 = vmax.f32 %v2359_v29, 0.0  ;;  %v1964_v7 = vpop.f32.mrf.mxu1  ;;  %v2363_v35 = vpop.f32.mrf.mxu0  ;;  %v299_v29 = vld [vmem:[%s5258_s0 + $0x8e8] sm:$0xff] }
 0x2ff   :  { %v2094_v23 = vpop.f32.mrf.mxu2  ;;  %v4827_v2 = vpop.f32.mrf.mxu3  ;;  %v1965_v13 = vadd.f32 %v1964_v7, %v3898_v60  ;;  %v336_v60 = vld [vmem:[%s5258_s0 + $0xa10] sm:$0xff] }
 0x300   :  { %2516 = vst [vmem:[%s5259_s3 + $0x50] sm:$0xff] %v2467_v25  ;;  %v2095_v11 = vadd.f32 %v2094_v23, %v1962_v62 }
 0x301   :  { %2003 = vmatmul.bf16.gmra.mxu1 %v586_v36  ;;  %2402 = vmatmul.bf16.gmra.mxu0 %v589_v53  ;;  %v596_v36 = vpack.c.bf16 %v299_v29, %v290_v48 }
 0x302   :  { %v2228_v30 = vadd.f32 %v4720_v51, %v2095_v11  ;;  %v327_v51 = vld [vmem:[%s5258_s0 + $0x9c8] sm:$0xff] }
 0x303   :  { %v615_v14 = vpack.c.bf16 %v336_v60, %v327_v51  ;;  %v319_v51 = vld [vmem:[%s5258_s0 + $0x988] sm:$0xff]  ;;  %v308_v60 = vld [vmem:[%s5258_s0 + $0x930] sm:$0xff] }
 0x304   :  { %v2361_v15 = vadd.f32 %v2360_v50, %v2228_v30  ;;  %2136 = vmatmul.bf16.gmra.mxu2 %v587_v1  ;;  %v289_v50 = vld [vmem:[%s5258_s0 + $0x898] sm:$0xff] }
 0x305   :  { %v595_v54 = vpack.c.bf16 %v298_v4, %v289_v50  ;;  %v317_v50 = vld [vmem:[%s5258_s0 + $0x978] sm:$0xff] }
 0x306   :  { %v2468_v56 = vmax.f32 %v2361_v15, 0.0  ;;  %v1966_v34 = vpop.f32.mrf.mxu1  ;;  %v2365_v18 = vpop.f32.mrf.mxu0 }
 0x307   :  { %v2097_v43 = vpop.f32.mrf.mxu2  ;;  %v4834_v16 = vpop.f32.mrf.mxu3  ;;  %v1967_v26 = vadd.f32 %v1966_v34, %v3911_v40 }
 0x308   :  { %2517 = vst [vmem:[%s5259_s3 + $0x58] sm:$0xff] %v2468_v56  ;;  %v2098_v22 = vadd.f32 %v2097_v43, %v1965_v13 }
 0x30a   :  { %v2231_v41 = vadd.f32 %v4751_v58, %v2098_v22  ;;  %v292_v58 = vld [vmem:[%s5258_s0 + $0x8b0] sm:$0xff]  ;;  %2284 = vmatmul.bf16.gmra.mxu3 %v615_v14  ;;  %v307_v22 = vld [vmem:[%s5258_s0 + $0x928] sm:$0xff] }
 0x30b   :  { %v598_v45 = vpack.c.bf16 %v301_v19, %v292_v58 }
 0x30c   :  { %v2364_v59 = vadd.f32 %v2363_v35, %v2231_v41  ;;  %v316_v41 = vld [vmem:[%s5258_s0 + $0x970] sm:$0xff] }
 0x30d   :  { %v604_v58 = vpack.c.bf16 %v316_v41, %v307_v22 }
 0x30e   :  { %v2469_v8 = vmax.f32 %v2364_v59, 0.0  ;;  %v1969_v62 = vpop.f32.mrf.mxu1  ;;  %v2368_v23 = vpop.f32.mrf.mxu0 }
 0x30f   :  { %v2099_v42 = vpop.f32.mrf.mxu2  ;;  %v4865_v53 = vpop.f32.mrf.mxu3  ;;  %v1970_v35 = vadd.f32 %v1969_v62, %v3936_v10  ;;  %v354_v10 = vld [vmem:[%s5258_s0 + $0xaa0] sm:$0xff] }
 0x310   :  { %2518 = vst [vmem:[%s5259_s3 + $0x60] sm:$0xff] %v2469_v8  ;;  %v2100_v25 = vadd.f32 %v2099_v42, %v1967_v26  ;;  %v605_v26 = vpack.c.bf16 %v317_v50, %v308_v60 }
 0x311   :  { %2008 = vmatmul.bf16.gmra.mxu1 %v595_v54  ;;  %2407 = vmatmul.bf16.gmra.mxu0 %v598_v45 }
 0x312   :  { %v2233_v11 = vadd.f32 %v4758_v46, %v2100_v25  ;;  %v345_v46 = vld [vmem:[%s5258_s0 + $0xa58] sm:$0xff] }
 0x313   :  { %v624_v34 = vpack.c.bf16 %v354_v10, %v345_v46  ;;  %v335_v46 = vld [vmem:[%s5258_s0 + $0xa08] sm:$0xff] }
 0x314   :  { %v2366_v7 = vadd.f32 %v2365_v18, %v2233_v11  ;;  %2141 = vmatmul.bf16.gmra.mxu2 %v596_v36 }
 0x316   :  { %v2470_v40 = vmax.f32 %v2366_v7, 0.0  ;;  %v1971_v15 = vpop.f32.mrf.mxu1  ;;  %v2370_v56 = vpop.f32.mrf.mxu0 }
 0x317   :  { %v2102_v1 = vpop.f32.mrf.mxu2  ;;  %v4872_v13 = vpop.f32.mrf.mxu3  ;;  %v1972_v59 = vadd.f32 %v1971_v15, %v3949_v44  ;;  %v334_v15 = vld [vmem:[%s5258_s0 + $0xa00] sm:$0xff] }
 0x318   :  { %2519 = vst [vmem:[%s5259_s3 + $0x68] sm:$0xff] %v2470_v40  ;;  %v2103_v30 = vadd.f32 %v2102_v1, %v1970_v35  ;;  %v325_v35 = vld [vmem:[%s5258_s0 + $0x9b8] sm:$0xff] }
 0x31a   :  { %v2236_v43 = vadd.f32 %v4789_v55, %v2103_v30  ;;  %v310_v55 = vld [vmem:[%s5258_s0 + $0x940] sm:$0xff]  ;;  %2289 = vmatmul.bf16.gmra.mxu3 %v624_v34 }
 0x31b   :  { %v607_v19 = vpack.c.bf16 %v319_v51, %v310_v55 }
 0x31c   :  { %v2369_v18 = vadd.f32 %v2368_v23, %v2236_v43  ;;  %v326_v43 = vld [vmem:[%s5258_s0 + $0x9c0] sm:$0xff] }
 0x31d   :  { %v614_v50 = vpack.c.bf16 %v335_v46, %v326_v43 }
 0x31e   :  { %v2471_v14 = vmax.f32 %v2369_v18, 0.0  ;;  %v1974_v29 = vpop.f32.mrf.mxu1  ;;  %v2373_v8 = vpop.f32.mrf.mxu0  ;;  %v613_v18 = vpack.c.bf16 %v334_v15, %v325_v35 }
 0x31f   :  { %v2104_v4 = vpop.f32.mrf.mxu2  ;;  %v4903_v42 = vpop.f32.mrf.mxu3  ;;  %v1975_v25 = vadd.f32 %v1974_v29, %v3974_v24  ;;  %v372_v24 = vld [vmem:[%s5258_s0 + $0xb30] sm:$0xff] }
 0x320   :  { %2520 = vst [vmem:[%s5259_s3 + $0x70] sm:$0xff] %v2471_v14  ;;  %v2105_v48 = vadd.f32 %v2104_v4, %v1972_v59 }
 0x321   :  { %2013 = vmatmul.bf16.gmra.mxu1 %v604_v58  ;;  %2412 = vmatmul.bf16.gmra.mxu0 %v607_v19 }
 0x322   :  { %v2238_v54 = vadd.f32 %v4796_v5, %v2105_v48  ;;  %v363_v5 = vld [vmem:[%s5258_s0 + $0xae8] sm:$0xff] }
 0x323   :  { %v633_v1 = vpack.c.bf16 %v372_v24, %v363_v5 }
 0x324   :  { %v2371_v45 = vadd.f32 %v2370_v56, %v2238_v54  ;;  %2146 = vmatmul.bf16.gmra.mxu2 %v605_v26  ;;  %v337_v56 = vld [vmem:[%s5258_s0 + $0xa18] sm:$0xff] }
 0x326   :  { %v2472_v44 = vmax.f32 %v2371_v45, 0.0  ;;  %v1976_v36 = vpop.f32.mrf.mxu1  ;;  %v2375_v11 = vpop.f32.mrf.mxu0  ;;  %v343_v45 = vld [vmem:[%s5258_s0 + $0xa48] sm:$0xff] }
 0x327   :  { %v2107_v62 = vpop.f32.mrf.mxu2  ;;  %v4910_v7 = vpop.f32.mrf.mxu3  ;;  %v1977_v22 = vadd.f32 %v1976_v36, %v3996_v47  ;;  %v344_v36 = vld [vmem:[%s5258_s0 + $0xa50] sm:$0xff] }
 0x328   :  { %2521 = vst [vmem:[%s5259_s3 + $0x78] sm:$0xff] %v2472_v44  ;;  %v2108_v23 = vadd.f32 %v2107_v62, %v1975_v25  ;;  %v352_v62 = vld [vmem:[%s5258_s0 + $0xa90] sm:$0xff] }
 0x329   :  { %v622_v35 = vpack.c.bf16 %v352_v62, %v343_v45 }
 0x32a   :  { %v2241_v40 = vadd.f32 %v4827_v2, %v2108_v23  ;;  %v328_v2 = vld [vmem:[%s5258_s0 + $0x9d0] sm:$0xff]  ;;  %2294 = vmatmul.bf16.gmra.mxu3 %v633_v1  ;;  %v355_v23 = vld [vmem:[%s5258_s0 + $0xaa8] sm:$0xff] }
 0x32b   :  { %v616_v41 = vpack.c.bf16 %v337_v56, %v328_v2 }
 0x32c   :  { %v2374_v30 = vadd.f32 %v2373_v8, %v2241_v40 }
 0x32e   :  { %v2473_v10 = vmax.f32 %v2374_v30, 0.0  ;;  %v1979_v51 = vpop.f32.mrf.mxu1  ;;  %v2378_v60 = vpop.f32.mrf.mxu0 }
 0x32f   :  { %v2109_v34 = vpop.f32.mrf.mxu2  ;;  %v4941_v14 = vpop.f32.mrf.mxu3  ;;  %v1980_v58 = vadd.f32 %v1979_v51, %v4024_v21  ;;  %v390_v21 = vld [vmem:[%s5258_s0 + $0xbc0] sm:$0xff] }
 0x330   :  { %2522 = vst [vmem:[%s5259_s3 + $0x80] sm:$0xff] %v2473_v10  ;;  %v2110_v55 = vadd.f32 %v2109_v34, %v1977_v22 }
 0x331   :  { %2018 = vmatmul.bf16.gmra.mxu1 %v613_v18  ;;  %2417 = vmatmul.bf16.gmra.mxu0 %v616_v41 }
 0x332   :  { %v2243_v59 = vadd.f32 %v4834_v16, %v2110_v55  ;;  %v381_v16 = vld [vmem:[%s5258_s0 + $0xb78] sm:$0xff] }
 0x333   :  { %v642_v44 = vpack.c.bf16 %v390_v21, %v381_v16 }
 0x334   :  { %v2376_v4 = vadd.f32 %v2375_v11, %v2243_v59  ;;  %2151 = vmatmul.bf16.gmra.mxu2 %v614_v50  ;;  %v353_v11 = vld [vmem:[%s5258_s0 + $0xa98] sm:$0xff] }
 0x335   :  { %v623_v56 = vpack.c.bf16 %v353_v11, %v344_v36  ;;  %v361_v50 = vld [vmem:[%s5258_s0 + $0xad8] sm:$0xff] }
 0x336   :  { %v2474_v47 = vmax.f32 %v2376_v4, 0.0  ;;  %v1981_v29 = vpop.f32.mrf.mxu1  ;;  %v2380_v8 = vpop.f32.mrf.mxu0 }
 0x337   :  { %v2112_v19 = vpop.f32.mrf.mxu2  ;;  %v4948_v26 = vpop.f32.mrf.mxu3  ;;  %v1982_v5 = vadd.f32 %v1981_v29, %v4037_v3 }
 0x338   :  { %2523 = vst [vmem:[%s5259_s3 + $0x88] sm:$0xff] %v2474_v47  ;;  %v2113_v48 = vadd.f32 %v2112_v19, %v1980_v58  ;;  %v370_v47 = vld [vmem:[%s5258_s0 + $0xb20] sm:$0xff]  ;;  %v373_v58 = vld [vmem:[%s5258_s0 + $0xb38] sm:$0xff] }
 0x339   :  { %v362_v19 = vld [vmem:[%s5258_s0 + $0xae0] sm:$0xff]  ;;  %v631_v16 = vpack.c.bf16 %v370_v47, %v361_v50 }
 0x33a   :  { %v2246_v54 = vadd.f32 %v4865_v53, %v2113_v48  ;;  %v346_v53 = vld [vmem:[%s5258_s0 + $0xa60] sm:$0xff]  ;;  %2299 = vmatmul.bf16.gmra.mxu3 %v642_v44  ;;  %v371_v48 = vld [vmem:[%s5258_s0 + $0xb28] sm:$0xff] }
 0x33b   :  { %v625_v1 = vpack.c.bf16 %v355_v23, %v346_v53  ;;  %v632_v62 = vpack.c.bf16 %v371_v48, %v362_v19 }
 0x33c   :  { %v2379_v25 = vadd.f32 %v2378_v60, %v2246_v54 }
 0x33e   :  { %v2475_v40 = vmax.f32 %v2379_v25, 0.0  ;;  %v1984_v15 = vpop.f32.mrf.mxu1  ;;  %v2383_v2 = vpop.f32.mrf.mxu0 }
 0x33f   :  { %v2114_v24 = vpop.f32.mrf.mxu2  ;;  %v4979_v43 = vpop.f32.mrf.mxu3  ;;  %v1985_v22 = vadd.f32 %v1984_v15, %v4062_v52  ;;  %v408_v52 = vld [vmem:[%s5258_s0 + $0xc50] sm:$0xff]  ;;  %v379_v15 = vld [vmem:[%s5258_s0 + $0xb68] sm:$0xff] }
 0x340   :  { %2524 = vst [vmem:[%s5259_s3 + $0x90] sm:$0xff] %v2475_v40  ;;  %v2115_v30 = vadd.f32 %v2114_v24, %v1982_v5 }
 0x341   :  { %2023 = vmatmul.bf16.gmra.mxu1 %v622_v35  ;;  %2422 = vmatmul.bf16.gmra.mxu0 %v625_v1 }
 0x342   :  { %v2248_v46 = vadd.f32 %v4872_v13, %v2115_v30  ;;  %v399_v13 = vld [vmem:[%s5258_s0 + $0xc08] sm:$0xff] }
 0x343   :  { %v651_v59 = vpack.c.bf16 %v408_v52, %v399_v13 }
 0x344   :  { %v2381_v10 = vadd.f32 %v2380_v8, %v2248_v46  ;;  %2156 = vmatmul.bf16.gmra.mxu2 %v623_v56  ;;  %v388_v46 = vld [vmem:[%s5258_s0 + $0xbb0] sm:$0xff] }
 0x346   :  { %v2476_v3 = vmax.f32 %v2381_v10, 0.0  ;;  %v1986_v41 = vpop.f32.mrf.mxu1  ;;  %v2385_v55 = vpop.f32.mrf.mxu0  ;;  %v391_v10 = vld [vmem:[%s5258_s0 + $0xbc8] sm:$0xff] }
 0x347   :  { %v2117_v34 = vpop.f32.mrf.mxu2  ;;  %v4986_v51 = vpop.f32.mrf.mxu3  ;;  %v1987_v8 = vadd.f32 %v1986_v41, %v4075_v33 }
 0x348   :  { %2525 = vst [vmem:[%s5259_s3 + $0x98] sm:$0xff] %v2476_v3  ;;  %v2118_v18 = vadd.f32 %v2117_v34, %v1985_v22  ;;  %v380_v3 = vld [vmem:[%s5258_s0 + $0xb70] sm:$0xff]  ;;  %v389_v22 = vld [vmem:[%s5258_s0 + $0xbb8] sm:$0xff] }
 0x34a   :  { %v2251_v60 = vadd.f32 %v4903_v42, %v2118_v18  ;;  %v364_v42 = vld [vmem:[%s5258_s0 + $0xaf0] sm:$0xff]  ;;  %2304 = vmatmul.bf16.gmra.mxu3 %v651_v59  ;;  %v641_v59 = vpack.c.bf16 %v389_v22, %v380_v3 }
 0x34b   :  { %v634_v21 = vpack.c.bf16 %v373_v58, %v364_v42 }
 0x34c   :  { %v2384_v4 = vadd.f32 %v2383_v2, %v2251_v60 }
 0x34e   :  { %v2477_v29 = vmax.f32 %v2384_v4, 0.0  ;;  %v1989_v44 = vpop.f32.mrf.mxu1  ;;  %v2388_v25 = vpop.f32.mrf.mxu0 }
 0x34f   :  { %v2119_v54 = vpop.f32.mrf.mxu2  ;;  %v5017_v53 = vpop.f32.mrf.mxu3  ;;  %v1990_v11 = vadd.f32 %v1989_v44, %v4100_v12  ;;  %v426_v12 = vld [vmem:[%s5258_s0 + $0xce0] sm:$0xff] }
 0x350   :  { %2526 = vst [vmem:[%s5259_s3 + $0xa0] sm:$0xff] %v2477_v29  ;;  %v2120_v45 = vadd.f32 %v2119_v54, %v1987_v8 }
 0x351   :  { %2028 = vmatmul.bf16.gmra.mxu1 %v631_v16  ;;  %2427 = vmatmul.bf16.gmra.mxu0 %v634_v21  ;;  %v397_v21 = vld [vmem:[%s5258_s0 + $0xbf8] sm:$0xff] }
 0x352   :  { %v2253_v23 = vadd.f32 %v4910_v7, %v2120_v45  ;;  %v417_v7 = vld [vmem:[%s5258_s0 + $0xc98] sm:$0xff] }
 0x353   :  { %v660_v2 = vpack.c.bf16 %v426_v12, %v417_v7 }
 0x354   :  { %v2386_v36 = vadd.f32 %v2385_v55, %v2253_v23  ;;  %2161 = vmatmul.bf16.gmra.mxu2 %v632_v62  ;;  %v640_v55 = vpack.c.bf16 %v388_v46, %v379_v15  ;;  %v409_v62 = vld [vmem:[%s5258_s0 + $0xc58] sm:$0xff]  ;;  %v398_v23 = vld [vmem:[%s5258_s0 + $0xc00] sm:$0xff] }
 0x356   :  { %v2478_v33 = vmax.f32 %v2386_v36, 0.0  ;;  %v1991_v24 = vpop.f32.mrf.mxu1  ;;  %v2390_v35 = vpop.f32.mrf.mxu0  ;;  %v407_v36 = vld [vmem:[%s5258_s0 + $0xc48] sm:$0xff] }
 0x357   :  { %v2122_v40 = vpop.f32.mrf.mxu2  ;;  %v5024_v1 = vpop.f32.mrf.mxu3  ;;  %v1992_v18 = vadd.f32 %v1991_v24, %v4122_v63  ;;  %v650_v12 = vpack.c.bf16 %v407_v36, %v398_v23 }
 0x358   :  { %2527 = vst [vmem:[%s5259_s3 + $0xa8] sm:$0xff] %v2478_v33  ;;  %v2123_v5 = vadd.f32 %v2122_v40, %v1990_v11 }
 0x35a   :  { %v2256_v30 = vadd.f32 %v4941_v14, %v2123_v5  ;;  %v382_v14 = vld [vmem:[%s5258_s0 + $0xb80] sm:$0xff]  ;;  %2309 = vmatmul.bf16.gmra.mxu3 %v660_v2 }
 0x35b   :  { %v643_v60 = vpack.c.bf16 %v391_v10, %v382_v14 }
 0x35c   :  { %v2389_v56 = vadd.f32 %v2388_v25, %v2256_v30  ;;  %v406_v25 = vld [vmem:[%s5258_s0 + $0xc40] sm:$0xff] }
 0x35d   :  { %v649_v5 = vpack.c.bf16 %v406_v25, %v397_v21 }
 0x35e   :  { %v2479_v34 = vmax.f32 %v2389_v56, 0.0  ;;  %v1994_v52 = vpop.f32.mrf.mxu1  ;;  %v2393_v50 = vpop.f32.mrf.mxu0 }
 0x35f   :  { %v2124_v41 = vpop.f32.mrf.mxu2  ;;  %v5055_v4 = vpop.f32.mrf.mxu3  ;;  %v1995_v58 = vadd.f32 %v1994_v52, %v4150_v31  ;;  %v444_v31 = vld [vmem:[%s5258_s0 + $0xd70] sm:$0xff] }
 0x360   :  { %2528 = vst [vmem:[%s5259_s3 + $0xb0] sm:$0xff] %v2479_v34  ;;  %v2125_v13 = vadd.f32 %v2124_v41, %v1992_v18  ;;  %v416_v52 = vld [vmem:[%s5258_s0 + $0xc90] sm:$0xff] }
 0x361   :  { %2033 = vmatmul.bf16.gmra.mxu1 %v640_v55  ;;  %2432 = vmatmul.bf16.gmra.mxu0 %v643_v60  ;;  %v424_v60 = vld [vmem:[%s5258_s0 + $0xcd0] sm:$0xff] }
 0x362   :  { %v2258_v47 = vadd.f32 %v4948_v26, %v2125_v13  ;;  %v435_v26 = vld [vmem:[%s5258_s0 + $0xd28] sm:$0xff]  ;;  %v418_v13 = vld [vmem:[%s5258_s0 + $0xca0] sm:$0xff] }
 0x363   :  { %v669_v45 = vpack.c.bf16 %v444_v31, %v435_v26 }
 0x364   :  { %v2391_v42 = vadd.f32 %v2390_v35, %v2258_v47  ;;  %2166 = vmatmul.bf16.gmra.mxu2 %v641_v59 }
 0x366   :  { %v2480_v63 = vmax.f32 %v2391_v42, 0.0  ;;  %v1996_v29 = vpop.f32.mrf.mxu1  ;;  %v2395_v8 = vpop.f32.mrf.mxu0 }
 0x367   :  { %v2127_v19 = vpop.f32.mrf.mxu2  ;;  %v5062_v54 = vpop.f32.mrf.mxu3  ;;  %v1997_v11 = vadd.f32 %v1996_v29, %v4163_v37 }
 0x368   :  { %2529 = vst [vmem:[%s5259_s3 + $0xb8] sm:$0xff] %v2480_v63  ;;  %v2128_v48 = vadd.f32 %v2127_v19, %v1995_v58 }
 0x36a   :  { %v2261_v16 = vadd.f32 %v4979_v43, %v2128_v48  ;;  %v400_v43 = vld [vmem:[%s5258_s0 + $0xc10] sm:$0xff]  ;;  %2314 = vmatmul.bf16.gmra.mxu3 %v669_v45 }
 0x36b   :  { %v652_v24 = vpack.c.bf16 %v409_v62, %v400_v43 }
 0x36c   :  { %v2394_v44 = vadd.f32 %v2393_v50, %v2261_v16  ;;  %v425_v50 = vld [vmem:[%s5258_s0 + $0xcd8] sm:$0xff] }
 0x36e   :  { %v2481_v33 = vmax.f32 %v2394_v44, 0.0  ;;  %v1999_v30 = vpop.f32.mrf.mxu1  ;;  %v2398_v7 = vpop.f32.mrf.mxu0 }
 0x36f   :  { %v2129_v40 = vpop.f32.mrf.mxu2  ;;  %v5093_v15 = vpop.f32.mrf.mxu3  ;;  %v2000_v46 = vadd.f32 %v1999_v30, %v4185_v32  ;;  %v415_v32 = vld [vmem:[%s5258_s0 + $0xc88] sm:$0xff] }
 0x370   :  { %2530 = vst [vmem:[%s5259_s3 + $0xc0] sm:$0xff] %v2481_v33  ;;  %v2130_v35 = vadd.f32 %v2129_v40, %v1997_v11  ;;  %v658_v63 = vpack.c.bf16 %v424_v60, %v415_v32  ;;  %v436_v33 = vld [vmem:[%s5258_s0 + $0xd30] sm:$0xff]  ;;  %v445_v11 = vld [vmem:[%s5258_s0 + $0xd78] sm:$0xff]  ;;  %v443_v40 = vld [vmem:[%s5258_s0 + $0xd68] sm:$0xff] }
 0x371   :  { %2038 = vmatmul.bf16.gmra.mxu1 %v649_v5  ;;  %2437 = vmatmul.bf16.gmra.mxu0 %v652_v24 }
 0x372   :  { %v2263_v2 = vadd.f32 %v4986_v51, %v2130_v35  ;;  %v453_v51 = vld [vmem:[%s5258_s0 + $0xdb8] sm:$0xff] }
 0x373   :  { %v678_v41 = vpack.c.bf16 %v453_v51, %v453_v51 }
 0x374   :  { %v2396_v56 = vadd.f32 %v2395_v8, %v2263_v2  ;;  %2171 = vmatmul.bf16.gmra.mxu2 %v650_v12  ;;  %v659_v8 = vpack.c.bf16 %v425_v50, %v416_v52 }
 0x376   :  { %v2482_v37 = vmax.f32 %v2396_v56, 0.0  ;;  %v2001_v3 = vpop.f32.mrf.mxu1  ;;  %v2400_v22 = vpop.f32.mrf.mxu0 }
 0x377   :  { %v2132_v14 = vpop.f32.mrf.mxu2  ;;  %v5100_v34 = vpop.f32.mrf.mxu3  ;;  %v2002_v47 = vadd.f32 %v2001_v3, %v4198_v17 }
 0x378   :  { %2531 = vst [vmem:[%s5259_s3 + $0xc8] sm:$0xff] %v2482_v37  ;;  %v2133_v10 = vadd.f32 %v2132_v14, %v2000_v46 }
 0x37a   :  { %v2266_v18 = vadd.f32 %v5017_v53, %v2133_v10  ;;  %v427_v53 = vld [vmem:[%s5258_s0 + $0xce8] sm:$0xff]  ;;  %2319 = vmatmul.bf16.gmra.mxu3 %v678_v41 }
 0x37b   :  { %v661_v58 = vpack.c.bf16 %v427_v53, %v418_v13  ;;  %v452_v13 = vld [vmem:[%s5258_s0 + $0xdb0] sm:$0xff] }
 0x37c   :  { %v2399_v55 = vadd.f32 %v2398_v7, %v2266_v18  ;;  %v670_v7 = vpack.c.bf16 %v445_v11, %v436_v33 }
 0x37e   :  { %v2483_v59 = vmax.f32 %v2399_v55, 0.0  ;;  %v2004_v48 = vpop.f32.mrf.mxu1  ;;  %v2403_v29 = vpop.f32.mrf.mxu0 }
 0x37f   :  { %v2134_v42 = vpop.f32.mrf.mxu2  ;;  %v5128_v16 = vpop.f32.mrf.mxu3  ;;  %v2005_v21 = vadd.f32 %v2004_v48, %v4228_v28  ;;  %v442_v28 = vld [vmem:[%s5258_s0 + $0xd60] sm:$0xff] }
 0x380   :  { %2532 = vst [vmem:[%s5259_s3 + $0xd0] sm:$0xff] %v2483_v59  ;;  %v2135_v19 = vadd.f32 %v2134_v42, %v2002_v47 }
 0x381   :  { %2043 = vmatmul.bf16.gmra.mxu1 %v658_v63  ;;  %2442 = vmatmul.bf16.gmra.mxu0 %v661_v58  ;;  %v677_v58 = vpack.c.bf16 %v452_v13, %v452_v13  ;;  %v5293_v13 = vld [vmem:[#allocation14_spill] sm:$0xff] }
 0x382   :  { %v2268_v26 = vadd.f32 %v5024_v1, %v2135_v19  ;;  %v433_v1 = vld [vmem:[%s5258_s0 + $0xd18] sm:$0xff] }
 0x383   :  { %v667_v30 = vpack.c.bf16 %v442_v28, %v433_v1 }
 0x384   :  { %v2401_v31 = vadd.f32 %v2400_v22, %v2268_v26  ;;  %2176 = vmatmul.bf16.gmra.mxu2 %v659_v8 }
 0x386   :  { %v2484_v17 = vmax.f32 %v2401_v31, 0.0  ;;  %v2006_v25 = vpop.f32.mrf.mxu1  ;;  %v2405_v43 = vpop.f32.mrf.mxu0 }
 0x387   :  { %v2137_v45 = vpop.f32.mrf.mxu2  ;;  %v5135_v62 = vpop.f32.mrf.mxu3  ;;  %v2007_v24 = vadd.f32 %v2006_v25, %v4241_v27 }
 0x388   :  { %2533 = vst [vmem:[%s5259_s3 + $0xd8] sm:$0xff] %v2484_v17  ;;  %v2138_v44 = vadd.f32 %v2137_v45, %v2005_v21 }
 0x38a   :  { %v2271_v23 = vadd.f32 %v5055_v4, %v2138_v44  ;;  %v434_v4 = vld [vmem:[%s5258_s0 + $0xd20] sm:$0xff] }
 0x38b   :  { %v668_v37 = vpack.c.bf16 %v443_v40, %v434_v4 }
 0x38c   :  { %v2404_v36 = vadd.f32 %v2403_v29, %v2271_v23 }
 0x38e   :  { %v2485_v5 = vmax.f32 %v2404_v36, 0.0  ;;  %v2009_v2 = vpop.f32.mrf.mxu1  ;;  %v2408_v56 = vpop.f32.mrf.mxu0 }
 0x38f   :  { %v2139_v35 = vpop.f32.mrf.mxu2  ;;  %v5160_v46 = vpop.f32.mrf.mxu3  ;;  %v2010_v3 = vadd.f32 %v2009_v2, %v4260_v49  ;;  %v454_v49 = vld [vmem:[%s5258_s0 + $0xdc0] sm:$0xff] }
 0x390   :  { %2534 = vst [vmem:[%s5259_s3 + $0xe0] sm:$0xff] %v2485_v5  ;;  %v2140_v12 = vadd.f32 %v2139_v35, %v2007_v24  ;;  %v679_v47 = vpack.c.bf16 %v454_v49, %v454_v49 }
 0x391   :  { %2048 = vmatmul.bf16.gmra.mxu1 %v667_v30  ;;  %2447 = vmatmul.bf16.gmra.mxu0 %v670_v7 }
 0x392   :  { %v2273_v14 = vadd.f32 %v5062_v54, %v2140_v12  ;;  %v451_v54 = vld [vmem:[%s5258_s0 + $0xda8] sm:$0xff] }
 0x393   :  { %v676_v59 = vpack.c.bf16 %v451_v54, %v451_v54 }
 0x394   :  { %v2406_v10 = vadd.f32 %v2405_v43, %v2273_v14  ;;  %2181 = vmatmul.bf16.gmra.mxu2 %v668_v37 }
 0x396   :  { %v2486_v27 = vmax.f32 %v2406_v10, 0.0  ;;  %v2011_v51 = vpop.f32.mrf.mxu1  ;;  %v2410_v32 = vpop.f32.mrf.mxu0 }
 0x397   :  { %v2142_v22 = vpop.f32.mrf.mxu2  ;;  %v2287_v41 = vpop.f32.mrf.mxu3  ;;  %v2012_v52 = vadd.f32 %v2011_v51, %v4270_v0 }
 0x398   :  { %2535 = vst [vmem:[%s5259_s3 + $0xe8] sm:$0xff] %v2486_v27  ;;  %v2143_v18 = vadd.f32 %v2142_v22, %v2010_v3  ;;  %v5292_v22 = vld [vmem:[#allocation13_spill] sm:$0xff] }
 0x39a   :  { %v2276_v55 = vadd.f32 %v5093_v15, %v2143_v18 }
 0x39c   :  { %v2409_v60 = vadd.f32 %v2408_v56, %v2276_v55 }
 0x39e   :  { %v2487_v53 = vmax.f32 %v2409_v60, 0.0  ;;  %v2014_v42 = vpop.f32.mrf.mxu1  ;;  %v2413_v63 = vpop.f32.mrf.mxu0 }
 0x39f   :  { %v2144_v50 = vpop.f32.mrf.mxu2  ;;  %v2290_v19 = vpop.f32.mrf.mxu3  ;;  %v2015_v0 = vadd.f32 %v2014_v42, %v4295_v9 }
 0x3a0   :  { %2536 = vst [vmem:[%s5259_s3 + $0xf0] sm:$0xff] %v2487_v53  ;;  %v2145_v15 = vadd.f32 %v2144_v50, %v2012_v52 }
 0x3a1   :  { %2053 = vmatmul.bf16.gmra.mxu1 %v676_v59  ;;  %2452 = vmatmul.bf16.gmra.mxu0 %v679_v47 }
 0x3a2   :  { %v2278_v48 = vadd.f32 %v5100_v34, %v2145_v15 }
 0x3a4   :  { %v2411_v29 = vadd.f32 %v2410_v32, %v2278_v48  ;;  %2186 = vmatmul.bf16.gmra.mxu2 %v677_v58  ;;  %v5294_v58 = vld [vmem:[#allocation9_spill] sm:$0xff] }
 0x3a6   :  { %v2488_v8 = vmax.f32 %v2411_v29, 0.0  ;;  %v2016_v17 = vpop.f32.mrf.mxu1  ;;  %v2415_v21 = vpop.f32.mrf.mxu0 }
 0x3a7   :  { %v2147_v26 = vpop.f32.mrf.mxu2  ;;  %v2292_v45 = vpop.f32.mrf.mxu3  ;;  %v2017_v43 = vadd.f32 %v2016_v17, %v4308_v61 }
 0x3a8   :  { %2537 = vst [vmem:[%s5259_s3 + $0xf8] sm:$0xff] %v2488_v8  ;;  %v2148_v31 = vadd.f32 %v2147_v26, %v2015_v0 }
 0x3aa   :  { %v2281_v44 = vadd.f32 %v5128_v16, %v2148_v31 }
 0x3ac   :  { %v2414_v25 = vadd.f32 %v2413_v63, %v2281_v44  ;;  %v5295_v44 = vld [vmem:[#allocation10_spill] sm:$0xff] }
 0x3ae   :  { %v2489_v34 = vmax.f32 %v2414_v25, 0.0  ;;  %v2019_v1 = vpop.f32.mrf.mxu1  ;;  %v2418_v36 = vpop.f32.mrf.mxu0 }
 0x3af   :  { %v2149_v23 = vpop.f32.mrf.mxu2  ;;  %v2295_v28 = vpop.f32.mrf.mxu3  ;;  %v2020_v40 = vadd.f32 %v2019_v1, %v4333_v20 }
 0x3b0   :  { %2538 = vst [vmem:[%s5259_s3 + $0x100] sm:$0xff] %v2489_v34  ;;  %v2150_v9 = vadd.f32 %v2149_v23, %v2017_v43 }
 0x3b2   :  { %v2283_v33 = vadd.f32 %v5135_v62, %v2150_v9 }
 0x3b4   :  { %v2416_v11 = vadd.f32 %v2415_v21, %v2283_v33 }
 0x3b6   :  { %v2490_v4 = vmax.f32 %v2416_v11, 0.0  ;;  %v2021_v5 = vpop.f32.mrf.mxu1  ;;  %v2420_v24 = vpop.f32.mrf.mxu0  ;;  %v5296_v11 = vld [vmem:[#allocation11_spill] sm:$0xff] }
 0x3b7   :  { %v2152_v16 = vpop.f32.mrf.mxu2  ;;  %v2297_v35 = vpop.f32.mrf.mxu3  ;;  %v2022_v2 = vadd.f32 %v2021_v5, %v4346_v39 }
 0x3b8   :  { %2539 = vst [vmem:[%s5259_s3 + $0x108] sm:$0xff] %v2490_v4  ;;  %v2153_v61 = vadd.f32 %v2152_v16, %v2020_v40 }
 0x3ba   :  { %v2286_v30 = vadd.f32 %v5160_v46, %v2153_v61 }
 0x3bc   :  { %v2419_v7 = vadd.f32 %v2418_v36, %v2286_v30 }
 0x3be   :  { %v2491_v12 = vmax.f32 %v2419_v7, 0.0  ;;  %v2024_v56 = vpop.f32.mrf.mxu1  ;;  %v2423_v37 = vpop.f32.mrf.mxu0 }
 0x3bf   :  { %v2154_v62 = vpop.f32.mrf.mxu2  ;;  %v2300_v14 = vpop.f32.mrf.mxu3  ;;  %v2025_v18 = vadd.f32 %v2024_v56, %v5292_v22  ;;  %v5298_v22 = vld [vmem:[#allocation3_spill] sm:$0xff] }
 0x3c0   :  { %2540 = vst [vmem:[%s5259_s3 + $0x110] sm:$0xff] %v2491_v12  ;;  %v2155_v20 = vadd.f32 %v2154_v62, %v2022_v2  ;;  %v5297_v12 = vld [vmem:[#allocation2_spill] sm:$0xff] }
 0x3c2   :  { %v2288_v10 = vadd.f32 %v2287_v41, %v2155_v20 }
 0x3c4   :  { %v2421_v27 = vadd.f32 %v2420_v24, %v2288_v10 }
 0x3c6   :  { %v2492_v3 = vmax.f32 %v2421_v27, 0.0  ;;  %v2026_v46 = vpop.f32.mrf.mxu1  ;;  %v2425_v32 = vpop.f32.mrf.mxu0 }
 0x3c7   :  { %v2157_v51 = vpop.f32.mrf.mxu2  ;;  %v2302_v55 = vpop.f32.mrf.mxu3  ;;  %v2027_v53 = vadd.f32 %v2026_v46, %v5293_v13 }
 0x3c8   :  { %2541 = vst [vmem:[%s5259_s3 + $0x118] sm:$0xff] %v2492_v3  ;;  %v2158_v39 = vadd.f32 %v2157_v51, %v2025_v18 }
 0x3ca   :  { %v2291_v60 = vadd.f32 %v2290_v19, %v2158_v39 }
 0x3cc   :  { %v2424_v54 = vadd.f32 %v2423_v37, %v2291_v60 }
 0x3ce   :  { %v2493_v49 = vmax.f32 %v2424_v54, 0.0  ;;  %v2029_v50 = vpop.f32.mrf.mxu1  ;;  %v2428_v59 = vpop.f32.mrf.mxu0 }
 0x3cf   :  { %v2159_v52 = vpop.f32.mrf.mxu2  ;;  %v2305_v47 = vpop.f32.mrf.mxu3  ;;  %v2030_v48 = vadd.f32 %v2029_v50, %v5294_v58 }
 0x3d0   :  { %2542 = vst [vmem:[%s5259_s3 + $0x120] sm:$0xff] %v2493_v49  ;;  %v2160_v41 = vadd.f32 %v2159_v52, %v2027_v53 }
 0x3d2   :  { %v2293_v15 = vadd.f32 %v2292_v45, %v2160_v41 }
 0x3d4   :  { %v2426_v42 = vadd.f32 %v2425_v32, %v2293_v15 }
 0x3d6   :  { %v2494_v63 = vmax.f32 %v2426_v42, 0.0  ;;  %v2031_v8 = vpop.f32.mrf.mxu1  ;;  %v2430_v0 = vpop.f32.mrf.mxu0 }
 0x3d7   :  { %v2162_v29 = vpop.f32.mrf.mxu2  ;;  %v2307_v26 = vpop.f32.mrf.mxu3  ;;  %v2032_v25 = vadd.f32 %v2031_v8, %v5295_v44 }
 0x3d8   :  { %2543 = vst [vmem:[%s5259_s3 + $0x128] sm:$0xff] %v2494_v63  ;;  %v2163_v19 = vadd.f32 %v2162_v29, %v2030_v48  ;;  %v5299_v63 = vld [vmem:[#allocation4_spill] sm:$0xff] }
 0x3da   :  { %v2296_v31 = vadd.f32 %v2295_v28, %v2163_v19 }
 0x3dc   :  { %v2429_v17 = vadd.f32 %v2428_v59, %v2296_v31 }
 0x3de   :  { %v2495_v21 = vmax.f32 %v2429_v17, 0.0  ;;  %v2034_v43 = vpop.f32.mrf.mxu1  ;;  %v2433_v23 = vpop.f32.mrf.mxu0  ;;  %v5300_v17 = vld [vmem:[#allocation5_spill] sm:$0xff] }
 0x3df   :  { %v2164_v34 = vpop.f32.mrf.mxu2  ;;  %v2310_v9 = vpop.f32.mrf.mxu3  ;;  %v2035_v4 = vadd.f32 %v2034_v43, %v5296_v11 }
 0x3e0   :  { %2544 = vst [vmem:[%s5259_s3 + $0x130] sm:$0xff] %v2495_v21  ;;  %v2165_v45 = vadd.f32 %v2164_v34, %v2032_v25 }
 0x3e2   :  { %v2298_v1 = vadd.f32 %v2297_v35, %v2165_v45 }
 0x3e4   :  { %v2431_v36 = vadd.f32 %v2430_v0, %v2298_v1  ;;  %v5301_v1 = vld [vmem:[#allocation6_spill] sm:$0xff] }
 0x3e6   :  { %v2496_v33 = vmax.f32 %v2431_v36, 0.0  ;;  %v2036_v16 = vpop.f32.mrf.mxu1  ;;  %v2435_v61 = vpop.f32.mrf.mxu0 }
 0x3e7   :  { %v2167_v40 = vpop.f32.mrf.mxu2  ;;  %v2312_v5 = vpop.f32.mrf.mxu3  ;;  %v2037_v2 = vadd.f32 %v2036_v16, %v5297_v12 }
 0x3e8   :  { %2545 = vst [vmem:[%s5259_s3 + $0x138] sm:$0xff] %v2496_v33  ;;  %v2168_v28 = vadd.f32 %v2167_v40, %v2035_v4 }
 0x3ea   :  { %v2301_v24 = vadd.f32 %v2300_v14, %v2168_v28 }
 0x3ec   :  { %v2434_v30 = vadd.f32 %v2433_v23, %v2301_v24 }
 0x3ee   :  { %v2497_v7 = vmax.f32 %v2434_v30, 0.0  ;;  %v2039_v20 = vpop.f32.mrf.mxu1  ;;  %v2438_v56 = vpop.f32.mrf.mxu0 }
 0x3ef   :  { %v2169_v62 = vpop.f32.mrf.mxu2  ;;  %v2315_v37 = vpop.f32.mrf.mxu3  ;;  %v2040_v18 = vadd.f32 %v2039_v20, %v5298_v22 }
 0x3f0   :  { %2546 = vst [vmem:[%s5259_s3 + $0x140] sm:$0xff] %v2497_v7  ;;  %v2170_v35 = vadd.f32 %v2169_v62, %v2037_v2 }
 0x3f2   :  { %v2303_v10 = vadd.f32 %v2302_v55, %v2170_v35 }
 0x3f4   :  { %v2436_v27 = vadd.f32 %v2435_v61, %v2303_v10 }
 0x3f6   :  { %v2498_v3 = vmax.f32 %v2436_v27, 0.0  ;;  %v2041_v39 = vpop.f32.mrf.mxu1  ;;  %v2440_v46 = vpop.f32.mrf.mxu0 }
 0x3f7   :  { %v2172_v51 = vpop.f32.mrf.mxu2  ;;  %v2317_v32 = vpop.f32.mrf.mxu3  ;;  %v2042_v13 = vadd.f32 %v2041_v39, %v4498_v6 }
 0x3f8   :  { %2547 = vst [vmem:[%s5259_s3 + $0x148] sm:$0xff] %v2498_v3  ;;  %v2173_v14 = vadd.f32 %v2172_v51, %v2040_v18 }
 0x3fa   :  { %v2306_v60 = vadd.f32 %v2305_v47, %v2173_v14 }
 0x3fc   :  { %v2439_v54 = vadd.f32 %v2438_v56, %v2306_v60 }
 0x3fe   :  { %v2499_v49 = vmax.f32 %v2439_v54, 0.0  ;;  %v2044_v52 = vpop.f32.mrf.mxu1  ;;  %v2443_v41 = vpop.f32.mrf.mxu0 }
 0x3ff   :  { %v2174_v53 = vpop.f32.mrf.mxu2  ;;  %v2320_v50 = vpop.f32.mrf.mxu3  ;;  %v2045_v58 = vadd.f32 %v2044_v52, %v5299_v63 }
 0x400   :  { %2548 = vst [vmem:[%s5259_s3 + $0x150] sm:$0xff] %v2499_v49  ;;  %v2175_v55 = vadd.f32 %v2174_v53, %v2042_v13 }
 0x402   :  { %v2308_v59 = vadd.f32 %v2307_v26, %v2175_v55 }
 0x404   :  { %v2441_v15 = vadd.f32 %v2440_v46, %v2308_v59 }
 0x406   :  { %v2500_v42 = vmax.f32 %v2441_v15, 0.0  ;;  %v2046_v47 = vpop.f32.mrf.mxu1  ;;  %v2445_v29 = vpop.f32.mrf.mxu0 }
 0x407   :  { %v2177_v48 = vpop.f32.mrf.mxu2  ;;  %v2322_v19 = vpop.f32.mrf.mxu3  ;;  %v2047_v21 = vadd.f32 %v2046_v47, %v5300_v17 }
 0x408   :  { %2549 = vst [vmem:[%s5259_s3 + $0x158] sm:$0xff] %v2500_v42  ;;  %v2178_v6 = vadd.f32 %v2177_v48, %v2045_v58 }
 0x40a   :  { %v2311_v8 = vadd.f32 %v2310_v9, %v2178_v6 }
 0x40c   :  { %v2444_v0 = vadd.f32 %v2443_v41, %v2311_v8 }
 0x40e   :  { %v2501_v31 = vmax.f32 %v2444_v0, 0.0  ;;  %v2049_v25 = vpop.f32.mrf.mxu1  ;;  %v2448_v34 = vpop.f32.mrf.mxu0 }
 0x40f   :  { %v2179_v44 = vpop.f32.mrf.mxu2  ;;  %v2050_v36 = vadd.f32 %v2049_v25, %v5301_v1 }
 0x410   :  { %2550 = vst [vmem:[%s5259_s3 + $0x160] sm:$0xff] %v2501_v31  ;;  %v2180_v26 = vadd.f32 %v2179_v44, %v2047_v21 }
 0x412   :  { %v2313_v45 = vadd.f32 %v2312_v5, %v2180_v26 }
 0x414   :  { %v2446_v43 = vadd.f32 %v2445_v29, %v2313_v45 }
 0x416   :  { %v2502_v23 = vmax.f32 %v2446_v43, 0.0  ;;  %v2051_v11 = vpop.f32.mrf.mxu1  ;;  %v2450_v4 = vpop.f32.mrf.mxu0 }
 0x417   :  { %v2182_v33 = vpop.f32.mrf.mxu2  ;;  %v2052_v61 = vadd.f32 %v2051_v11, %v4572_v38 }
 0x418   :  { %2551 = vst [vmem:[%s5259_s3 + $0x168] sm:$0xff] %v2502_v23  ;;  %v2183_v9 = vadd.f32 %v2182_v33, %v2050_v36 }
 0x41a   :  { %v2316_v40 = vadd.f32 %v2315_v37, %v2183_v9 }
 0x41c   :  { %v2449_v28 = vadd.f32 %v2448_v34, %v2316_v40 }
 0x41e   :  { %v2503_v16 = vmax.f32 %v2449_v28, 0.0  ;;  %v2054_v30 = vpop.f32.mrf.mxu1  ;;  %v2453_v7 = vpop.f32.mrf.mxu0 }
 0x41f   :  { %v2184_v24 = vpop.f32.mrf.mxu2  ;;  %v2055_v35 = vadd.f32 %v2054_v30, %v4595_v57 }
 0x420   :  { %2552 = vst [vmem:[%s5259_s3 + $0x170] sm:$0xff] %v2503_v16  ;;  %v2185_v5 = vadd.f32 %v2184_v24, %v2052_v61 }
 0x422   :  { %v2318_v12 = vadd.f32 %v2317_v32, %v2185_v5 }
 0x424   :  { %v2451_v2 = vadd.f32 %v2450_v4, %v2318_v12 }
 0x426   :  { %v2504_v62 = vmax.f32 %v2451_v2, 0.0  ;;  %v2056_v38 = vpop.f32.mrf.mxu1  ;;  %v2455_v37 = vpop.f32.mrf.mxu0 }
 0x427   :  { %v2187_v20 = vpop.f32.mrf.mxu2 }
 0x428   :  { %2553 = vst [vmem:[%s5259_s3 + $0x178] sm:$0xff] %v2504_v62  ;;  %v2188_v56 = vadd.f32 %v2187_v20, %v2055_v35 }
 0x42a   :  { %v2321_v10 = vadd.f32 %v2320_v50, %v2188_v56 }
 0x42c   :  { %v2454_v27 = vadd.f32 %v2453_v7, %v2321_v10 }
 0x42e   :  { %v2505_v3 = vmax.f32 %v2454_v27, 0.0 }
 0x42f   :  { %v2189_v22 = vpop.f32.mrf.mxu2 }
 0x430   :  { %2554 = vst [vmem:[%s5259_s3 + $0x180] sm:$0xff] %v2505_v3 }

// kernel: fwd.9
= control target key start
LH: loop header
LB: loop body
LE: loop exit
PB: predicated region body
PF: predicated region fallthrough
CT: control target
= control target key end

     0   :  { %s358_s1 = inlined_call_operand.vmem [shape: bf16[128,256], index: 1, kind: input, shape index: {}]   ;;  %s359_s0 = inlined_call_operand.vmem [shape: f32[8,128], index: 0, kind: input, shape index: {}]   ;;  %s360_s2 = inlined_call_operand.vmem [shape: f32[1,256], index: 2, kind: input, shape index: {}]   ;;  %s361_s3 = inlined_call_operand.vmem [shape: f32[8,256], index: 3, kind: output, shape index: {}]  }
   0x1   :  { %v208_v0 = vld [vmem:[%s358_s1 + $0x70] sm:$0xf]  ;;  %v229_v1 = vld [vmem:[%s358_s1 + $0x74] sm:$0xf0]  ;;  %v228_v2 = vld [vmem:[%s358_s1 + $0x74] sm:$0xf] }
   0x2   :  { %v209_v3 = vor.u32 %v229_v1, %v208_v0  ;;  %v210_v4 = vld [vmem:[%s358_s1 + $0x78] sm:$0xf0]  ;;  %v200_v5 = vld [vmem:[%s358_s1 + $0x60] sm:$0xf]  ;;  %v227_v6 = vld [vmem:[%s358_s1 + $0x64] sm:$0xf0] }
   0x3   :  { %v213_v7 = vor.u32 %v228_v2, %v210_v4  ;;  %v226_v8 = vld [vmem:[%s358_s1 + $0x64] sm:$0xf]  ;;  %v202_v9 = vld [vmem:[%s358_s1 + $0x68] sm:$0xf0]  ;;  %v201_v10 = vor.u32 %v227_v6, %v200_v5  ;;  %v192_v12 = vld [vmem:[%s358_s1 + $0x50] sm:$0xf] }
   0x4   :  { %118 = vmatpush.bf16.msra.mxu0 %v209_v3  ;;  %v205_v11 = vor.u32 %v226_v8, %v202_v9  ;;  %v225_v13 = vld [vmem:[%s358_s1 + $0x54] sm:$0xf0]  ;;  %v224_v14 = vld [vmem:[%s358_s1 + $0x54] sm:$0xf]  ;;  %v194_v15 = vld [vmem:[%s358_s1 + $0x58] sm:$0xf0] }
   0x5   :  { %131 = vmatpush.bf16.msra.mxu1 %v213_v7  ;;  %v193_v16 = vor.u32 %v225_v13, %v192_v12  ;;  %v197_v17 = vor.u32 %v224_v14, %v194_v15  ;;  %v184_v18 = vld [vmem:[%s358_s1 + $0x40] sm:$0xf]  ;;  %v223_v19 = vld [vmem:[%s358_s1 + $0x44] sm:$0xf0]  ;;  %v222_v20 = vld [vmem:[%s358_s1 + $0x44] sm:$0xf] }
   0x6   :  { %v186_v21 = vld [vmem:[%s358_s1 + $0x48] sm:$0xf0]  ;;  %v185_v22 = vor.u32 %v223_v19, %v184_v18  ;;  %v176_v24 = vld [vmem:[%s358_s1 + $0x30] sm:$0xf]  ;;  %v221_v25 = vld [vmem:[%s358_s1 + $0x34] sm:$0xf0] }
   0x7   :  { %v189_v23 = vor.u32 %v222_v20, %v186_v21  ;;  %v220_v26 = vld [vmem:[%s358_s1 + $0x34] sm:$0xf]  ;;  %v178_v27 = vld [vmem:[%s358_s1 + $0x38] sm:$0xf0]  ;;  %v177_v28 = vor.u32 %v221_v25, %v176_v24  ;;  %v168_v30 = vld [vmem:[%s358_s1 + $0x20] sm:$0xf] }
   0x8   :  { %119 = vmatpush.bf16.msra.mxu0 %v201_v10  ;;  %v181_v29 = vor.u32 %v220_v26, %v178_v27  ;;  %v219_v31 = vld [vmem:[%s358_s1 + $0x24] sm:$0xf0]  ;;  %v218_v32 = vld [vmem:[%s358_s1 + $0x24] sm:$0xf]  ;;  %v170_v33 = vld [vmem:[%s358_s1 + $0x28] sm:$0xf0] }
   0x9   :  { %132 = vmatpush.bf16.msra.mxu1 %v205_v11  ;;  %v169_v34 = vor.u32 %v219_v31, %v168_v30  ;;  %v173_v35 = vor.u32 %v218_v32, %v170_v33  ;;  %v160_v36 = vld [vmem:[%s358_s1 + $0x10] sm:$0xf]  ;;  %v217_v37 = vld [vmem:[%s358_s1 + $0x14] sm:$0xf0]  ;;  %v216_v38 = vld [vmem:[%s358_s1 + $0x14] sm:$0xf] }
   0xa   :  { %v162_v39 = vld [vmem:[%s358_s1 + $0x18] sm:$0xf0]  ;;  %v161_v40 = vor.u32 %v217_v37, %v160_v36  ;;  %v152_v42 = vld [vmem:[%s358_s1] sm:$0xf]  ;;  %v215_v43 = vld [vmem:[%s358_s1 + $0x4] sm:$0xf0] }
   0xb   :  { %v165_v41 = vor.u32 %v216_v38, %v162_v39  ;;  %v214_v44 = vld [vmem:[%s358_s1 + $0x4] sm:$0xf]  ;;  %v154_v45 = vld [vmem:[%s358_s1 + $0x8] sm:$0xf0]  ;;  %v153_v46 = vor.u32 %v215_v43, %v152_v42  ;;  %v32_v50 = vld [vmem:[%s360_s2] sm:$0x3] }
   0xc   :  { %120 = vmatpush.bf16.msra.mxu0 %v193_v16  ;;  %v14_v47 = vld [vmem:[%s359_s0] sm:$0xff]  ;;  %v157_v48 = vor.u32 %v214_v44, %v154_v45  ;;  %v34_v51 = vperm.slane %v32_v50, 0  ;;  %v35_v52 = vperm.slane %v32_v50, 1 }
   0xd   :  { %133 = vmatpush.bf16.msra.mxu1 %v197_v17  ;;  %v15_v49 = vpack.c.bf16 %v14_v47, %v14_v47 }
  0x10   :  { %121 = vmatpush.bf16.msra.mxu0 %v185_v22 }
  0x11   :  { %134 = vmatpush.bf16.msra.mxu1 %v189_v23 }
  0x14   :  { %122 = vmatpush.bf16.msra.mxu0 %v177_v28 }
  0x15   :  { %135 = vmatpush.bf16.msra.mxu1 %v181_v29 }
  0x18   :  { %123 = vmatpush.bf16.msra.mxu0 %v169_v34 }
  0x19   :  { %136 = vmatpush.bf16.msra.mxu1 %v173_v35 }
  0x1c   :  { %124 = vmatpush.bf16.msra.mxu0 %v161_v40 }
  0x1d   :  { %137 = vmatpush.bf16.msra.mxu1 %v165_v41 }
  0x20   :  { %125 = vmatpush.bf16.msra.mxu0 %v153_v46 }
  0x21   :  { %138 = vmatpush.bf16.msra.mxu1 %v157_v48 }
  0x23   :  { %126 = vmatmul.bf16.vlgmr.msra.gmra.mxu0 %v15_v49 }
  0x24   :  { %139 = vmatmul.bf16.vlgmr.msra.gmra.mxu1 %v15_v49 }
  0xa0   :  { %v127_v53 = vpop.f32.mrf.mxu0 }
  0xa1   :  { %v128_v54 = vadd.f32 %v127_v53, %v34_v51  ;;  %v140_v55 = vpop.f32.mrf.mxu1 }
  0xa2   :  { %v141_v56 = vadd.f32 %v140_v55, %v35_v52 }
  0xa3   :  { %144 = vst [vmem:[%s361_s3] sm:$0xff] %v128_v54 }
  0xa4   :  { %145 = vst [vmem:[%s361_s3 + $0x8] sm:$0xff] %v141_v56 }
  0xa8   :  { %v129_v57 = vpop.f32.mrf.mxu0 }
  0xa9   :  { %v142_v58 = vpop.f32.mrf.mxu1 }

// kernel: fwd.8
= control target key start
LH: loop header
LB: loop body
LE: loop exit
PB: predicated region body
PF: predicated region fallthrough
CT: control target
= control target key end

     0   :  { %s4170_s1 = inlined_call_operand.vmem [shape: bf16[1152,128], index: 1, kind: input, shape index: {}]   ;;  %s4171_s2 = inlined_call_operand.vmem [shape: f32[1,128], index: 2, kind: input, shape index: {}]   ;;  %s4172_s0 = inlined_call_operand.vmem [shape: f32[288,1152], index: 0, kind: input, shape index: {}]   ;;  %s4173_s3 = inlined_call_operand.vmem [shape: f32[288,128], index: 3, kind: output, shape index: {}]  }
   0x1   :  { %v2342_v0 = vld [vmem:[%s4170_s1 + $0x38] sm:$0xff]  ;;  %v2341_v1 = vld [vmem:[%s4170_s1 + $0x30] sm:$0xff]  ;;  %v2340_v2 = vld [vmem:[%s4170_s1 + $0x28] sm:$0xff] }
   0x2   :  { %2407 = vmatpush.bf16.msra.mxu1 %v2342_v0  ;;  %2408 = vmatpush.bf16.msra.mxu2 %v2342_v0  ;;  %v2339_v3 = vld [vmem:[%s4170_s1 + $0x20] sm:$0xff]  ;;  %v2338_v4 = vld [vmem:[%s4170_s1 + $0x18] sm:$0xff]  ;;  %v2337_v5 = vld [vmem:[%s4170_s1 + $0x10] sm:$0xff] }
   0x3   :  { %1080 = vmatpush.bf16.msra.mxu0 %v2342_v0  ;;  %2409 = vmatpush.bf16.msra.mxu3 %v2342_v0  ;;  %v2336_v6 = vld [vmem:[%s4170_s1 + $0x8] sm:$0xff]  ;;  %v2335_v7 = vld [vmem:[%s4170_s1] sm:$0xff]  ;;  %v104_v8 = vld [vmem:[%s4172_s0 + $0x2d0] sm:$0xff] }
   0x4   :  { %v113_v9 = vld [vmem:[%s4172_s0 + $0x318] sm:$0xff]  ;;  %v194_v10 = vld [vmem:[%s4172_s0 + $0x5a0] sm:$0xff]  ;;  %v203_v11 = vld [vmem:[%s4172_s0 + $0x5e8] sm:$0xff] }
   0x5   :  { %v2358_v12 = vld [vmem:[%s4170_s1 + $0xb8] sm:$0xff]  ;;  %v14_v13 = vld [vmem:[%s4172_s0] sm:$0xff]  ;;  %v23_v14 = vld [vmem:[%s4172_s0 + $0x48] sm:$0xff]  ;;  %v383_v17 = vpack.c.bf16 %v113_v9, %v104_v8  ;;  %v428_v18 = vpack.c.bf16 %v203_v11, %v194_v10 }
   0x6   :  { %2410 = vmatpush.bf16.msra.mxu1 %v2341_v1  ;;  %2411 = vmatpush.bf16.msra.mxu2 %v2341_v1  ;;  %v2350_v15 = vld [vmem:[%s4170_s1 + $0x78] sm:$0xff]  ;;  %v338_v19 = vpack.c.bf16 %v23_v14, %v14_v13  ;;  %v284_v20 = vld [vmem:[%s4172_s0 + $0x870] sm:$0xff]  ;;  %v2356_v27 = vld [vmem:[%s4170_s1 + $0xa8] sm:$0xff] }
   0x7   :  { %1081 = vmatpush.bf16.msra.mxu0 %v2341_v1  ;;  %2412 = vmatpush.bf16.msra.mxu3 %v2341_v1  ;;  %v2374_v16 = vld [vmem:[%s4170_s1 + $0x138] sm:$0xff]  ;;  %v2357_v22 = vld [vmem:[%s4170_s1 + $0xb0] sm:$0xff]  ;;  %v2348_v28 = vld [vmem:[%s4170_s1 + $0x68] sm:$0xff] }
   0x8   :  { %v293_v21 = vld [vmem:[%s4172_s0 + $0x8b8] sm:$0xff]  ;;  %v2349_v23 = vld [vmem:[%s4170_s1 + $0x70] sm:$0xff]  ;;  %v2372_v29 = vld [vmem:[%s4170_s1 + $0x128] sm:$0xff] }
   0x9   :  { %v2373_v24 = vld [vmem:[%s4170_s1 + $0x130] sm:$0xff]  ;;  %v473_v25 = vpack.c.bf16 %v293_v21, %v284_v20  ;;  %v2366_v26 = vld [vmem:[%s4170_s1 + $0xf8] sm:$0xff]  ;;  %v2355_v31 = vld [vmem:[%s4170_s1 + $0xa0] sm:$0xff] }
   0xa   :  { %2413 = vmatpush.bf16.msra.mxu1 %v2340_v2  ;;  %2414 = vmatpush.bf16.msra.mxu2 %v2340_v2  ;;  %v2365_v30 = vld [vmem:[%s4170_s1 + $0xf0] sm:$0xff]  ;;  %v2347_v32 = vld [vmem:[%s4170_s1 + $0x60] sm:$0xff]  ;;  %v131_v35 = vld [vmem:[%s4172_s0 + $0x3a8] sm:$0xff] }
   0xb   :  { %1082 = vmatpush.bf16.msra.mxu0 %v2340_v2  ;;  %2415 = vmatpush.bf16.msra.mxu3 %v2340_v2  ;;  %v2371_v33 = vld [vmem:[%s4170_s1 + $0x120] sm:$0xff]  ;;  %v212_v36 = vld [vmem:[%s4172_s0 + $0x630] sm:$0xff]  ;;  %v221_v37 = vld [vmem:[%s4172_s0 + $0x678] sm:$0xff] }
   0xc   :  { %v122_v34 = vld [vmem:[%s4172_s0 + $0x360] sm:$0xff]  ;;  %v2364_v38 = vld [vmem:[%s4170_s1 + $0xe8] sm:$0xff]  ;;  %v32_v39 = vld [vmem:[%s4172_s0 + $0x90] sm:$0xff]  ;;  %v437_v44 = vpack.c.bf16 %v221_v37, %v212_v36 }
   0xd   :  { %v41_v40 = vld [vmem:[%s4172_s0 + $0xd8] sm:$0xff]  ;;  %v392_v43 = vpack.c.bf16 %v131_v35, %v122_v34  ;;  %v302_v46 = vld [vmem:[%s4172_s0 + $0x900] sm:$0xff]  ;;  %v311_v47 = vld [vmem:[%s4172_s0 + $0x948] sm:$0xff] }
   0xe   :  { %2416 = vmatpush.bf16.msra.mxu1 %v2339_v3  ;;  %2417 = vmatpush.bf16.msra.mxu2 %v2339_v3  ;;  %v2354_v41 = vld [vmem:[%s4170_s1 + $0x98] sm:$0xff]  ;;  %v347_v45 = vpack.c.bf16 %v41_v40, %v32_v39  ;;  %v482_v48 = vpack.c.bf16 %v311_v47, %v302_v46  ;;  %v2353_v49 = vld [vmem:[%s4170_s1 + $0x90] sm:$0xff]  ;;  %v2363_v51 = vld [vmem:[%s4170_s1 + $0xe0] sm:$0xff] }
   0xf   :  { %1083 = vmatpush.bf16.msra.mxu0 %v2339_v3  ;;  %2418 = vmatpush.bf16.msra.mxu3 %v2339_v3  ;;  %v2346_v42 = vld [vmem:[%s4170_s1 + $0x58] sm:$0xff]  ;;  %v2345_v52 = vld [vmem:[%s4170_s1 + $0x50] sm:$0xff]  ;;  %v2352_v53 = vld [vmem:[%s4170_s1 + $0x88] sm:$0xff] }
  0x10   :  { %v2370_v50 = vld [vmem:[%s4170_s1 + $0x118] sm:$0xff]  ;;  %v2369_v54 = vld [vmem:[%s4170_s1 + $0x110] sm:$0xff]  ;;  %v230_v58 = vld [vmem:[%s4172_s0 + $0x6c0] sm:$0xff] }
  0x11   :  { %v2362_v55 = vld [vmem:[%s4170_s1 + $0xd8] sm:$0xff]  ;;  %v140_v56 = vld [vmem:[%s4172_s0 + $0x3f0] sm:$0xff]  ;;  %v239_v59 = vld [vmem:[%s4172_s0 + $0x708] sm:$0xff] }
  0x12   :  { %2419 = vmatpush.bf16.msra.mxu1 %v2338_v4  ;;  %2420 = vmatpush.bf16.msra.mxu2 %v2338_v4  ;;  %v149_v57 = vld [vmem:[%s4172_s0 + $0x438] sm:$0xff]  ;;  %v2361_v60 = vld [vmem:[%s4170_s1 + $0xd0] sm:$0xff]  ;;  %v50_v61 = vld [vmem:[%s4172_s0 + $0x120] sm:$0xff]  ;;  %v446_v0 = vpack.c.bf16 %v239_v59, %v230_v58 }
  0x13   :  { %1084 = vmatpush.bf16.msra.mxu0 %v2338_v4  ;;  %2421 = vmatpush.bf16.msra.mxu3 %v2338_v4  ;;  %v59_v62 = vld [vmem:[%s4172_s0 + $0x168] sm:$0xff]  ;;  %v401_v63 = vpack.c.bf16 %v149_v57, %v140_v56  ;;  %v320_v2 = vld [vmem:[%s4172_s0 + $0x990] sm:$0xff]  ;;  %v329_v3 = vld [vmem:[%s4172_s0 + $0x9d8] sm:$0xff] }
  0x14   :  { %v356_v1 = vpack.c.bf16 %v59_v62, %v50_v61  ;;  %v491_v4 = vpack.c.bf16 %v329_v3, %v320_v2  ;;  %v2368_v8 = vld [vmem:[%s4170_s1 + $0x108] sm:$0xff]  ;;  %v2343_v9 = vld [vmem:[%s4170_s1 + $0x40] sm:$0xff]  ;;  %v248_v14 = vld [vmem:[%s4172_s0 + $0x750] sm:$0xff] }
  0x15   :  { %v2359_v10 = vld [vmem:[%s4170_s1 + $0xc0] sm:$0xff]  ;;  %v167_v13 = vld [vmem:[%s4172_s0 + $0x4c8] sm:$0xff]  ;;  %v17_v21 = vld [vmem:[%s4172_s0 + $0x18] sm:$0xff] }
  0x16   :  { %2422 = vmatpush.bf16.msra.mxu1 %v2337_v5  ;;  %2423 = vmatpush.bf16.msra.mxu2 %v2337_v5  ;;  %v2367_v11 = vld [vmem:[%s4170_s1 + $0x100] sm:$0xff]  ;;  %v35_v37 = vld [vmem:[%s4172_s0 + $0xa8] sm:$0xff]  ;;  %v36_v59 = vld [vmem:[%s4172_s0 + $0xb0] sm:$0xff] }
  0x17   :  { %1085 = vmatpush.bf16.msra.mxu0 %v2337_v5  ;;  %2424 = vmatpush.bf16.msra.mxu3 %v2337_v5  ;;  %v2344_v5 = vld [vmem:[%s4170_s1 + $0x48] sm:$0xff]  ;;  %v42_v56 = vld [vmem:[%s4172_s0 + $0xe0] sm:$0xff]  ;;  %v2405_v2 = vld [vmem:[%s4170_s1 + $0x230] sm:$0xff] }
  0x18   :  { %v15_v40 = vld [vmem:[%s4172_s0 + $0x8] sm:$0xff]  ;;  %v34_v57 = vld [vmem:[%s4172_s0 + $0xa0] sm:$0xff] }
  0x19   :  { %v43_v58 = vld [vmem:[%s4172_s0 + $0xe8] sm:$0xff] }
  0x1a   :  { %2425 = vmatpush.bf16.msra.mxu1 %v2336_v6  ;;  %2426 = vmatpush.bf16.msra.mxu2 %v2336_v6  ;;  %v349_v62 = vpack.c.bf16 %v43_v58, %v34_v57  ;;  %v105_v58 = vld [vmem:[%s4172_s0 + $0x2d8] sm:$0xff] }
  0x1b   :  { %1086 = vmatpush.bf16.msra.mxu0 %v2336_v6  ;;  %2427 = vmatpush.bf16.msra.mxu3 %v2336_v6  ;;  %v2360_v6 = vld [vmem:[%s4170_s1 + $0xc8] sm:$0xff] }
  0x1e   :  { %2428 = vmatpush.bf16.msra.mxu1 %v2335_v7  ;;  %2429 = vmatpush.bf16.msra.mxu2 %v2335_v7 }
  0x1f   :  { %1087 = vmatpush.bf16.msra.mxu0 %v2335_v7  ;;  %2430 = vmatpush.bf16.msra.mxu3 %v2335_v7  ;;  %v2351_v7 = vld [vmem:[%s4170_s1 + $0x80] sm:$0xff] }
  0x21   :  { %1113 = vmatmul.bf16.vlgmr.msra.gmra.mxu1 %v383_v17  ;;  %1138 = vmatmul.bf16.vlgmr.msra.gmra.mxu2 %v428_v18  ;;  %v77_v17 = vld [vmem:[%s4172_s0 + $0x1f8] sm:$0xff] }
  0x22   :  { %1278 = vmatpush.bf16.msrb.mxu2 %v2358_v12  ;;  %1179 = vmatpush.bf16.msrb.mxu1 %v2350_v15  ;;  %v158_v12 = vld [vmem:[%s4172_s0 + $0x480] sm:$0xff]  ;;  %v257_v15 = vld [vmem:[%s4172_s0 + $0x798] sm:$0xff] }
  0x23   :  { %1476 = vmatpush.bf16.msrb.mxu0 %v2374_v16  ;;  %1163 = vmatmul.bf16.vlgmr.msra.gmra.mxu3 %v473_v25  ;;  %v68_v16 = vld [vmem:[%s4172_s0 + $0x1b0] sm:$0xff]  ;;  %v410_v18 = vpack.c.bf16 %v167_v13, %v158_v12  ;;  %v2398_v25 = vld [vmem:[%s4170_s1 + $0x1f8] sm:$0xff] }
  0x24   :  { %1088 = vmatmul.bf16.vlgmr.msra.gmra.mxu0 %v338_v19  ;;  %1377 = vmatpush.bf16.msrb.mxu3 %v2366_v26  ;;  %v455_v19 = vpack.c.bf16 %v257_v15, %v248_v14  ;;  %v365_v20 = vpack.c.bf16 %v77_v17, %v68_v16  ;;  %v2382_v26 = vld [vmem:[%s4170_s1 + $0x178] sm:$0xff]  ;;  %v98_v14 = vld [vmem:[%s4172_s0 + $0x2a0] sm:$0xff]  ;;  %v2388_v16 = vld [vmem:[%s4170_s1 + $0x1a8] sm:$0xff] }
  0x25   :  { %v89_v13 = vld [vmem:[%s4172_s0 + $0x258] sm:$0xff] }
  0x26   :  { %1279 = vmatpush.bf16.msrb.mxu2 %v2357_v22  ;;  %1180 = vmatpush.bf16.msrb.mxu1 %v2349_v23  ;;  %v26_v22 = vld [vmem:[%s4172_s0 + $0x60] sm:$0xff]  ;;  %v377_v15 = vpack.c.bf16 %v98_v14, %v89_v13  ;;  %v69_v17 = vld [vmem:[%s4172_s0 + $0x1b8] sm:$0xff] }
  0x27   :  { %1477 = vmatpush.bf16.msrb.mxu0 %v2373_v24  ;;  %v341_v23 = vpack.c.bf16 %v26_v22, %v17_v21  ;;  %v2390_v24 = vld [vmem:[%s4170_s1 + $0x1b8] sm:$0xff]  ;;  %v79_v21 = vld [vmem:[%s4172_s0 + $0x208] sm:$0xff]  ;;  %v72_v22 = vld [vmem:[%s4172_s0 + $0x1d0] sm:$0xff] }
  0x28   :  { %1378 = vmatpush.bf16.msrb.mxu3 %v2365_v30  ;;  %v266_v30 = vld [vmem:[%s4172_s0 + $0x7e0] sm:$0xff] }
  0x2a   :  { %1280 = vmatpush.bf16.msrb.mxu2 %v2356_v27  ;;  %1181 = vmatpush.bf16.msrb.mxu1 %v2348_v28  ;;  %v2406_v27 = vld [vmem:[%s4170_s1 + $0x238] sm:$0xff]  ;;  %v176_v28 = vld [vmem:[%s4172_s0 + $0x510] sm:$0xff] }
  0x2b   :  { %1478 = vmatpush.bf16.msrb.mxu0 %v2372_v29  ;;  %v185_v29 = vld [vmem:[%s4172_s0 + $0x558] sm:$0xff] }
  0x2c   :  { %1379 = vmatpush.bf16.msrb.mxu3 %v2364_v38  ;;  %v419_v34 = vpack.c.bf16 %v185_v29, %v176_v28  ;;  %v44_v38 = vld [vmem:[%s4172_s0 + $0xf0] sm:$0xff]  ;;  %v107_v29 = vld [vmem:[%s4172_s0 + $0x2e8] sm:$0xff] }
  0x2d   :  { %v350_v39 = vpack.c.bf16 %v44_v38, %v35_v37  ;;  %v87_v38 = vld [vmem:[%s4172_s0 + $0x248] sm:$0xff] }
  0x2e   :  { %1281 = vmatpush.bf16.msrb.mxu2 %v2355_v31  ;;  %1182 = vmatpush.bf16.msrb.mxu1 %v2347_v32  ;;  %v275_v31 = vld [vmem:[%s4172_s0 + $0x828] sm:$0xff]  ;;  %v86_v32 = vld [vmem:[%s4172_s0 + $0x240] sm:$0xff] }
  0x2f   :  { %1479 = vmatpush.bf16.msrb.mxu0 %v2371_v33  ;;  %v95_v33 = vld [vmem:[%s4172_s0 + $0x288] sm:$0xff]  ;;  %v464_v35 = vpack.c.bf16 %v275_v31, %v266_v30  ;;  %v116_v30 = vld [vmem:[%s4172_s0 + $0x330] sm:$0xff] }
  0x30   :  { %1380 = vmatpush.bf16.msrb.mxu3 %v2363_v51  ;;  %v374_v36 = vpack.c.bf16 %v95_v33, %v86_v32  ;;  %v386_v32 = vpack.c.bf16 %v116_v30, %v107_v29  ;;  %v2404_v33 = vld [vmem:[%s4170_s1 + $0x228] sm:$0xff]  ;;  %v161_v30 = vld [vmem:[%s4172_s0 + $0x498] sm:$0xff] }
  0x31   :  { %1118 = vmatmul.bf16.gmra.mxu1 %v392_v43  ;;  %1143 = vmatmul.bf16.gmra.mxu2 %v437_v44  ;;  %v25_v43 = vld [vmem:[%s4172_s0 + $0x58] sm:$0xff]  ;;  %v18_v44 = vld [vmem:[%s4172_s0 + $0x20] sm:$0xff] }
  0x32   :  { %1282 = vmatpush.bf16.msrb.mxu2 %v2354_v41  ;;  %1183 = vmatpush.bf16.msrb.mxu1 %v2346_v42  ;;  %v24_v41 = vld [vmem:[%s4172_s0 + $0x50] sm:$0xff] }
  0x33   :  { %1480 = vmatpush.bf16.msrb.mxu0 %v2370_v50  ;;  %1168 = vmatmul.bf16.gmra.mxu3 %v482_v48  ;;  %v16_v42 = vld [vmem:[%s4172_s0 + $0x10] sm:$0xff]  ;;  %v339_v46 = vpack.c.bf16 %v24_v41, %v15_v40  ;;  %v62_v50 = vld [vmem:[%s4172_s0 + $0x180] sm:$0xff]  ;;  %v97_v41 = vld [vmem:[%s4172_s0 + $0x298] sm:$0xff] }
  0x34   :  { %1093 = vmatmul.bf16.gmra.mxu0 %v347_v45  ;;  %1381 = vmatpush.bf16.msrb.mxu3 %v2362_v55  ;;  %v27_v45 = vld [vmem:[%s4172_s0 + $0x68] sm:$0xff]  ;;  %v340_v47 = vpack.c.bf16 %v25_v43, %v16_v42  ;;  %v33_v55 = vld [vmem:[%s4172_s0 + $0x98] sm:$0xff]  ;;  %v88_v40 = vld [vmem:[%s4172_s0 + $0x250] sm:$0xff] }
  0x35   :  { %v342_v48 = vpack.c.bf16 %v27_v45, %v18_v44  ;;  %v348_v61 = vpack.c.bf16 %v42_v56, %v33_v55  ;;  %v90_v42 = vld [vmem:[%s4172_s0 + $0x260] sm:$0xff]  ;;  %v99_v43 = vld [vmem:[%s4172_s0 + $0x2a8] sm:$0xff] }
  0x36   :  { %1283 = vmatpush.bf16.msrb.mxu2 %v2353_v49  ;;  %1184 = vmatpush.bf16.msrb.mxu1 %v2345_v52  ;;  %v53_v49 = vld [vmem:[%s4172_s0 + $0x138] sm:$0xff]  ;;  %v2389_v52 = vld [vmem:[%s4170_s1 + $0x1b0] sm:$0xff] }
  0x37   :  { %1481 = vmatpush.bf16.msrb.mxu0 %v2369_v54  ;;  %v359_v51 = vpack.c.bf16 %v62_v50, %v53_v49  ;;  %v2381_v54 = vld [vmem:[%s4170_s1 + $0x170] sm:$0xff]  ;;  %v125_v49 = vld [vmem:[%s4172_s0 + $0x378] sm:$0xff]  ;;  %v134_v50 = vld [vmem:[%s4172_s0 + $0x3c0] sm:$0xff] }
  0x38   :  { %1382 = vmatpush.bf16.msrb.mxu3 %v2361_v60  ;;  %v45_v60 = vld [vmem:[%s4172_s0 + $0xf8] sm:$0xff] }
  0x3a   :  { %1284 = vmatpush.bf16.msrb.mxu2 %v2352_v53  ;;  %1185 = vmatpush.bf16.msrb.mxu1 %v2344_v5  ;;  %v2397_v53 = vld [vmem:[%s4170_s1 + $0x1f0] sm:$0xff] }
  0x3b   :  { %1482 = vmatpush.bf16.msrb.mxu0 %v2368_v8  ;;  %v60_v5 = vld [vmem:[%s4172_s0 + $0x170] sm:$0xff]  ;;  %v54_v8 = vld [vmem:[%s4172_s0 + $0x140] sm:$0xff] }
  0x3c   :  { %1383 = vmatpush.bf16.msrb.mxu3 %v2360_v6  ;;  %v52_v6 = vld [vmem:[%s4172_s0 + $0x130] sm:$0xff] }
  0x3e   :  { %1285 = vmatpush.bf16.msrb.mxu2 %v2351_v7  ;;  %1186 = vmatpush.bf16.msrb.mxu1 %v2343_v9  ;;  %v61_v7 = vld [vmem:[%s4172_s0 + $0x178] sm:$0xff]  ;;  %v63_v9 = vld [vmem:[%s4172_s0 + $0x188] sm:$0xff] }
  0x3f   :  { %1483 = vmatpush.bf16.msrb.mxu0 %v2367_v11  ;;  %v358_v11 = vpack.c.bf16 %v61_v7, %v52_v6  ;;  %v360_v12 = vpack.c.bf16 %v63_v9, %v54_v8  ;;  %v143_v6 = vld [vmem:[%s4172_s0 + $0x408] sm:$0xff]  ;;  %v152_v7 = vld [vmem:[%s4172_s0 + $0x450] sm:$0xff]  ;;  %v2395_v9 = vld [vmem:[%s4170_s1 + $0x1e0] sm:$0xff] }
  0x40   :  { %1384 = vmatpush.bf16.msrb.mxu3 %v2359_v10 }
  0x41   :  { %1123 = vmatmul.bf16.gmra.mxu1 %v401_v63  ;;  %1148 = vmatmul.bf16.gmra.mxu2 %v446_v0  ;;  %v351_v63 = vpack.c.bf16 %v45_v60, %v36_v59  ;;  %v71_v0 = vld [vmem:[%s4172_s0 + $0x1c8] sm:$0xff]  ;;  %v114_v59 = vld [vmem:[%s4172_s0 + $0x320] sm:$0xff] }
  0x42   :  { %1674 = vmatpush.bf16.msra.mxu2 %v2390_v24  ;;  %1575 = vmatpush.bf16.msra.mxu1 %v2382_v26  ;;  %v2380_v26 = vld [vmem:[%s4170_s1 + $0x168] sm:$0xff]  ;;  %v106_v60 = vld [vmem:[%s4172_s0 + $0x2e0] sm:$0xff] }
  0x43   :  { %1173 = vmatmul.bf16.gmra.mxu3 %v491_v4  ;;  %1872 = vmatpush.bf16.msra.mxu0 %v2406_v27  ;;  %v51_v4 = vld [vmem:[%s4172_s0 + $0x128] sm:$0xff] }
  0x44   :  { %1098 = vmatmul.bf16.gmra.mxu0 %v356_v1  ;;  %1773 = vmatpush.bf16.msra.mxu3 %v2398_v25  ;;  %v80_v1 = vld [vmem:[%s4172_s0 + $0x210] sm:$0xff]  ;;  %v357_v10 = vpack.c.bf16 %v60_v5, %v51_v4 }
  0x45   :  { %v368_v3 = vpack.c.bf16 %v80_v1, %v71_v0  ;;  %v384_v1 = vpack.c.bf16 %v114_v59, %v105_v58 }
  0x46   :  { %1675 = vmatpush.bf16.msra.mxu2 %v2389_v52  ;;  %1576 = vmatpush.bf16.msra.mxu1 %v2381_v54 }
  0x47   :  { %1873 = vmatpush.bf16.msra.mxu0 %v2405_v2 }
  0x48   :  { %1774 = vmatpush.bf16.msra.mxu3 %v2397_v53  ;;  %v395_v53 = vpack.c.bf16 %v134_v50, %v125_v49  ;;  %v151_v49 = vld [vmem:[%s4172_s0 + $0x448] sm:$0xff]  ;;  %v144_v50 = vld [vmem:[%s4172_s0 + $0x410] sm:$0xff] }
  0x4a   :  { %1676 = vmatpush.bf16.msra.mxu2 %v2388_v16  ;;  %1577 = vmatpush.bf16.msra.mxu1 %v2380_v26  ;;  %v2403_v16 = vld [vmem:[%s4170_s1 + $0x220] sm:$0xff] }
  0x4b   :  { %1874 = vmatpush.bf16.msra.mxu0 %v2404_v33 }
  0x4f   :  { %1875 = vmatpush.bf16.msra.mxu0 %v2403_v16  ;;  %v2378_v16 = vld [vmem:[%s4170_s1 + $0x158] sm:$0xff] }
  0x51   :  { %1128 = vmatmul.bf16.gmra.mxu1 %v410_v18  ;;  %1153 = vmatmul.bf16.gmra.mxu2 %v455_v19  ;;  %v2396_v18 = vld [vmem:[%s4170_s1 + $0x1e8] sm:$0xff]  ;;  %v78_v19 = vld [vmem:[%s4172_s0 + $0x200] sm:$0xff] }
  0x52   :  { %1775 = vmatpush.bf16.msra.mxu3 %v2396_v18  ;;  %v366_v24 = vpack.c.bf16 %v78_v19, %v69_v17  ;;  %v123_v18 = vld [vmem:[%s4172_s0 + $0x368] sm:$0xff]  ;;  %v132_v19 = vld [vmem:[%s4172_s0 + $0x3b0] sm:$0xff] }
  0x53   :  { %1385 = vmatmul.bf16.vlgmr.msrb.gmra.mxu3 %v341_v23  ;;  %v81_v23 = vld [vmem:[%s4172_s0 + $0x218] sm:$0xff] }
  0x54   :  { %1103 = vmatmul.bf16.gmra.mxu0 %v365_v20  ;;  %v70_v20 = vld [vmem:[%s4172_s0 + $0x1c0] sm:$0xff]  ;;  %v369_v28 = vpack.c.bf16 %v81_v23, %v72_v22  ;;  %v135_v23 = vld [vmem:[%s4172_s0 + $0x3c8] sm:$0xff] }
  0x55   :  { %v367_v25 = vpack.c.bf16 %v79_v21, %v70_v20  ;;  %v124_v20 = vld [vmem:[%s4172_s0 + $0x370] sm:$0xff]  ;;  %v133_v21 = vld [vmem:[%s4172_s0 + $0x3b8] sm:$0xff]  ;;  %v126_v22 = vld [vmem:[%s4172_s0 + $0x380] sm:$0xff] }
  0x56   :  { %1776 = vmatpush.bf16.msra.mxu3 %v2395_v9  ;;  %v394_v26 = vpack.c.bf16 %v133_v21, %v124_v20  ;;  %v396_v29 = vpack.c.bf16 %v135_v23, %v126_v22  ;;  %v159_v20 = vld [vmem:[%s4172_s0 + $0x488] sm:$0xff]  ;;  %v168_v21 = vld [vmem:[%s4172_s0 + $0x4d0] sm:$0xff]  ;;  %v169_v23 = vld [vmem:[%s4172_s0 + $0x4d8] sm:$0xff] }
  0x57   :  { %v160_v22 = vld [vmem:[%s4172_s0 + $0x490] sm:$0xff] }
  0x61   :  { %1133 = vmatmul.bf16.gmra.mxu1 %v419_v34  ;;  %1158 = vmatmul.bf16.gmra.mxu2 %v464_v35 }
  0x63   :  { %1390 = vmatmul.bf16.gmra.mxu3 %v350_v39  ;;  %v96_v39 = vld [vmem:[%s4172_s0 + $0x290] sm:$0xff] }
  0x64   :  { %1108 = vmatmul.bf16.gmra.mxu0 %v374_v36  ;;  %v375_v45 = vpack.c.bf16 %v96_v39, %v87_v38 }
  0x71   :  { %1187 = vmatmul.bf16.vlgmr.msrb.gmra.mxu1 %v339_v46  ;;  %1286 = vmatmul.bf16.vlgmr.msrb.gmra.mxu2 %v340_v47  ;;  %v376_v46 = vpack.c.bf16 %v97_v41, %v88_v40 }
  0x73   :  { %1395 = vmatmul.bf16.gmra.mxu3 %v359_v51 }
  0x74   :  { %1484 = vmatmul.bf16.vlgmr.msrb.gmra.mxu0 %v342_v48  ;;  %v378_v48 = vpack.c.bf16 %v99_v43, %v90_v42 }
  0x81   :  { %1192 = vmatmul.bf16.gmra.mxu1 %v348_v61  ;;  %1291 = vmatmul.bf16.gmra.mxu2 %v349_v62  ;;  %v115_v61 = vld [vmem:[%s4172_s0 + $0x328] sm:$0xff]  ;;  %v108_v62 = vld [vmem:[%s4172_s0 + $0x2f0] sm:$0xff] }
  0x82   :  { %v385_v2 = vpack.c.bf16 %v115_v61, %v106_v60 }
  0x83   :  { %1400 = vmatmul.bf16.gmra.mxu3 %v368_v3  ;;  %v2387_v3 = vld [vmem:[%s4170_s1 + $0x1a0] sm:$0xff] }
  0x84   :  { %1489 = vmatmul.bf16.gmra.mxu0 %v351_v63  ;;  %v117_v63 = vld [vmem:[%s4172_s0 + $0x338] sm:$0xff]  ;;  %1677 = vmatpush.bf16.msra.mxu2 %v2387_v3 }
  0x85   :  { %v387_v5 = vpack.c.bf16 %v117_v63, %v108_v62  ;;  %v179_v63 = vld [vmem:[%s4172_s0 + $0x528] sm:$0xff] }
  0x91   :  { %1197 = vmatmul.bf16.gmra.mxu1 %v357_v10  ;;  %1296 = vmatmul.bf16.gmra.mxu2 %v358_v11  ;;  %v404_v11 = vpack.c.bf16 %v152_v7, %v143_v6  ;;  %v2386_v6 = vld [vmem:[%s4170_s1 + $0x198] sm:$0xff] }
  0x92   :  { %v2394_v7 = vld [vmem:[%s4170_s1 + $0x1d8] sm:$0xff]  ;;  %1678 = vmatpush.bf16.msra.mxu2 %v2386_v6 }
  0x93   :  { %1405 = vmatmul.bf16.gmra.mxu3 %v377_v15 }
  0x94   :  { %1494 = vmatmul.bf16.gmra.mxu0 %v360_v12  ;;  %v2379_v12 = vld [vmem:[%s4170_s1 + $0x160] sm:$0xff]  ;;  %1777 = vmatpush.bf16.msra.mxu3 %v2394_v7 }
  0x95   :  { %1578 = vmatpush.bf16.msra.mxu1 %v2379_v12 }
  0x99   :  { %1579 = vmatpush.bf16.msra.mxu1 %v2378_v16 }
  0x9e   :  { %v2816_v27 = vpop.f32.mrf.mxu1 }
  0xa1   :  { %v2824_v31 = vpop.f32.mrf.mxu0  ;;  %1202 = vmatmul.bf16.gmra.mxu1 %v366_v24  ;;  %1301 = vmatmul.bf16.gmra.mxu2 %v367_v25  ;;  %v393_v25 = vpack.c.bf16 %v132_v19, %v123_v18  ;;  %v2402_v19 = vld [vmem:[%s4170_s1 + $0x218] sm:$0xff] }
  0xa2   :  { %1876 = vmatpush.bf16.msra.mxu0 %v2402_v19 }
  0xa3   :  { %1410 = vmatmul.bf16.gmra.mxu3 %v386_v32  ;;  %v170_v32 = vld [vmem:[%s4172_s0 + $0x4e0] sm:$0xff] }
  0xa4   :  { %1499 = vmatmul.bf16.gmra.mxu0 %v369_v28  ;;  %v2829_v34 = vpop.f32.mrf.mxu2  ;;  %v413_v39 = vpack.c.bf16 %v170_v32, %v161_v30 }
  0xa6   :  { %v2831_v35 = vpop.f32.mrf.mxu1  ;;  %v2835_v37 = vpop.f32.mrf.mxu3 }
  0xa9   :  { %v2833_v36 = vpop.f32.mrf.mxu0 }
  0xac   :  { %v2855_v44 = vpop.f32.mrf.mxu2 }
  0xae   :  { %v2857_v47 = vpop.f32.mrf.mxu1  ;;  %v2867_v52 = vpop.f32.mrf.mxu3 }
  0xb1   :  { %v2865_v51 = vpop.f32.mrf.mxu0  ;;  %1207 = vmatmul.bf16.gmra.mxu1 %v375_v45  ;;  %1306 = vmatmul.bf16.gmra.mxu2 %v376_v46  ;;  %v141_v45 = vld [vmem:[%s4172_s0 + $0x3f8] sm:$0xff]  ;;  %v150_v46 = vld [vmem:[%s4172_s0 + $0x440] sm:$0xff] }
  0xb2   :  { %v402_v59 = vpack.c.bf16 %v150_v46, %v141_v45  ;;  %v412_v45 = vpack.c.bf16 %v169_v23, %v160_v22  ;;  %v186_v22 = vld [vmem:[%s4172_s0 + $0x560] sm:$0xff]  ;;  %v180_v23 = vld [vmem:[%s4172_s0 + $0x530] sm:$0xff] }
  0xb3   :  { %1415 = vmatmul.bf16.gmra.mxu3 %v395_v53  ;;  %v153_v53 = vld [vmem:[%s4172_s0 + $0x458] sm:$0xff] }
  0xb4   :  { %1504 = vmatmul.bf16.gmra.mxu0 %v378_v48  ;;  %v2869_v54 = vpop.f32.mrf.mxu2  ;;  %v142_v48 = vld [vmem:[%s4172_s0 + $0x400] sm:$0xff]  ;;  %v405_v62 = vpack.c.bf16 %v153_v53, %v144_v50 }
  0xb5   :  { %v403_v60 = vpack.c.bf16 %v151_v49, %v142_v48  ;;  %v197_v49 = vld [vmem:[%s4172_s0 + $0x5b8] sm:$0xff]  ;;  %v206_v50 = vld [vmem:[%s4172_s0 + $0x600] sm:$0xff] }
  0xb6   :  { %v2871_v55 = vpop.f32.mrf.mxu1  ;;  %v2875_v57 = vpop.f32.mrf.mxu3 }
  0xb9   :  { %v2873_v56 = vpop.f32.mrf.mxu0 }
  0xbc   :  { %v2895_v0 = vpop.f32.mrf.mxu2 }
  0xbe   :  { %v2900_v4 = vpop.f32.mrf.mxu1  ;;  %v2913_v10 = vpop.f32.mrf.mxu3 }
  0xc1   :  { %v2908_v8 = vpop.f32.mrf.mxu0  ;;  %1212 = vmatmul.bf16.gmra.mxu1 %v384_v1  ;;  %1311 = vmatmul.bf16.gmra.mxu2 %v385_v2  ;;  %v188_v1 = vld [vmem:[%s4172_s0 + $0x570] sm:$0xff] }
  0xc3   :  { %1420 = vmatmul.bf16.gmra.mxu3 %v404_v11 }
  0xc4   :  { %1509 = vmatmul.bf16.gmra.mxu0 %v387_v5  ;;  %v2918_v13 = vpop.f32.mrf.mxu2  ;;  %v422_v5 = vpack.c.bf16 %v188_v1, %v179_v63 }
  0xc6   :  { %v2920_v14 = vpop.f32.mrf.mxu1  ;;  %v2927_v17 = vpop.f32.mrf.mxu3 }
  0xc9   :  { %v2922_v15 = vpop.f32.mrf.mxu0 }
  0xcc   :  { %v2947_v24 = vpop.f32.mrf.mxu2 }
  0xce   :  { %v2949_v28 = vpop.f32.mrf.mxu1  ;;  %v2959_v38 = vpop.f32.mrf.mxu3 }
  0xd1   :  { %v2957_v33 = vpop.f32.mrf.mxu0  ;;  %1217 = vmatmul.bf16.gmra.mxu1 %v393_v25  ;;  %1316 = vmatmul.bf16.gmra.mxu2 %v394_v26  ;;  %v3034_v25 = vld [vmem:[%s4171_s2] ss:$0 sm:$0xff] }
  0xd2   :  { %v162_v26 = vld [vmem:[%s4172_s0 + $0x4a0] sm:$0xff]  ;;  %v1090_v32 = vadd.f32 %v3034_v25, %v2824_v31  ;;  %v1092_v63 = vadd.f32 %v3034_v25, %v2833_v36 }
  0xd3   :  { %1425 = vmatmul.bf16.gmra.mxu3 %v413_v39  ;;  %v411_v39 = vpack.c.bf16 %v168_v21, %v159_v20  ;;  %v177_v20 = vld [vmem:[%s4172_s0 + $0x518] sm:$0xff]  ;;  %v178_v36 = vld [vmem:[%s4172_s0 + $0x520] sm:$0xff] }
  0xd4   :  { %1514 = vmatmul.bf16.gmra.mxu0 %v396_v29  ;;  %v2961_v40 = vpop.f32.mrf.mxu2  ;;  %v171_v29 = vld [vmem:[%s4172_s0 + $0x4e8] sm:$0xff] }
  0xd5   :  { %v414_v48 = vpack.c.bf16 %v171_v29, %v162_v26  ;;  %v189_v26 = vld [vmem:[%s4172_s0 + $0x578] sm:$0xff] }
  0xd6   :  { %v2963_v41 = vpop.f32.mrf.mxu1  ;;  %v1386_v43 = vpop.f32.mrf.mxu3 }
  0xd9   :  { %v2965_v42 = vpop.f32.mrf.mxu0 }
  0xdc   :  { %v2985_v58 = vpop.f32.mrf.mxu2 }
  0xde   :  { %v2987_v61 = vpop.f32.mrf.mxu1  ;;  %v2997_v3 = vpop.f32.mrf.mxu3 }
  0xe1   :  { %v2995_v2 = vpop.f32.mrf.mxu0  ;;  %1222 = vmatmul.bf16.gmra.mxu1 %v402_v59  ;;  %1321 = vmatmul.bf16.gmra.mxu2 %v403_v60 }
  0xe3   :  { %1430 = vmatmul.bf16.gmra.mxu3 %v422_v5 }
  0xe4   :  { %1519 = vmatmul.bf16.gmra.mxu0 %v405_v62  ;;  %v3005_v9 = vpop.f32.mrf.mxu2  ;;  %v431_v62 = vpack.c.bf16 %v206_v50, %v197_v49  ;;  %v423_v49 = vpack.c.bf16 %v189_v26, %v180_v23  ;;  %v215_v50 = vld [vmem:[%s4172_s0 + $0x648] sm:$0xff]  ;;  %v2377_v23 = vld [vmem:[%s4170_s1 + $0x150] sm:$0xff] }
  0xe5   :  { %1580 = vmatpush.bf16.msra.mxu1 %v2377_v23  ;;  %v1102_v23 = vadd.f32 %v3034_v25, %v2922_v15  ;;  %v214_v15 = vld [vmem:[%s4172_s0 + $0x640] sm:$0xff] }
  0xe6   :  { %v3007_v11 = vpop.f32.mrf.mxu1  ;;  %v3014_v18 = vpop.f32.mrf.mxu3 }
  0xe9   :  { %v3009_v12 = vpop.f32.mrf.mxu0 }
  0xec   :  { %v3042_v30 = vpop.f32.mrf.mxu2 }
  0xee   :  { %v1188_v46 = vpop.f32.mrf.mxu1  ;;  %v3052_v60 = vpop.f32.mrf.mxu3 }
  0xef   :  { %v1189_v53 = vadd.f32 %v1188_v46, %v1090_v32  ;;  %v1095_v32 = vadd.f32 %v3034_v25, %v2865_v51 }
  0xf1   :  { %v1485_v59 = vpop.f32.mrf.mxu0  ;;  %1227 = vmatmul.bf16.gmra.mxu1 %v411_v39  ;;  %1326 = vmatmul.bf16.gmra.mxu2 %v412_v45  ;;  %v420_v45 = vpack.c.bf16 %v186_v22, %v177_v20 }
  0xf3   :  { %1435 = vmatmul.bf16.gmra.mxu3 %v431_v62 }
  0xf4   :  { %1524 = vmatmul.bf16.gmra.mxu0 %v414_v48  ;;  %v1287_v31 = vpop.f32.mrf.mxu2 }
  0xf5   :  { %v1288_v1 = vadd.f32 %v1287_v31, %v1189_v53  ;;  %v224_v53 = vld [vmem:[%s4172_s0 + $0x690] sm:$0xff] }
  0xf6   :  { %v1190_v5 = vpop.f32.mrf.mxu1  ;;  %v3056_v19 = vpop.f32.mrf.mxu3  ;;  %v440_v51 = vpack.c.bf16 %v224_v53, %v215_v50 }
  0xf7   :  { %v1387_v6 = vadd.f32 %v1386_v43, %v1288_v1  ;;  %v1191_v7 = vadd.f32 %v1190_v5, %v1092_v63  ;;  %v187_v43 = vld [vmem:[%s4172_s0 + $0x568] sm:$0xff] }
  0xf8   :  { %v421_v46 = vpack.c.bf16 %v187_v43, %v178_v36  ;;  %v2385_v43 = vld [vmem:[%s4170_s1 + $0x190] sm:$0xff] }
  0xf9   :  { %v1487_v16 = vpop.f32.mrf.mxu0  ;;  %v3061_v21 = vadd.f32 %v1485_v59, %v1387_v6  ;;  %v1097_v6 = vadd.f32 %v3034_v25, %v2873_v56  ;;  %1679 = vmatpush.bf16.msra.mxu2 %v2385_v43 }
  0xfc   :  { %v1289_v29 = vpop.f32.mrf.mxu2 }
  0xfd   :  { %v1290_v39 = vadd.f32 %v1289_v29, %v1191_v7  ;;  %v204_v29 = vld [vmem:[%s4172_s0 + $0x5f0] sm:$0xff] }
  0xfe   :  { %v1193_v48 = vpop.f32.mrf.mxu1  ;;  %v3087_v63 = vpop.f32.mrf.mxu3 }
  0xff   :  { %v1389_v59 = vadd.f32 %v2997_v3, %v1290_v39  ;;  %v1194_v62 = vadd.f32 %v1193_v48, %v1095_v32  ;;  %v196_v32 = vld [vmem:[%s4172_s0 + $0x5b0] sm:$0xff]  ;;  %v205_v39 = vld [vmem:[%s4172_s0 + $0x5f8] sm:$0xff] }
 0x101   :  { %v1490_v31 = vpop.f32.mrf.mxu0  ;;  %1232 = vmatmul.bf16.gmra.mxu1 %v420_v45  ;;  %1331 = vmatmul.bf16.gmra.mxu2 %v421_v46  ;;  %v3089_v1 = vadd.f32 %v1487_v16, %v1389_v59  ;;  %v2393_v16 = vld [vmem:[%s4170_s1 + $0x1d0] sm:$0xff]  ;;  %v198_v45 = vld [vmem:[%s4172_s0 + $0x5c0] sm:$0xff]  ;;  %v207_v46 = vld [vmem:[%s4172_s0 + $0x608] sm:$0xff]  ;;  %v430_v59 = vpack.c.bf16 %v205_v39, %v196_v32 }
 0x102   :  { %1778 = vmatpush.bf16.msra.mxu3 %v2393_v16 }
 0x103   :  { %1440 = vmatmul.bf16.gmra.mxu3 %v440_v51  ;;  %v233_v51 = vld [vmem:[%s4172_s0 + $0x6d8] sm:$0xff] }
 0x104   :  { %1529 = vmatmul.bf16.gmra.mxu0 %v423_v49  ;;  %v1292_v5 = vpop.f32.mrf.mxu2  ;;  %v1100_v49 = vadd.f32 %v3034_v25, %v2908_v8  ;;  %v2401_v8 = vld [vmem:[%s4170_s1 + $0x210] sm:$0xff] }
 0x105   :  { %v1293_v7 = vadd.f32 %v1292_v5, %v1194_v62  ;;  %v242_v5 = vld [vmem:[%s4172_s0 + $0x720] sm:$0xff]  ;;  %1877 = vmatpush.bf16.msra.mxu0 %v2401_v8 }
 0x106   :  { %v1195_v20 = vpop.f32.mrf.mxu1  ;;  %v3103_v56 = vpop.f32.mrf.mxu3 }
 0x107   :  { %v1392_v22 = vadd.f32 %v3014_v18, %v1293_v7  ;;  %v1196_v3 = vadd.f32 %v1195_v20, %v1097_v6  ;;  %v195_v18 = vld [vmem:[%s4172_s0 + $0x5a8] sm:$0xff] }
 0x108   :  { %v429_v53 = vpack.c.bf16 %v204_v29, %v195_v18 }
 0x109   :  { %v1492_v36 = vpop.f32.mrf.mxu0  ;;  %v3108_v26 = vadd.f32 %v1490_v31, %v1392_v22  ;;  %v432_v31 = vpack.c.bf16 %v207_v46, %v198_v45 }
 0x10c   :  { %v1294_v48 = vpop.f32.mrf.mxu2 }
 0x10d   :  { %v1295_v50 = vadd.f32 %v1294_v48, %v1196_v3  ;;  %v449_v3 = vpack.c.bf16 %v242_v5, %v233_v51  ;;  %v222_v48 = vld [vmem:[%s4172_s0 + $0x680] sm:$0xff] }
 0x10e   :  { %v1198_v62 = vpop.f32.mrf.mxu1  ;;  %v3137_v22 = vpop.f32.mrf.mxu3 }
 0x10f   :  { %v1394_v6 = vadd.f32 %v3052_v60, %v1295_v50  ;;  %v1199_v7 = vadd.f32 %v1198_v62, %v1100_v49  ;;  %v216_v49 = vld [vmem:[%s4172_s0 + $0x650] sm:$0xff]  ;;  %v225_v50 = vld [vmem:[%s4172_s0 + $0x698] sm:$0xff] }
 0x111   :  { %v1495_v20 = vpop.f32.mrf.mxu0  ;;  %1237 = vmatmul.bf16.gmra.mxu1 %v429_v53  ;;  %1336 = vmatmul.bf16.gmra.mxu2 %v430_v59  ;;  %v3139_v43 = vadd.f32 %v1492_v36, %v1394_v6  ;;  %v213_v36 = vld [vmem:[%s4172_s0 + $0x638] sm:$0xff]  ;;  %v1105_v59 = vadd.f32 %v3034_v25, %v2957_v33  ;;  %v441_v6 = vpack.c.bf16 %v225_v50, %v216_v49 }
 0x113   :  { %1445 = vmatmul.bf16.gmra.mxu3 %v449_v3 }
 0x114   :  { %1534 = vmatmul.bf16.gmra.mxu0 %v432_v31  ;;  %v1297_v16 = vpop.f32.mrf.mxu2  ;;  %v438_v31 = vpack.c.bf16 %v222_v48, %v213_v36 }
 0x115   :  { %v1298_v60 = vadd.f32 %v1297_v16, %v1199_v7  ;;  %v251_v7 = vld [vmem:[%s4172_s0 + $0x768] sm:$0xff] }
 0x116   :  { %v1200_v18 = vpop.f32.mrf.mxu1  ;;  %v3144_v45 = vpop.f32.mrf.mxu3 }
 0x117   :  { %v1397_v29 = vadd.f32 %v3056_v19, %v1298_v60  ;;  %v1201_v32 = vadd.f32 %v1200_v18, %v1102_v23  ;;  %v223_v19 = vld [vmem:[%s4172_s0 + $0x688] sm:$0xff] }
 0x118   :  { %v439_v51 = vpack.c.bf16 %v223_v19, %v214_v15  ;;  %v2384_v19 = vld [vmem:[%s4170_s1 + $0x188] sm:$0xff] }
 0x119   :  { %v1497_v39 = vpop.f32.mrf.mxu0  ;;  %v3149_v46 = vadd.f32 %v1495_v20, %v1397_v29  ;;  %v260_v20 = vld [vmem:[%s4172_s0 + $0x7b0] sm:$0xff]  ;;  %v1107_v29 = vadd.f32 %v3034_v25, %v2965_v42  ;;  %v231_v42 = vld [vmem:[%s4172_s0 + $0x6c8] sm:$0xff]  ;;  %1680 = vmatpush.bf16.msra.mxu2 %v2384_v19 }
 0x11a   :  { %v458_v33 = vpack.c.bf16 %v260_v20, %v251_v7  ;;  %v2400_v19 = vld [vmem:[%s4170_s1 + $0x208] sm:$0xff] }
 0x11b   :  { %1878 = vmatpush.bf16.msra.mxu0 %v2400_v19 }
 0x11c   :  { %v1299_v53 = vpop.f32.mrf.mxu2 }
 0x11d   :  { %v1300_v62 = vadd.f32 %v1299_v53, %v1201_v32  ;;  %v232_v53 = vld [vmem:[%s4172_s0 + $0x6d0] sm:$0xff] }
 0x11e   :  { %v1203_v5 = vpop.f32.mrf.mxu1  ;;  %v3175_v23 = vpop.f32.mrf.mxu3 }
 0x11f   :  { %v1399_v8 = vadd.f32 %v3087_v63, %v1300_v62  ;;  %v1204_v3 = vadd.f32 %v1203_v5, %v1105_v59  ;;  %v241_v59 = vld [vmem:[%s4172_s0 + $0x718] sm:$0xff]  ;;  %v234_v62 = vld [vmem:[%s4172_s0 + $0x6e0] sm:$0xff]  ;;  %v1110_v5 = vadd.f32 %v3034_v25, %v2995_v2  ;;  %v2376_v2 = vld [vmem:[%s4170_s1 + $0x148] sm:$0xff] }
 0x120   :  { %v448_v20 = vpack.c.bf16 %v241_v59, %v232_v53  ;;  %1581 = vmatpush.bf16.msra.mxu1 %v2376_v2  ;;  %v296_v2 = vld [vmem:[%s4172_s0 + $0x8d0] sm:$0xff] }
 0x121   :  { %v1500_v16 = vpop.f32.mrf.mxu0  ;;  %1242 = vmatmul.bf16.gmra.mxu1 %v438_v31  ;;  %1341 = vmatmul.bf16.gmra.mxu2 %v439_v51  ;;  %v3177_v60 = vadd.f32 %v1497_v39, %v1399_v8  ;;  %v2392_v39 = vld [vmem:[%s4170_s1 + $0x1c8] sm:$0xff] }
 0x122   :  { %1779 = vmatpush.bf16.msra.mxu3 %v2392_v39  ;;  %v243_v31 = vld [vmem:[%s4172_s0 + $0x728] sm:$0xff]  ;;  %v1112_v39 = vadd.f32 %v3034_v25, %v3009_v12  ;;  %v250_v12 = vld [vmem:[%s4172_s0 + $0x760] sm:$0xff] }
 0x123   :  { %1450 = vmatmul.bf16.gmra.mxu3 %v458_v33  ;;  %v278_v33 = vld [vmem:[%s4172_s0 + $0x840] sm:$0xff] }
 0x124   :  { %1539 = vmatmul.bf16.gmra.mxu0 %v441_v6  ;;  %v1302_v18 = vpop.f32.mrf.mxu2 }
 0x125   :  { %v1303_v32 = vadd.f32 %v1302_v18, %v1204_v3  ;;  %v450_v3 = vpack.c.bf16 %v243_v31, %v234_v62  ;;  %v249_v31 = vld [vmem:[%s4172_s0 + $0x758] sm:$0xff] }
 0x126   :  { %v1205_v36 = vpop.f32.mrf.mxu1  ;;  %v3185_v49 = vpop.f32.mrf.mxu3 }
 0x127   :  { %v1402_v48 = vadd.f32 %v3103_v56, %v1303_v32  ;;  %v1206_v63 = vadd.f32 %v1205_v36, %v1107_v29  ;;  %v240_v56 = vld [vmem:[%s4172_s0 + $0x710] sm:$0xff] }
 0x128   :  { %v447_v7 = vpack.c.bf16 %v240_v56, %v231_v42 }
 0x129   :  { %v1502_v15 = vpop.f32.mrf.mxu0  ;;  %v3193_v50 = vadd.f32 %v1500_v16, %v1402_v48  ;;  %v269_v16 = vld [vmem:[%s4172_s0 + $0x7f8] sm:$0xff] }
 0x12a   :  { %v467_v48 = vpack.c.bf16 %v278_v33, %v269_v16 }
 0x12c   :  { %v1304_v51 = vpop.f32.mrf.mxu2 }
 0x12d   :  { %v1305_v6 = vadd.f32 %v1304_v51, %v1206_v63 }
 0x12e   :  { %v1208_v8 = vpop.f32.mrf.mxu1  ;;  %v3222_v36 = vpop.f32.mrf.mxu3 }
 0x12f   :  { %v1404_v18 = vadd.f32 %v3137_v22, %v1305_v6  ;;  %v1209_v29 = vadd.f32 %v1208_v8, %v1110_v5  ;;  %v258_v5 = vld [vmem:[%s4172_s0 + $0x7a0] sm:$0xff]  ;;  %v252_v6 = vld [vmem:[%s4172_s0 + $0x770] sm:$0xff]  ;;  %v1115_v8 = vadd.f32 %v3034_v25, %v2816_v27 }
 0x130   :  { %v456_v16 = vpack.c.bf16 %v258_v5, %v249_v31 }
 0x131   :  { %v1505_v32 = vpop.f32.mrf.mxu0  ;;  %1247 = vmatmul.bf16.gmra.mxu1 %v447_v7  ;;  %1346 = vmatmul.bf16.gmra.mxu2 %v448_v20  ;;  %v3224_v63 = vadd.f32 %v1502_v15, %v1404_v18  ;;  %v261_v7 = vld [vmem:[%s4172_s0 + $0x7b8] sm:$0xff] }
 0x133   :  { %1455 = vmatmul.bf16.gmra.mxu3 %v467_v48 }
 0x134   :  { %1544 = vmatmul.bf16.gmra.mxu0 %v450_v3  ;;  %v1307_v22 = vpop.f32.mrf.mxu2 }
 0x135   :  { %v1308_v42 = vadd.f32 %v1307_v22, %v1209_v29  ;;  %v459_v29 = vpack.c.bf16 %v261_v7, %v252_v6  ;;  %v267_v6 = vld [vmem:[%s4172_s0 + $0x7e8] sm:$0xff]  ;;  %v276_v7 = vld [vmem:[%s4172_s0 + $0x830] sm:$0xff] }
 0x136   :  { %v1210_v56 = vpop.f32.mrf.mxu1  ;;  %v3232_v15 = vpop.f32.mrf.mxu3 }
 0x137   :  { %v1407_v53 = vadd.f32 %v3144_v45, %v1308_v42  ;;  %v1211_v59 = vadd.f32 %v1210_v56, %v1112_v39  ;;  %v259_v45 = vld [vmem:[%s4172_s0 + $0x7a8] sm:$0xff] }
 0x138   :  { %v457_v33 = vpack.c.bf16 %v259_v45, %v250_v12 }
 0x139   :  { %v1507_v62 = vpop.f32.mrf.mxu0  ;;  %v3237_v51 = vadd.f32 %v1505_v32, %v1407_v53  ;;  %v287_v32 = vld [vmem:[%s4172_s0 + $0x888] sm:$0xff]  ;;  %v1117_v53 = vadd.f32 %v3034_v25, %v2831_v35  ;;  %v268_v35 = vld [vmem:[%s4172_s0 + $0x7f0] sm:$0xff] }
 0x13a   :  { %v476_v27 = vpack.c.bf16 %v296_v2, %v287_v32 }
 0x13c   :  { %v1309_v20 = vpop.f32.mrf.mxu2 }
 0x13d   :  { %v1310_v3 = vadd.f32 %v1309_v20, %v1211_v59  ;;  %v270_v20 = vld [vmem:[%s4172_s0 + $0x800] sm:$0xff] }
 0x13e   :  { %v1213_v18 = vpop.f32.mrf.mxu1  ;;  %v3263_v39 = vpop.f32.mrf.mxu3 }
 0x13f   :  { %v1409_v48 = vadd.f32 %v3175_v23, %v1310_v3  ;;  %v1214_v19 = vadd.f32 %v1213_v18, %v1115_v8  ;;  %v279_v8 = vld [vmem:[%s4172_s0 + $0x848] sm:$0xff]  ;;  %v465_v18 = vpack.c.bf16 %v276_v7, %v267_v6  ;;  %v1122_v6 = vadd.f32 %v3034_v25, %v2871_v55  ;;  %v294_v55 = vld [vmem:[%s4172_s0 + $0x8c0] sm:$0xff] }
 0x140   :  { %v468_v2 = vpack.c.bf16 %v279_v8, %v270_v20 }
 0x141   :  { %v1510_v22 = vpop.f32.mrf.mxu0  ;;  %1252 = vmatmul.bf16.gmra.mxu1 %v456_v16  ;;  %1351 = vmatmul.bf16.gmra.mxu2 %v457_v33  ;;  %v3265_v42 = vadd.f32 %v1507_v62, %v1409_v48  ;;  %v1120_v16 = vadd.f32 %v3034_v25, %v2857_v47  ;;  %v305_v48 = vld [vmem:[%s4172_s0 + $0x918] sm:$0xff]  ;;  %v2383_v47 = vld [vmem:[%s4170_s1 + $0x180] sm:$0xff] }
 0x142   :  { %1681 = vmatpush.bf16.msra.mxu2 %v2383_v47 }
 0x143   :  { %1460 = vmatmul.bf16.gmra.mxu3 %v476_v27 }
 0x144   :  { %1549 = vmatmul.bf16.gmra.mxu0 %v459_v29  ;;  %v1312_v56 = vpop.f32.mrf.mxu2 }
 0x145   :  { %v1313_v59 = vadd.f32 %v1312_v56, %v1214_v19  ;;  %v314_v19 = vld [vmem:[%s4172_s0 + $0x960] sm:$0xff] }
 0x146   :  { %v1215_v31 = vpop.f32.mrf.mxu1  ;;  %v3270_v45 = vpop.f32.mrf.mxu3 }
 0x147   :  { %v1412_v5 = vadd.f32 %v3185_v49, %v1313_v59  ;;  %v1216_v23 = vadd.f32 %v1215_v31, %v1117_v53  ;;  %v277_v49 = vld [vmem:[%s4172_s0 + $0x838] sm:$0xff]  ;;  %v2391_v53 = vld [vmem:[%s4170_s1 + $0x1c0] sm:$0xff]  ;;  %v485_v31 = vpack.c.bf16 %v314_v19, %v305_v48  ;;  %v1125_v48 = vadd.f32 %v3034_v25, %v2900_v4 }
 0x148   :  { %v466_v29 = vpack.c.bf16 %v277_v49, %v268_v35  ;;  %1780 = vmatpush.bf16.msra.mxu3 %v2391_v53  ;;  %v323_v53 = vld [vmem:[%s4172_s0 + $0x9a8] sm:$0xff] }
 0x149   :  { %v1512_v12 = vpop.f32.mrf.mxu0  ;;  %v3275_v62 = vadd.f32 %v1510_v22, %v1412_v5  ;;  %v2375_v5 = vld [vmem:[%s4170_s1 + $0x140] sm:$0xff] }
 0x14a   :  { %1582 = vmatpush.bf16.msra.mxu1 %v2375_v5 }
 0x14c   :  { %v1314_v3 = vpop.f32.mrf.mxu2 }
 0x14d   :  { %v1315_v33 = vadd.f32 %v1314_v3, %v1216_v23 }
 0x14e   :  { %v1218_v32 = vpop.f32.mrf.mxu1  ;;  %v3307_v59 = vpop.f32.mrf.mxu3 }
 0x14f   :  { %v1414_v22 = vadd.f32 %v3222_v36, %v1315_v33  ;;  %v1219_v27 = vadd.f32 %v1218_v32, %v1120_v16  ;;  %v285_v16 = vld [vmem:[%s4172_s0 + $0x878] sm:$0xff] }
 0x150   :  { %v297_v32 = vld [vmem:[%s4172_s0 + $0x8d8] sm:$0xff] }
 0x151   :  { %v1515_v56 = vpop.f32.mrf.mxu0  ;;  %1257 = vmatmul.bf16.gmra.mxu1 %v465_v18  ;;  %1356 = vmatmul.bf16.gmra.mxu2 %v466_v29  ;;  %v3312_v36 = vadd.f32 %v1512_v12, %v1414_v22  ;;  %v2399_v12 = vld [vmem:[%s4170_s1 + $0x200] sm:$0xff]  ;;  %v295_v18 = vld [vmem:[%s4172_s0 + $0x8c8] sm:$0xff]  ;;  %v288_v29 = vld [vmem:[%s4172_s0 + $0x890] sm:$0xff]  ;;  %v474_v22 = vpack.c.bf16 %v294_v55, %v285_v16 }
 0x152   :  { %1879 = vmatpush.bf16.msra.mxu0 %v2399_v12  ;;  %v477_v47 = vpack.c.bf16 %v297_v32, %v288_v29  ;;  %v303_v29 = vld [vmem:[%s4172_s0 + $0x908] sm:$0xff]  ;;  %v312_v32 = vld [vmem:[%s4172_s0 + $0x950] sm:$0xff] }
 0x153   :  { %1465 = vmatmul.bf16.gmra.mxu3 %v485_v31  ;;  %v332_v31 = vld [vmem:[%s4172_s0 + $0x9f0] sm:$0xff] }
 0x154   :  { %1554 = vmatmul.bf16.gmra.mxu0 %v468_v2  ;;  %v1317_v23 = vpop.f32.mrf.mxu2  ;;  %v494_v4 = vpack.c.bf16 %v332_v31, %v323_v53 }
 0x155   :  { %v1318_v7 = vadd.f32 %v1317_v23, %v1219_v27 }
 0x156   :  { %v1220_v35 = vpop.f32.mrf.mxu1  ;;  %v3320_v3 = vpop.f32.mrf.mxu3 }
 0x157   :  { %v1417_v49 = vadd.f32 %v3232_v15, %v1318_v7  ;;  %v1221_v20 = vadd.f32 %v1220_v35, %v1122_v6  ;;  %v286_v15 = vld [vmem:[%s4172_s0 + $0x880] sm:$0xff] }
 0x158   :  { %v475_v27 = vpack.c.bf16 %v295_v18, %v286_v15 }
 0x159   :  { %v1517_v8 = vpop.f32.mrf.mxu0  ;;  %v3325_v33 = vadd.f32 %v1515_v56, %v1417_v49 }
 0x15c   :  { %v1319_v2 = vpop.f32.mrf.mxu2 }
 0x15d   :  { %v1320_v19 = vadd.f32 %v1319_v2, %v1221_v20  ;;  %v1127_v20 = vadd.f32 %v3034_v25, %v2920_v14  ;;  %v304_v14 = vld [vmem:[%s4172_s0 + $0x910] sm:$0xff]  ;;  %v306_v2 = vld [vmem:[%s4172_s0 + $0x920] sm:$0xff] }
 0x15e   :  { %v1223_v56 = vpop.f32.mrf.mxu1  ;;  %v3351_v7 = vpop.f32.mrf.mxu3 }
 0x15f   :  { %v1419_v5 = vadd.f32 %v3263_v39, %v1320_v19  ;;  %v1224_v23 = vadd.f32 %v1223_v56, %v1125_v48  ;;  %v315_v48 = vld [vmem:[%s4172_s0 + $0x968] sm:$0xff]  ;;  %v483_v56 = vpack.c.bf16 %v312_v32, %v303_v29 }
 0x160   :  { %v486_v31 = vpack.c.bf16 %v315_v48, %v306_v2  ;;  %v321_v2 = vld [vmem:[%s4172_s0 + $0x998] sm:$0xff]  ;;  %v330_v48 = vld [vmem:[%s4172_s0 + $0x9e0] sm:$0xff] }
 0x161   :  { %v1520_v6 = vpop.f32.mrf.mxu0  ;;  %1262 = vmatmul.bf16.gmra.mxu1 %v474_v22  ;;  %1361 = vmatmul.bf16.gmra.mxu2 %v475_v27  ;;  %v3353_v35 = vadd.f32 %v1517_v8, %v1419_v5  ;;  %v1130_v22 = vadd.f32 %v3034_v25, %v2949_v28  ;;  %v21_v5 = vld [vmem:[%s4172_s0 + $0x38] sm:$0xff] }
 0x163   :  { %1470 = vmatmul.bf16.gmra.mxu3 %v494_v4 }
 0x164   :  { %1559 = vmatmul.bf16.gmra.mxu0 %v477_v47  ;;  %v1322_v49 = vpop.f32.mrf.mxu2 }
 0x165   :  { %v1323_v12 = vadd.f32 %v1322_v49, %v1224_v23  ;;  %v30_v23 = vld [vmem:[%s4172_s0 + $0x80] sm:$0xff] }
 0x166   :  { %v1225_v16 = vpop.f32.mrf.mxu1  ;;  %v3358_v18 = vpop.f32.mrf.mxu3  ;;  %v345_v28 = vpack.c.bf16 %v30_v23, %v21_v5 }
 0x167   :  { %v1422_v55 = vadd.f32 %v3270_v45, %v1323_v12  ;;  %v1226_v39 = vadd.f32 %v1225_v16, %v1127_v20  ;;  %v313_v45 = vld [vmem:[%s4172_s0 + $0x958] sm:$0xff] }
 0x168   :  { %v484_v47 = vpack.c.bf16 %v313_v45, %v304_v14 }
 0x169   :  { %v1522_v15 = vpop.f32.mrf.mxu0  ;;  %v3363_v8 = vadd.f32 %v1520_v6, %v1422_v55  ;;  %v1132_v55 = vadd.f32 %v3034_v25, %v2963_v41  ;;  %v322_v41 = vld [vmem:[%s4172_s0 + $0x9a0] sm:$0xff] }
 0x16c   :  { %v1324_v19 = vpop.f32.mrf.mxu2 }
 0x16d   :  { %v1325_v27 = vadd.f32 %v1324_v19, %v1226_v39  ;;  %v324_v19 = vld [vmem:[%s4172_s0 + $0x9b0] sm:$0xff] }
 0x16e   :  { %v1228_v53 = vpop.f32.mrf.mxu1  ;;  %v3389_v20 = vpop.f32.mrf.mxu3 }
 0x16f   :  { %v1424_v6 = vadd.f32 %v3307_v59, %v1325_v27  ;;  %v1229_v4 = vadd.f32 %v1228_v53, %v1130_v22  ;;  %v333_v22 = vld [vmem:[%s4172_s0 + $0x9f8] sm:$0xff]  ;;  %v492_v53 = vpack.c.bf16 %v330_v48, %v321_v2 }
 0x170   :  { %v495_v23 = vpack.c.bf16 %v333_v22, %v324_v19  ;;  %v19_v19 = vld [vmem:[%s4172_s0 + $0x28] sm:$0xff]  ;;  %v28_v22 = vld [vmem:[%s4172_s0 + $0x70] sm:$0xff] }
 0x171   :  { %v1525_v49 = vpop.f32.mrf.mxu0  ;;  %1267 = vmatmul.bf16.gmra.mxu1 %v483_v56  ;;  %1366 = vmatmul.bf16.gmra.mxu2 %v484_v47  ;;  %v3391_v12 = vadd.f32 %v1522_v15, %v1424_v6  ;;  %v1135_v56 = vadd.f32 %v3034_v25, %v2987_v61  ;;  %v39_v6 = vld [vmem:[%s4172_s0 + $0xc8] sm:$0xff] }
 0x173   :  { %1781 = vmatmul.bf16.vlgmr.msra.gmra.mxu3 %v345_v28 }
 0x174   :  { %1564 = vmatmul.bf16.gmra.mxu0 %v486_v31  ;;  %v1327_v16 = vpop.f32.mrf.mxu2 }
 0x175   :  { %v1328_v39 = vadd.f32 %v1327_v16, %v1229_v4  ;;  %v48_v4 = vld [vmem:[%s4172_s0 + $0x110] sm:$0xff] }
 0x176   :  { %v1230_v29 = vpop.f32.mrf.mxu1  ;;  %v3396_v45 = vpop.f32.mrf.mxu3  ;;  %v354_v61 = vpack.c.bf16 %v48_v4, %v39_v6 }
 0x177   :  { %v1427_v32 = vadd.f32 %v3320_v3, %v1328_v39  ;;  %v1231_v59 = vadd.f32 %v1230_v29, %v1132_v55  ;;  %v331_v3 = vld [vmem:[%s4172_s0 + $0x9e8] sm:$0xff] }
 0x178   :  { %v493_v31 = vpack.c.bf16 %v331_v3, %v322_v41 }
 0x179   :  { %v1527_v14 = vpop.f32.mrf.mxu0  ;;  %v3401_v15 = vadd.f32 %v1525_v49, %v1427_v32  ;;  %v1137_v32 = vadd.f32 %v3034_v25, %v3007_v11  ;;  %v20_v11 = vld [vmem:[%s4172_s0 + $0x30] sm:$0xff] }
 0x17c   :  { %v1329_v27 = vpop.f32.mrf.mxu2 }
 0x17d   :  { %v1330_v47 = vadd.f32 %v1329_v27, %v1231_v59  ;;  %v22_v27 = vld [vmem:[%s4172_s0 + $0x40] sm:$0xff] }
 0x17e   :  { %v1233_v5 = vpop.f32.mrf.mxu1  ;;  %v3427_v55 = vpop.f32.mrf.mxu3 }
 0x17f   :  { %v1429_v49 = vadd.f32 %v3351_v7, %v1330_v47  ;;  %v1234_v28 = vadd.f32 %v1233_v5, %v1135_v56  ;;  %v31_v56 = vld [vmem:[%s4172_s0 + $0x88] sm:$0xff]  ;;  %v343_v5 = vpack.c.bf16 %v28_v22, %v19_v19 }
 0x180   :  { %v346_v4 = vpack.c.bf16 %v31_v56, %v22_v27  ;;  %v37_v27 = vld [vmem:[%s4172_s0 + $0xb8] sm:$0xff]  ;;  %v46_v56 = vld [vmem:[%s4172_s0 + $0x100] sm:$0xff] }
 0x181   :  { %v1530_v16 = vpop.f32.mrf.mxu0  ;;  %1272 = vmatmul.bf16.gmra.mxu1 %v492_v53  ;;  %1371 = vmatmul.bf16.gmra.mxu2 %v493_v31  ;;  %v3429_v39 = vadd.f32 %v1527_v14, %v1429_v49  ;;  %v1140_v53 = vadd.f32 %v3034_v25, %v2829_v34  ;;  %v57_v49 = vld [vmem:[%s4172_s0 + $0x158] sm:$0xff] }
 0x183   :  { %1786 = vmatmul.bf16.gmra.mxu3 %v354_v61 }
 0x184   :  { %1569 = vmatmul.bf16.gmra.mxu0 %v495_v23  ;;  %v1332_v29 = vpop.f32.mrf.mxu2 }
 0x185   :  { %v1333_v59 = vadd.f32 %v1332_v29, %v1234_v28  ;;  %v66_v28 = vld [vmem:[%s4172_s0 + $0x1a0] sm:$0xff] }
 0x186   :  { %v1235_v2 = vpop.f32.mrf.mxu1  ;;  %v3434_v3 = vpop.f32.mrf.mxu3  ;;  %v363_v34 = vpack.c.bf16 %v66_v28, %v57_v49 }
 0x187   :  { %v1432_v48 = vadd.f32 %v3358_v18, %v1333_v59  ;;  %v1236_v7 = vadd.f32 %v1235_v2, %v1137_v32  ;;  %v29_v18 = vld [vmem:[%s4172_s0 + $0x78] sm:$0xff] }
 0x188   :  { %v344_v23 = vpack.c.bf16 %v29_v18, %v20_v11 }
 0x189   :  { %v1532_v41 = vpop.f32.mrf.mxu0  ;;  %v3439_v14 = vadd.f32 %v1530_v16, %v1432_v48  ;;  %v1142_v48 = vadd.f32 %v3034_v25, %v2855_v44  ;;  %v38_v44 = vld [vmem:[%s4172_s0 + $0xc0] sm:$0xff] }
 0x18c   :  { %v1334_v47 = vpop.f32.mrf.mxu2 }
 0x18d   :  { %v1335_v31 = vadd.f32 %v1334_v47, %v1236_v7  ;;  %v40_v47 = vld [vmem:[%s4172_s0 + $0xd0] sm:$0xff] }
 0x18e   :  { %v1238_v6 = vpop.f32.mrf.mxu1  ;;  %v3465_v32 = vpop.f32.mrf.mxu3 }
 0x18f   :  { %v1434_v16 = vadd.f32 %v3389_v20, %v1335_v31  ;;  %v1239_v61 = vadd.f32 %v1238_v6, %v1140_v53  ;;  %v49_v53 = vld [vmem:[%s4172_s0 + $0x118] sm:$0xff]  ;;  %v352_v6 = vpack.c.bf16 %v46_v56, %v37_v27 }
 0x190   :  { %v355_v28 = vpack.c.bf16 %v49_v53, %v40_v47  ;;  %v55_v47 = vld [vmem:[%s4172_s0 + $0x148] sm:$0xff]  ;;  %v64_v53 = vld [vmem:[%s4172_s0 + $0x190] sm:$0xff] }
 0x191   :  { %v1535_v29 = vpop.f32.mrf.mxu0  ;;  %1583 = vmatmul.bf16.vlgmr.msra.gmra.mxu1 %v343_v5  ;;  %1682 = vmatmul.bf16.vlgmr.msra.gmra.mxu2 %v344_v23  ;;  %v3467_v59 = vadd.f32 %v1532_v41, %v1434_v16  ;;  %v1145_v5 = vadd.f32 %v3034_v25, %v2869_v54  ;;  %v75_v16 = vld [vmem:[%s4172_s0 + $0x1e8] sm:$0xff] }
 0x193   :  { %1791 = vmatmul.bf16.gmra.mxu3 %v363_v34 }
 0x194   :  { %1880 = vmatmul.bf16.vlgmr.msra.gmra.mxu0 %v346_v4  ;;  %v1337_v2 = vpop.f32.mrf.mxu2 }
 0x195   :  { %v1338_v7 = vadd.f32 %v1337_v2, %v1239_v61  ;;  %v84_v61 = vld [vmem:[%s4172_s0 + $0x230] sm:$0xff] }
 0x196   :  { %v1240_v19 = vpop.f32.mrf.mxu1  ;;  %v3472_v18 = vpop.f32.mrf.mxu3  ;;  %v372_v54 = vpack.c.bf16 %v84_v61, %v75_v16 }
 0x197   :  { %v1437_v22 = vadd.f32 %v3396_v45, %v1338_v7  ;;  %v1241_v20 = vadd.f32 %v1240_v19, %v1142_v48  ;;  %v47_v45 = vld [vmem:[%s4172_s0 + $0x108] sm:$0xff] }
 0x198   :  { %v353_v4 = vpack.c.bf16 %v47_v45, %v38_v44 }
 0x199   :  { %v1537_v11 = vpop.f32.mrf.mxu0  ;;  %v3477_v41 = vadd.f32 %v1535_v29, %v1437_v22  ;;  %v1147_v22 = vadd.f32 %v3034_v25, %v2895_v0  ;;  %v56_v0 = vld [vmem:[%s4172_s0 + $0x150] sm:$0xff] }
 0x19c   :  { %v1339_v31 = vpop.f32.mrf.mxu2 }
 0x19d   :  { %v1340_v23 = vadd.f32 %v1339_v31, %v1241_v20  ;;  %v58_v31 = vld [vmem:[%s4172_s0 + $0x160] sm:$0xff] }
 0x19e   :  { %v1243_v49 = vpop.f32.mrf.mxu1  ;;  %v3503_v48 = vpop.f32.mrf.mxu3 }
 0x19f   :  { %v1439_v29 = vadd.f32 %v3427_v55, %v1340_v23  ;;  %v1244_v34 = vadd.f32 %v1243_v49, %v1145_v5  ;;  %v67_v5 = vld [vmem:[%s4172_s0 + $0x1a8] sm:$0xff]  ;;  %v361_v49 = vpack.c.bf16 %v64_v53, %v55_v47 }
 0x1a0   :  { %v364_v61 = vpack.c.bf16 %v67_v5, %v58_v31  ;;  %v73_v31 = vld [vmem:[%s4172_s0 + $0x1d8] sm:$0xff]  ;;  %v82_v5 = vld [vmem:[%s4172_s0 + $0x220] sm:$0xff] }
 0x1a1   :  { %v1540_v2 = vpop.f32.mrf.mxu0  ;;  %1588 = vmatmul.bf16.gmra.mxu1 %v352_v6  ;;  %1687 = vmatmul.bf16.gmra.mxu2 %v353_v4  ;;  %v3505_v7 = vadd.f32 %v1537_v11, %v1439_v29  ;;  %v1150_v6 = vadd.f32 %v3034_v25, %v2918_v13  ;;  %v93_v29 = vld [vmem:[%s4172_s0 + $0x278] sm:$0xff] }
 0x1a3   :  { %1796 = vmatmul.bf16.gmra.mxu3 %v372_v54 }
 0x1a4   :  { %1885 = vmatmul.bf16.gmra.mxu0 %v355_v28  ;;  %v1342_v19 = vpop.f32.mrf.mxu2 }
 0x1a5   :  { %v1343_v20 = vadd.f32 %v1342_v19, %v1244_v34  ;;  %v102_v34 = vld [vmem:[%s4172_s0 + $0x2c0] sm:$0xff] }
 0x1a6   :  { %v1245_v27 = vpop.f32.mrf.mxu1  ;;  %v3510_v45 = vpop.f32.mrf.mxu3  ;;  %v381_v13 = vpack.c.bf16 %v102_v34, %v93_v29 }
 0x1a7   :  { %v1442_v56 = vadd.f32 %v3434_v3, %v1343_v20  ;;  %v1246_v55 = vadd.f32 %v1245_v27, %v1147_v22  ;;  %v65_v3 = vld [vmem:[%s4172_s0 + $0x198] sm:$0xff] }
 0x1a8   :  { %v362_v28 = vpack.c.bf16 %v65_v3, %v56_v0 }
 0x1a9   :  { %v1542_v44 = vpop.f32.mrf.mxu0  ;;  %v3515_v11 = vadd.f32 %v1540_v2, %v1442_v56  ;;  %v1152_v56 = vadd.f32 %v3034_v25, %v2947_v24  ;;  %v74_v24 = vld [vmem:[%s4172_s0 + $0x1e0] sm:$0xff] }
 0x1ac   :  { %v1344_v23 = vpop.f32.mrf.mxu2 }
 0x1ad   :  { %v1345_v4 = vadd.f32 %v1344_v23, %v1246_v55  ;;  %v76_v23 = vld [vmem:[%s4172_s0 + $0x1f0] sm:$0xff] }
 0x1ae   :  { %v1248_v16 = vpop.f32.mrf.mxu1  ;;  %v3541_v22 = vpop.f32.mrf.mxu3 }
 0x1af   :  { %v1444_v2 = vadd.f32 %v3465_v32, %v1345_v4  ;;  %v1249_v54 = vadd.f32 %v1248_v16, %v1150_v6  ;;  %v85_v6 = vld [vmem:[%s4172_s0 + $0x238] sm:$0xff]  ;;  %v370_v16 = vpack.c.bf16 %v82_v5, %v73_v31 }
 0x1b0   :  { %v373_v34 = vpack.c.bf16 %v85_v6, %v76_v23  ;;  %v91_v23 = vld [vmem:[%s4172_s0 + $0x268] sm:$0xff]  ;;  %v100_v6 = vld [vmem:[%s4172_s0 + $0x2b0] sm:$0xff] }
 0x1b1   :  { %v1545_v19 = vpop.f32.mrf.mxu0  ;;  %1593 = vmatmul.bf16.gmra.mxu1 %v361_v49  ;;  %1692 = vmatmul.bf16.gmra.mxu2 %v362_v28  ;;  %v3543_v20 = vadd.f32 %v1542_v44, %v1444_v2  ;;  %v1155_v49 = vadd.f32 %v3034_v25, %v2961_v40  ;;  %v111_v2 = vld [vmem:[%s4172_s0 + $0x308] sm:$0xff] }
 0x1b3   :  { %1801 = vmatmul.bf16.gmra.mxu3 %v381_v13 }
 0x1b4   :  { %1890 = vmatmul.bf16.gmra.mxu0 %v364_v61  ;;  %v1347_v27 = vpop.f32.mrf.mxu2 }
 0x1b5   :  { %v1348_v55 = vadd.f32 %v1347_v27, %v1249_v54  ;;  %v120_v54 = vld [vmem:[%s4172_s0 + $0x350] sm:$0xff] }
 0x1b6   :  { %v1250_v47 = vpop.f32.mrf.mxu1  ;;  %v3548_v3 = vpop.f32.mrf.mxu3  ;;  %v390_v40 = vpack.c.bf16 %v120_v54, %v111_v2 }
 0x1b7   :  { %v1447_v53 = vadd.f32 %v3472_v18, %v1348_v55  ;;  %v1251_v32 = vadd.f32 %v1250_v47, %v1152_v56  ;;  %v83_v18 = vld [vmem:[%s4172_s0 + $0x228] sm:$0xff] }
 0x1b8   :  { %v371_v61 = vpack.c.bf16 %v83_v18, %v74_v24 }
 0x1b9   :  { %v1547_v0 = vpop.f32.mrf.mxu0  ;;  %v3553_v44 = vadd.f32 %v1545_v19, %v1447_v53  ;;  %v1157_v53 = vadd.f32 %v3034_v25, %v2985_v58  ;;  %v92_v58 = vld [vmem:[%s4172_s0 + $0x270] sm:$0xff] }
 0x1bc   :  { %v1349_v4 = vpop.f32.mrf.mxu2 }
 0x1bd   :  { %v1350_v28 = vadd.f32 %v1349_v4, %v1251_v32  ;;  %v94_v4 = vld [vmem:[%s4172_s0 + $0x280] sm:$0xff] }
 0x1be   :  { %v1253_v29 = vpop.f32.mrf.mxu1  ;;  %v3579_v56 = vpop.f32.mrf.mxu3 }
 0x1bf   :  { %v1449_v19 = vadd.f32 %v3503_v48, %v1350_v28  ;;  %v1254_v13 = vadd.f32 %v1253_v29, %v1155_v49  ;;  %v103_v49 = vld [vmem:[%s4172_s0 + $0x2c8] sm:$0xff]  ;;  %v379_v29 = vpack.c.bf16 %v100_v6, %v91_v23 }
 0x1c0   :  { %v382_v54 = vpack.c.bf16 %v103_v49, %v94_v4  ;;  %v118_v49 = vld [vmem:[%s4172_s0 + $0x340] sm:$0xff] }
 0x1c1   :  { %v1550_v27 = vpop.f32.mrf.mxu0  ;;  %1598 = vmatmul.bf16.gmra.mxu1 %v370_v16  ;;  %1697 = vmatmul.bf16.gmra.mxu2 %v371_v61  ;;  %v3581_v55 = vadd.f32 %v1547_v0, %v1449_v19  ;;  %v1160_v16 = vadd.f32 %v3034_v25, %v3005_v9  ;;  %v129_v19 = vld [vmem:[%s4172_s0 + $0x398] sm:$0xff] }
 0x1c3   :  { %1806 = vmatmul.bf16.gmra.mxu3 %v390_v40 }
 0x1c4   :  { %1895 = vmatmul.bf16.gmra.mxu0 %v373_v34  ;;  %v1352_v47 = vpop.f32.mrf.mxu2 }
 0x1c5   :  { %v1353_v32 = vadd.f32 %v1352_v47, %v1254_v13  ;;  %v138_v13 = vld [vmem:[%s4172_s0 + $0x3e0] sm:$0xff] }
 0x1c6   :  { %v1255_v31 = vpop.f32.mrf.mxu1  ;;  %v3586_v18 = vpop.f32.mrf.mxu3  ;;  %v399_v9 = vpack.c.bf16 %v138_v13, %v129_v19 }
 0x1c7   :  { %v1452_v5 = vadd.f32 %v3510_v45, %v1353_v32  ;;  %v1256_v48 = vadd.f32 %v1255_v31, %v1157_v53  ;;  %v101_v45 = vld [vmem:[%s4172_s0 + $0x2b8] sm:$0xff]  ;;  %v3624_v31 = vld [vmem:[%s4171_s2] ss:$0 sm:$0xff] }
 0x1c8   :  { %v380_v34 = vpack.c.bf16 %v101_v45, %v92_v58 }
 0x1c9   :  { %v1552_v24 = vpop.f32.mrf.mxu0  ;;  %v3591_v0 = vadd.f32 %v1550_v27, %v1452_v5  ;;  %v1162_v5 = vadd.f32 %v3624_v31, %v3042_v30  ;;  %v110_v30 = vld [vmem:[%s4172_s0 + $0x300] sm:$0xff] }
 0x1cc   :  { %v1354_v28 = vpop.f32.mrf.mxu2 }
 0x1cd   :  { %v1355_v61 = vadd.f32 %v1354_v28, %v1256_v48  ;;  %v112_v28 = vld [vmem:[%s4172_s0 + $0x310] sm:$0xff] }
 0x1ce   :  { %v1258_v2 = vpop.f32.mrf.mxu1  ;;  %v3617_v53 = vpop.f32.mrf.mxu3 }
 0x1cf   :  { %v1454_v27 = vadd.f32 %v3541_v22, %v1355_v61  ;;  %v1259_v40 = vadd.f32 %v1258_v2, %v1160_v16  ;;  %v121_v16 = vld [vmem:[%s4172_s0 + $0x358] sm:$0xff] }
 0x1d0   :  { %v391_v13 = vpack.c.bf16 %v121_v16, %v112_v28  ;;  %v127_v28 = vld [vmem:[%s4172_s0 + $0x388] sm:$0xff]  ;;  %v136_v16 = vld [vmem:[%s4172_s0 + $0x3d0] sm:$0xff] }
 0x1d1   :  { %v1555_v47 = vpop.f32.mrf.mxu0  ;;  %1603 = vmatmul.bf16.gmra.mxu1 %v379_v29  ;;  %1702 = vmatmul.bf16.gmra.mxu2 %v380_v34  ;;  %v3619_v25 = vadd.f32 %v1552_v24, %v1454_v27  ;;  %v109_v24 = vld [vmem:[%s4172_s0 + $0x2f8] sm:$0xff]  ;;  %v1165_v29 = vadd.f32 %v3624_v31, %v2835_v37  ;;  %v147_v27 = vld [vmem:[%s4172_s0 + $0x428] sm:$0xff] }
 0x1d2   :  { %v388_v2 = vpack.c.bf16 %v118_v49, %v109_v24 }
 0x1d3   :  { %1811 = vmatmul.bf16.gmra.mxu3 %v399_v9 }
 0x1d4   :  { %1900 = vmatmul.bf16.gmra.mxu0 %v382_v54  ;;  %v1357_v32 = vpop.f32.mrf.mxu2 }
 0x1d5   :  { %v1358_v22 = vadd.f32 %v1357_v32, %v1259_v40  ;;  %v156_v40 = vld [vmem:[%s4172_s0 + $0x470] sm:$0xff] }
 0x1d6   :  { %v1260_v48 = vpop.f32.mrf.mxu1  ;;  %v3629_v45 = vpop.f32.mrf.mxu3  ;;  %v408_v37 = vpack.c.bf16 %v156_v40, %v147_v27 }
 0x1d7   :  { %v1457_v23 = vadd.f32 %v3548_v3, %v1358_v22  ;;  %v1261_v6 = vadd.f32 %v1260_v48, %v1162_v5  ;;  %v119_v3 = vld [vmem:[%s4172_s0 + $0x348] sm:$0xff] }
 0x1d8   :  { %v389_v54 = vpack.c.bf16 %v119_v3, %v110_v30 }
 0x1d9   :  { %v1557_v58 = vpop.f32.mrf.mxu0  ;;  %v3634_v4 = vadd.f32 %v1555_v47, %v1457_v23  ;;  %v1167_v23 = vadd.f32 %v3624_v31, %v2867_v52  ;;  %v128_v52 = vld [vmem:[%s4172_s0 + $0x390] sm:$0xff] }
 0x1dc   :  { %v1359_v61 = vpop.f32.mrf.mxu2 }
 0x1dd   :  { %v1360_v34 = vadd.f32 %v1359_v61, %v1261_v6  ;;  %v130_v61 = vld [vmem:[%s4172_s0 + $0x3a0] sm:$0xff] }
 0x1de   :  { %v1263_v19 = vpop.f32.mrf.mxu1  ;;  %v3660_v5 = vpop.f32.mrf.mxu3 }
 0x1df   :  { %v1459_v47 = vadd.f32 %v3579_v56, %v1360_v34  ;;  %v1264_v9 = vadd.f32 %v1263_v19, %v1165_v29  ;;  %v139_v29 = vld [vmem:[%s4172_s0 + $0x3e8] sm:$0xff]  ;;  %v397_v19 = vpack.c.bf16 %v136_v16, %v127_v28 }
 0x1e0   :  { %v400_v40 = vpack.c.bf16 %v139_v29, %v130_v61  ;;  %v145_v61 = vld [vmem:[%s4172_s0 + $0x418] sm:$0xff]  ;;  %v154_v29 = vld [vmem:[%s4172_s0 + $0x460] sm:$0xff] }
 0x1e1   :  { %v1560_v32 = vpop.f32.mrf.mxu0  ;;  %1608 = vmatmul.bf16.gmra.mxu1 %v388_v2  ;;  %1707 = vmatmul.bf16.gmra.mxu2 %v389_v54  ;;  %v3662_v22 = vadd.f32 %v1557_v58, %v1459_v47  ;;  %v1170_v2 = vadd.f32 %v3624_v31, %v2875_v57  ;;  %v165_v47 = vld [vmem:[%s4172_s0 + $0x4b8] sm:$0xff] }
 0x1e3   :  { %1816 = vmatmul.bf16.gmra.mxu3 %v408_v37 }
 0x1e4   :  { %1905 = vmatmul.bf16.gmra.mxu0 %v391_v13  ;;  %v1362_v48 = vpop.f32.mrf.mxu2 }
 0x1e5   :  { %v1363_v6 = vadd.f32 %v1362_v48, %v1264_v9  ;;  %v174_v9 = vld [vmem:[%s4172_s0 + $0x500] sm:$0xff] }
 0x1e6   :  { %v1265_v24 = vpop.f32.mrf.mxu1  ;;  %v3667_v3 = vpop.f32.mrf.mxu3  ;;  %v417_v57 = vpack.c.bf16 %v174_v9, %v165_v47 }
 0x1e7   :  { %v1462_v49 = vadd.f32 %v3586_v18, %v1363_v6  ;;  %v1266_v56 = vadd.f32 %v1265_v24, %v1167_v23  ;;  %v137_v18 = vld [vmem:[%s4172_s0 + $0x3d8] sm:$0xff] }
 0x1e8   :  { %v398_v13 = vpack.c.bf16 %v137_v18, %v128_v52 }
 0x1e9   :  { %v1562_v30 = vpop.f32.mrf.mxu0  ;;  %v3672_v58 = vadd.f32 %v1560_v32, %v1462_v49  ;;  %v1172_v49 = vadd.f32 %v3624_v31, %v2913_v10  ;;  %v146_v10 = vld [vmem:[%s4172_s0 + $0x420] sm:$0xff] }
 0x1ec   :  { %v1364_v34 = vpop.f32.mrf.mxu2 }
 0x1ed   :  { %v1365_v54 = vadd.f32 %v1364_v34, %v1266_v56  ;;  %v148_v34 = vld [vmem:[%s4172_s0 + $0x430] sm:$0xff] }
 0x1ee   :  { %v1268_v27 = vpop.f32.mrf.mxu1  ;;  %v3698_v23 = vpop.f32.mrf.mxu3 }
 0x1ef   :  { %v1464_v32 = vadd.f32 %v3617_v53, %v1365_v54  ;;  %v1269_v37 = vadd.f32 %v1268_v27, %v1170_v2  ;;  %v157_v2 = vld [vmem:[%s4172_s0 + $0x478] sm:$0xff]  ;;  %v406_v27 = vpack.c.bf16 %v154_v29, %v145_v61 }
 0x1f0   :  { %v409_v9 = vpack.c.bf16 %v157_v2, %v148_v34  ;;  %v163_v34 = vld [vmem:[%s4172_s0 + $0x4a8] sm:$0xff]  ;;  %v172_v2 = vld [vmem:[%s4172_s0 + $0x4f0] sm:$0xff] }
 0x1f1   :  { %v1565_v48 = vpop.f32.mrf.mxu0  ;;  %1613 = vmatmul.bf16.gmra.mxu1 %v397_v19  ;;  %1712 = vmatmul.bf16.gmra.mxu2 %v398_v13  ;;  %v3700_v6 = vadd.f32 %v1562_v30, %v1464_v32  ;;  %v1175_v19 = vadd.f32 %v3624_v31, %v2927_v17  ;;  %v183_v32 = vld [vmem:[%s4172_s0 + $0x548] sm:$0xff] }
 0x1f3   :  { %1821 = vmatmul.bf16.gmra.mxu3 %v417_v57 }
 0x1f4   :  { %1910 = vmatmul.bf16.gmra.mxu0 %v400_v40  ;;  %v1367_v24 = vpop.f32.mrf.mxu2 }
 0x1f5   :  { %v1368_v56 = vadd.f32 %v1367_v24, %v1269_v37  ;;  %v192_v37 = vld [vmem:[%s4172_s0 + $0x590] sm:$0xff] }
 0x1f6   :  { %v1270_v28 = vpop.f32.mrf.mxu1  ;;  %v3705_v18 = vpop.f32.mrf.mxu3  ;;  %v426_v17 = vpack.c.bf16 %v192_v37, %v183_v32  ;;  %v201_v32 = vld [vmem:[%s4172_s0 + $0x5d8] sm:$0xff]  ;;  %v210_v37 = vld [vmem:[%s4172_s0 + $0x620] sm:$0xff] }
 0x1f7   :  { %v1467_v16 = vadd.f32 %v3629_v45, %v1368_v56  ;;  %v1271_v53 = vadd.f32 %v1270_v28, %v1172_v49  ;;  %v155_v45 = vld [vmem:[%s4172_s0 + $0x468] sm:$0xff] }
 0x1f8   :  { %v407_v40 = vpack.c.bf16 %v155_v45, %v146_v10 }
 0x1f9   :  { %v1567_v52 = vpop.f32.mrf.mxu0  ;;  %v3710_v30 = vadd.f32 %v1565_v48, %v1467_v16  ;;  %v1177_v16 = vadd.f32 %v3624_v31, %v2959_v38  ;;  %v164_v38 = vld [vmem:[%s4172_s0 + $0x4b0] sm:$0xff]  ;;  %v173_v31 = vld [vmem:[%s4172_s0 + $0x4f8] sm:$0xff] }
 0x1fc   :  { %v1369_v54 = vpop.f32.mrf.mxu2 }
 0x1fd   :  { %v1370_v13 = vadd.f32 %v1369_v54, %v1271_v53  ;;  %v175_v54 = vld [vmem:[%s4172_s0 + $0x508] sm:$0xff] }
 0x1fe   :  { %v1273_v47 = vpop.f32.mrf.mxu1  ;;  %v3736_v49 = vpop.f32.mrf.mxu3 }
 0x1ff   :  { %v1469_v48 = vadd.f32 %v3660_v5, %v1370_v13  ;;  %v1274_v57 = vadd.f32 %v1273_v47, %v1175_v19 }
 0x201   :  { %v1570_v24 = vpop.f32.mrf.mxu0  ;;  %1618 = vmatmul.bf16.gmra.mxu1 %v406_v27  ;;  %1717 = vmatmul.bf16.gmra.mxu2 %v407_v40  ;;  %v3738_v56 = vadd.f32 %v1567_v52, %v1469_v48  ;;  %v415_v27 = vpack.c.bf16 %v172_v2, %v163_v34  ;;  %v416_v40 = vpack.c.bf16 %v173_v31, %v164_v38  ;;  %v181_v38 = vld [vmem:[%s4172_s0 + $0x538] sm:$0xff] }
 0x203   :  { %1826 = vmatmul.bf16.gmra.mxu3 %v426_v17  ;;  %v435_v17 = vpack.c.bf16 %v210_v37, %v201_v32  ;;  %v228_v37 = vld [vmem:[%s4172_s0 + $0x6b0] sm:$0xff] }
 0x204   :  { %1915 = vmatmul.bf16.gmra.mxu0 %v409_v9  ;;  %v1372_v28 = vpop.f32.mrf.mxu2 }
 0x205   :  { %v1373_v53 = vadd.f32 %v1372_v28, %v1274_v57 }
 0x206   :  { %v1275_v61 = vpop.f32.mrf.mxu1  ;;  %v3743_v45 = vpop.f32.mrf.mxu3 }
 0x207   :  { %v1472_v29 = vadd.f32 %v3667_v3, %v1373_v53  ;;  %v1276_v5 = vadd.f32 %v1275_v61, %v1177_v16  ;;  %v166_v3 = vld [vmem:[%s4172_s0 + $0x4c0] sm:$0xff] }
 0x208   :  { %v418_v9 = vpack.c.bf16 %v175_v54, %v166_v3  ;;  %v184_v54 = vld [vmem:[%s4172_s0 + $0x550] sm:$0xff] }
 0x209   :  { %v1572_v10 = vpop.f32.mrf.mxu0  ;;  %v3748_v52 = vadd.f32 %v1570_v24, %v1472_v29 }
 0x20c   :  { %v1374_v19 = vpop.f32.mrf.mxu2 }
 0x20d   :  { %v1375_v13 = vadd.f32 %v1374_v19, %v1276_v5  ;;  %v193_v19 = vld [vmem:[%s4172_s0 + $0x598] sm:$0xff] }
 0x20e   :  { %v1584_v47 = vpop.f32.mrf.mxu1  ;;  %v3772_v24 = vpop.f32.mrf.mxu3  ;;  %v427_v32 = vpack.c.bf16 %v193_v19, %v184_v54  ;;  %v202_v19 = vld [vmem:[%s4172_s0 + $0x5e0] sm:$0xff] }
 0x20f   :  { %v1474_v48 = vadd.f32 %v3698_v23, %v1375_v13  ;;  %v1585_v16 = vadd.f32 %v1584_v47, %v3061_v21  ;;  %v182_v21 = vld [vmem:[%s4172_s0 + $0x540] sm:$0xff] }
 0x211   :  { %v1881_v57 = vpop.f32.mrf.mxu0  ;;  %1623 = vmatmul.bf16.gmra.mxu1 %v415_v27  ;;  %1722 = vmatmul.bf16.gmra.mxu2 %v416_v40  ;;  %v3774_v28 = vadd.f32 %v1572_v10, %v1474_v48  ;;  %v190_v10 = vld [vmem:[%s4172_s0 + $0x580] sm:$0xff] }
 0x212   :  { %v424_v40 = vpack.c.bf16 %v190_v10, %v181_v38 }
 0x213   :  { %1831 = vmatmul.bf16.gmra.mxu3 %v435_v17 }
 0x214   :  { %1920 = vmatmul.bf16.gmra.mxu0 %v418_v9  ;;  %v1683_v53 = vpop.f32.mrf.mxu2 }
 0x215   :  { %v1684_v61 = vadd.f32 %v1683_v53, %v1585_v16 }
 0x216   :  { %v1586_v29 = vpop.f32.mrf.mxu1  ;;  %v3778_v2 = vpop.f32.mrf.mxu3 }
 0x217   :  { %v1783_v5 = vadd.f32 %v3705_v18, %v1684_v61  ;;  %v191_v18 = vld [vmem:[%s4172_s0 + $0x588] sm:$0xff]  ;;  %v1587_v3 = vadd.f32 %v1586_v29, %v3089_v1 }
 0x218   :  { %v425_v47 = vpack.c.bf16 %v191_v18, %v182_v21  ;;  %v219_v1 = vld [vmem:[%s4172_s0 + $0x668] sm:$0xff] }
 0x219   :  { %v1883_v34 = vpop.f32.mrf.mxu0  ;;  %v1882_v23 = vadd.f32 %v1881_v57, %v1783_v5  ;;  %v444_v53 = vpack.c.bf16 %v228_v37, %v219_v1  ;;  %v199_v18 = vld [vmem:[%s4172_s0 + $0x5c8] sm:$0xff]  ;;  %v246_v37 = vld [vmem:[%s4172_s0 + $0x740] sm:$0xff] }
 0x21b   :  { %v1971_v31 = vmax.f32 %v1882_v23, 0.0 }
 0x21c   :  { %v1685_v13 = vpop.f32.mrf.mxu2 }
 0x21d   :  { %2007 = vst [vmem:[%s4173_s3] sm:$0xff] %v1971_v31  ;;  %v1686_v27 = vadd.f32 %v1685_v13, %v1587_v3  ;;  %v200_v31 = vld [vmem:[%s4172_s0 + $0x5d0] sm:$0xff]  ;;  %v211_v13 = vld [vmem:[%s4172_s0 + $0x628] sm:$0xff] }
 0x21e   :  { %v1589_v9 = vpop.f32.mrf.mxu1  ;;  %v3809_v17 = vpop.f32.mrf.mxu3  ;;  %v436_v1 = vpack.c.bf16 %v211_v13, %v202_v19  ;;  %v229_v19 = vld [vmem:[%s4172_s0 + $0x6b8] sm:$0xff] }
 0x21f   :  { %v1785_v48 = vadd.f32 %v3736_v49, %v1686_v27  ;;  %v1590_v29 = vadd.f32 %v1589_v9, %v3108_v26  ;;  %v208_v26 = vld [vmem:[%s4172_s0 + $0x610] sm:$0xff] }
 0x221   :  { %v1886_v57 = vpop.f32.mrf.mxu0  ;;  %v1884_v16 = vadd.f32 %v1883_v34, %v1785_v48  ;;  %1628 = vmatmul.bf16.gmra.mxu1 %v424_v40  ;;  %1727 = vmatmul.bf16.gmra.mxu2 %v425_v47  ;;  %v433_v47 = vpack.c.bf16 %v208_v26, %v199_v18  ;;  %v217_v26 = vld [vmem:[%s4172_s0 + $0x658] sm:$0xff] }
 0x223   :  { %v1972_v61 = vmax.f32 %v1884_v16, 0.0  ;;  %1836 = vmatmul.bf16.gmra.mxu3 %v444_v53 }
 0x224   :  { %1925 = vmatmul.bf16.gmra.mxu0 %v427_v32  ;;  %v1688_v5 = vpop.f32.mrf.mxu2 }
 0x225   :  { %2008 = vst [vmem:[%s4173_s3 + $0x8] sm:$0xff] %v1972_v61  ;;  %v1689_v23 = vadd.f32 %v1688_v5, %v1590_v29 }
 0x226   :  { %v1591_v38 = vpop.f32.mrf.mxu1  ;;  %v3816_v21 = vpop.f32.mrf.mxu3 }
 0x227   :  { %v1788_v49 = vadd.f32 %v3743_v45, %v1689_v23  ;;  %v209_v45 = vld [vmem:[%s4172_s0 + $0x618] sm:$0xff]  ;;  %v1592_v54 = vadd.f32 %v1591_v38, %v3139_v43 }
 0x228   :  { %v434_v9 = vpack.c.bf16 %v209_v45, %v200_v31  ;;  %v237_v43 = vld [vmem:[%s4172_s0 + $0x6f8] sm:$0xff]  ;;  %v218_v31 = vld [vmem:[%s4172_s0 + $0x660] sm:$0xff] }
 0x229   :  { %v1888_v10 = vpop.f32.mrf.mxu0  ;;  %v1887_v34 = vadd.f32 %v1886_v57, %v1788_v49  ;;  %v453_v61 = vpack.c.bf16 %v246_v37, %v237_v43 }
 0x22b   :  { %v1973_v3 = vmax.f32 %v1887_v34, 0.0 }
 0x22c   :  { %v1690_v27 = vpop.f32.mrf.mxu2 }
 0x22d   :  { %2009 = vst [vmem:[%s4173_s3 + $0x10] sm:$0xff] %v1973_v3  ;;  %v1691_v40 = vadd.f32 %v1690_v27, %v1592_v54  ;;  %v220_v54 = vld [vmem:[%s4172_s0 + $0x670] sm:$0xff] }
 0x22e   :  { %v1594_v32 = vpop.f32.mrf.mxu1  ;;  %v3847_v16 = vpop.f32.mrf.mxu3 }
 0x22f   :  { %v1790_v48 = vadd.f32 %v3772_v24, %v1691_v40  ;;  %v1595_v5 = vadd.f32 %v1594_v32, %v3149_v46  ;;  %v226_v46 = vld [vmem:[%s4172_s0 + $0x6a0] sm:$0xff]  ;;  %v445_v32 = vpack.c.bf16 %v229_v19, %v220_v54 }
 0x230   :  { %v442_v40 = vpack.c.bf16 %v226_v46, %v217_v26  ;;  %v236_v26 = vld [vmem:[%s4172_s0 + $0x6f0] sm:$0xff] }
 0x231   :  { %v1891_v57 = vpop.f32.mrf.mxu0  ;;  %v1889_v53 = vadd.f32 %v1888_v10, %v1790_v48  ;;  %1633 = vmatmul.bf16.gmra.mxu1 %v433_v47  ;;  %1732 = vmatmul.bf16.gmra.mxu2 %v434_v9 }
 0x233   :  { %v1974_v29 = vmax.f32 %v1889_v53, 0.0  ;;  %1841 = vmatmul.bf16.gmra.mxu3 %v453_v61 }
 0x234   :  { %1930 = vmatmul.bf16.gmra.mxu0 %v436_v1  ;;  %v1693_v23 = vpop.f32.mrf.mxu2  ;;  %v264_v1 = vld [vmem:[%s4172_s0 + $0x7d0] sm:$0xff] }
 0x235   :  { %2010 = vst [vmem:[%s4173_s3 + $0x18] sm:$0xff] %v1974_v29  ;;  %v1694_v38 = vadd.f32 %v1693_v23, %v1595_v5 }
 0x236   :  { %v1596_v49 = vpop.f32.mrf.mxu1  ;;  %v3854_v18 = vpop.f32.mrf.mxu3 }
 0x237   :  { %v1793_v24 = vadd.f32 %v3778_v2, %v1694_v38  ;;  %v227_v2 = vld [vmem:[%s4172_s0 + $0x6a8] sm:$0xff]  ;;  %v1597_v3 = vadd.f32 %v1596_v49, %v3177_v60 }
 0x238   :  { %v443_v47 = vpack.c.bf16 %v227_v2, %v218_v31  ;;  %v255_v60 = vld [vmem:[%s4172_s0 + $0x788] sm:$0xff]  ;;  %v238_v2 = vld [vmem:[%s4172_s0 + $0x700] sm:$0xff] }
 0x239   :  { %v1893_v34 = vpop.f32.mrf.mxu0  ;;  %v1892_v10 = vadd.f32 %v1891_v57, %v1793_v24  ;;  %v462_v53 = vpack.c.bf16 %v264_v1, %v255_v60 }
 0x23b   :  { %v1975_v45 = vmax.f32 %v1892_v10, 0.0  ;;  %v235_v10 = vld [vmem:[%s4172_s0 + $0x6e8] sm:$0xff] }
 0x23c   :  { %v1695_v13 = vpop.f32.mrf.mxu2 }
 0x23d   :  { %2011 = vst [vmem:[%s4173_s3 + $0x20] sm:$0xff] %v1975_v45  ;;  %v1696_v27 = vadd.f32 %v1695_v13, %v1597_v3  ;;  %v247_v45 = vld [vmem:[%s4172_s0 + $0x748] sm:$0xff] }
 0x23e   :  { %v1599_v9 = vpop.f32.mrf.mxu1  ;;  %v3885_v48 = vpop.f32.mrf.mxu3 }
 0x23f   :  { %v1795_v43 = vadd.f32 %v3809_v17, %v1696_v27  ;;  %v1600_v29 = vadd.f32 %v1599_v9, %v3193_v50  ;;  %v244_v50 = vld [vmem:[%s4172_s0 + $0x730] sm:$0xff] }
 0x240   :  { %v451_v19 = vpack.c.bf16 %v244_v50, %v235_v10  ;;  %v256_v50 = vld [vmem:[%s4172_s0 + $0x790] sm:$0xff] }
 0x241   :  { %v1896_v37 = vpop.f32.mrf.mxu0  ;;  %v1894_v57 = vadd.f32 %v1893_v34, %v1795_v43  ;;  %1638 = vmatmul.bf16.gmra.mxu1 %v442_v40  ;;  %1737 = vmatmul.bf16.gmra.mxu2 %v443_v47  ;;  %v454_v40 = vpack.c.bf16 %v247_v45, %v238_v2  ;;  %v282_v47 = vld [vmem:[%s4172_s0 + $0x860] sm:$0xff] }
 0x243   :  { %v1976_v61 = vmax.f32 %v1894_v57, 0.0  ;;  %1846 = vmatmul.bf16.gmra.mxu3 %v462_v53 }
 0x244   :  { %1935 = vmatmul.bf16.gmra.mxu0 %v445_v32  ;;  %v1698_v5 = vpop.f32.mrf.mxu2 }
 0x245   :  { %2012 = vst [vmem:[%s4173_s3 + $0x28] sm:$0xff] %v1976_v61  ;;  %v1699_v23 = vadd.f32 %v1698_v5, %v1600_v29 }
 0x246   :  { %v1601_v38 = vpop.f32.mrf.mxu1  ;;  %v3892_v24 = vpop.f32.mrf.mxu3 }
 0x247   :  { %v1798_v17 = vadd.f32 %v3816_v21, %v1699_v23  ;;  %v245_v21 = vld [vmem:[%s4172_s0 + $0x738] sm:$0xff]  ;;  %v1602_v31 = vadd.f32 %v1601_v38, %v3224_v63 }
 0x248   :  { %v452_v13 = vpack.c.bf16 %v245_v21, %v236_v26  ;;  %v273_v63 = vld [vmem:[%s4172_s0 + $0x818] sm:$0xff] }
 0x249   :  { %v1898_v49 = vpop.f32.mrf.mxu0  ;;  %v1897_v34 = vadd.f32 %v1896_v37, %v1798_v17  ;;  %v471_v43 = vpack.c.bf16 %v282_v47, %v273_v63  ;;  %v253_v17 = vld [vmem:[%s4172_s0 + $0x778] sm:$0xff] }
 0x24a   :  { %v265_v26 = vld [vmem:[%s4172_s0 + $0x7d8] sm:$0xff] }
 0x24b   :  { %v1977_v46 = vmax.f32 %v1897_v34, 0.0 }
 0x24c   :  { %v1700_v3 = vpop.f32.mrf.mxu2 }
 0x24d   :  { %2013 = vst [vmem:[%s4173_s3 + $0x30] sm:$0xff] %v1977_v46  ;;  %v1701_v54 = vadd.f32 %v1700_v3, %v1602_v31  ;;  %v463_v3 = vpack.c.bf16 %v265_v26, %v256_v50  ;;  %v318_v26 = vld [vmem:[%s4172_s0 + $0x980] sm:$0xff] }
 0x24e   :  { %v1604_v27 = vpop.f32.mrf.mxu1  ;;  %v3923_v60 = vpop.f32.mrf.mxu3 }
 0x24f   :  { %v1800_v9 = vadd.f32 %v3847_v16, %v1701_v54  ;;  %v1605_v57 = vadd.f32 %v1604_v27, %v3237_v51  ;;  %v262_v51 = vld [vmem:[%s4172_s0 + $0x7c0] sm:$0xff]  ;;  %v300_v54 = vld [vmem:[%s4172_s0 + $0x8f0] sm:$0xff] }
 0x250   :  { %v460_v31 = vpack.c.bf16 %v262_v51, %v253_v17  ;;  %v283_v17 = vld [vmem:[%s4172_s0 + $0x868] sm:$0xff] }
 0x251   :  { %v1901_v32 = vpop.f32.mrf.mxu0  ;;  %v1899_v1 = vadd.f32 %v1898_v49, %v1800_v9  ;;  %1643 = vmatmul.bf16.gmra.mxu1 %v451_v19  ;;  %1742 = vmatmul.bf16.gmra.mxu2 %v452_v13  ;;  %v254_v49 = vld [vmem:[%s4172_s0 + $0x780] sm:$0xff] }
 0x253   :  { %v1978_v37 = vmax.f32 %v1899_v1, 0.0  ;;  %1851 = vmatmul.bf16.gmra.mxu3 %v471_v43 }
 0x254   :  { %1940 = vmatmul.bf16.gmra.mxu0 %v454_v40  ;;  %v1703_v53 = vpop.f32.mrf.mxu2 }
 0x255   :  { %2014 = vst [vmem:[%s4173_s3 + $0x38] sm:$0xff] %v1978_v37  ;;  %v1704_v61 = vadd.f32 %v1703_v53, %v1605_v57 }
 0x256   :  { %v1606_v29 = vpop.f32.mrf.mxu1  ;;  %v3930_v23 = vpop.f32.mrf.mxu3 }
 0x257   :  { %v1803_v16 = vadd.f32 %v3854_v18, %v1704_v61  ;;  %v263_v18 = vld [vmem:[%s4172_s0 + $0x7c8] sm:$0xff]  ;;  %v1607_v10 = vadd.f32 %v1606_v29, %v3265_v42  ;;  %v272_v29 = vld [vmem:[%s4172_s0 + $0x810] sm:$0xff] }
 0x258   :  { %v461_v2 = vpack.c.bf16 %v263_v18, %v254_v49  ;;  %v291_v42 = vld [vmem:[%s4172_s0 + $0x8a8] sm:$0xff] }
 0x259   :  { %v1903_v5 = vpop.f32.mrf.mxu0  ;;  %v1902_v38 = vadd.f32 %v1901_v32, %v1803_v16  ;;  %v480_v63 = vpack.c.bf16 %v300_v54, %v291_v42  ;;  %v271_v61 = vld [vmem:[%s4172_s0 + $0x808] sm:$0xff] }
 0x25b   :  { %v1979_v34 = vmax.f32 %v1902_v38, 0.0  ;;  %v274_v38 = vld [vmem:[%s4172_s0 + $0x820] sm:$0xff] }
 0x25c   :  { %v1705_v21 = vpop.f32.mrf.mxu2  ;;  %v472_v50 = vpack.c.bf16 %v283_v17, %v274_v38 }
 0x25d   :  { %2015 = vst [vmem:[%s4173_s3 + $0x40] sm:$0xff] %v1979_v34  ;;  %v1706_v46 = vadd.f32 %v1705_v21, %v1607_v10 }
 0x25e   :  { %v1609_v45 = vpop.f32.mrf.mxu1  ;;  %v3961_v27 = vpop.f32.mrf.mxu3 }
 0x25f   :  { %v1805_v19 = vadd.f32 %v3885_v48, %v1706_v46  ;;  %v1610_v9 = vadd.f32 %v1609_v45, %v3275_v62  ;;  %v280_v62 = vld [vmem:[%s4172_s0 + $0x850] sm:$0xff] }
 0x260   :  { %v469_v18 = vpack.c.bf16 %v280_v62, %v271_v61 }
 0x261   :  { %v1906_v13 = vpop.f32.mrf.mxu0  ;;  %v1904_v40 = vadd.f32 %v1903_v5, %v1805_v19  ;;  %1648 = vmatmul.bf16.gmra.mxu1 %v460_v31  ;;  %1747 = vmatmul.bf16.gmra.mxu2 %v461_v2 }
 0x263   :  { %v1980_v47 = vmax.f32 %v1904_v40, 0.0  ;;  %1856 = vmatmul.bf16.gmra.mxu3 %v480_v63 }
 0x264   :  { %1945 = vmatmul.bf16.gmra.mxu0 %v463_v3  ;;  %v1708_v32 = vpop.f32.mrf.mxu2 }
 0x265   :  { %2016 = vst [vmem:[%s4173_s3 + $0x48] sm:$0xff] %v1980_v47  ;;  %v1709_v1 = vadd.f32 %v1708_v32, %v1610_v9  ;;  %v289_v9 = vld [vmem:[%s4172_s0 + $0x898] sm:$0xff]  ;;  %v290_v32 = vld [vmem:[%s4172_s0 + $0x8a0] sm:$0xff] }
 0x266   :  { %v1611_v43 = vpop.f32.mrf.mxu1  ;;  %v3968_v57 = vpop.f32.mrf.mxu3 }
 0x267   :  { %v1808_v48 = vadd.f32 %v3892_v24, %v1709_v1  ;;  %v281_v24 = vld [vmem:[%s4172_s0 + $0x858] sm:$0xff]  ;;  %v1612_v5 = vadd.f32 %v1611_v43, %v3312_v36 }
 0x268   :  { %v470_v34 = vpack.c.bf16 %v281_v24, %v272_v29  ;;  %v309_v36 = vld [vmem:[%s4172_s0 + $0x938] sm:$0xff] }
 0x269   :  { %v1908_v37 = vpop.f32.mrf.mxu0  ;;  %v1907_v53 = vadd.f32 %v1906_v13, %v1808_v48  ;;  %v489_v45 = vpack.c.bf16 %v318_v26, %v309_v36  ;;  %v292_v48 = vld [vmem:[%s4172_s0 + $0x8b0] sm:$0xff] }
 0x26b   :  { %v1981_v16 = vmax.f32 %v1907_v53, 0.0 }
 0x26c   :  { %v1710_v51 = vpop.f32.mrf.mxu2 }
 0x26d   :  { %2017 = vst [vmem:[%s4173_s3 + $0x50] sm:$0xff] %v1981_v16  ;;  %v1711_v49 = vadd.f32 %v1710_v51, %v1612_v5  ;;  %v336_v5 = vld [vmem:[%s4172_s0 + $0xa10] sm:$0xff] }
 0x26e   :  { %v1614_v10 = vpop.f32.mrf.mxu1  ;;  %v3999_v31 = vpop.f32.mrf.mxu3 }
 0x26f   :  { %v1810_v21 = vadd.f32 %v3923_v60, %v1711_v49  ;;  %v1615_v42 = vadd.f32 %v1614_v10, %v3325_v33  ;;  %v298_v33 = vld [vmem:[%s4172_s0 + $0x8e0] sm:$0xff] }
 0x270   :  { %v478_v62 = vpack.c.bf16 %v298_v33, %v289_v9 }
 0x271   :  { %v1911_v46 = vpop.f32.mrf.mxu0  ;;  %v1909_v2 = vadd.f32 %v1908_v37, %v1810_v21  ;;  %1653 = vmatmul.bf16.gmra.mxu1 %v469_v18  ;;  %1752 = vmatmul.bf16.gmra.mxu2 %v470_v34  ;;  %v301_v37 = vld [vmem:[%s4172_s0 + $0x8f8] sm:$0xff] }
 0x272   :  { %v481_v16 = vpack.c.bf16 %v301_v37, %v292_v48 }
 0x273   :  { %v1982_v3 = vmax.f32 %v1909_v2, 0.0  ;;  %1861 = vmatmul.bf16.gmra.mxu3 %v489_v45  ;;  %v307_v45 = vld [vmem:[%s4172_s0 + $0x928] sm:$0xff] }
 0x274   :  { %1950 = vmatmul.bf16.gmra.mxu0 %v472_v50  ;;  %v1713_v54 = vpop.f32.mrf.mxu2 }
 0x275   :  { %2018 = vst [vmem:[%s4173_s3 + $0x58] sm:$0xff] %v1982_v3  ;;  %v1714_v19 = vadd.f32 %v1713_v54, %v1615_v42  ;;  %v308_v3 = vld [vmem:[%s4172_s0 + $0x930] sm:$0xff]  ;;  %v317_v42 = vld [vmem:[%s4172_s0 + $0x978] sm:$0xff] }
 0x276   :  { %v1616_v13 = vpop.f32.mrf.mxu1  ;;  %v4006_v63 = vpop.f32.mrf.mxu3  ;;  %v488_v9 = vpack.c.bf16 %v317_v42, %v308_v3 }
 0x277   :  { %v1813_v60 = vadd.f32 %v3930_v23, %v1714_v19  ;;  %v299_v23 = vld [vmem:[%s4172_s0 + $0x8e8] sm:$0xff]  ;;  %v1617_v43 = vadd.f32 %v1616_v13, %v3353_v35  ;;  %v310_v19 = vld [vmem:[%s4172_s0 + $0x940] sm:$0xff] }
 0x278   :  { %v479_v29 = vpack.c.bf16 %v299_v23, %v290_v32  ;;  %v327_v35 = vld [vmem:[%s4172_s0 + $0x9c8] sm:$0xff] }
 0x279   :  { %v1913_v40 = vpop.f32.mrf.mxu0  ;;  %v1912_v47 = vadd.f32 %v1911_v46, %v1813_v60  ;;  %v498_v18 = vpack.c.bf16 %v336_v5, %v327_v35  ;;  %v319_v13 = vld [vmem:[%s4172_s0 + $0x988] sm:$0xff]  ;;  %v325_v35 = vld [vmem:[%s4172_s0 + $0x9b8] sm:$0xff]  ;;  %v326_v5 = vld [vmem:[%s4172_s0 + $0x9c0] sm:$0xff] }
 0x27a   :  { %v490_v32 = vpack.c.bf16 %v319_v13, %v310_v19 }
 0x27b   :  { %v1983_v1 = vmax.f32 %v1912_v47, 0.0 }
 0x27c   :  { %v1715_v53 = vpop.f32.mrf.mxu2 }
 0x27d   :  { %2019 = vst [vmem:[%s4173_s3 + $0x60] sm:$0xff] %v1983_v1  ;;  %v1716_v61 = vadd.f32 %v1715_v53, %v1617_v43 }
 0x27e   :  { %v1619_v24 = vpop.f32.mrf.mxu1  ;;  %v4037_v51 = vpop.f32.mrf.mxu3 }
 0x27f   :  { %v1815_v38 = vadd.f32 %v3961_v27, %v1716_v61  ;;  %v1620_v10 = vadd.f32 %v1619_v24, %v3363_v8  ;;  %v316_v8 = vld [vmem:[%s4172_s0 + $0x970] sm:$0xff] }
 0x280   :  { %v487_v47 = vpack.c.bf16 %v316_v8, %v307_v45 }
 0x281   :  { %v1916_v17 = vpop.f32.mrf.mxu0  ;;  %v1914_v49 = vadd.f32 %v1913_v40, %v1815_v38  ;;  %1658 = vmatmul.bf16.gmra.mxu1 %v478_v62  ;;  %1757 = vmatmul.bf16.gmra.mxu2 %v479_v29  ;;  %v335_v38 = vld [vmem:[%s4172_s0 + $0xa08] sm:$0xff] }
 0x283   :  { %v1984_v34 = vmax.f32 %v1914_v49, 0.0  ;;  %1866 = vmatmul.bf16.gmra.mxu3 %v498_v18  ;;  %v328_v49 = vld [vmem:[%s4172_s0 + $0x9d0] sm:$0xff]  ;;  %v337_v18 = vld [vmem:[%s4172_s0 + $0xa18] sm:$0xff] }
 0x284   :  { %1955 = vmatmul.bf16.gmra.mxu0 %v481_v16  ;;  %v1718_v50 = vpop.f32.mrf.mxu2 }
 0x285   :  { %2020 = vst [vmem:[%s4173_s3 + $0x68] sm:$0xff] %v1984_v34  ;;  %v1719_v36 = vadd.f32 %v1718_v50, %v1620_v10 }
 0x286   :  { %v1621_v26 = vpop.f32.mrf.mxu1  ;;  %v1827_v46 = vpop.f32.mrf.mxu3 }
 0x287   :  { %v1818_v27 = vadd.f32 %v3968_v57, %v1719_v36  ;;  %v1622_v54 = vadd.f32 %v1621_v26, %v3391_v12  ;;  %v497_v36 = vpack.c.bf16 %v335_v38, %v326_v5 }
 0x289   :  { %v1918_v21 = vpop.f32.mrf.mxu0  ;;  %v1917_v2 = vadd.f32 %v1916_v17, %v1818_v27  ;;  %v499_v27 = vpack.c.bf16 %v337_v18, %v328_v49 }
 0x28b   :  { %v1985_v57 = vmax.f32 %v1917_v2, 0.0 }
 0x28c   :  { %v1720_v60 = vpop.f32.mrf.mxu2 }
 0x28d   :  { %2021 = vst [vmem:[%s4173_s3 + $0x70] sm:$0xff] %v1985_v57  ;;  %v1721_v40 = vadd.f32 %v1720_v60, %v1622_v54 }
 0x28e   :  { %v1624_v33 = vpop.f32.mrf.mxu1  ;;  %v1829_v1 = vpop.f32.mrf.mxu3 }
 0x28f   :  { %v1820_v12 = vadd.f32 %v3999_v31, %v1721_v40  ;;  %v1625_v37 = vadd.f32 %v1624_v33, %v3401_v15  ;;  %v334_v15 = vld [vmem:[%s4172_s0 + $0xa00] sm:$0xff] }
 0x290   :  { %v496_v50 = vpack.c.bf16 %v334_v15, %v325_v35 }
 0x291   :  { %v1921_v23 = vpop.f32.mrf.mxu0  ;;  %v1919_v43 = vadd.f32 %v1918_v21, %v1820_v12  ;;  %1663 = vmatmul.bf16.gmra.mxu1 %v487_v47  ;;  %1762 = vmatmul.bf16.gmra.mxu2 %v488_v9 }
 0x293   :  { %v1986_v48 = vmax.f32 %v1919_v43, 0.0 }
 0x294   :  { %1960 = vmatmul.bf16.gmra.mxu0 %v490_v32  ;;  %v1723_v53 = vpop.f32.mrf.mxu2 }
 0x295   :  { %2022 = vst [vmem:[%s4173_s3 + $0x78] sm:$0xff] %v1986_v48  ;;  %v1724_v61 = vadd.f32 %v1723_v53, %v1625_v37 }
 0x296   :  { %v1626_v62 = vpop.f32.mrf.mxu1  ;;  %v1832_v31 = vpop.f32.mrf.mxu3 }
 0x297   :  { %v1823_v29 = vadd.f32 %v4006_v63, %v1724_v61  ;;  %v1627_v17 = vadd.f32 %v1626_v62, %v3429_v39 }
 0x299   :  { %v1923_v24 = vpop.f32.mrf.mxu0  ;;  %v1922_v16 = vadd.f32 %v1921_v23, %v1823_v29 }
 0x29b   :  { %v1987_v63 = vmax.f32 %v1922_v16, 0.0 }
 0x29c   :  { %v1725_v34 = vpop.f32.mrf.mxu2 }
 0x29d   :  { %2023 = vst [vmem:[%s4173_s3 + $0x80] sm:$0xff] %v1987_v63  ;;  %v1726_v10 = vadd.f32 %v1725_v34, %v1627_v17 }
 0x29e   :  { %v1629_v26 = vpop.f32.mrf.mxu1  ;;  %v1834_v45 = vpop.f32.mrf.mxu3 }
 0x29f   :  { %v1825_v39 = vadd.f32 %v4037_v51, %v1726_v10  ;;  %v1630_v3 = vadd.f32 %v1629_v26, %v3439_v14 }
 0x2a1   :  { %v1926_v21 = vpop.f32.mrf.mxu0  ;;  %v1924_v2 = vadd.f32 %v1923_v24, %v1825_v39  ;;  %1668 = vmatmul.bf16.gmra.mxu1 %v496_v50  ;;  %1767 = vmatmul.bf16.gmra.mxu2 %v497_v36 }
 0x2a3   :  { %v1988_v8 = vmax.f32 %v1924_v2, 0.0 }
 0x2a4   :  { %1965 = vmatmul.bf16.gmra.mxu0 %v499_v27  ;;  %v1728_v42 = vpop.f32.mrf.mxu2 }
 0x2a5   :  { %2024 = vst [vmem:[%s4173_s3 + $0x88] sm:$0xff] %v1988_v8  ;;  %v1729_v57 = vadd.f32 %v1728_v42, %v1630_v3 }
 0x2a6   :  { %v1631_v54 = vpop.f32.mrf.mxu1  ;;  %v1837_v9 = vpop.f32.mrf.mxu3 }
 0x2a7   :  { %v1828_v19 = vadd.f32 %v1827_v46, %v1729_v57  ;;  %v1632_v40 = vadd.f32 %v1631_v54, %v3467_v59 }
 0x2a9   :  { %v1928_v13 = vpop.f32.mrf.mxu0  ;;  %v1927_v60 = vadd.f32 %v1926_v21, %v1828_v19 }
 0x2ab   :  { %v1989_v51 = vmax.f32 %v1927_v60, 0.0 }
 0x2ac   :  { %v1730_v47 = vpop.f32.mrf.mxu2 }
 0x2ad   :  { %2025 = vst [vmem:[%s4173_s3 + $0x90] sm:$0xff] %v1989_v51  ;;  %v1731_v14 = vadd.f32 %v1730_v47, %v1632_v40 }
 0x2ae   :  { %v1634_v33 = vpop.f32.mrf.mxu1  ;;  %v1839_v53 = vpop.f32.mrf.mxu3 }
 0x2af   :  { %v1830_v32 = vadd.f32 %v1829_v1, %v1731_v14  ;;  %v1635_v48 = vadd.f32 %v1634_v33, %v3477_v41 }
 0x2b1   :  { %v1931_v12 = vpop.f32.mrf.mxu0  ;;  %v1929_v23 = vadd.f32 %v1928_v13, %v1830_v32 }
 0x2b3   :  { %v1990_v43 = vmax.f32 %v1929_v23, 0.0 }
 0x2b4   :  { %v1733_v46 = vpop.f32.mrf.mxu2 }
 0x2b5   :  { %2026 = vst [vmem:[%s4173_s3 + $0x98] sm:$0xff] %v1990_v43  ;;  %v1734_v59 = vadd.f32 %v1733_v46, %v1635_v48 }
 0x2b6   :  { %v1636_v37 = vpop.f32.mrf.mxu1  ;;  %v1842_v38 = vpop.f32.mrf.mxu3 }
 0x2b7   :  { %v1833_v61 = vadd.f32 %v1832_v31, %v1734_v59  ;;  %v1637_v16 = vadd.f32 %v1636_v37, %v3505_v7 }
 0x2b9   :  { %v1933_v62 = vpop.f32.mrf.mxu0  ;;  %v1932_v29 = vadd.f32 %v1931_v12, %v1833_v61 }
 0x2bb   :  { %v1991_v24 = vmax.f32 %v1932_v29, 0.0 }
 0x2bc   :  { %v1735_v1 = vpop.f32.mrf.mxu2 }
 0x2bd   :  { %2027 = vst [vmem:[%s4173_s3 + $0xa0] sm:$0xff] %v1991_v24  ;;  %v1736_v41 = vadd.f32 %v1735_v1, %v1637_v16 }
 0x2be   :  { %v1639_v35 = vpop.f32.mrf.mxu1  ;;  %v1844_v36 = vpop.f32.mrf.mxu3 }
 0x2bf   :  { %v1835_v15 = vadd.f32 %v1834_v45, %v1736_v41  ;;  %v1640_v49 = vadd.f32 %v1639_v35, %v3515_v11 }
 0x2c1   :  { %v1936_v5 = vpop.f32.mrf.mxu0  ;;  %v1934_v63 = vadd.f32 %v1933_v62, %v1835_v15 }
 0x2c3   :  { %v1992_v17 = vmax.f32 %v1934_v63, 0.0 }
 0x2c4   :  { %v1738_v31 = vpop.f32.mrf.mxu2 }
 0x2c5   :  { %2028 = vst [vmem:[%s4173_s3 + $0xa8] sm:$0xff] %v1992_v17  ;;  %v1739_v7 = vadd.f32 %v1738_v31, %v1640_v49 }
 0x2c6   :  { %v1641_v18 = vpop.f32.mrf.mxu1  ;;  %v1847_v54 = vpop.f32.mrf.mxu3 }
 0x2c7   :  { %v1838_v34 = vadd.f32 %v1837_v9, %v1739_v7  ;;  %v1642_v27 = vadd.f32 %v1641_v18, %v3543_v20 }
 0x2c9   :  { %v1938_v10 = vpop.f32.mrf.mxu0  ;;  %v1937_v50 = vadd.f32 %v1936_v5, %v1838_v34 }
 0x2cb   :  { %v1993_v26 = vmax.f32 %v1937_v50, 0.0 }
 0x2cc   :  { %v1740_v39 = vpop.f32.mrf.mxu2 }
 0x2cd   :  { %2029 = vst [vmem:[%s4173_s3 + $0xb0] sm:$0xff] %v1993_v26  ;;  %v1741_v11 = vadd.f32 %v1740_v39, %v1642_v27 }
 0x2ce   :  { %v1644_v21 = vpop.f32.mrf.mxu1  ;;  %v1849_v33 = vpop.f32.mrf.mxu3 }
 0x2cf   :  { %v1840_v2 = vadd.f32 %v1839_v53, %v1741_v11  ;;  %v1645_v42 = vadd.f32 %v1644_v21, %v3553_v44 }
 0x2d1   :  { %v1941_v45 = vpop.f32.mrf.mxu0  ;;  %v1939_v8 = vadd.f32 %v1938_v10, %v1840_v2 }
 0x2d3   :  { %v1994_v3 = vmax.f32 %v1939_v8, 0.0 }
 0x2d4   :  { %v1743_v57 = vpop.f32.mrf.mxu2 }
 0x2d5   :  { %2030 = vst [vmem:[%s4173_s3 + $0xb8] sm:$0xff] %v1994_v3  ;;  %v1744_v20 = vadd.f32 %v1743_v57, %v1645_v42 }
 0x2d6   :  { %v1646_v19 = vpop.f32.mrf.mxu1  ;;  %v1852_v61 = vpop.f32.mrf.mxu3 }
 0x2d7   :  { %v1843_v13 = vadd.f32 %v1842_v38, %v1744_v20  ;;  %v1647_v47 = vadd.f32 %v1646_v19, %v3581_v55 }
 0x2d9   :  { %v1943_v60 = vpop.f32.mrf.mxu0  ;;  %v1942_v51 = vadd.f32 %v1941_v45, %v1843_v13 }
 0x2db   :  { %v1995_v40 = vmax.f32 %v1942_v51, 0.0 }
 0x2dc   :  { %v1745_v9 = vpop.f32.mrf.mxu2 }
 0x2dd   :  { %2031 = vst [vmem:[%s4173_s3 + $0xc0] sm:$0xff] %v1995_v40  ;;  %v1746_v44 = vadd.f32 %v1745_v9, %v1647_v47 }
 0x2de   :  { %v1649_v14 = vpop.f32.mrf.mxu1  ;;  %v1854_v5 = vpop.f32.mrf.mxu3 }
 0x2df   :  { %v1845_v32 = vadd.f32 %v1844_v36, %v1746_v44  ;;  %v1650_v48 = vadd.f32 %v1649_v14, %v3591_v0 }
 0x2e1   :  { %v1946_v12 = vpop.f32.mrf.mxu0  ;;  %v1944_v23 = vadd.f32 %v1943_v60, %v1845_v32 }
 0x2e3   :  { %v1996_v43 = vmax.f32 %v1944_v23, 0.0 }
 0x2e4   :  { %v1748_v46 = vpop.f32.mrf.mxu2 }
 0x2e5   :  { %2032 = vst [vmem:[%s4173_s3 + $0xc8] sm:$0xff] %v1996_v43  ;;  %v1749_v55 = vadd.f32 %v1748_v46, %v1650_v48 }
 0x2e6   :  { %v1651_v59 = vpop.f32.mrf.mxu1  ;;  %v1857_v36 = vpop.f32.mrf.mxu3 }
 0x2e7   :  { %v1848_v37 = vadd.f32 %v1847_v54, %v1749_v55  ;;  %v1652_v24 = vadd.f32 %v1651_v59, %v3619_v25 }
 0x2e9   :  { %v1948_v53 = vpop.f32.mrf.mxu0  ;;  %v1947_v62 = vadd.f32 %v1946_v12, %v1848_v37 }
 0x2eb   :  { %v1997_v29 = vmax.f32 %v1947_v62, 0.0 }
 0x2ec   :  { %v1750_v16 = vpop.f32.mrf.mxu2 }
 0x2ed   :  { %2033 = vst [vmem:[%s4173_s3 + $0xd0] sm:$0xff] %v1997_v29  ;;  %v1751_v0 = vadd.f32 %v1750_v16, %v1652_v24 }
 0x2ee   :  { %v1654_v1 = vpop.f32.mrf.mxu1  ;;  %v1859_v3 = vpop.f32.mrf.mxu3 }
 0x2ef   :  { %v1850_v41 = vadd.f32 %v1849_v33, %v1751_v0  ;;  %v1655_v63 = vadd.f32 %v1654_v1, %v3634_v4 }
 0x2f1   :  { %v1951_v35 = vpop.f32.mrf.mxu0  ;;  %v1949_v15 = vadd.f32 %v1948_v53, %v1850_v41 }
 0x2f3   :  { %v1998_v38 = vmax.f32 %v1949_v15, 0.0 }
 0x2f4   :  { %v1753_v17 = vpop.f32.mrf.mxu2 }
 0x2f5   :  { %2034 = vst [vmem:[%s4173_s3 + $0xd8] sm:$0xff] %v1998_v38  ;;  %v1754_v25 = vadd.f32 %v1753_v17, %v1655_v63 }
 0x2f6   :  { %v1656_v49 = vpop.f32.mrf.mxu1  ;;  %v1862_v40 = vpop.f32.mrf.mxu3 }
 0x2f7   :  { %v1853_v31 = vadd.f32 %v1852_v61, %v1754_v25  ;;  %v1657_v10 = vadd.f32 %v1656_v49, %v3662_v22 }
 0x2f9   :  { %v1953_v7 = vpop.f32.mrf.mxu0  ;;  %v1952_v18 = vadd.f32 %v1951_v35, %v1853_v31 }
 0x2fb   :  { %v1999_v34 = vmax.f32 %v1952_v18, 0.0 }
 0x2fc   :  { %v1755_v50 = vpop.f32.mrf.mxu2 }
 0x2fd   :  { %2035 = vst [vmem:[%s4173_s3 + $0xe0] sm:$0xff] %v1999_v34  ;;  %v1756_v4 = vadd.f32 %v1755_v50, %v1657_v10 }
 0x2fe   :  { %v1659_v26 = vpop.f32.mrf.mxu1  ;;  %v1864_v43 = vpop.f32.mrf.mxu3 }
 0x2ff   :  { %v1855_v27 = vadd.f32 %v1854_v5, %v1756_v4  ;;  %v1660_v2 = vadd.f32 %v1659_v26, %v3672_v58 }
 0x301   :  { %v1956_v39 = vpop.f32.mrf.mxu0  ;;  %v1954_v11 = vadd.f32 %v1953_v7, %v1855_v27 }
 0x303   :  { %v2000_v21 = vmax.f32 %v1954_v11, 0.0 }
 0x304   :  { %v1758_v45 = vpop.f32.mrf.mxu2 }
 0x305   :  { %2036 = vst [vmem:[%s4173_s3 + $0xe8] sm:$0xff] %v2000_v21  ;;  %v1759_v22 = vadd.f32 %v1758_v45, %v1660_v2 }
 0x306   :  { %v1661_v8 = vpop.f32.mrf.mxu1  ;;  %v1867_v24 = vpop.f32.mrf.mxu3 }
 0x307   :  { %v1858_v42 = vadd.f32 %v1857_v36, %v1759_v22  ;;  %v1662_v19 = vadd.f32 %v1661_v8, %v3700_v6 }
 0x309   :  { %v1958_v57 = vpop.f32.mrf.mxu0  ;;  %v1957_v54 = vadd.f32 %v1956_v39, %v1858_v42 }
 0x30b   :  { %v2001_v20 = vmax.f32 %v1957_v54, 0.0 }
 0x30c   :  { %v1760_v13 = vpop.f32.mrf.mxu2 }
 0x30d   :  { %2037 = vst [vmem:[%s4173_s3 + $0xf0] sm:$0xff] %v2001_v20  ;;  %v1761_v58 = vadd.f32 %v1760_v13, %v1662_v19 }
 0x30e   :  { %v1664_v60 = vpop.f32.mrf.mxu1  ;;  %v1869_v63 = vpop.f32.mrf.mxu3 }
 0x30f   :  { %v1860_v51 = vadd.f32 %v1859_v3, %v1761_v58  ;;  %v1665_v14 = vadd.f32 %v1664_v60, %v3710_v30 }
 0x311   :  { %v1959_v47 = vadd.f32 %v1958_v57, %v1860_v51  ;;  %v1961_v9 = vpop.f32.mrf.mxu0 }
 0x313   :  { %v2002_v44 = vmax.f32 %v1959_v47, 0.0 }
 0x314   :  { %v1763_v33 = vpop.f32.mrf.mxu2 }
 0x315   :  { %2038 = vst [vmem:[%s4173_s3 + $0xf8] sm:$0xff] %v2002_v44  ;;  %v1764_v6 = vadd.f32 %v1763_v33, %v1665_v14 }
 0x316   :  { %v1666_v32 = vpop.f32.mrf.mxu1 }
 0x317   :  { %v1863_v12 = vadd.f32 %v1862_v40, %v1764_v6  ;;  %v1667_v46 = vadd.f32 %v1666_v32, %v3738_v56 }
 0x319   :  { %v1962_v23 = vadd.f32 %v1961_v9, %v1863_v12  ;;  %v1963_v55 = vpop.f32.mrf.mxu0 }
 0x31b   :  { %v2003_v48 = vmax.f32 %v1962_v23, 0.0 }
 0x31c   :  { %v1765_v59 = vpop.f32.mrf.mxu2 }
 0x31d   :  { %2039 = vst [vmem:[%s4173_s3 + $0x100] sm:$0xff] %v2003_v48  ;;  %v1766_v30 = vadd.f32 %v1765_v59, %v1667_v46 }
 0x31e   :  { %v1669_v37 = vpop.f32.mrf.mxu1 }
 0x31f   :  { %v1865_v53 = vadd.f32 %v1864_v43, %v1766_v30  ;;  %v1670_v29 = vadd.f32 %v1669_v37, %v3748_v52 }
 0x321   :  { %v1964_v61 = vadd.f32 %v1963_v55, %v1865_v53  ;;  %v1966_v0 = vpop.f32.mrf.mxu0 }
 0x323   :  { %v2004_v62 = vmax.f32 %v1964_v61, 0.0 }
 0x324   :  { %v1768_v16 = vpop.f32.mrf.mxu2 }
 0x325   :  { %2040 = vst [vmem:[%s4173_s3 + $0x108] sm:$0xff] %v2004_v62  ;;  %v1769_v56 = vadd.f32 %v1768_v16, %v1670_v29 }
 0x326   :  { %v1671_v41 = vpop.f32.mrf.mxu1 }
 0x327   :  { %v1868_v1 = vadd.f32 %v1867_v24, %v1769_v56  ;;  %v1672_v5 = vadd.f32 %v1671_v41, %v3774_v28 }
 0x329   :  { %v1967_v35 = vadd.f32 %v1966_v0, %v1868_v1  ;;  %v1968_v25 = vpop.f32.mrf.mxu0 }
 0x32b   :  { %v2005_v15 = vmax.f32 %v1967_v35, 0.0 }
 0x32c   :  { %v1770_v38 = vpop.f32.mrf.mxu2 }
 0x32d   :  { %2041 = vst [vmem:[%s4173_s3 + $0x110] sm:$0xff] %v2005_v15  ;;  %v1771_v52 = vadd.f32 %v1770_v38, %v1672_v5 }
 0x32f   :  { %v1870_v17 = vadd.f32 %v1869_v63, %v1771_v52 }
 0x331   :  { %v1969_v49 = vadd.f32 %v1968_v25, %v1870_v17 }
 0x333   :  { %v2006_v31 = vmax.f32 %v1969_v49, 0.0 }
 0x335   :  { %2042 = vst [vmem:[%s4173_s3 + $0x118] sm:$0xff] %v2006_v31 }

// kernel: fwd.11
= control target key start
LH: loop header
LB: loop body
LE: loop exit
PB: predicated region body
PF: predicated region fallthrough
CT: control target
= control target key end

     0   :  { %s692_s1 = inlined_call_operand.vmem [shape: bf16[128,512], index: 1, kind: input, shape index: {}]   ;;  %s693_s0 = inlined_call_operand.vmem [shape: f32[16,128], index: 0, kind: input, shape index: {}]   ;;  %s694_s2 = inlined_call_operand.vmem [shape: f32[1,512], index: 2, kind: input, shape index: {}]   ;;  %s695_s3 = inlined_call_operand.vmem [shape: f32[16,512], index: 3, kind: output, shape index: {}]  }
   0x1   :  { %v401_v0 = vld [vmem:[%s692_s1 + $0xe0] sm:$0xf]  ;;  %v445_v1 = vld [vmem:[%s692_s1 + $0xec] sm:$0xf0]  ;;  %v443_v2 = vld [vmem:[%s692_s1 + $0xe4] sm:$0xf] }
   0x2   :  { %v402_v3 = vor.u32 %v445_v1, %v401_v0  ;;  %v403_v4 = vld [vmem:[%s692_s1 + $0xf0] sm:$0xf0]  ;;  %v409_v5 = vld [vmem:[%s692_s1 + $0xe8] sm:$0xf]  ;;  %v446_v6 = vld [vmem:[%s692_s1 + $0xf4] sm:$0xf0] }
   0x3   :  { %v406_v7 = vor.u32 %v443_v2, %v403_v4  ;;  %v410_v8 = vor.u32 %v446_v6, %v409_v5  ;;  %v444_v9 = vld [vmem:[%s692_s1 + $0xec] sm:$0xf]  ;;  %v411_v10 = vld [vmem:[%s692_s1 + $0xf8] sm:$0xf0]  ;;  %v385_v11 = vld [vmem:[%s692_s1 + $0xc0] sm:$0xf] }
   0x4   :  { %219 = vmatpush.bf16.msra.mxu0 %v402_v3  ;;  %v414_v12 = vor.u32 %v444_v9, %v411_v10  ;;  %v441_v13 = vld [vmem:[%s692_s1 + $0xcc] sm:$0xf0]  ;;  %v439_v14 = vld [vmem:[%s692_s1 + $0xc4] sm:$0xf]  ;;  %v387_v15 = vld [vmem:[%s692_s1 + $0xd0] sm:$0xf0] }
   0x5   :  { %233 = vmatpush.bf16.msra.mxu1 %v406_v7  ;;  %247 = vmatpush.bf16.msra.mxu2 %v410_v8  ;;  %v386_v16 = vor.u32 %v441_v13, %v385_v11  ;;  %v390_v17 = vor.u32 %v439_v14, %v387_v15  ;;  %v393_v18 = vld [vmem:[%s692_s1 + $0xc8] sm:$0xf]  ;;  %v442_v19 = vld [vmem:[%s692_s1 + $0xd4] sm:$0xf0]  ;;  %v440_v20 = vld [vmem:[%s692_s1 + $0xcc] sm:$0xf] }
   0x6   :  { %261 = vmatpush.bf16.msra.mxu3 %v414_v12  ;;  %v394_v21 = vor.u32 %v442_v19, %v393_v18  ;;  %v395_v22 = vld [vmem:[%s692_s1 + $0xd8] sm:$0xf0]  ;;  %v369_v23 = vld [vmem:[%s692_s1 + $0xa0] sm:$0xf]  ;;  %v437_v24 = vld [vmem:[%s692_s1 + $0xac] sm:$0xf0] }
   0x7   :  { %v398_v25 = vor.u32 %v440_v20, %v395_v22  ;;  %v435_v26 = vld [vmem:[%s692_s1 + $0xa4] sm:$0xf]  ;;  %v371_v27 = vld [vmem:[%s692_s1 + $0xb0] sm:$0xf0]  ;;  %v377_v28 = vld [vmem:[%s692_s1 + $0xa8] sm:$0xf]  ;;  %v370_v29 = vor.u32 %v437_v24, %v369_v23 }
   0x8   :  { %220 = vmatpush.bf16.msra.mxu0 %v386_v16  ;;  %v438_v30 = vld [vmem:[%s692_s1 + $0xb4] sm:$0xf0]  ;;  %v436_v31 = vld [vmem:[%s692_s1 + $0xac] sm:$0xf]  ;;  %v379_v32 = vld [vmem:[%s692_s1 + $0xb8] sm:$0xf0]  ;;  %v374_v33 = vor.u32 %v435_v26, %v371_v27 }
   0x9   :  { %234 = vmatpush.bf16.msra.mxu1 %v390_v17  ;;  %248 = vmatpush.bf16.msra.mxu2 %v394_v21  ;;  %v378_v34 = vor.u32 %v438_v30, %v377_v28  ;;  %v353_v35 = vld [vmem:[%s692_s1 + $0x80] sm:$0xf]  ;;  %v433_v36 = vld [vmem:[%s692_s1 + $0x8c] sm:$0xf0]  ;;  %v431_v37 = vld [vmem:[%s692_s1 + $0x84] sm:$0xf]  ;;  %v382_v38 = vor.u32 %v436_v31, %v379_v32 }
   0xa   :  { %262 = vmatpush.bf16.msra.mxu3 %v398_v25  ;;  %v355_v39 = vld [vmem:[%s692_s1 + $0x90] sm:$0xf0]  ;;  %v361_v40 = vld [vmem:[%s692_s1 + $0x88] sm:$0xf]  ;;  %v434_v41 = vld [vmem:[%s692_s1 + $0x94] sm:$0xf0]  ;;  %v354_v44 = vor.u32 %v433_v36, %v353_v35 }
   0xb   :  { %v432_v42 = vld [vmem:[%s692_s1 + $0x8c] sm:$0xf]  ;;  %v363_v43 = vld [vmem:[%s692_s1 + $0x98] sm:$0xf0]  ;;  %v358_v45 = vor.u32 %v431_v37, %v355_v39  ;;  %v362_v46 = vor.u32 %v434_v41, %v361_v40  ;;  %v337_v47 = vld [vmem:[%s692_s1 + $0x60] sm:$0xf] }
   0xc   :  { %221 = vmatpush.bf16.msra.mxu0 %v370_v29  ;;  %v429_v48 = vld [vmem:[%s692_s1 + $0x6c] sm:$0xf0]  ;;  %v427_v49 = vld [vmem:[%s692_s1 + $0x64] sm:$0xf]  ;;  %v366_v50 = vor.u32 %v432_v42, %v363_v43  ;;  %v339_v51 = vld [vmem:[%s692_s1 + $0x70] sm:$0xf0] }
   0xd   :  { %235 = vmatpush.bf16.msra.mxu1 %v374_v33  ;;  %249 = vmatpush.bf16.msra.mxu2 %v378_v34  ;;  %v345_v52 = vld [vmem:[%s692_s1 + $0x68] sm:$0xf]  ;;  %v430_v53 = vld [vmem:[%s692_s1 + $0x74] sm:$0xf0]  ;;  %v428_v54 = vld [vmem:[%s692_s1 + $0x6c] sm:$0xf]  ;;  %v338_v56 = vor.u32 %v429_v48, %v337_v47  ;;  %v342_v57 = vor.u32 %v427_v49, %v339_v51 }
   0xe   :  { %263 = vmatpush.bf16.msra.mxu3 %v382_v38  ;;  %v347_v55 = vld [vmem:[%s692_s1 + $0x78] sm:$0xf0]  ;;  %v346_v58 = vor.u32 %v430_v53, %v345_v52  ;;  %v321_v59 = vld [vmem:[%s692_s1 + $0x40] sm:$0xf]  ;;  %v425_v60 = vld [vmem:[%s692_s1 + $0x4c] sm:$0xf0] }
   0xf   :  { %v423_v61 = vld [vmem:[%s692_s1 + $0x44] sm:$0xf]  ;;  %v350_v62 = vor.u32 %v428_v54, %v347_v55  ;;  %v323_v63 = vld [vmem:[%s692_s1 + $0x50] sm:$0xf0]  ;;  %v329_v0 = vld [vmem:[%s692_s1 + $0x48] sm:$0xf]  ;;  %v322_v4 = vor.u32 %v425_v60, %v321_v59 }
  0x10   :  { %222 = vmatpush.bf16.msra.mxu0 %v354_v44  ;;  %v426_v1 = vld [vmem:[%s692_s1 + $0x54] sm:$0xf0]  ;;  %v424_v2 = vld [vmem:[%s692_s1 + $0x4c] sm:$0xf]  ;;  %v331_v3 = vld [vmem:[%s692_s1 + $0x58] sm:$0xf0]  ;;  %v326_v5 = vor.u32 %v423_v61, %v323_v63 }
  0x11   :  { %236 = vmatpush.bf16.msra.mxu1 %v358_v45  ;;  %250 = vmatpush.bf16.msra.mxu2 %v362_v46  ;;  %v330_v6 = vor.u32 %v426_v1, %v329_v0  ;;  %v305_v7 = vld [vmem:[%s692_s1 + $0x20] sm:$0xf]  ;;  %v421_v8 = vld [vmem:[%s692_s1 + $0x2c] sm:$0xf0]  ;;  %v419_v9 = vld [vmem:[%s692_s1 + $0x24] sm:$0xf]  ;;  %v334_v10 = vor.u32 %v424_v2, %v331_v3 }
  0x12   :  { %264 = vmatpush.bf16.msra.mxu3 %v366_v50  ;;  %v307_v11 = vld [vmem:[%s692_s1 + $0x30] sm:$0xf0]  ;;  %v313_v12 = vld [vmem:[%s692_s1 + $0x28] sm:$0xf]  ;;  %v422_v13 = vld [vmem:[%s692_s1 + $0x34] sm:$0xf0]  ;;  %v306_v16 = vor.u32 %v421_v8, %v305_v7 }
  0x13   :  { %v420_v14 = vld [vmem:[%s692_s1 + $0x2c] sm:$0xf]  ;;  %v315_v15 = vld [vmem:[%s692_s1 + $0x38] sm:$0xf0]  ;;  %v310_v17 = vor.u32 %v419_v9, %v307_v11  ;;  %v314_v18 = vor.u32 %v422_v13, %v313_v12  ;;  %v289_v19 = vld [vmem:[%s692_s1] sm:$0xf] }
  0x14   :  { %223 = vmatpush.bf16.msra.mxu0 %v338_v56  ;;  %v417_v20 = vld [vmem:[%s692_s1 + $0xc] sm:$0xf0]  ;;  %v415_v21 = vld [vmem:[%s692_s1 + $0x4] sm:$0xf]  ;;  %v318_v22 = vor.u32 %v420_v14, %v315_v15  ;;  %v291_v23 = vld [vmem:[%s692_s1 + $0x10] sm:$0xf0] }
  0x15   :  { %237 = vmatpush.bf16.msra.mxu1 %v342_v57  ;;  %251 = vmatpush.bf16.msra.mxu2 %v346_v58  ;;  %v297_v24 = vld [vmem:[%s692_s1 + $0x8] sm:$0xf]  ;;  %v418_v25 = vld [vmem:[%s692_s1 + $0x14] sm:$0xf0]  ;;  %v416_v26 = vld [vmem:[%s692_s1 + $0xc] sm:$0xf]  ;;  %v290_v28 = vor.u32 %v417_v20, %v289_v19  ;;  %v294_v31 = vor.u32 %v415_v21, %v291_v23 }
  0x16   :  { %265 = vmatpush.bf16.msra.mxu3 %v350_v62  ;;  %v299_v27 = vld [vmem:[%s692_s1 + $0x18] sm:$0xf0]  ;;  %v14_v29 = vld [vmem:[%s693_s0] sm:$0xff]  ;;  %v15_v30 = vld [vmem:[%s693_s0 + $0x8] sm:$0xff]  ;;  %v298_v32 = vor.u32 %v418_v25, %v297_v24 }
  0x17   :  { %v302_v33 = vor.u32 %v416_v26, %v299_v27  ;;  %v16_v34 = vpack.c.bf16 %v15_v30, %v14_v29  ;;  %v49_v35 = vld [vmem:[%s694_s2] sm:$0xf] }
  0x18   :  { %224 = vmatpush.bf16.msra.mxu0 %v322_v4  ;;  %v51_v36 = vperm.slane %v49_v35, 0  ;;  %v52_v37 = vperm.slane %v49_v35, 1  ;;  %v53_v42 = vperm.slane %v49_v35, 2  ;;  %v54_v43 = vperm.slane %v49_v35, 3 }
  0x19   :  { %238 = vmatpush.bf16.msra.mxu1 %v326_v5  ;;  %252 = vmatpush.bf16.msra.mxu2 %v330_v6 }
  0x1a   :  { %266 = vmatpush.bf16.msra.mxu3 %v334_v10 }
  0x1c   :  { %225 = vmatpush.bf16.msra.mxu0 %v306_v16 }
  0x1d   :  { %239 = vmatpush.bf16.msra.mxu1 %v310_v17  ;;  %253 = vmatpush.bf16.msra.mxu2 %v314_v18 }
  0x1e   :  { %267 = vmatpush.bf16.msra.mxu3 %v318_v22 }
  0x20   :  { %226 = vmatpush.bf16.msra.mxu0 %v290_v28 }
  0x21   :  { %240 = vmatpush.bf16.msra.mxu1 %v294_v31  ;;  %254 = vmatpush.bf16.msra.mxu2 %v298_v32 }
  0x22   :  { %268 = vmatpush.bf16.msra.mxu3 %v302_v33 }
  0x23   :  { %227 = vmatmul.bf16.vlgmr.msra.gmra.mxu0 %v16_v34 }
  0x24   :  { %241 = vmatmul.bf16.vlgmr.msra.gmra.mxu1 %v16_v34  ;;  %255 = vmatmul.bf16.vlgmr.msra.gmra.mxu2 %v16_v34 }
  0x25   :  { %269 = vmatmul.bf16.vlgmr.msra.gmra.mxu3 %v16_v34 }
  0xa0   :  { %v228_v38 = vpop.f32.mrf.mxu0 }
  0xa1   :  { %v229_v39 = vadd.f32 %v228_v38, %v51_v36  ;;  %v242_v40 = vpop.f32.mrf.mxu1 }
  0xa2   :  { %v243_v41 = vadd.f32 %v242_v40, %v52_v37 }
  0xa3   :  { %275 = vst [vmem:[%s695_s3] sm:$0xff] %v229_v39 }
  0xa4   :  { %276 = vst [vmem:[%s695_s3 + $0x8] sm:$0xff] %v243_v41 }
  0xa7   :  { %v256_v44 = vpop.f32.mrf.mxu2 }
  0xa8   :  { %v257_v45 = vadd.f32 %v256_v44, %v53_v42  ;;  %v270_v46 = vpop.f32.mrf.mxu3  ;;  %v230_v47 = vpop.f32.mrf.mxu0 }
  0xa9   :  { %v271_v48 = vadd.f32 %v270_v46, %v54_v43  ;;  %v231_v49 = vadd.f32 %v230_v47, %v51_v36  ;;  %v244_v50 = vpop.f32.mrf.mxu1 }
  0xaa   :  { %277 = vst [vmem:[%s695_s3 + $0x10] sm:$0xff] %v257_v45  ;;  %v245_v51 = vadd.f32 %v244_v50, %v52_v37 }
  0xab   :  { %278 = vst [vmem:[%s695_s3 + $0x18] sm:$0xff] %v271_v48 }
  0xac   :  { %279 = vst [vmem:[%s695_s3 + $0x20] sm:$0xff] %v231_v49 }
  0xad   :  { %280 = vst [vmem:[%s695_s3 + $0x28] sm:$0xff] %v245_v51 }
  0xaf   :  { %v258_v52 = vpop.f32.mrf.mxu2 }
  0xb0   :  { %v259_v53 = vadd.f32 %v258_v52, %v53_v42  ;;  %v272_v54 = vpop.f32.mrf.mxu3 }
  0xb1   :  { %v273_v55 = vadd.f32 %v272_v54, %v54_v43 }
  0xb2   :  { %281 = vst [vmem:[%s695_s3 + $0x30] sm:$0xff] %v259_v53 }
  0xb3   :  { %282 = vst [vmem:[%s695_s3 + $0x38] sm:$0xff] %v273_v55 }

// kernel: fwd.13
= control target key start
LH: loop header
LB: loop body
LE: loop exit
PB: predicated region body
PF: predicated region fallthrough
CT: control target
= control target key end

     0   :  { %s205_s1 = inlined_call_operand.vmem [shape: bf16[128,128], index: 1, kind: input, shape index: {}]   ;;  %s206_s2 = inlined_call_operand.vmem [shape: f32[1,128], index: 2, kind: input, shape index: {}]   ;;  %s207_s0 = inlined_call_operand.vmem [shape: f32[16,128], index: 0, kind: input, shape index: {}]   ;;  %s208_s3 = inlined_call_operand.vmem [shape: f32[16,128], index: 3, kind: output, shape index: {}]  }
   0x1   :  { %v144_v0 = vld [vmem:[%s205_s1 + $0x38] sm:$0xff]  ;;  %v143_v1 = vld [vmem:[%s205_s1 + $0x30] sm:$0xff]  ;;  %v142_v2 = vld [vmem:[%s205_s1 + $0x28] sm:$0xff] }
   0x2   :  { %85 = vmatpush.bf16.msra.mxu0 %v144_v0  ;;  %v141_v3 = vld [vmem:[%s205_s1 + $0x20] sm:$0xff]  ;;  %v140_v4 = vld [vmem:[%s205_s1 + $0x18] sm:$0xff]  ;;  %v139_v5 = vld [vmem:[%s205_s1 + $0x10] sm:$0xff] }
   0x3   :  { %v138_v6 = vld [vmem:[%s205_s1 + $0x8] sm:$0xff]  ;;  %v137_v7 = vld [vmem:[%s205_s1] sm:$0xff] }
   0x4   :  { %v14_v8 = vld [vmem:[%s207_s0] sm:$0xff]  ;;  %v15_v9 = vld [vmem:[%s207_s0 + $0x8] sm:$0xff] }
   0x5   :  { %v16_v10 = vpack.c.bf16 %v15_v9, %v14_v8  ;;  %v145_v11 = vld [vmem:[%s206_s2] ss:$0 sm:$0xff] }
   0x6   :  { %86 = vmatpush.bf16.msra.mxu0 %v143_v1 }
   0xa   :  { %87 = vmatpush.bf16.msra.mxu0 %v142_v2 }
   0xe   :  { %88 = vmatpush.bf16.msra.mxu0 %v141_v3 }
  0x12   :  { %89 = vmatpush.bf16.msra.mxu0 %v140_v4 }
  0x16   :  { %90 = vmatpush.bf16.msra.mxu0 %v139_v5 }
  0x1a   :  { %91 = vmatpush.bf16.msra.mxu0 %v138_v6 }
  0x1e   :  { %92 = vmatpush.bf16.msra.mxu0 %v137_v7 }
  0x21   :  { %93 = vmatmul.bf16.vlgmr.msra.gmra.mxu0 %v16_v10 }
  0x9e   :  { %v94_v12 = vpop.f32.mrf.mxu0 }
  0x9f   :  { %v95_v13 = vadd.f32 %v145_v11, %v94_v12 }
  0xa1   :  { %99 = vst [vmem:[%s208_s3] sm:$0xff] %v95_v13 }
  0xa6   :  { %v96_v14 = vpop.f32.mrf.mxu0 }
  0xa7   :  { %v97_v15 = vadd.f32 %v145_v11, %v96_v14 }
  0xa9   :  { %100 = vst [vmem:[%s208_s3 + $0x8] sm:$0xff] %v97_v15 }

// kernel: fwd.12
= control target key start
LH: loop header
LB: loop body
LE: loop exit
PB: predicated region body
PF: predicated region fallthrough
CT: control target
= control target key end

     0   :  { %s3336_s15 = smov 0   ;;  %s3338_s16 = smov 0   ;;  %s5105_s0 = inlined_call_operand.vmem [shape: f32[8,2,512], index: 0, kind: input, shape index: {}]   ;;  %s5106_s1 = inlined_call_operand.vmem [shape: f32[2,256,128], index: 1, kind: input, shape index: {}]   ;;  %s5107_s2 = inlined_call_operand.vmem [shape: f32[2,256,128], index: 2, kind: input, shape index: {}]   ;;  %s5108_s3 = inlined_call_operand.vmem [shape: f32[2,256], index: 3, kind: input, shape index: {}]   ;;  %s5109_s4 = inlined_call_operand.vmem [shape: bf16[128,768], index: 4, kind: input, shape index: {}]   ;;  %s5110_s5 = inlined_call_operand.vmem [shape: f32[1,768], index: 5, kind: input, shape index: {}]   ;;  %s5111_s6 = inlined_call_operand.vmem [shape: f32[1,128], index: 6, kind: input, shape index: {}]   ;;  %s5112_s7 = inlined_call_operand.<no memory space> [shape: f32[1,1], index: 7, kind: input, shape index: {}]   ;;  %s5113_s8 = inlined_call_operand.vmem [shape: bf16[128,512], index: 8, kind: input, shape index: {}]   ;;  %s5114_s9 = inlined_call_operand.vmem [shape: f32[8,2,128], index: 9, kind: output, shape index: {0}]   ;;  %s5115_s10 = inlined_call_operand.vmem [shape: f32[8,2,256], index: 10, kind: output, shape index: {1}]  }
   0x1   :  { %16 = sst [smem:[#allocation4]] %s5112_s7  ;;  %s3340_s17 = smov 0  }
   0x2 LB: > { %s31_s7 = sadd.s32 1, %s3272_s16  ;;  %p2723_p0 = scmp.ge.s32.totalorder %s3276_s17, 1  ;;  %s3276_s17 = sphi %s3340_s17, %s22_s17   ;;  %s3272_s16 = sphi %s3338_s16, %s5117_s16   ;;  %s3268_s15 = sphi %s3336_s15, %s5116_s15  }
   0x3   : > { %p32_p1 = scmp.ge.s32.totalorder %s31_s7, 8  ;;  %p366_p2 = scmp.lt.s32.totalorder %s3276_s17, 9 }
   0x5   : > { %s5119_s7 = smov (%p32_p1, %s31_s7), 0  ;;  %p367_p3 = pnand %p2723_p0, %p366_p2 }
   0x6   : > { %p456_p4 = scmp.lt.s32.totalorder (!%p367_p3), %s3268_s15, 7  ;;  %p2727_p5 = scmp.ne.s32.totalorder (!%p367_p3), %s3268_s15, 0 }
   0x7   : > { %370 = sbr.rel (%p367_p3) target bundleno = 1450 (0x5aa), region = 56 }
   0xc   : > { %s457_s18 = scalar_select %p456_p4, %s3268_s15, 7 }
   0xd   : > { %475 = sbr.rel (%p2727_p5) target bundleno = 21 (0x15), region = 60 }
   0xe   : > { %s2724_s19 = sshll.u32 %s457_s18, 1  ;;  %s3056_s20 = sshll.u32 %s457_s18, 2 }
   0xf   : > { %s3361_s23 = scalar_lea.vmem %s5114_s9, %s2724_s19  ;;  %s3366_s26 = scalar_lea.vmem %s5115_s10, %s3056_s20 }
  0x12   : > { %v476_v0 = vld [vmem:[%s5108_s3] sm:$0x3]  ;;  %v478_v1 = vld [vmem:[%s5108_s3 + $0x2] sm:$0x3] }
  0x13   : > { %477 = vst [vmem:[#allocation2] sm:$0x3] %v476_v0 }
  0x14   : > { %479 = vst [vmem:[#allocation3] sm:$0x3] %v478_v1 }
  0x15 PF: > { %v2898_v2 = vld [vmem:[%s5109_s4 + $0x150] sm:$0xf]  ;;  %v3102_v3 = vld [vmem:[%s5109_s4 + $0x164] sm:$0xf0]  ;;  %v2874_v4 = vld [vmem:[%s5109_s4 + $0x120] sm:$0xf] }
  0x16   : > { %v2899_v5 = vor.u32 %v3102_v3, %v2898_v2  ;;  %v3096_v6 = vld [vmem:[%s5109_s4 + $0x134] sm:$0xf0]  ;;  %v2850_v8 = vld [vmem:[%s5109_s4 + $0xf0] sm:$0xf]  ;;  %v3090_v9 = vld [vmem:[%s5109_s4 + $0x104] sm:$0xf0] }
  0x17   : > { %v2875_v7 = vor.u32 %v3096_v6, %v2874_v4  ;;  %v2851_v10 = vor.u32 %v3090_v9, %v2850_v8  ;;  %v2826_v11 = vld [vmem:[%s5109_s4 + $0xc0] sm:$0xf]  ;;  %v3084_v12 = vld [vmem:[%s5109_s4 + $0xd4] sm:$0xf0]  ;;  %v2802_v14 = vld [vmem:[%s5109_s4 + $0x90] sm:$0xf] }
  0x18   : > { %785 = vmatpush.bf16.msra.mxu0 %v2899_v5  ;;  %v2827_v13 = vor.u32 %v3084_v12, %v2826_v11  ;;  %v3078_v15 = vld [vmem:[%s5109_s4 + $0xa4] sm:$0xf0]  ;;  %v2778_v17 = vld [vmem:[%s5109_s4 + $0x60] sm:$0xf]  ;;  %v3072_v18 = vld [vmem:[%s5109_s4 + $0x74] sm:$0xf0] }
  0x19   : > { %v2803_v16 = vor.u32 %v3078_v15, %v2802_v14  ;;  %v2779_v19 = vor.u32 %v3072_v18, %v2778_v17  ;;  %v2754_v20 = vld [vmem:[%s5109_s4 + $0x30] sm:$0xf]  ;;  %v3066_v21 = vld [vmem:[%s5109_s4 + $0x44] sm:$0xf0]  ;;  %v2730_v23 = vld [vmem:[%s5109_s4] sm:$0xf] }
  0x1a   : > { %v2755_v22 = vor.u32 %v3066_v21, %v2754_v20  ;;  %v3060_v24 = vld [vmem:[%s5109_s4 + $0x14] sm:$0xf0]  ;;  %v480_v26 = vld [vmem:[#allocation2] sm:$0x3]  ;;  %v884_v33 = vld [vmem:[%s5107_s2 + $0x10] sm:$0xff]  ;;  %s1276_s30 = sld [smem:[#allocation4]] }
  0x1b   : > { %v2731_v25 = vor.u32 %v3060_v24, %v2730_v23  ;;  %v3423_v27 = vpack.c.bf16 %v480_v26, %v480_v26  ;;  %v531_v28 = vld [vmem:[%s5110_s5] sm:$0x3f]  ;;  %v887_v36 = vld [vmem:[%s5107_s2 + $0x28] sm:$0xff]  ;;  %v885_v37 = vld [vmem:[%s5107_s2 + $0x18] sm:$0xff]  ;;  %vm1414_vm0 = vcmask 130112   ;;  %vm1418_vm1 = vcmask 195712  }
  0x1c   : > { %786 = vmatpush.bf16.msra.mxu0 %v2875_v7  ;;  %v533_v29 = vperm.slane %v531_v28, 0  ;;  %v886_v32 = vld [vmem:[%s5107_s2 + $0x20] sm:$0xff]  ;;  %v883_v47 = vld [vmem:[%s5107_s2 + $0x8] sm:$0xff]  ;;  %v889_v50 = vld [vmem:[%s5107_s2 + $0x38] sm:$0xff]  ;;  %vm1422_vm2 = vcmask 261312   ;;  %vm1426_vm3 = vcmask 326912  }
  0x1d   : > { %v882_v34 = vld [vmem:[%s5107_s2] sm:$0xff]  ;;  %v888_v51 = vld [vmem:[%s5107_s2 + $0x30] sm:$0xff]  ;;  %v893_v52 = vld [vmem:[%s5107_s2 + $0x58] sm:$0xff]  ;;  %vm1430_vm4 = vcmask 392512   ;;  %vm1434_vm5 = vcmask 458112   ;;  %vm1438_vm6 = vcmask 523712  }
  0x1e   : > { %v3453_v39 = vld [vmem:[%s5111_s6] ss:$0 sm:$0xff]  ;;  %v892_v56 = vld [vmem:[%s5107_s2 + $0x50] sm:$0xff]  ;;  %v891_v57 = vld [vmem:[%s5107_s2 + $0x48] sm:$0xff]  ;;  %vm1442_vm7 = vcmask 589312   ;;  %vm1446_vm8 = vcmask 654912  }
  0x1f   : > { %v890_v48 = vld [vmem:[%s5107_s2 + $0x40] sm:$0xff]  ;;  %v896_v58 = vld [vmem:[%s5107_s2 + $0x70] sm:$0xff]  ;;  %v895_v61 = vld [vmem:[%s5107_s2 + $0x68] sm:$0xff]  ;;  %vm1450_vm9 = vcmask 720512   ;;  %vm1454_vm10 = vcmask 786112   ;;  %vm1458_vm11 = vcmask 851712  }
  0x20   : > { %787 = vmatpush.bf16.msra.mxu0 %v2851_v10  ;;  %v894_v62 = vld [vmem:[%s5107_s2 + $0x60] sm:$0xff]  ;;  %v899_v3 = vld [vmem:[%s5107_s2 + $0x88] sm:$0xff]  ;;  %v897_v15 = vld [vmem:[%s5107_s2 + $0x78] sm:$0xff]  ;;  %vm1462_vm12 = vcmask 917312   ;;  %vm1466_vm13 = vcmask 982912   ;;  %vm1470_vm14 = vcmask 1048512  }
  0x21   : > { %v898_v14 = vld [vmem:[%s5107_s2 + $0x80] sm:$0xff]  ;;  %vm1565_vm15 = vcmask 1041409   ;;  %s3105_s12 = sshll.u32 %s3268_s15, 3 }
  0x22   : > { %s2189_s18 = scalar_lea.vmem %s5105_s0, %s3105_s12 }
  0x24   : > { %788 = vmatpush.bf16.msra.mxu0 %v2827_v13 }
  0x28   : > { %789 = vmatpush.bf16.msra.mxu0 %v2803_v16 }
  0x2c   : > { %790 = vmatpush.bf16.msra.mxu0 %v2779_v19 }
  0x30   : > { %791 = vmatpush.bf16.msra.mxu0 %v2755_v22 }
  0x34   : > { %792 = vmatpush.bf16.msra.mxu0 %v2731_v25 }
  0x37   : > { %793 = vmatmul.bf16.vlgmr.msra.gmra.mxu0 %v3423_v27 }
  0xb4   : > { %v794_v30 = vpop.f32.mrf.mxu0 }
  0xb5   : > { %v3429_v31 = vadd.f32 %v794_v30, %v533_v29 }
  0xb7   : > { %v3441_v35 = vperm.slane %v3429_v31, 0  ;;  %v947_v10 = vrot.slane %v3429_v31, 1 }
  0xb9   : > { %v956_v38 = vadd.f32 %v3441_v35, %v886_v32  ;;  %v954_v40 = vadd.f32 %v3441_v35, %v884_v33  ;;  %v952_v41 = vadd.f32 %v3441_v35, %v882_v34  ;;  %v957_v42 = vadd.f32 %v3441_v35, %v887_v36  ;;  %v902_v36 = vld [vmem:[%s5107_s2 + $0xa0] sm:$0xff] }
  0xba   : > { %v955_v46 = vadd.f32 %v3441_v35, %v885_v37  ;;  %v953_v59 = vadd.f32 %v3441_v35, %v883_v47  ;;  %v960_v60 = vadd.f32 %v3441_v35, %v890_v48  ;;  %v959_v1 = vadd.f32 %v3441_v35, %v889_v50  ;;  %v901_v37 = vld [vmem:[%s5107_s2 + $0x98] sm:$0xff] }
  0xbb   : > { %v1020_v43 = vmax.f32 %v956_v38, 0.0  ;;  %v1018_v44 = vmax.f32 %v954_v40, 0.0  ;;  %v1016_v45 = vmax.f32 %v952_v41, 0.0  ;;  %v1021_v63 = vmax.f32 %v957_v42, 0.0  ;;  %v900_v38 = vld [vmem:[%s5107_s2 + $0x90] sm:$0xff] }
  0xbc   : > { %v796_v49 = vpop.f32.mrf.mxu0  ;;  %v1019_v0 = vmax.f32 %v955_v46, 0.0  ;;  %v958_v2 = vadd.f32 %v3441_v35, %v888_v51  ;;  %v963_v4 = vadd.f32 %v3441_v35, %v893_v52  ;;  %v962_v5 = vadd.f32 %v3441_v35, %v892_v56  ;;  %v906_v46 = vld [vmem:[%s5107_s2 + $0xc0] sm:$0xff]  ;;  %v911_v51 = vld [vmem:[%s5107_s2 + $0xe8] sm:$0xff] }
  0xbd   : > { %v1088_v53 = vmul.f32 %v3453_v39, %v1020_v43  ;;  %v1086_v54 = vmul.f32 %v3453_v39, %v1018_v44  ;;  %v1084_v55 = vmul.f32 %v3453_v39, %v1016_v45  ;;  %v961_v6 = vadd.f32 %v3441_v35, %v891_v57  ;;  %v908_v44 = vld [vmem:[%s5107_s2 + $0xd0] sm:$0xff]  ;;  %v907_v45 = vld [vmem:[%s5107_s2 + $0xc8] sm:$0xff]  ;;  %v910_v52 = vld [vmem:[%s5107_s2 + $0xe0] sm:$0xff] }
  0xbe   : > { %v966_v7 = vadd.f32 %v3441_v35, %v896_v58  ;;  %v965_v8 = vadd.f32 %v3441_v35, %v895_v61  ;;  %v964_v9 = vadd.f32 %v3441_v35, %v894_v62  ;;  %v1017_v11 = vmax.f32 %v953_v59, 0.0  ;;  %v913_v58 = vld [vmem:[%s5107_s2 + $0xf8] sm:$0xff]  ;;  %v912_v59 = vld [vmem:[%s5107_s2 + $0xf0] sm:$0xff] }
  0xbf   : > { %1156 = vadd.xlane.f32.xlu2 %v1088_v53  ;;  %1152 = vadd.xlane.f32.xlu1 %v1086_v54  ;;  %v1024_v12 = vmax.f32 %v960_v60, 0.0  ;;  %v969_v13 = vadd.f32 %v3441_v35, %v899_v3  ;;  %v1089_v16 = vmul.f32 %v3453_v39, %v1021_v63  ;;  %v1087_v17 = vmul.f32 %v3453_v39, %v1019_v0  ;;  %v909_v53 = vld [vmem:[%s5107_s2 + $0xd8] sm:$0xff] }
  0xc0   : > { %1148 = vadd.xlane.f32.xlu0 %v1084_v55  ;;  %v1023_v18 = vmax.f32 %v959_v1, 0.0  ;;  %v1022_v19 = vmax.f32 %v958_v2, 0.0  ;;  %v1027_v20 = vmax.f32 %v963_v4, 0.0  ;;  %v1026_v21 = vmax.f32 %v962_v5, 0.0 }
  0xc1   : > { %v1025_v22 = vmax.f32 %v961_v6, 0.0  ;;  %v1030_v23 = vmax.f32 %v966_v7, 0.0  ;;  %v1029_v24 = vmax.f32 %v965_v8, 0.0  ;;  %v1028_v25 = vmax.f32 %v964_v9, 0.0  ;;  %v914_v8 = vld [vmem:[%s5107_s2 + $0x100] sm:$0xff] }
  0xc2   : > { %v968_v26 = vadd.f32 %v3441_v35, %v898_v14  ;;  %v967_v28 = vadd.f32 %v3441_v35, %v897_v15  ;;  %v1085_v29 = vmul.f32 %v3453_v39, %v1017_v11  ;;  %v1033_v30 = vmax.f32 %v969_v13, 0.0  ;;  %v916_v13 = vld [vmem:[%s5107_s2 + $0x110] sm:$0xff]  ;;  %v915_v14 = vld [vmem:[%s5107_s2 + $0x108] sm:$0xff] }
  0xc3   : > { %v3518_v31 = vperm.slane %v947_v10, 0  ;;  %v1092_v32 = vmul.f32 %v3453_v39, %v1024_v12  ;;  %v1091_v40 = vmul.f32 %v3453_v39, %v1023_v18  ;;  %v1090_v41 = vmul.f32 %v3453_v39, %v1022_v19  ;;  %v917_v19 = vld [vmem:[%s5107_s2 + $0x118] sm:$0xff] }
  0xc4   : > { %v1032_v33 = vmax.f32 %v968_v26, 0.0  ;;  %v1031_v34 = vmax.f32 %v967_v28, 0.0  ;;  %v3533_v42 = vmul.f32 %v3453_v39, %v1027_v20  ;;  %v3536_v43 = vmul.f32 %v3453_v39, %v1026_v21  ;;  %v919_v20 = vld [vmem:[%s5107_s2 + $0x128] sm:$0xff]  ;;  %v918_v21 = vld [vmem:[%s5107_s2 + $0x120] sm:$0xff]  ;;  %v920_v26 = vld [vmem:[%s5107_s2 + $0x130] sm:$0xff] }
  0xc5   : > { %v3548_v47 = vmul.f32 %v3453_v39, %v1025_v22  ;;  %v3551_v48 = vmul.f32 %v3453_v39, %v1030_v23  ;;  %v3554_v49 = vmul.f32 %v3453_v39, %v1029_v24  ;;  %v3557_v50 = vmul.f32 %v3453_v39, %v1028_v25  ;;  %v930_v28 = vld [vmem:[%s5107_s2 + $0x180] sm:$0xff] }
  0xc6   : > { %v3569_v54 = vmul.f32 %v3453_v39, %v1033_v30  ;;  %v3572_v55 = vadd.f32 %v3441_v35, %v902_v36  ;;  %v3575_v56 = vadd.f32 %v3441_v35, %v901_v37  ;;  %v3578_v57 = vadd.f32 %v3441_v35, %v900_v38 }
  0xc7   : > { %1158 = vadd.xlane.f32.xlu2 %v1089_v16  ;;  %1154 = vadd.xlane.f32.xlu1 %v1087_v17  ;;  %v3587_v60 = vmul.f32 %v3453_v39, %v1032_v33  ;;  %v3590_v61 = vmul.f32 %v3453_v39, %v1031_v34  ;;  %v978_v62 = vadd.f32 %v3441_v35, %v908_v44 }
  0xc8   : > { %1150 = vadd.xlane.f32.xlu0 %v1085_v29  ;;  %v977_v63 = vadd.f32 %v3441_v35, %v907_v45  ;;  %v976_v0 = vadd.f32 %v3441_v35, %v906_v46  ;;  %v981_v1 = vadd.f32 %v3441_v35, %v911_v51  ;;  %v980_v2 = vadd.f32 %v3441_v35, %v910_v52 }
  0xc9   : > { %v979_v3 = vadd.f32 %v3441_v35, %v909_v53  ;;  %v1042_v4 = vmax.f32 %v978_v62, 0.0  ;;  %v983_v6 = vadd.f32 %v3441_v35, %v913_v58  ;;  %v982_v7 = vadd.f32 %v3441_v35, %v912_v59  ;;  %v921_v58 = vld [vmem:[%s5107_s2 + $0x138] sm:$0xff]  ;;  %v931_v59 = vld [vmem:[%s5107_s2 + $0x188] sm:$0xff] }
  0xca   : > { %v1041_v5 = vmax.f32 %v977_v63, 0.0  ;;  %v1040_v9 = vmax.f32 %v976_v0, 0.0  ;;  %v1045_v10 = vmax.f32 %v981_v1, 0.0  ;;  %v1044_v11 = vmax.f32 %v980_v2, 0.0  ;;  %v933_v2 = vld [vmem:[%s5107_s2 + $0x198] sm:$0xff] }
  0xcb   : > { %v1043_v12 = vmax.f32 %v979_v3, 0.0  ;;  %v3610_v15 = vmul.f32 %v3453_v39, %v1042_v4  ;;  %v1047_v17 = vmax.f32 %v983_v6, 0.0  ;;  %v1046_v18 = vmax.f32 %v982_v7, 0.0  ;;  %v932_v3 = vld [vmem:[%s5107_s2 + $0x190] sm:$0xff]  ;;  %v934_v4 = vld [vmem:[%s5107_s2 + $0x1a0] sm:$0xff] }
  0xcc   : > { %v3613_v16 = vmul.f32 %v3453_v39, %v1041_v5  ;;  %v3625_v22 = vmul.f32 %v3453_v39, %v1040_v9  ;;  %v3628_v23 = vmul.f32 %v3453_v39, %v1045_v10  ;;  %v3631_v24 = vmul.f32 %v3453_v39, %v1044_v11  ;;  %v936_v9 = vld [vmem:[%s5107_s2 + $0x1b0] sm:$0xff]  ;;  %v935_v10 = vld [vmem:[%s5107_s2 + $0x1a8] sm:$0xff]  ;;  %v937_v11 = vld [vmem:[%s5107_s2 + $0x1b8] sm:$0xff] }
  0xcd   : > { %v3634_v25 = vmul.f32 %v3453_v39, %v1043_v12  ;;  %v3643_v29 = vmul.f32 %v3453_v39, %v1047_v17  ;;  %v3646_v30 = vmul.f32 %v3453_v39, %v1046_v18  ;;  %v986_v33 = vadd.f32 %v3518_v31, %v916_v13 }
  0xce   : > { %v985_v34 = vadd.f32 %v3518_v31, %v915_v14  ;;  %v987_v36 = vadd.f32 %v3518_v31, %v917_v19  ;;  %v989_v37 = vadd.f32 %v3518_v31, %v919_v20  ;;  %v988_v38 = vadd.f32 %v3518_v31, %v918_v21 }
  0xcf   : > { %1164 = vadd.xlane.f32.xlu2 %v1092_v32  ;;  %1162 = vadd.xlane.f32.xlu1 %v1091_v40  ;;  %v984_v32 = vadd.f32 %v3518_v31, %v914_v8  ;;  %v990_v44 = vadd.f32 %v3518_v31, %v920_v26  ;;  %v1000_v45 = vadd.f32 %v3518_v31, %v930_v28  ;;  %v1036_v12 = vmax.f32 %v3572_v55, 0.0 }
  0xd0   : > { %1160 = vadd.xlane.f32.xlu0 %v1090_v41  ;;  %v1050_v41 = vmax.f32 %v986_v33, 0.0  ;;  %v1049_v46 = vmax.f32 %v985_v34, 0.0  ;;  %v1051_v51 = vmax.f32 %v987_v36, 0.0  ;;  %v1053_v52 = vmax.f32 %v989_v37, 0.0  ;;  %v938_v37 = vld [vmem:[%s5107_s2 + $0x1c0] sm:$0xff] }
  0xd1   : > { %v1048_v40 = vmax.f32 %v984_v32, 0.0  ;;  %v1052_v53 = vmax.f32 %v988_v38, 0.0  ;;  %v1054_v0 = vmax.f32 %v990_v44, 0.0  ;;  %v1064_v1 = vmax.f32 %v1000_v45, 0.0  ;;  %v939_v45 = vld [vmem:[%s5107_s2 + $0x1c8] sm:$0xff] }
  0xd2   : > { %v3666_v63 = vmul.f32 %v3453_v39, %v1050_v41  ;;  %v3678_v5 = vmul.f32 %v3453_v39, %v1049_v46  ;;  %v3681_v6 = vmul.f32 %v3453_v39, %v1051_v51  ;;  %v3684_v7 = vmul.f32 %v3453_v39, %v1053_v52  ;;  %v940_v46 = vld [vmem:[%s5107_s2 + $0x1d0] sm:$0xff]  ;;  %v923_v51 = vld [vmem:[%s5107_s2 + $0x148] sm:$0xff] }
  0xd3   : > { %v3663_v62 = vmul.f32 %v3453_v39, %v1048_v40  ;;  %v3687_v8 = vmul.f32 %v3453_v39, %v1052_v53  ;;  %v3702_v13 = vmul.f32 %v3453_v39, %v1054_v0  ;;  %v3705_v14 = vmul.f32 %v3453_v39, %v1064_v1  ;;  %v924_v0 = vld [vmem:[%s5107_s2 + $0x150] sm:$0xff]  ;;  %v925_v1 = vld [vmem:[%s5107_s2 + $0x158] sm:$0xff] }
  0xd4   : > { %v991_v17 = vadd.f32 %v3518_v31, %v921_v58  ;;  %v1001_v18 = vadd.f32 %v3518_v31, %v931_v59  ;;  %v1003_v19 = vadd.f32 %v3518_v31, %v933_v2  ;;  %v1006_v21 = vadd.f32 %v3518_v31, %v936_v9  ;;  %v941_v2 = vld [vmem:[%s5107_s2 + $0x1d8] sm:$0xff] }
  0xd5   : > { %v1005_v26 = vadd.f32 %v3518_v31, %v935_v10  ;;  %v1007_v28 = vadd.f32 %v3518_v31, %v937_v11  ;;  %v1008_v11 = vadd.f32 %v3518_v31, %v938_v37 }
  0xd6   : > { %v1055_v20 = vmax.f32 %v991_v17, 0.0  ;;  %v1065_v32 = vmax.f32 %v1001_v18, 0.0  ;;  %v1067_v33 = vmax.f32 %v1003_v19, 0.0  ;;  %v1070_v40 = vmax.f32 %v1006_v21, 0.0 }
  0xd7   : > { %1170 = vadd.xlane.f32.xlu2 %v3533_v42  ;;  %1168 = vadd.xlane.f32.xlu1 %v3536_v43  ;;  %v1002_v42 = vadd.f32 %v3518_v31, %v932_v3  ;;  %v1004_v43 = vadd.f32 %v3518_v31, %v934_v4  ;;  %v1069_v41 = vmax.f32 %v1005_v26, 0.0  ;;  %v1071_v44 = vmax.f32 %v1007_v28, 0.0 }
  0xd8   : > { %1166 = vadd.xlane.f32.xlu0 %v3548_v47  ;;  %v922_v47 = vld [vmem:[%s5107_s2 + $0x140] sm:$0xff]  ;;  %v3723_v38 = vmul.f32 %v3453_v39, %v1055_v20  ;;  %v3735_v52 = vmul.f32 %v3453_v39, %v1065_v32  ;;  %v3738_v53 = vmul.f32 %v3453_v39, %v1067_v33  ;;  %v3756_v3 = vmul.f32 %v3453_v39, %v1070_v40  ;;  %v927_v40 = vld [vmem:[%s5107_s2 + $0x168] sm:$0xff] }
  0xd9   : > { %v1066_v34 = vmax.f32 %v1002_v42, 0.0  ;;  %v1068_v36 = vmax.f32 %v1004_v43, 0.0  ;;  %v3759_v4 = vmul.f32 %v3453_v39, %v1069_v41  ;;  %v3762_v9 = vmul.f32 %v3453_v39, %v1071_v44  ;;  %v928_v41 = vld [vmem:[%s5107_s2 + $0x170] sm:$0xff] }
  0xda   : > { %v992_v10 = vadd.f32 %v3518_v31, %v922_v47  ;;  %v1009_v17 = vadd.f32 %v3518_v31, %v939_v45  ;;  %v1010_v18 = vadd.f32 %v3518_v31, %v940_v46  ;;  %v993_v19 = vadd.f32 %v3518_v31, %v923_v51 }
  0xdb   : > { %v3741_v58 = vmul.f32 %v3453_v39, %v1066_v34  ;;  %v3744_v59 = vmul.f32 %v3453_v39, %v1068_v36  ;;  %v994_v43 = vadd.f32 %v3518_v31, %v924_v0  ;;  %v995_v20 = vadd.f32 %v3518_v31, %v925_v1  ;;  %v942_v34 = vld [vmem:[%s5107_s2 + $0x1e0] sm:$0xff]  ;;  %v944_v0 = vld [vmem:[%s5107_s2 + $0x1f0] sm:$0xff]  ;;  %v945_v1 = vld [vmem:[%s5107_s2 + $0x1f8] sm:$0xff] }
  0xdc   : > { %v1056_v42 = vmax.f32 %v992_v10, 0.0  ;;  %v1011_v21 = vadd.f32 %v3518_v31, %v941_v2  ;;  %v1072_v26 = vmax.f32 %v1008_v11, 0.0  ;;  %v1073_v28 = vmax.f32 %v1009_v17, 0.0  ;;  %v929_v2 = vld [vmem:[%s5107_s2 + $0x178] sm:$0xff] }
  0xdd   : > { %v1074_v32 = vmax.f32 %v1010_v18, 0.0  ;;  %v1057_v33 = vmax.f32 %v993_v19, 0.0  ;;  %v1058_v36 = vmax.f32 %v994_v43, 0.0  ;;  %v1059_v47 = vmax.f32 %v995_v20, 0.0 }
  0xde   : > { %v1075_v37 = vmax.f32 %v1011_v21, 0.0  ;;  %v3794_v44 = vmul.f32 %v3453_v39, %v1072_v26  ;;  %v3797_v45 = vmul.f32 %v3453_v39, %v1073_v28  ;;  %v1012_v18 = vadd.f32 %v3518_v31, %v942_v34 }
  0xdf   : > { %1176 = vadd.xlane.f32.xlu2 %v3551_v48  ;;  %1174 = vadd.xlane.f32.xlu1 %v3554_v49  ;;  %v943_v48 = vld [vmem:[%s5107_s2 + $0x1e8] sm:$0xff]  ;;  %v3782_v49 = vmul.f32 %v3453_v39, %v1056_v42  ;;  %v3800_v46 = vmul.f32 %v3453_v39, %v1074_v32  ;;  %v3803_v51 = vmul.f32 %v3453_v39, %v1057_v33 }
  0xe0   : > { %1172 = vadd.xlane.f32.xlu0 %v3557_v50  ;;  %v926_v50 = vld [vmem:[%s5107_s2 + $0x160] sm:$0xff]  ;;  %v3815_v10 = vmul.f32 %v3453_v39, %v1058_v36  ;;  %v3818_v11 = vmul.f32 %v3453_v39, %v1059_v47  ;;  %v3821_v17 = vmul.f32 %v3453_v39, %v1075_v37  ;;  %v1013_v19 = vadd.f32 %v3518_v31, %v943_v48 }
  0xe1   : > { %v996_v42 = vadd.f32 %v3518_v31, %v926_v50  ;;  %v997_v43 = vadd.f32 %v3518_v31, %v927_v40  ;;  %v998_v20 = vadd.f32 %v3518_v31, %v928_v41  ;;  %v1076_v21 = vmax.f32 %v1012_v18, 0.0 }
  0xe2   : > { %v1014_v26 = vadd.f32 %v3518_v31, %v944_v0  ;;  %v1015_v28 = vadd.f32 %v3518_v31, %v945_v1  ;;  %v999_v32 = vadd.f32 %v3518_v31, %v929_v2  ;;  %v1077_v33 = vmax.f32 %v1013_v19, 0.0  ;;  %v905_v19 = vld [vmem:[%s5107_s2 + $0xb8] sm:$0xff] }
  0xe3   : > { %v1060_v36 = vmax.f32 %v996_v42, 0.0  ;;  %v1061_v47 = vmax.f32 %v997_v43, 0.0  ;;  %v1062_v37 = vmax.f32 %v998_v20, 0.0  ;;  %v3834_v34 = vmul.f32 %v3453_v39, %v1076_v21  ;;  %v904_v42 = vld [vmem:[%s5107_s2 + $0xb0] sm:$0xff] }
  0xe4   : > { %v1078_v48 = vmax.f32 %v1014_v26, 0.0  ;;  %v1079_v50 = vmax.f32 %v1015_v28, 0.0  ;;  %v1063_v40 = vmax.f32 %v999_v32, 0.0  ;;  %v3838_v41 = vmul.f32 %v3453_v39, %v1077_v33 }
  0xe5   : > { %v3841_v31 = vmul.f32 %v3453_v39, %v1060_v36  ;;  %v3844_v0 = vmul.f32 %v3453_v39, %v1061_v47  ;;  %v1034_v18 = vmax.f32 %v3578_v57, 0.0  ;;  %v1104_v43 = vmul.f32 %v3453_v39, %v1036_v12 }
  0xe6   : > { %v3851_v1 = vmul.f32 %v3453_v39, %v1078_v48  ;;  %v3854_v2 = vmul.f32 %v3453_v39, %v1079_v50  ;;  %v975_v57 = vadd.f32 %v3441_v35, %v905_v19  ;;  %v974_v21 = vadd.f32 %v3441_v35, %v904_v42 }
  0xe7   : > { %1182 = vadd.xlane.f32.xlu2 %v3569_v54  ;;  %1180 = vadd.xlane.f32.xlu1 %v3587_v60  ;;  %v3847_v54 = vmul.f32 %v3453_v39, %v1062_v37  ;;  %v1035_v60 = vmax.f32 %v3575_v56, 0.0  ;;  %v903_v56 = vld [vmem:[%s5107_s2 + $0xa8] sm:$0xff]  ;;  %v1102_v26 = vmul.f32 %v3453_v39, %v1034_v18 }
  0xe8   : > { %1178 = vadd.xlane.f32.xlu0 %v3590_v61  ;;  %v3857_v61 = vmul.f32 %v3453_v39, %v1063_v40  ;;  %v973_v28 = vadd.f32 %v3441_v35, %v903_v56  ;;  %v1039_v32 = vmax.f32 %v975_v57, 0.0  ;;  %v1038_v33 = vmax.f32 %v974_v21, 0.0 }
  0xe9   : > { %v1103_v20 = vmul.f32 %v3453_v39, %v1035_v60 }
  0xea   : > { %v1037_v36 = vmax.f32 %v973_v28, 0.0  ;;  %v1107_v55 = vmul.f32 %v3453_v39, %v1039_v32  ;;  %v1106_v12 = vmul.f32 %v3453_v39, %v1038_v33 }
  0xec   : > { %v1105_v47 = vmul.f32 %v3453_v39, %v1037_v36 }
  0xef   : > { %1188 = vadd.xlane.f32.xlu2 %v1104_v43  ;;  %1186 = vadd.xlane.f32.xlu1 %v1103_v20 }
  0xf0   : > { %1184 = vadd.xlane.f32.xlu0 %v1102_v26 }
  0xf7   : > { %1194 = vadd.xlane.f32.xlu2 %v1107_v55  ;;  %1192 = vadd.xlane.f32.xlu1 %v1106_v12 }
  0xf8   : > { %1190 = vadd.xlane.f32.xlu0 %v1105_v47 }
  0xff   : > { %1200 = vadd.xlane.f32.xlu2 %v3610_v15  ;;  %1198 = vadd.xlane.f32.xlu1 %v3613_v16  ;;  %v1342_v15 = vlaneseq }
 0x100   : > { %1196 = vadd.xlane.f32.xlu0 %v3625_v22  ;;  %v3901_v22 = vstv %s1276_s30 }
 0x107   : > { %1206 = vadd.xlane.f32.xlu2 %v3628_v23  ;;  %1204 = vadd.xlane.f32.xlu1 %v3631_v24  ;;  %v3904_v23 = vand.u32 127, %v1342_v15 }
 0x108   : > { %1202 = vadd.xlane.f32.xlu0 %v3634_v25 }
 0x109   : > { %v3941_v48 = vadd.s32 4294967240, %v3904_v23  ;;  %v3946_v60 = vadd.s32 4294967248, %v3904_v23  ;;  %v3951_v42 = vadd.s32 4294967232, %v3904_v23  ;;  %v3965_v33 = vadd.s32 4294967216, %v3904_v23 }
 0x10f   : > { %1210 = vadd.xlane.f32.xlu1 %v3643_v29  ;;  %1212 = vadd.xlane.f32.xlu2 %v3663_v62  ;;  %v3914_v62 = vadd.s32 4294967280, %v3904_v23 }
 0x110   : > { %1208 = vadd.xlane.f32.xlu0 %v3646_v30  ;;  %v3911_v30 = vadd.s32 4294967288, %v3904_v23 }
 0x117   : > { %1216 = vadd.xlane.f32.xlu1 %v3666_v63  ;;  %1218 = vadd.xlane.f32.xlu2 %v3681_v6  ;;  %v3918_v6 = vadd.s32 4294967272, %v3904_v23 }
 0x118   : > { %1214 = vadd.xlane.f32.xlu0 %v3678_v5 }
 0x11f   : > { %1222 = vadd.xlane.f32.xlu1 %v3684_v7  ;;  %1224 = vadd.xlane.f32.xlu2 %v3702_v13  ;;  %v3923_v13 = vadd.s32 4294967264, %v3904_v23 }
 0x120   : > { %1220 = vadd.xlane.f32.xlu0 %v3687_v8 }
 0x127   : > { %1244 = vadd.xlane.f32.xlu1 %v3705_v14  ;;  %1246 = vadd.xlane.f32.xlu2 %v3735_v52 }
 0x128   : > { %1226 = vadd.xlane.f32.xlu0 %v3723_v38  ;;  %v3927_v38 = vadd.s32 4294967256, %v3904_v23 }
 0x12f   : > { %1250 = vadd.xlane.f32.xlu1 %v3738_v53  ;;  %1252 = vadd.xlane.f32.xlu2 %v3744_v59 }
 0x130   : > { %1248 = vadd.xlane.f32.xlu0 %v3741_v58 }
 0x132   : > { %v1157_v35 = vpop.xlane.xlu2 %1156  ;;  %v1153_v39 = vpop.xlane.xlu1 %1152 }
 0x133   : > { %v1149_v16 = vpop.xlane.xlu0 %1148  ;;  %v1280_v63 = vadd.f32 %v3901_v22, %v1153_v39  ;;  %v1282_v14 = vadd.f32 %v3901_v22, %v1157_v35  ;;  %v3973_v35 = vadd.s32 4294967208, %v3904_v23 }
 0x134   : > { %v1278_v24 = vadd.f32 %v3901_v22, %v1149_v16 }
 0x135   : > { %v1417_v59 = vperm.slane %v1280_v63, %v3914_v62 }
 0x136   : > { %v1411_v52 = vperm.slane %v1278_v24, %v3904_v23 }
 0x137   : > { %1256 = vadd.xlane.f32.xlu1 %v3756_v3  ;;  %1258 = vadd.xlane.f32.xlu2 %v3762_v9  ;;  %v1425_v9 = vperm.slane %v1282_v14, %v3923_v13 }
 0x138   : > { %1254 = vadd.xlane.f32.xlu0 %v3759_v4 }
 0x13a   : > { %v1159_v25 = vpop.xlane.xlu2 %1158  ;;  %v1155_v29 = vpop.xlane.xlu1 %1154 }
 0x13b   : > { %v1151_v5 = vpop.xlane.xlu0 %1150  ;;  %v1281_v7 = vadd.f32 %v3901_v22, %v1155_v29  ;;  %v1283_v53 = vadd.f32 %v3901_v22, %v1159_v25 }
 0x13c   : > { %v1279_v8 = vadd.f32 %v3901_v22, %v1151_v5  ;;  %v3986_v5 = vadd.s32 4294967192, %v3904_v23 }
 0x13d   : > { %v1421_v3 = vperm.slane %v1281_v7, %v3918_v6  ;;  %v1429_v50 = vperm.slane %v1283_v53, %v3927_v38 }
 0x13e   : > { %v1413_v58 = vperm.slane %v1279_v8, %v3911_v30 }
 0x13f   : > { %1228 = vadd.xlane.f32.xlu1 %v3782_v49  ;;  %1262 = vadd.xlane.f32.xlu2 %v3797_v45 }
 0x140   : > { %v1415_v4 = vsel %vm1414_vm0, %v1413_v58, %v1411_v52  ;;  %1260 = vadd.xlane.f32.xlu0 %v3794_v44 }
 0x141   : > { %v1419_v37 = vsel %vm1418_vm1, %v1417_v59, %v1415_v4 }
 0x142   : > { %v1423_v49 = vsel %vm1422_vm2, %v1421_v3, %v1419_v37  ;;  %v1165_v45 = vpop.xlane.xlu2 %1164  ;;  %v1163_v40 = vpop.xlane.xlu1 %1162 }
 0x143   : > { %v1285_v44 = vadd.f32 %v3901_v22, %v1163_v40  ;;  %v1427_v18 = vsel %vm1426_vm3, %v1425_v9, %v1423_v49  ;;  %v1161_v19 = vpop.xlane.xlu0 %1160  ;;  %v1286_v56 = vadd.f32 %v3901_v22, %v1165_v45  ;;  %v4004_v45 = vadd.s32 4294967184, %v3904_v23 }
 0x144   : > { %v1431_v43 = vsel %vm1430_vm4, %v1429_v50, %v1427_v18  ;;  %v1284_v20 = vadd.f32 %v3901_v22, %v1161_v19  ;;  %v4015_v18 = vadd.s32 4294967176, %v3904_v23 }
 0x145   : > { %v1437_v57 = vperm.slane %v1285_v44, %v3941_v48  ;;  %v1441_v26 = vperm.slane %v1286_v56, %v3951_v42 }
 0x146   : > { %v1433_v21 = vperm.slane %v1284_v20, %v3946_v60 }
 0x147   : > { %1264 = vadd.xlane.f32.xlu1 %v3800_v46  ;;  %1232 = vadd.xlane.f32.xlu2 %v3815_v10  ;;  %v3969_v46 = vadd.s32 4294967224, %v3904_v23 }
 0x148   : > { %v1435_v28 = vsel %vm1434_vm5, %v1433_v21, %v1431_v43  ;;  %1230 = vadd.xlane.f32.xlu0 %v3803_v51 }
 0x149   : > { %v1439_v32 = vsel %vm1438_vm6, %v1437_v57, %v1435_v28 }
 0x14a   : > { %v1171_v36 = vpop.xlane.xlu2 %1170  ;;  %v1169_v55 = vpop.xlane.xlu1 %1168  ;;  %v1443_v12 = vsel %vm1442_vm7, %v1441_v26, %v1439_v32 }
 0x14b   : > { %v1288_v10 = vadd.f32 %v3901_v22, %v1169_v55  ;;  %v1167_v47 = vpop.xlane.xlu0 %1166  ;;  %v1289_v51 = vadd.f32 %v3901_v22, %v1171_v36 }
 0x14c   : > { %v1287_v39 = vadd.f32 %v3901_v22, %v1167_v47 }
 0x14d   : > { %v1449_v16 = vperm.slane %v1288_v10, %v3965_v33  ;;  %v1453_v25 = vperm.slane %v1289_v51, %v3973_v35 }
 0x14e   : > { %v1445_v24 = vperm.slane %v1287_v39, %v3969_v46 }
 0x14f   : > { %1234 = vadd.xlane.f32.xlu1 %v3818_v11  ;;  %1268 = vadd.xlane.f32.xlu2 %v3834_v34  ;;  %v3990_v11 = vadd.s32 4294967200, %v3904_v23 }
 0x150   : > { %v1447_v29 = vsel %vm1446_vm8, %v1445_v24, %v1443_v12  ;;  %1266 = vadd.xlane.f32.xlu0 %v3821_v17 }
 0x151   : > { %v1451_v63 = vsel %vm1450_vm9, %v1449_v16, %v1447_v29 }
 0x152   : > { %v1177_v7 = vpop.xlane.xlu2 %1176  ;;  %v1175_v8 = vpop.xlane.xlu1 %1174  ;;  %v1455_v14 = vsel %vm1454_vm10, %v1453_v25, %v1451_v63 }
 0x153   : > { %v1291_v34 = vadd.f32 %v3901_v22, %v1175_v8  ;;  %v1173_v52 = vpop.xlane.xlu0 %1172 }
 0x154   : > { %v1290_v53 = vadd.f32 %v3901_v22, %v1173_v52 }
 0x155   : > { %v1461_v58 = vperm.slane %v1291_v34, %v3986_v5 }
 0x156   : > { %v1457_v17 = vperm.slane %v1290_v53, %v3990_v11 }
 0x157   : > { %1270 = vadd.xlane.f32.xlu1 %v3838_v41  ;;  %1238 = vadd.xlane.f32.xlu2 %v3844_v0  ;;  %v1292_v41 = vadd.f32 %v3901_v22, %v1177_v7 }
 0x158   : > { %v1459_v59 = vsel %vm1458_vm11, %v1457_v17, %v1455_v14  ;;  %1236 = vadd.xlane.f32.xlu0 %v3841_v31 }
 0x159   : > { %v1463_v3 = vsel %vm1462_vm12, %v1461_v58, %v1459_v59  ;;  %v1465_v44 = vperm.slane %v1292_v41, %v4004_v45 }
 0x15a   : > { %v1183_v4 = vpop.xlane.xlu2 %1182  ;;  %v1181_v9 = vpop.xlane.xlu1 %1180 }
 0x15b   : > { %v1295_v37 = vadd.f32 %v3901_v22, %v1183_v4  ;;  %v1294_v50 = vadd.f32 %v3901_v22, %v1181_v9  ;;  %v1179_v49 = vpop.xlane.xlu0 %1178  ;;  %v1467_v21 = vsel %vm1466_vm13, %v1465_v44, %v1463_v3 }
 0x15c   : > { %v1293_v19 = vadd.f32 %v3901_v22, %v1179_v49 }
 0x15d   : > { %v1473_v0 = vperm.slane %v1295_v37, %v3911_v30  ;;  %v1472_v40 = vperm.slane %v1294_v50, %v3904_v23 }
 0x15f   : > { %v1474_v31 = vsel %vm1414_vm0, %v1473_v0, %v1472_v40  ;;  %1240 = vadd.xlane.f32.xlu1 %v3847_v54  ;;  %1274 = vadd.xlane.f32.xlu2 %v3854_v2 }
 0x160   : > { %1272 = vadd.xlane.f32.xlu0 %v3851_v1  ;;  %v1469_v1 = vperm.slane %v1293_v19, %v4015_v18 }
 0x162   : > { %v1189_v56 = vpop.xlane.xlu2 %1188  ;;  %v1187_v43 = vpop.xlane.xlu1 %1186  ;;  %v4030_v12 = vsel %vm1470_vm14, %v1469_v1, %v1467_v21 }
 0x163   : > { %v1297_v20 = vadd.f32 %v3901_v22, %v1187_v43  ;;  %v1185_v57 = vpop.xlane.xlu0 %1184  ;;  %v1298_v54 = vadd.f32 %v3901_v22, %v1189_v56 }
 0x164   : > { %v1296_v2 = vadd.f32 %v3901_v22, %v1185_v57 }
 0x165   : > { %v1477_v26 = vperm.slane %v1297_v20, %v3918_v6  ;;  %v1479_v32 = vperm.slane %v1298_v54, %v3923_v13 }
 0x166   : > { %v1475_v28 = vperm.slane %v1296_v2, %v3914_v62 }
 0x168   : > { %v1476_v36 = vsel %vm1418_vm1, %v1475_v28, %v1474_v31  ;;  %1242 = vadd.xlane.f32.xlu0 %v3857_v61 }
 0x169   : > { %v1478_v55 = vsel %vm1422_vm2, %v1477_v26, %v1476_v36 }
 0x16a   : > { %v1195_v10 = vpop.xlane.xlu2 %1194  ;;  %v1193_v47 = vpop.xlane.xlu1 %1192  ;;  %v1480_v51 = vsel %vm1426_vm3, %v1479_v32, %v1478_v55 }
 0x16b   : > { %v1300_v39 = vadd.f32 %v3901_v22, %v1193_v47  ;;  %v1191_v16 = vpop.xlane.xlu0 %1190  ;;  %v1301_v24 = vadd.f32 %v3901_v22, %v1195_v10 }
 0x16c   : > { %v1299_v25 = vadd.f32 %v3901_v22, %v1191_v16 }
 0x16d   : > { %v1483_v29 = vperm.slane %v1300_v39, %v3946_v60  ;;  %v1485_v63 = vperm.slane %v1301_v24, %v3941_v48 }
 0x16e   : > { %v1481_v61 = vperm.slane %v1299_v25, %v3927_v38 }
 0x170   : > { %v1482_v7 = vsel %vm1430_vm4, %v1481_v61, %v1480_v51 }
 0x171   : > { %v1484_v8 = vsel %vm1434_vm5, %v1483_v29, %v1482_v7 }
 0x172   : > { %v1201_v14 = vpop.xlane.xlu2 %1200  ;;  %v1199_v34 = vpop.xlane.xlu1 %1198  ;;  %v1486_v52 = vsel %vm1438_vm6, %v1485_v63, %v1484_v8 }
 0x173   : > { %v1303_v53 = vadd.f32 %v3901_v22, %v1199_v34  ;;  %v1197_v58 = vpop.xlane.xlu0 %1196  ;;  %v1304_v17 = vadd.f32 %v3901_v22, %v1201_v14 }
 0x174   : > { %v1302_v59 = vadd.f32 %v3901_v22, %v1197_v58 }
 0x175   : > { %v1489_v3 = vperm.slane %v1303_v53, %v3969_v46  ;;  %v1491_v9 = vperm.slane %v1304_v17, %v3965_v33 }
 0x176   : > { %v1487_v4 = vperm.slane %v1302_v59, %v3951_v42 }
 0x178   : > { %v1488_v37 = vsel %vm1442_vm7, %v1487_v4, %v1486_v52 }
 0x179   : > { %v1490_v50 = vsel %vm1446_vm8, %v1489_v3, %v1488_v37 }
 0x17a   : > { %v1207_v49 = vpop.xlane.xlu2 %1206  ;;  %v1205_v41 = vpop.xlane.xlu1 %1204  ;;  %v1492_v0 = vsel %vm1450_vm9, %v1491_v9, %v1490_v50 }
 0x17b   : > { %v1306_v40 = vadd.f32 %v3901_v22, %v1205_v41  ;;  %v1203_v31 = vpop.xlane.xlu0 %1202  ;;  %v1307_v44 = vadd.f32 %v3901_v22, %v1207_v49 }
 0x17c   : > { %v1305_v19 = vadd.f32 %v3901_v22, %v1203_v31 }
 0x17d   : > { %v1495_v56 = vperm.slane %v1306_v40, %v3990_v11  ;;  %v1497_v20 = vperm.slane %v1307_v44, %v3986_v5 }
 0x17e   : > { %v1493_v43 = vperm.slane %v1305_v19, %v3973_v35 }
 0x180   : > { %v1494_v57 = vsel %vm1454_vm10, %v1493_v43, %v1492_v0 }
 0x181   : > { %v1496_v21 = vsel %vm1458_vm11, %v1495_v56, %v1494_v57 }
 0x182   : > { %v1211_v54 = vpop.xlane.xlu1 %1210  ;;  %v1498_v2 = vsel %vm1462_vm12, %v1497_v20, %v1496_v21  ;;  %v1213_v1 = vpop.xlane.xlu2 %1212 }
 0x183   : > { %v1209_v26 = vpop.xlane.xlu0 %1208  ;;  %v1309_v55 = vadd.f32 %v3901_v22, %v1211_v54  ;;  %v1310_v10 = vadd.f32 %v3901_v22, %v1213_v1 }
 0x184   : > { %v1308_v28 = vadd.f32 %v3901_v22, %v1209_v26 }
 0x185   : > { %v1501_v24 = vperm.slane %v1309_v55, %v4015_v18  ;;  %v1503_v25 = vperm.slane %v1310_v10, %v3904_v23 }
 0x186   : > { %v1499_v32 = vperm.slane %v1308_v28, %v4004_v45 }
 0x188   : > { %v1500_v36 = vsel %vm1466_vm13, %v1499_v32, %v1498_v2 }
 0x189   : > { %v4071_v8 = vsel %vm1470_vm14, %v1501_v24, %v1500_v36 }
 0x18a   : > { %v1217_v47 = vpop.xlane.xlu1 %1216  ;;  %v1219_v51 = vpop.xlane.xlu2 %1218 }
 0x18b   : > { %v1215_v39 = vpop.xlane.xlu0 %1214  ;;  %v1312_v21 = vadd.f32 %v3901_v22, %v1217_v47  ;;  %v1313_v36 = vadd.f32 %v3901_v22, %v1219_v51 }
 0x18c   : > { %v1311_v16 = vadd.f32 %v3901_v22, %v1215_v39 }
 0x18d   : > { %v1506_v32 = vperm.slane %v1312_v21, %v3914_v62 }
 0x18e   : > { %v1504_v29 = vperm.slane %v1311_v16, %v3911_v30 }
 0x190   : > { %v1505_v61 = vsel %vm1414_vm0, %v1504_v29, %v1503_v25 }
 0x191   : > { %v1507_v29 = vsel %vm1418_vm1, %v1506_v32, %v1505_v61 }
 0x192   : > { %v1223_v63 = vpop.xlane.xlu1 %1222  ;;  %v1225_v7 = vpop.xlane.xlu2 %1224 }
 0x193   : > { %v1221_v14 = vpop.xlane.xlu0 %1220 }
 0x19a   : > { %v1245_v34 = vpop.xlane.xlu1 %1244  ;;  %v1247_v52 = vpop.xlane.xlu2 %1246 }
 0x19b   : > { %v1227_v53 = vpop.xlane.xlu0 %1226  ;;  %v1326_v41 = vadd.f32 %v3901_v22, %v1245_v34  ;;  %v1327_v0 = vadd.f32 %v3901_v22, %v1247_v52  ;;  %v1315_v34 = vadd.f32 %v3901_v22, %v1223_v63 }
 0x19d   : > { %v1534_v19 = vperm.slane %v1326_v41, %v3904_v23  ;;  %v1535_v56 = vperm.slane %v1327_v0, %v3911_v30  ;;  %v1314_v30 = vadd.f32 %v3901_v22, %v1221_v14  ;;  %v1508_v14 = vperm.slane %v1313_v36, %v3918_v6 }
 0x19e   : > { %v1512_v61 = vperm.slane %v1315_v34, %v3927_v38 }
 0x19f   : > { %v1536_v54 = vsel %vm1414_vm0, %v1535_v56, %v1534_v19 }
 0x1a2   : > { %v1251_v58 = vpop.xlane.xlu1 %1250  ;;  %v1253_v17 = vpop.xlane.xlu2 %1252 }
 0x1a3   : > { %v1249_v59 = vpop.xlane.xlu0 %1248  ;;  %v1329_v43 = vadd.f32 %v3901_v22, %v1251_v58  ;;  %v1330_v28 = vadd.f32 %v3901_v22, %v1253_v17 }
 0x1a4   : > { %v1328_v40 = vadd.f32 %v3901_v22, %v1249_v59 }
 0x1a5   : > { %v1539_v2 = vperm.slane %v1329_v43, %v3918_v6  ;;  %v1541_v25 = vperm.slane %v1330_v28, %v3923_v13  ;;  %v1317_v6 = vadd.f32 %v3901_v22, %v1227_v53 }
 0x1a6   : > { %v1537_v57 = vperm.slane %v1328_v40, %v3914_v62  ;;  %v1510_v62 = vperm.slane %v1314_v30, %v3923_v13 }
 0x1a8   : > { %v1538_v26 = vsel %vm1418_vm1, %v1537_v57, %v1536_v54  ;;  %vm1572_vm1 = vcmask 1041408  }
 0x1a9   : > { %v1540_v39 = vsel %vm1422_vm2, %v1539_v2, %v1538_v26 }
 0x1aa   : > { %v1257_v3 = vpop.xlane.xlu1 %1256  ;;  %v1259_v4 = vpop.xlane.xlu2 %1258  ;;  %v1542_v51 = vsel %vm1426_vm3, %v1541_v25, %v1540_v39 }
 0x1ab   : > { %v1255_v9 = vpop.xlane.xlu0 %1254  ;;  %v1332_v55 = vadd.f32 %v3901_v22, %v1257_v3  ;;  %v1333_v59 = vadd.f32 %v3901_v22, %v1259_v4  ;;  %v1509_v3 = vsel %vm1422_vm2, %v1508_v14, %v1507_v29  ;;  %v1316_v4 = vadd.f32 %v3901_v22, %v1225_v7 }
 0x1ac   : > { %v1331_v1 = vadd.f32 %v3901_v22, %v1255_v9  ;;  %v1511_v63 = vsel %vm1426_vm3, %v1510_v62, %v1509_v3 }
 0x1ad   : > { %v1545_v52 = vperm.slane %v1332_v55, %v3946_v60  ;;  %v1547_v19 = vperm.slane %v1333_v59, %v3941_v48 }
 0x1ae   : > { %v1543_v16 = vperm.slane %v1331_v1, %v3927_v38  ;;  %v1514_v1 = vperm.slane %v1316_v4, %v3946_v60 }
 0x1b0   : > { %v1544_v17 = vsel %vm1430_vm4, %v1543_v16, %v1542_v51 }
 0x1b1   : > { %v1546_v9 = vsel %vm1434_vm5, %v1545_v52, %v1544_v17 }
 0x1b2   : > { %v1229_v37 = vpop.xlane.xlu1 %1228  ;;  %v1263_v50 = vpop.xlane.xlu2 %1262  ;;  %v1548_v53 = vsel %vm1438_vm6, %v1547_v19, %v1546_v9 }
 0x1b3   : > { %v1261_v49 = vpop.xlane.xlu0 %1260  ;;  %v1335_v13 = vadd.f32 %v3901_v22, %v1263_v50  ;;  %v1318_v43 = vadd.f32 %v3901_v22, %v1229_v37  ;;  %v1513_v50 = vsel %vm1430_vm4, %v1512_v61, %v1511_v63 }
 0x1b4   : > { %v1334_v58 = vadd.f32 %v3901_v22, %v1261_v49  ;;  %v1515_v32 = vsel %vm1434_vm5, %v1514_v1, %v1513_v50 }
 0x1b5   : > { %v1551_v57 = vperm.slane %v1335_v13, %v3969_v46  ;;  %v1518_v28 = vperm.slane %v1318_v43, %v3951_v42 }
 0x1b6   : > { %v1549_v41 = vperm.slane %v1334_v58, %v3951_v42 }
 0x1b8   : > { %v1550_v54 = vsel %vm1442_vm7, %v1549_v41, %v1548_v53 }
 0x1ba   : > { %v1265_v31 = vpop.xlane.xlu1 %1264  ;;  %v1233_v44 = vpop.xlane.xlu2 %1232 }
 0x1bb   : > { %v1231_v20 = vpop.xlane.xlu0 %1230  ;;  %v1336_v49 = vadd.f32 %v3901_v22, %v1265_v31  ;;  %v1516_v31 = vperm.slane %v1317_v6, %v3941_v48  ;;  %v1320_v30 = vadd.f32 %v3901_v22, %v1233_v44 }
 0x1bc   : > { %v1319_v21 = vadd.f32 %v3901_v22, %v1231_v20  ;;  %v1552_v20 = vsel %vm1446_vm8, %v1551_v57, %v1550_v54 }
 0x1bd   : > { %v1553_v7 = vperm.slane %v1336_v49, %v3965_v33  ;;  %v1517_v36 = vsel %vm1438_vm6, %v1516_v31, %v1515_v32  ;;  %vm2444_vm6 = vcmask 1045508  }
 0x1be   : > { %v1520_v48 = vperm.slane %v1319_v21, %v3969_v46  ;;  %v1519_v44 = vsel %vm1442_vm7, %v1518_v28, %v1517_v36  ;;  %vm2446_vm7 = vcmask 1043456  }
 0x1bf   : > { %v1554_v55 = vsel %vm1450_vm9, %v1553_v7, %v1552_v20 }
 0x1c0   : > { %v1521_v62 = vsel %vm1446_vm8, %v1520_v48, %v1519_v44 }
 0x1c2   : > { %v1235_v10 = vpop.xlane.xlu1 %1234  ;;  %v1269_v47 = vpop.xlane.xlu2 %1268 }
 0x1c3   : > { %v1267_v24 = vpop.xlane.xlu0 %1266  ;;  %v1338_v2 = vadd.f32 %v3901_v22, %v1269_v47  ;;  %v1321_v60 = vadd.f32 %v3901_v22, %v1235_v10  ;;  %v1522_v10 = vperm.slane %v1320_v30, %v3965_v33  ;;  %v1344_v33 = vadd.s32 128, %v3904_v23 }
 0x1c4   : > { %v1337_v38 = vadd.f32 %v3901_v22, %v1267_v24 }
 0x1c5   : > { %v1557_v47 = vperm.slane %v1338_v2, %v3990_v11  ;;  %v1524_v51 = vperm.slane %v1321_v60, %v3973_v35  ;;  %v1523_v13 = vsel %vm1450_vm9, %v1522_v10, %v1521_v62  ;;  %vm1346_vm0 = vcmp.lt.s32.totalorder %v1344_v33, 144 }
 0x1c6   : > { %v1555_v37 = vperm.slane %v1337_v38, %v3973_v35  ;;  %v4172_v2 = vshrl.u32 %v1342_v15, 7 }
 0x1c7   : > { %v1525_v6 = vsel %vm1454_vm10, %v1524_v51, %v1523_v13  ;;  %v1592_v51 = vld [vmem:[%s5106_s1] sm:$0xff] }
 0x1c8   : > { %v1556_v16 = vsel %vm1454_vm10, %v1555_v37, %v1554_v55  ;;  %3162 = vset.pattern.permute.xlu0 %v4172_v2  ;;  %v4176_v1 = vadd.s32 16, %v4172_v2  ;;  %v4179_v37 = vadd.s32 8, %v4172_v2  ;;  %v4191_v36 = vadd.s32 24, %v4172_v2 }
 0x1c9   : > { %v1558_v52 = vsel %vm1458_vm11, %v1557_v47, %v1556_v16  ;;  %v4194_v55 = vadd.s32 32, %v4172_v2  ;;  %v4197_v60 = vadd.s32 56, %v4172_v2  ;;  %v4206_v47 = vadd.s32 40, %v4172_v2 }
 0x1ca   : > { %v1271_v0 = vpop.xlane.xlu1 %1270  ;;  %v1239_v40 = vpop.xlane.xlu2 %1238  ;;  %3164 = vset.pattern.permute.xlu2 %v4176_v1  ;;  %3163 = vset.pattern.permute.xlu1 %v4179_v37  ;;  %v4212_v16 = vadd.s32 96, %v4172_v2  ;;  %v4238_v44 = vadd.s32 88, %v4172_v2 }
 0x1cb   : > { %v1237_v56 = vpop.xlane.xlu0 %1236  ;;  %v1339_v26 = vadd.f32 %v3901_v22, %v1271_v0  ;;  %v1323_v58 = vadd.f32 %v3901_v22, %v1239_v40 }
 0x1cc   : > { %v1322_v24 = vadd.f32 %v3901_v22, %v1237_v56 }
 0x1cd   : > { %v1559_v42 = vperm.slane %v1339_v26, %v3986_v5  ;;  %v1528_v9 = vperm.slane %v1323_v58, %v3986_v5  ;;  %v1594_v58 = vld [vmem:[%s5106_s1 + $0x10] sm:$0xff] }
 0x1ce   : > { %v1526_v3 = vperm.slane %v1322_v24, %v3990_v11  ;;  %v4224_v24 = vadd.s32 72, %v4172_v2 }
 0x1cf   : > { %v1560_v59 = vsel %vm1462_vm12, %v1559_v42, %v1558_v52  ;;  %v4221_v42 = vadd.s32 64, %v4172_v2 }
 0x1d0   : > { %v1527_v41 = vsel %vm1458_vm11, %v1526_v3, %v1525_v6 }
 0x1d1   : > { %v1529_v40 = vsel %vm1462_vm12, %v1528_v9, %v1527_v41  ;;  %v1596_v41 = vld [vmem:[%s5106_s1 + $0x20] sm:$0xff] }
 0x1d2   : > { %v1275_v39 = vpop.xlane.xlu2 %1274  ;;  %v1241_v29 = vpop.xlane.xlu1 %1240 }
 0x1d3   : > { %v1273_v25 = vpop.xlane.xlu0 %1272  ;;  %v1341_v46 = vadd.f32 %v3901_v22, %v1275_v39  ;;  %v1324_v61 = vadd.f32 %v3901_v22, %v1241_v29  ;;  %v4209_v39 = vadd.s32 48, %v4172_v2  ;;  %v4247_v29 = vadd.s32 104, %v4172_v2 }
 0x1d4   : > { %v1340_v34 = vadd.f32 %v3901_v22, %v1273_v25 }
 0x1d5   : > { %v1563_v14 = vperm.slane %v1341_v46, %v4015_v18  ;;  %v1530_v49 = vperm.slane %v1324_v61, %v4004_v45  ;;  %v4235_v46 = vadd.s32 80, %v4172_v2  ;;  %v1595_v61 = vld [vmem:[%s5106_s1 + $0x18] sm:$0xff] }
 0x1d6   : > { %v1561_v17 = vperm.slane %v1340_v34, %v4004_v45 }
 0x1d7   : > { %v1531_v19 = vsel %vm1466_vm13, %v1530_v49, %v1529_v40  ;;  %v1597_v49 = vld [vmem:[%s5106_s1 + $0x28] sm:$0xff] }
 0x1d8   : > { %v1562_v63 = vsel %vm1466_vm13, %v1561_v17, %v1560_v59 }
 0x1d9   : > { %v1564_v35 = vsel %vm1470_vm14, %v1563_v14, %v1562_v63  ;;  %v1593_v14 = vld [vmem:[%s5106_s1 + $0x8] sm:$0xff] }
 0x1da   : > { %v1567_v23 = vsel %vm1565_vm15, %v1564_v35, %v4071_v8 }
 0x1db   : > { %v1243_v11 = vpop.xlane.xlu0 %1242  ;;  %v1571_v38 = vsel %vm1346_vm0, %v1567_v23, -1e+30 }
 0x1dc   : > { %v1325_v0 = vadd.f32 %v3901_v22, %v1243_v11  ;;  %v1574_v22 = vsel %vm1572_vm1, %v1571_v38, -inf }
 0x1de   : > { %v1532_v4 = vperm.slane %v1325_v0, %v4015_v18 }
 0x1e0   : > { %v1533_v5 = vsel %vm1470_vm14, %v1532_v4, %v1531_v19 }
 0x1e1   : > { %v1566_v45 = vsel %vm1565_vm15, %v1533_v5, %v4030_v12  ;;  %v1599_v5 = vld [vmem:[%s5106_s1 + $0x38] sm:$0xff] }
 0x1e2   : > { %v1573_v56 = vsel %vm1572_vm1, %v1566_v45, -inf }
 0x1e3   : > { %v1575_v43 = vmax.f32 %v1573_v56, %v1574_v22 }
 0x1e5   : > { %1576 = vmax.xlane.f32.xlu1 %v1575_v43  ;;  %v1600_v43 = vld [vmem:[%s5106_s1 + $0x40] sm:$0xff] }
 0x258   : > { %v1577_v8 = vpop.xlane.xlu1 %1576 }
 0x259   : > { %v1578_v50 = vsub.f32 %v1566_v45, %v1577_v8  ;;  %v1579_v53 = vsub.f32 %v1571_v38, %v1577_v8  ;;  %v1598_v38 = vld [vmem:[%s5106_s1 + $0x30] sm:$0xff] }
 0x25b   : > { %v1580_v57 = vmul.f32 1.442695, %v1578_v50  ;;  %v1582_v18 = vmul.f32 1.442695, %v1579_v53 }
 0x25d   : > { %3227 = vpow2.f32 %v1580_v57 }
 0x25e   : > { %3229 = vpow2.f32 %v1582_v18 }
 0x263   : > { %v3228_v21 = vpop.eup %3227 }
 0x264   : > { %v3230_v31 = vpop.eup %3229  ;;  %v1584_v54 = vsel %vm1572_vm1, %v3228_v21, 0.0 }
 0x265   : > { %v1585_v7 = vsel %vm1572_vm1, %v3230_v31, 0.0 }
 0x266   : > { %v1586_v12 = vadd.f32 %v1585_v7, %v1584_v54  ;;  %v1602_v54 = vld [vmem:[%s5106_s1 + $0x50] sm:$0xff] }
 0x268   : > { %1587 = vadd.xlane.f32.xlu2 %v1586_v12 }
 0x2db   : > { %v1588_v26 = vpop.xlane.xlu2 %1587 }
 0x2dc   : > { %3231 = vrcp.f32 %v1588_v26 }
 0x2e2   : > { %v3232_v28 = vpop.eup %3231 }
 0x2e3   : > { %v1590_v32 = vmul.f32 %v3232_v28, %v3228_v21  ;;  %v1591_v20 = vmul.f32 %v3232_v28, %v3230_v31  ;;  %v1601_v31 = vld [vmem:[%s5106_s1 + $0x48] sm:$0xff]  ;;  %v4323_v28 = vadd.s32 112, %v4172_v2 }
 0x2e5   : > { %v4183_v15 = vperm.slane %v1590_v32, 0  ;;  %v2537_v48 = vrot.slane %v1591_v20, 6  ;;  %v4229_v25 = vperm.slane %v1590_v32, 1  ;;  %v4258_v34 = vperm.slane %v1591_v20, 0 }
 0x2e6   : > { %v4266_v10 = vperm.slane %v1591_v20, 1 }
 0x2e7   : > { %1673 = vperm.xlu2 %3164, %v4183_v15   ;;  %1667 = vperm.xlu1 %3163, %v4183_v15   ;;  %v2538_v30 = vsel %vm1572_vm1, %v1590_v32, %v2537_v48 }
 0x2e8   : > { %1661 = vperm.xlu0 %3162, %v4183_v15   ;;  %2540 = vst [vmem:[%s3366_s26] sm:$0xf] %v2538_v30  ;;  %v1603_v30 = vld [vmem:[%s5106_s1 + $0x58] sm:$0xff] }
 0x2ef   : > { %3165 = vset.pattern.permute.xlu2 %v4191_v36  ;;  %3166 = vset.pattern.permute.xlu1 %v4194_v55 }
 0x2f0   : > { %3169 = vset.pattern.permute.xlu0 %v4197_v60 }
 0x2f7   : > { %1679 = vperm.xlu2 %3165, %v4183_v15   ;;  %1685 = vperm.xlu1 %3166, %v4183_v15  }
 0x2f8   : > { %1703 = vperm.xlu0 %3169, %v4183_v15  }
 0x2ff   : > { %3167 = vset.pattern.permute.xlu2 %v4206_v47  ;;  %3168 = vset.pattern.permute.xlu1 %v4209_v39 }
 0x300   : > { %3174 = vset.pattern.permute.xlu0 %v4212_v16 }
 0x307   : > { %1691 = vperm.xlu2 %3167, %v4183_v15   ;;  %1697 = vperm.xlu1 %3168, %v4183_v15  }
 0x308   : > { %1733 = vperm.xlu0 %3174, %v4183_v15  }
 0x30f   : > { %3170 = vset.pattern.permute.xlu2 %v4221_v42  ;;  %3171 = vset.pattern.permute.xlu1 %v4224_v24 }
 0x310   : > { %3179 = vset.pattern.permute.xlu0 %v4191_v36 }
 0x317   : > { %1709 = vperm.xlu2 %3170, %v4183_v15   ;;  %1715 = vperm.xlu1 %3171, %v4183_v15  }
 0x318   : > { %1873 = vperm.xlu0 %3179, %v4229_v25  }
 0x31f   : > { %3172 = vset.pattern.permute.xlu2 %v4235_v46  ;;  %3173 = vset.pattern.permute.xlu1 %v4238_v44 }
 0x320   : > { %3184 = vset.pattern.permute.xlu0 %v4221_v42 }
 0x327   : > { %1721 = vperm.xlu2 %3172, %v4183_v15   ;;  %1727 = vperm.xlu1 %3173, %v4183_v15  }
 0x328   : > { %1903 = vperm.xlu0 %3184, %v4229_v25  }
 0x32f   : > { %3175 = vset.pattern.permute.xlu2 %v4247_v29  ;;  %3176 = vset.pattern.permute.xlu1 %v4172_v2 }
 0x330   : > { %3189 = vset.pattern.permute.xlu0 %v4247_v29 }
 0x337   : > { %1739 = vperm.xlu2 %3175, %v4183_v15   ;;  %1855 = vperm.xlu1 %3176, %v4229_v25  }
 0x338   : > { %1933 = vperm.xlu0 %3189, %v4229_v25  }
 0x33f   : > { %3177 = vset.pattern.permute.xlu2 %v4179_v37  ;;  %3178 = vset.pattern.permute.xlu1 %v4176_v1 }
 0x340   : > { %3194 = vset.pattern.permute.xlu0 %v4172_v2 }
 0x341   : > { %v1674_v62 = vpop.permute.xlu2 %1673 }
 0x342   : > { %v2046_v33 = vmul.f32 %v1674_v62, %v1594_v58  ;;  %v1604_v58 = vld [vmem:[%s5106_s1 + $0x60] sm:$0xff] }
 0x347   : > { %1861 = vperm.xlu2 %3177, %v4229_v25   ;;  %1867 = vperm.xlu1 %3178, %v4229_v25  }
 0x348   : > { %1758 = vperm.xlu0 %3194, %v4258_v34  }
 0x34f   : > { %3180 = vset.pattern.permute.xlu2 %v4194_v55  ;;  %3181 = vset.pattern.permute.xlu1 %v4206_v47 }
 0x350   : > { %3199 = vset.pattern.permute.xlu0 %v4176_v1 }
 0x351   : > { %v1680_v63 = vpop.permute.xlu2 %1679 }
 0x352   : > { %v2047_v35 = vmul.f32 %v1680_v63, %v1595_v61  ;;  %v1605_v61 = vld [vmem:[%s5106_s1 + $0x68] sm:$0xff] }
 0x357   : > { %1879 = vperm.xlu2 %3180, %v4229_v25   ;;  %1885 = vperm.xlu1 %3181, %v4229_v25  }
 0x358   : > { %1964 = vperm.xlu0 %3199, %v4266_v10  }
 0x359   : > { %v1668_v52 = vpop.permute.xlu1 %1667 }
 0x35a   : > { %v2045_v17 = vmul.f32 %v1668_v52, %v1593_v14  ;;  %v1662_v59 = vpop.permute.xlu0 %1661 }
 0x35b   : > { %v2044_v3 = vmul.f32 %v1662_v59, %v1592_v51  ;;  %v4335_v51 = vadd.s32 120, %v4172_v2 }
 0x35d   : > { %v2108_v13 = vadd.f32 %v2045_v17, %v2044_v3 }
 0x35f   : > { %v2109_v6 = vadd.f32 %v2108_v13, %v2046_v33  ;;  %3182 = vset.pattern.permute.xlu2 %v4209_v39  ;;  %3183 = vset.pattern.permute.xlu1 %v4197_v60  ;;  %v1625_v13 = vld [vmem:[%s5106_s1 + $0x108] sm:$0xff] }
 0x360   : > { %3204 = vset.pattern.permute.xlu0 %v4206_v47 }
 0x361   : > { %v2110_v9 = vadd.f32 %v2109_v6, %v2047_v35  ;;  %v1692_v11 = vpop.permute.xlu2 %1691  ;;  %v1624_v6 = vld [vmem:[%s5106_s1 + $0x100] sm:$0xff] }
 0x362   : > { %v2049_v40 = vmul.f32 %v1692_v11, %v1597_v49 }
 0x367   : > { %1891 = vperm.xlu2 %3182, %v4229_v25   ;;  %1897 = vperm.xlu1 %3183, %v4229_v25  }
 0x368   : > { %1788 = vperm.xlu0 %3204, %v4258_v34  }
 0x369   : > { %v1686_v0 = vpop.permute.xlu1 %1685 }
 0x36a   : > { %v2048_v23 = vmul.f32 %v1686_v0, %v1596_v41  ;;  %v1704_v45 = vpop.permute.xlu0 %1703 }
 0x36b   : > { %v2051_v50 = vmul.f32 %v1704_v45, %v1599_v5 }
 0x36c   : > { %v2111_v4 = vadd.f32 %v2110_v9, %v2048_v23 }
 0x36e   : > { %v2112_v19 = vadd.f32 %v2111_v4, %v2049_v40 }
 0x36f   : > { %3185 = vset.pattern.permute.xlu2 %v4224_v24  ;;  %3186 = vset.pattern.permute.xlu1 %v4235_v46 }
 0x370   : > { %3209 = vset.pattern.permute.xlu0 %v4197_v60 }
 0x371   : > { %v1710_v8 = vpop.permute.xlu2 %1709 }
 0x372   : > { %v2052_v57 = vmul.f32 %v1710_v8, %v1600_v43  ;;  %v1629_v43 = vld [vmem:[%s5106_s1 + $0x128] sm:$0xff]  ;;  %v1630_v8 = vld [vmem:[%s5106_s1 + $0x130] sm:$0xff] }
 0x377   : > { %1909 = vperm.xlu2 %3185, %v4229_v25   ;;  %1915 = vperm.xlu1 %3186, %v4229_v25  }
 0x378   : > { %1994 = vperm.xlu0 %3209, %v4266_v10  }
 0x379   : > { %v1698_v56 = vpop.permute.xlu1 %1697 }
 0x37a   : > { %v2050_v22 = vmul.f32 %v1698_v56, %v1598_v38  ;;  %v1734_v17 = vpop.permute.xlu0 %1733 }
 0x37b   : > { %v2056_v3 = vmul.f32 %v1734_v17, %v1604_v58 }
 0x37c   : > { %v2113_v53 = vadd.f32 %v2112_v19, %v2050_v22 }
 0x37e   : > { %v2114_v18 = vadd.f32 %v2113_v53, %v2051_v50 }
 0x37f   : > { %3187 = vset.pattern.permute.xlu2 %v4238_v44  ;;  %3188 = vset.pattern.permute.xlu1 %v4212_v16 }
 0x380   : > { %3214 = vset.pattern.permute.xlu0 %v4235_v46  ;;  %v2115_v21 = vadd.f32 %v2114_v18, %v2052_v57 }
 0x381   : > { %v1722_v7 = vpop.permute.xlu2 %1721 }
 0x382   : > { %v2054_v32 = vmul.f32 %v1722_v7, %v1602_v54 }
 0x387   : > { %1921 = vperm.xlu2 %3187, %v4229_v25   ;;  %1927 = vperm.xlu1 %3188, %v4229_v25  }
 0x388   : > { %1818 = vperm.xlu0 %3214, %v4258_v34  }
 0x389   : > { %v1716_v12 = vpop.permute.xlu1 %1715 }
 0x38a   : > { %v2053_v26 = vmul.f32 %v1716_v12, %v1601_v31  ;;  %v1874_v23 = vpop.permute.xlu0 %1873  ;;  %v1632_v31 = vld [vmem:[%s5106_s1 + $0x140] sm:$0xff] }
 0x38c   : > { %v2116_v20 = vadd.f32 %v2115_v21, %v2053_v26  ;;  %v1633_v26 = vld [vmem:[%s5106_s1 + $0x148] sm:$0xff] }
 0x38e   : > { %v2117_v48 = vadd.f32 %v2116_v20, %v2054_v32 }
 0x38f   : > { %3190 = vset.pattern.permute.xlu2 %v4323_v28  ;;  %3191 = vset.pattern.permute.xlu1 %v4323_v28 }
 0x390   : > { %3219 = vset.pattern.permute.xlu0 %v4212_v16 }
 0x391   : > { %v1740_v59 = vpop.permute.xlu2 %1739 }
 0x392   : > { %v2057_v33 = vmul.f32 %v1740_v59, %v1605_v61 }
 0x397   : > { %1745 = vperm.xlu2 %3190, %v4183_v15   ;;  %1939 = vperm.xlu1 %3191, %v4229_v25  }
 0x398   : > { %2024 = vperm.xlu0 %3219, %v4266_v10  }
 0x399   : > { %v1728_v62 = vpop.permute.xlu1 %1727 }
 0x39a   : > { %v2055_v14 = vmul.f32 %v1728_v62, %v1603_v30  ;;  %v1904_v54 = vpop.permute.xlu0 %1903 }
 0x39b   : > { %v2084_v32 = vmul.f32 %v1904_v54, %v1632_v31  ;;  %v1639_v31 = vld [vmem:[%s5106_s1 + $0x178] sm:$0xff]  ;;  %v3069_v54 = vld [vmem:[%s5109_s4 + $0x64] sm:$0xf] }
 0x39c   : > { %v2118_v52 = vadd.f32 %v2117_v48, %v2055_v14  ;;  %v1634_v14 = vld [vmem:[%s5106_s1 + $0x150] sm:$0xff] }
 0x39e   : > { %v2119_v63 = vadd.f32 %v2118_v52, %v2056_v3  ;;  %v1635_v52 = vld [vmem:[%s5106_s1 + $0x158] sm:$0xff] }
 0x39f   : > { %3192 = vset.pattern.permute.xlu2 %v4335_v51  ;;  %3193 = vset.pattern.permute.xlu1 %v4335_v51 }
 0x3a0   : > { %3224 = vset.pattern.permute.xlu0 %v4335_v51  ;;  %v4355_v9 = vadd.f32 %v2119_v63, %v2057_v33 }
 0x3a1   : > { %v1862_v35 = vpop.permute.xlu2 %1861 }
 0x3a2   : > { %v2077_v49 = vmul.f32 %v1862_v35, %v1625_v13 }
 0x3a7   : > { %1751 = vperm.xlu2 %3192, %v4183_v15   ;;  %1945 = vperm.xlu1 %3193, %v4229_v25   ;;  %v1626_v15 = vld [vmem:[%s5106_s1 + $0x110] sm:$0xff]  ;;  %v1627_v25 = vld [vmem:[%s5106_s1 + $0x118] sm:$0xff] }
 0x3a8   : > { %1848 = vperm.xlu0 %3224, %v4258_v34   ;;  %v2079_v38 = vmul.f32 %v1874_v23, %v1627_v25  ;;  %v3099_v25 = vld [vmem:[%s5109_s4 + $0x154] sm:$0xf]  ;;  %v2900_v23 = vld [vmem:[%s5109_s4 + $0x168] sm:$0xf0] }
 0x3a9   : > { %v1856_v41 = vpop.permute.xlu1 %1855 }
 0x3aa   : > { %v2076_v11 = vmul.f32 %v1856_v41, %v1624_v6  ;;  %v1636_v6 = vld [vmem:[%s5106_s1 + $0x160] sm:$0xff] }
 0x3ac   : > { %v2145_v0 = vadd.f32 %v2077_v49, %v2076_v11  ;;  %v1607_v11 = vld [vmem:[%s5106_s1 + $0x78] sm:$0xff] }
 0x3af   : > { %3195 = vset.pattern.permute.xlu2 %v4172_v2  ;;  %3196 = vset.pattern.permute.xlu1 %v4179_v37  ;;  %v1628_v2 = vld [vmem:[%s5106_s1 + $0x120] sm:$0xff] }
 0x3b1   : > { %v1880_v19 = vpop.permute.xlu2 %1879 }
 0x3b2   : > { %v2080_v45 = vmul.f32 %v1880_v19, %v1628_v2  ;;  %v3093_v2 = vld [vmem:[%s5109_s4 + $0x124] sm:$0xf]  ;;  %v2876_v19 = vld [vmem:[%s5109_s4 + $0x138] sm:$0xf0] }
 0x3b7   : > { %1952 = vperm.xlu2 %3195, %v4266_v10   ;;  %1764 = vperm.xlu1 %3196, %v4258_v34  }
 0x3b9   : > { %v1868_v40 = vpop.permute.xlu1 %1867 }
 0x3ba   : > { %v2078_v4 = vmul.f32 %v1868_v40, %v1626_v15  ;;  %v2903_v40 = vor.u32 %v3099_v25, %v2900_v23  ;;  %v3094_v25 = vld [vmem:[%s5109_s4 + $0x12c] sm:$0xf]  ;;  %v2884_v23 = vld [vmem:[%s5109_s4 + $0x140] sm:$0xf0] }
 0x3bc   : > { %v2146_v5 = vadd.f32 %v2145_v0, %v2078_v4  ;;  %v1638_v4 = vld [vmem:[%s5106_s1 + $0x170] sm:$0xff]  ;;  %798 = vmatpush.bf16.msra.mxu1 %v2903_v40  ;;  %v2887_v40 = vor.u32 %v3094_v25, %v2884_v23 }
 0x3be   : > { %v2147_v56 = vadd.f32 %v2146_v5, %v2079_v38  ;;  %v2879_v5 = vor.u32 %v3093_v2, %v2876_v19  ;;  %v3098_v2 = vld [vmem:[%s5109_s4 + $0x144] sm:$0xf0]  ;;  %v3095_v19 = vld [vmem:[%s5109_s4 + $0x134] sm:$0xf] }
 0x3bf   : > { %3197 = vset.pattern.permute.xlu2 %v4179_v37  ;;  %3198 = vset.pattern.permute.xlu1 %v4176_v1  ;;  %v1631_v1 = vld [vmem:[%s5106_s1 + $0x138] sm:$0xff] }
 0x3c0   : > { %v2148_v22 = vadd.f32 %v2147_v56, %v2080_v45  ;;  %799 = vmatpush.bf16.msra.mxu1 %v2879_v5  ;;  %v2892_v5 = vld [vmem:[%s5109_s4 + $0x148] sm:$0xf0] }
 0x3c1   : > { %v1892_v50 = vpop.permute.xlu2 %1891 }
 0x3c2   : > { %v2082_v18 = vmul.f32 %v1892_v50, %v1630_v8  ;;  %v3087_v8 = vld [vmem:[%s5109_s4 + $0xf4] sm:$0xf]  ;;  %v2852_v50 = vld [vmem:[%s5109_s4 + $0x108] sm:$0xf0] }
 0x3c7   : > { %1958 = vperm.xlu2 %3197, %v4266_v10   ;;  %1770 = vperm.xlu1 %3198, %v4258_v34  }
 0x3c9   : > { %v1886_v53 = vpop.permute.xlu1 %1885 }
 0x3ca   : > { %v2081_v57 = vmul.f32 %v1886_v53, %v1629_v43  ;;  %v2855_v53 = vor.u32 %v3087_v8, %v2852_v50  ;;  %v3091_v8 = vld [vmem:[%s5109_s4 + $0x10c] sm:$0xf0]  ;;  %v3088_v50 = vld [vmem:[%s5109_s4 + $0xfc] sm:$0xf] }
 0x3cc   : > { %v2149_v37 = vadd.f32 %v2148_v22, %v2081_v57  ;;  %v3081_v57 = vld [vmem:[%s5109_s4 + $0xc4] sm:$0xf]  ;;  %800 = vmatpush.bf16.msra.mxu1 %v2855_v53 }
 0x3ce   : > { %v2150_v21 = vadd.f32 %v2149_v37, %v2082_v18  ;;  %v2828_v18 = vld [vmem:[%s5109_s4 + $0xd8] sm:$0xf0] }
 0x3cf   : > { %3200 = vset.pattern.permute.xlu2 %v4191_v36  ;;  %3201 = vset.pattern.permute.xlu1 %v4191_v36  ;;  %v2831_v37 = vor.u32 %v3081_v57, %v2828_v18  ;;  %v2860_v57 = vld [vmem:[%s5109_s4 + $0x110] sm:$0xf0]  ;;  %v2866_v18 = vld [vmem:[%s5109_s4 + $0x100] sm:$0xf] }
 0x3d1   : > { %v1910_v36 = vpop.permute.xlu2 %1909  ;;  %801 = vmatpush.bf16.msra.mxu1 %v2831_v37  ;;  %v3092_v37 = vld [vmem:[%s5109_s4 + $0x114] sm:$0xf0] }
 0x3d2   : > { %v2085_v48 = vmul.f32 %v1910_v36, %v1633_v26  ;;  %v1640_v26 = vld [vmem:[%s5106_s1 + $0x180] sm:$0xff] }
 0x3d7   : > { %1776 = vperm.xlu2 %3200, %v4258_v34   ;;  %1970 = vperm.xlu1 %3201, %v4266_v10  }
 0x3d9   : > { %v1898_v7 = vpop.permute.xlu1 %1897 }
 0x3da   : > { %v2083_v12 = vmul.f32 %v1898_v7, %v1631_v1  ;;  %v2804_v1 = vld [vmem:[%s5109_s4 + $0xa8] sm:$0xf0]  ;;  %v2780_v7 = vld [vmem:[%s5109_s4 + $0x78] sm:$0xf0] }
 0x3dc   : > { %v2151_v20 = vadd.f32 %v2150_v21, %v2083_v12  ;;  %v3075_v21 = vld [vmem:[%s5109_s4 + $0x94] sm:$0xf]  ;;  %v2783_v12 = vor.u32 %v3069_v54, %v2780_v7  ;;  %v2868_v54 = vld [vmem:[%s5109_s4 + $0x118] sm:$0xf0] }
 0x3de   : > { %v2152_v30 = vadd.f32 %v2151_v20, %v2084_v32 }
 0x3df   : > { %3202 = vset.pattern.permute.xlu2 %v4194_v55  ;;  %3203 = vset.pattern.permute.xlu1 %v4194_v55  ;;  %v1606_v55 = vld [vmem:[%s5106_s1 + $0x70] sm:$0xff] }
 0x3e0   : > { %v2153_v62 = vadd.f32 %v2152_v30, %v2085_v48 }
 0x3e1   : > { %v1922_v58 = vpop.permute.xlu2 %1921 }
 0x3e2   : > { %v2087_v3 = vmul.f32 %v1922_v58, %v1635_v52 }
 0x3e7   : > { %1782 = vperm.xlu2 %3202, %v4258_v34   ;;  %1976 = vperm.xlu1 %3203, %v4266_v10  }
 0x3e9   : > { %v1916_v17 = vpop.permute.xlu1 %1915 }
 0x3ea   : > { %v2086_v59 = vmul.f32 %v1916_v17, %v1634_v14  ;;  %v2756_v14 = vld [vmem:[%s5109_s4 + $0x48] sm:$0xf0]  ;;  %v3057_v17 = vld [vmem:[%s5109_s4 + $0x4] sm:$0xf] }
 0x3ec   : > { %v2154_v61 = vadd.f32 %v2153_v62, %v2086_v59  ;;  %v3063_v62 = vld [vmem:[%s5109_s4 + $0x34] sm:$0xf]  ;;  %v2732_v59 = vld [vmem:[%s5109_s4 + $0x18] sm:$0xf0] }
 0x3ed   : > { %v2759_v52 = vor.u32 %v3063_v62, %v2756_v14  ;;  %v3086_v62 = vld [vmem:[%s5109_s4 + $0xe4] sm:$0xf0] }
 0x3ee   : > { %v2155_v63 = vadd.f32 %v2154_v61, %v2087_v3  ;;  %v2735_v3 = vor.u32 %v3057_v17, %v2732_v59  ;;  %v3083_v17 = vld [vmem:[%s5109_s4 + $0xd4] sm:$0xf]  ;;  %v2844_v59 = vld [vmem:[%s5109_s4 + $0xe8] sm:$0xf0] }
 0x3ef   : > { %3205 = vset.pattern.permute.xlu2 %v4206_v47  ;;  %3206 = vset.pattern.permute.xlu1 %v4209_v39 }
 0x3f1   : > { %v1746_v33 = vpop.permute.xlu2 %1745 }
 0x3f2   : > { %v2058_v13 = vmul.f32 %v1746_v33, %v1606_v55  ;;  %v2908_v33 = vld [vmem:[%s5109_s4 + $0x170] sm:$0xf0] }
 0x3f4   : > { %v2121_v35 = vadd.f32 %v4355_v9, %v2058_v13  ;;  %v2914_v13 = vld [vmem:[%s5109_s4 + $0x160] sm:$0xf] }
 0x3f7   : > { %1982 = vperm.xlu2 %3205, %v4266_v10   ;;  %1794 = vperm.xlu1 %3206, %v4258_v34  }
 0x3f9   : > { %v1928_v41 = vpop.permute.xlu1 %1927 }
 0x3fa   : > { %v2088_v47 = vmul.f32 %v1928_v41, %v1636_v6 }
 0x3fc   : > { %v2156_v49 = vadd.f32 %v2155_v63, %v2088_v47  ;;  %v3100_v63 = vld [vmem:[%s5109_s4 + $0x15c] sm:$0xf]  ;;  %v3101_v47 = vld [vmem:[%s5109_s4 + $0x164] sm:$0xf] }
 0x3fd   : > { %v2911_v6 = vor.u32 %v3100_v63, %v2908_v33 }
 0x3ff   : > { %3207 = vset.pattern.permute.xlu2 %v4209_v39  ;;  %3208 = vset.pattern.permute.xlu1 %v4197_v60  ;;  %v1637_v60 = vld [vmem:[%s5106_s1 + $0x168] sm:$0xff]  ;;  %v1934_v39 = vpop.permute.xlu0 %1933 }
 0x400   : > { %v2089_v38 = vmul.f32 %v1934_v39, %v1637_v60  ;;  %824 = vmatpush.bf16.msra.mxu3 %v2911_v6 }
 0x401   : > { %v1752_v9 = vpop.permute.xlu2 %1751 }
 0x402   : > { %v2059_v0 = vmul.f32 %v1752_v9, %v1607_v11  ;;  %v2157_v22 = vadd.f32 %v2156_v49, %v2089_v38  ;;  %v2916_v49 = vld [vmem:[%s5109_s4 + $0x178] sm:$0xf0]  ;;  %v2882_v11 = vld [vmem:[%s5109_s4 + $0x128] sm:$0xf] }
 0x403   : > { %v2919_v9 = vor.u32 %v3101_v47, %v2916_v49 }
 0x404   : > { %v4419_v15 = vadd.f32 %v2121_v35, %v2059_v0  ;;  %v3104_v35 = vld [vmem:[%s5109_s4 + $0x174] sm:$0xf0]  ;;  %v3097_v0 = vld [vmem:[%s5109_s4 + $0x13c] sm:$0xf0]  ;;  %825 = vmatpush.bf16.msra.mxu3 %v2887_v40 }
 0x405   : > { %v2915_v41 = vor.u32 %v3104_v35, %v2914_v13  ;;  %v2883_v39 = vor.u32 %v3097_v0, %v2882_v11 }
 0x407   : > { %1988 = vperm.xlu2 %3207, %v4266_v10   ;;  %1800 = vperm.xlu1 %3208, %v4258_v34  }
 0x408   : > { %837 = vmatpush.bf16.msrb.mxu0 %v2915_v41 }
 0x409   : > { %v1940_v45 = vpop.permute.xlu1 %1939 }
 0x40a   : > { %v2090_v56 = vmul.f32 %v1940_v45, %v1638_v4  ;;  %v2890_v4 = vld [vmem:[%s5109_s4 + $0x130] sm:$0xf] }
 0x40b   : > { %v2891_v38 = vor.u32 %v3098_v2, %v2890_v4  ;;  %v1613_v2 = vld [vmem:[%s5106_s1 + $0xa8] sm:$0xff] }
 0x40c   : > { %v2158_v43 = vadd.f32 %v2157_v22, %v2090_v56  ;;  %v2895_v56 = vor.u32 %v3095_v19, %v2892_v5  ;;  %v1759_v22 = vpop.permute.xlu0 %1758  ;;  %v1614_v19 = vld [vmem:[%s5106_s1 + $0xb0] sm:$0xff]  ;;  %v1615_v5 = vld [vmem:[%s5106_s1 + $0xb8] sm:$0xff] }
 0x40d   : > { %838 = vmatpush.bf16.msrb.mxu0 %v2891_v38 }
 0x40f   : > { %3210 = vset.pattern.permute.xlu2 %v4221_v42  ;;  %3211 = vset.pattern.permute.xlu1 %v4221_v42  ;;  %v2807_v42 = vor.u32 %v3075_v21, %v2804_v1  ;;  %v2863_v1 = vor.u32 %v3088_v50, %v2860_v57  ;;  %v3076_v50 = vld [vmem:[%s5109_s4 + $0x9c] sm:$0xf] }
 0x411   : > { %802 = vmatpush.bf16.msra.mxu1 %v2807_v42  ;;  %v1953_v36 = vpop.permute.xlu2 %1952  ;;  %v2867_v42 = vor.u32 %v3092_v37, %v2866_v18  ;;  %826 = vmatpush.bf16.msra.mxu3 %v2863_v1  ;;  %v1643_v18 = vld [vmem:[%s5106_s1 + $0x198] sm:$0xff] }
 0x412   : > { %v2092_v48 = vmul.f32 %v1953_v36, %v1640_v26  ;;  %v3085_v26 = vld [vmem:[%s5109_s4 + $0xdc] sm:$0xf0]  ;;  %v3082_v36 = vld [vmem:[%s5109_s4 + $0xcc] sm:$0xf] }
 0x413   : > { %839 = vmatpush.bf16.msrb.mxu0 %v2867_v42  ;;  %v2812_v42 = vld [vmem:[%s5109_s4 + $0xb0] sm:$0xf0] }
 0x414   : > { %v4638_v63 = vpop.permute.xlu0 %1964 }
 0x415   : > { %803 = vmatpush.bf16.msra.mxu1 %v2783_v12  ;;  %v2834_v12 = vld [vmem:[%s5109_s4 + $0xc8] sm:$0xf] }
 0x417   : > { %1806 = vperm.xlu2 %3210, %v4258_v34   ;;  %2000 = vperm.xlu1 %3211, %v4266_v10  }
 0x419   : > { %v1946_v32 = vpop.permute.xlu1 %1945  ;;  %804 = vmatpush.bf16.msra.mxu1 %v2759_v52 }
 0x41a   : > { %v2091_v20 = vmul.f32 %v1946_v32, %v1639_v31  ;;  %v3089_v31 = vld [vmem:[%s5109_s4 + $0x104] sm:$0xf] }
 0x41b   : > { %v2871_v7 = vor.u32 %v3089_v31, %v2868_v54  ;;  %v2818_v31 = vld [vmem:[%s5109_s4 + $0xa0] sm:$0xf]  ;;  %v3080_v54 = vld [vmem:[%s5109_s4 + $0xb4] sm:$0xf0] }
 0x41c   : > { %v2159_v30 = vadd.f32 %v2158_v43, %v2091_v20  ;;  %v2858_v43 = vld [vmem:[%s5109_s4 + $0xf8] sm:$0xf]  ;;  %v2835_v20 = vor.u32 %v3085_v26, %v2834_v12  ;;  %v1789_v0 = vpop.permute.xlu0 %1788  ;;  %v2819_v12 = vor.u32 %v3080_v54, %v2818_v31  ;;  %v3077_v26 = vld [vmem:[%s5109_s4 + $0xa4] sm:$0xf]  ;;  %v2746_v31 = vld [vmem:[%s5109_s4 + $0x10] sm:$0xf] }
 0x41d   : > { %805 = vmatpush.bf16.msra.mxu1 %v2735_v3  ;;  %v2859_v53 = vor.u32 %v3091_v8, %v2858_v43  ;;  %v1608_v3 = vld [vmem:[%s5106_s1 + $0x80] sm:$0xff]  ;;  %v1642_v43 = vld [vmem:[%s5106_s1 + $0x190] sm:$0xff] }
 0x41e   : > { %v4481_v58 = vadd.f32 %v2159_v30, %v2092_v48  ;;  %v2836_v48 = vld [vmem:[%s5109_s4 + $0xe0] sm:$0xf0]  ;;  %v2842_v30 = vld [vmem:[%s5109_s4 + $0xd0] sm:$0xf]  ;;  %v2060_v33 = vmul.f32 %v1759_v22, %v1608_v3 }
 0x41f   : > { %3212 = vset.pattern.permute.xlu2 %v4224_v24  ;;  %3213 = vset.pattern.permute.xlu1 %v4224_v24  ;;  %v2839_v14 = vor.u32 %v3082_v36, %v2836_v48  ;;  %v2843_v52 = vor.u32 %v3086_v62, %v2842_v30  ;;  %v3079_v8 = vld [vmem:[%s5109_s4 + $0xac] sm:$0xf0]  ;;  %v2786_v36 = vld [vmem:[%s5109_s4 + $0x68] sm:$0xf]  ;;  %v1644_v48 = vld [vmem:[%s5106_s1 + $0x1a0] sm:$0xff] }
 0x420   : > { %806 = vmatmul.bf16.vlgmr.msra.gmra.mxu1 %v3423_v27  ;;  %v2123_v41 = vadd.f32 %v4419_v15, %v2060_v33  ;;  %v3071_v33 = vld [vmem:[%s5109_s4 + $0x74] sm:$0xf] }
 0x421   : > { %850 = vmatpush.bf16.msrb.mxu1 %v2919_v9  ;;  %827 = vmatpush.bf16.msra.mxu3 %v2839_v14  ;;  %v1611_v9 = vld [vmem:[%s5106_s1 + $0x98] sm:$0xff] }
 0x422   : > { %840 = vmatpush.bf16.msrb.mxu0 %v2843_v52  ;;  %v3073_v52 = vld [vmem:[%s5109_s4 + $0x7c] sm:$0xf0] }
 0x424   : > { %v4695_v57 = vpop.permute.xlu0 %1994 }
 0x425   : > { %851 = vmatpush.bf16.msrb.mxu1 %v2895_v56  ;;  %v4680_v56 = vld [vmem:[%s5110_s5] sm:$0x3f] }
 0x426   : > { %v534_v22 = vperm.slane %v4680_v56, 1  ;;  %841 = vmatpush.bf16.msrb.mxu0 %v2819_v12 }
 0x427   : > { %1812 = vperm.xlu2 %3212, %v4258_v34   ;;  %2006 = vperm.xlu1 %3213, %v4266_v10  }
 0x429   : > { %v4514_v24 = vpop.permute.xlu1 %1764  ;;  %852 = vmatpush.bf16.msrb.mxu1 %v2871_v7  ;;  %v2815_v7 = vor.u32 %v3076_v50, %v2812_v42  ;;  %v2740_v42 = vld [vmem:[%s5109_s4 + $0x20] sm:$0xf0] }
 0x42b   : > { %828 = vmatpush.bf16.msra.mxu3 %v2815_v7  ;;  %v1619_v7 = vld [vmem:[%s5106_s1 + $0xd8] sm:$0xff] }
 0x42c   : > { %v1819_v50 = vpop.permute.xlu0 %1818 }
 0x42f   : > { %3215 = vset.pattern.permute.xlu2 %v4235_v46  ;;  %3216 = vset.pattern.permute.xlu1 %v4238_v44 }
 0x437   : > { %2012 = vperm.xlu2 %3215, %v4266_v10   ;;  %1824 = vperm.xlu1 %3216, %v4258_v34  }
 0x43f   : > { %3217 = vset.pattern.permute.xlu2 %v4238_v44  ;;  %3218 = vset.pattern.permute.xlu1 %v4212_v16  ;;  %v4511_v16 = vpop.permute.xlu2 %1958  ;;  %v4518_v44 = vpop.permute.xlu1 %1770 }
 0x447   : > { %2018 = vperm.xlu2 %3217, %v4266_v10   ;;  %1830 = vperm.xlu1 %3218, %v4258_v34   ;;  %v4516_v46 = vpop.permute.xlu2 %1776 }
 0x448   : > { %v2063_v23 = vmul.f32 %v4516_v46, %v1611_v9  ;;  %v2796_v9 = vld [vmem:[%s5109_s4 + $0x88] sm:$0xf0] }
 0x449   : > { %v4522_v61 = vpop.permute.xlu1 %1970 }
 0x44f   : > { %3220 = vset.pattern.permute.xlu2 %v4247_v29  ;;  %3221 = vset.pattern.permute.xlu1 %v4247_v29  ;;  %v4520_v29 = vpop.permute.xlu2 %1782 }
 0x457   : > { %1836 = vperm.xlu2 %3220, %v4258_v34   ;;  %2030 = vperm.xlu1 %3221, %v4266_v10  }
 0x45f   : > { %3222 = vset.pattern.permute.xlu2 %v4323_v28  ;;  %3223 = vset.pattern.permute.xlu1 %v4323_v28  ;;  %v4524_v28 = vpop.permute.xlu2 %1982 }
 0x467   : > { %1842 = vperm.xlu2 %3222, %v4258_v34   ;;  %2036 = vperm.xlu1 %3223, %v4266_v10   ;;  %v4526_v34 = vpop.permute.xlu1 %1976  ;;  %v4564_v60 = vpop.permute.xlu2 %1988 }
 0x46f   : > { %3225 = vset.pattern.permute.xlu2 %v4335_v51  ;;  %v2906_v51 = vld [vmem:[%s5109_s4 + $0x158] sm:$0xf]  ;;  %v4578_v45 = vpop.permute.xlu1 %1794 }
 0x470   : > { %v2066_v37 = vmul.f32 %v4578_v45, %v1614_v19  ;;  %v2820_v45 = vld [vmem:[%s5109_s4 + $0xb8] sm:$0xf0]  ;;  %v3068_v19 = vld [vmem:[%s5109_s4 + $0x54] sm:$0xf0] }
 0x471   : > { %v4598_v21 = vpop.permute.xlu2 %1806  ;;  %v2823_v14 = vor.u32 %v3077_v26, %v2820_v45  ;;  %v3062_v26 = vld [vmem:[%s5109_s4 + $0x24] sm:$0xf0]  ;;  %v3059_v45 = vld [vmem:[%s5109_s4 + $0x14] sm:$0xf] }
 0x477   : > { %2042 = vperm.xlu2 %3225, %v4266_v10   ;;  %v3103_v10 = vld [vmem:[%s5109_s4 + $0x16c] sm:$0xf0] }
 0x478   : > { %v2907_v55 = vor.u32 %v3103_v10, %v2906_v51  ;;  %v1609_v51 = vld [vmem:[%s5106_s1 + $0x88] sm:$0xff]  ;;  %v2847_v10 = vor.u32 %v3083_v17, %v2844_v59  ;;  %v1616_v59 = vld [vmem:[%s5106_s1 + $0xc0] sm:$0xff] }
 0x479   : > { %v4615_v32 = vpop.permute.xlu1 %1800  ;;  %v2061_v13 = vmul.f32 %v4514_v24, %v1609_v51  ;;  %v1612_v24 = vld [vmem:[%s5106_s1 + $0xa0] sm:$0xff]  ;;  %v3070_v17 = vld [vmem:[%s5109_s4 + $0x6c] sm:$0xf] }
 0x47a   : > { %811 = vmatpush.bf16.msra.mxu2 %v2907_v55  ;;  %v1610_v55 = vld [vmem:[%s5106_s1 + $0x90] sm:$0xff]  ;;  %853 = vmatpush.bf16.msrb.mxu1 %v2847_v10  ;;  %v2067_v62 = vmul.f32 %v4615_v32, %v1615_v5  ;;  %v2787_v32 = vor.u32 %v3073_v52, %v2786_v36 }
 0x47b   : > { %v2062_v47 = vmul.f32 %v4518_v44, %v1610_v55  ;;  %v2124_v11 = vadd.f32 %v2123_v41, %v2061_v13  ;;  %v1641_v44 = vld [vmem:[%s5106_s1 + $0x188] sm:$0xff]  ;;  %v2794_v10 = vld [vmem:[%s5109_s4 + $0x70] sm:$0xf]  ;;  %v2094_v13 = vmul.f32 %v4638_v63, %v1642_v43  ;;  %v2772_v43 = vld [vmem:[%s5109_s4 + $0x58] sm:$0xf0] }
 0x47c   : > { %v2093_v46 = vmul.f32 %v4511_v16, %v1641_v44  ;;  %v2810_v16 = vld [vmem:[%s5109_s4 + $0x98] sm:$0xf]  ;;  %v3074_v55 = vld [vmem:[%s5109_s4 + $0x84] sm:$0xf0]  ;;  %v2764_v44 = vld [vmem:[%s5109_s4 + $0x50] sm:$0xf0] }
 0x47d   : > { %v2125_v25 = vadd.f32 %v2124_v11, %v2062_v47  ;;  %v2811_v1 = vor.u32 %v3079_v8, %v2810_v16  ;;  %v1617_v47 = vld [vmem:[%s5106_s1 + $0xc8] sm:$0xff]  ;;  %v2795_v11 = vor.u32 %v3074_v55, %v2794_v10  ;;  %v3061_v8 = vld [vmem:[%s5109_s4 + $0x1c] sm:$0xf0] }
 0x47e   : > { %812 = vmatpush.bf16.msra.mxu2 %v2883_v39  ;;  %v2064_v39 = vmul.f32 %v4520_v29, %v1612_v24  ;;  %854 = vmatpush.bf16.msrb.mxu1 %v2823_v14  ;;  %v2762_v24 = vld [vmem:[%s5109_s4 + $0x38] sm:$0xf]  ;;  %v2738_v16 = vld [vmem:[%s5109_s4 + $0x8] sm:$0xf] }
 0x47f   : > { %v2126_v4 = vadd.f32 %v2125_v25, %v2063_v23  ;;  %v2799_v23 = vor.u32 %v3071_v33, %v2796_v9  ;;  %842 = vmatpush.bf16.msrb.mxu0 %v2795_v11  ;;  %v3045_v10 = vld [vmem:[%s5113_s8 + $0xe8] sm:$0xf]  ;;  %v3047_v11 = vld [vmem:[%s5113_s8 + $0xf8] sm:$0xf0] }
 0x481   : > { %v4646_v6 = vpop.permute.xlu2 %1812  ;;  %v2127_v29 = vadd.f32 %v2126_v4, %v2064_v39  ;;  %v3067_v39 = vld [vmem:[%s5109_s4 + $0x4c] sm:$0xf0] }
 0x482   : > { %813 = vmatpush.bf16.msra.mxu2 %v2859_v53  ;;  %v2065_v53 = vmul.f32 %v1789_v0, %v1613_v2  ;;  %v2095_v0 = vmul.f32 %v4522_v61, %v1643_v18  ;;  %v2763_v61 = vor.u32 %v3067_v39, %v2762_v24  ;;  %v2069_v18 = vmul.f32 %v4646_v6, %v1617_v47  ;;  %v1646_v6 = vld [vmem:[%s5106_s1 + $0x1b0] sm:$0xff]  ;;  %v3135_v47 = vld [vmem:[%s5113_s8 + $0xec] sm:$0xf] }
 0x483   : > { %855 = vmatpush.bf16.msrb.mxu1 %v2799_v23  ;;  %v3021_v23 = vld [vmem:[%s5113_s8 + $0xc0] sm:$0xf]  ;;  %v3132_v39 = vld [vmem:[%s5113_s8 + $0xcc] sm:$0xf0] }
 0x484   : > { %v2128_v30 = vadd.f32 %v2127_v29, %v2065_v53  ;;  %v2096_v29 = vmul.f32 %v4526_v34, %v1644_v48  ;;  %v1645_v34 = vld [vmem:[%s5106_s1 + $0x1a8] sm:$0xff]  ;;  %v2068_v53 = vmul.f32 %v4598_v21, %v1616_v59  ;;  %v1618_v21 = vld [vmem:[%s5106_s1 + $0xd0] sm:$0xff]  ;;  %v2747_v59 = vor.u32 %v3062_v26, %v2746_v31  ;;  %v1623_v26 = vld [vmem:[%s5106_s1 + $0xf8] sm:$0xff] }
 0x485   : > { %v2748_v48 = vld [vmem:[%s5109_s4 + $0x28] sm:$0xf0]  ;;  %v2097_v9 = vmul.f32 %v4524_v28, %v1645_v34  ;;  %v1622_v31 = vld [vmem:[%s5106_s1 + $0xf0] sm:$0xff] }
 0x486   : > { %814 = vmatpush.bf16.msra.mxu2 %v2835_v20  ;;  %v2161_v20 = vadd.f32 %v4481_v58, %v2093_v46  ;;  %v2788_v58 = vld [vmem:[%s5109_s4 + $0x80] sm:$0xf0]  ;;  %v2129_v41 = vadd.f32 %v2128_v30, %v2066_v37  ;;  %v3037_v30 = vld [vmem:[%s5113_s8 + $0xe0] sm:$0xf]  ;;  %v2751_v33 = vor.u32 %v3059_v45, %v2748_v48 }
 0x487   : > { %v2791_v51 = vor.u32 %v3070_v17, %v2788_v58  ;;  %v3065_v46 = vld [vmem:[%s5109_s4 + $0x44] sm:$0xf] }
 0x488   : > { %v2162_v4 = vadd.f32 %v2161_v20, %v2094_v13  ;;  %v2130_v2 = vadd.f32 %v2129_v41, %v2067_v62  ;;  %v2775_v37 = vor.u32 %v3065_v46, %v2772_v43  ;;  %v2739_v20 = vor.u32 %v3061_v8, %v2738_v16  ;;  %v3136_v62 = vld [vmem:[%s5113_s8 + $0xec] sm:$0xf0]  ;;  %v1620_v17 = vld [vmem:[%s5106_s1 + $0xe0] sm:$0xff]  ;;  %v3137_v41 = vld [vmem:[%s5113_s8 + $0xf4] sm:$0xf0] }
 0x489   : > { %v4650_v49 = vpop.permute.xlu1 %2000  ;;  %829 = vmatpush.bf16.msra.mxu3 %v2791_v51  ;;  %v3039_v51 = vld [vmem:[%s5113_s8 + $0xf0] sm:$0xf0]  ;;  %v3038_v13 = vor.u32 %v3136_v62, %v3037_v30  ;;  %v3022_v43 = vor.u32 %v3132_v39, %v3021_v23  ;;  %v1647_v16 = vld [vmem:[%s5106_s1 + $0x1b8] sm:$0xff]  ;;  %v1648_v8 = vld [vmem:[%s5106_s1 + $0x1c0] sm:$0xff] }
 0x48a   : > { %815 = vmatpush.bf16.msra.mxu2 %v2811_v1  ;;  %v3058_v1 = vld [vmem:[%s5109_s4 + $0xc] sm:$0xf]  ;;  %v2163_v54 = vadd.f32 %v2162_v4, %v2095_v0  ;;  %v2131_v36 = vadd.f32 %v2130_v2, %v2068_v53  ;;  %856 = vmatpush.bf16.msrb.mxu1 %v2775_v37  ;;  %v2098_v4 = vmul.f32 %v4564_v60, %v1646_v6  ;;  %v2991_v39 = vld [vmem:[%s5113_s8 + $0x90] sm:$0xf0] }
 0x48b   : > { %v2743_v58 = vor.u32 %v3058_v1, %v2740_v42  ;;  %v3050_v2 = vor.u32 %v3135_v47, %v3047_v11  ;;  %v3131_v60 = vld [vmem:[%s5113_s8 + $0xcc] sm:$0xf]  ;;  %v2100_v6 = vmul.f32 %v4650_v49, %v1648_v8  ;;  %v1650_v49 = vld [vmem:[%s5106_s1 + $0x1d0] sm:$0xff] }
 0x48c   : > { %v2164_v14 = vadd.f32 %v2163_v54, %v2096_v29  ;;  %v2132_v55 = vadd.f32 %v2131_v36, %v2069_v18  ;;  %v4877_v29 = vpop.permute.xlu0 %2024  ;;  %v1649_v1 = vld [vmem:[%s5106_s1 + $0x1c8] sm:$0xff]  ;;  %v2099_v54 = vmul.f32 %v4695_v57, %v1647_v16  ;;  %v3128_v57 = vld [vmem:[%s5113_s8 + $0xac] sm:$0xf0] }
 0x48d   : > { %v1621_v42 = vld [vmem:[%s5106_s1 + $0xe8] sm:$0xff] }
 0x48e   : > { %816 = vmatpush.bf16.msra.mxu2 %v2787_v32  ;;  %v3134_v32 = vld [vmem:[%s5113_s8 + $0xe4] sm:$0xf]  ;;  %v2165_v46 = vadd.f32 %v2164_v14, %v2097_v9  ;;  %857 = vmatpush.bf16.msrb.mxu1 %v2751_v33  ;;  %v3127_v33 = vld [vmem:[%s5113_s8 + $0xac] sm:$0xf]  ;;  %v2989_v9 = vld [vmem:[%s5113_s8 + $0x80] sm:$0xf] }
 0x48f   : > { %v3042_v0 = vor.u32 %v3134_v32, %v3039_v51  ;;  %v1651_v32 = vld [vmem:[%s5106_s1 + $0x1d8] sm:$0xff] }
 0x490   : > { %v2166_v53 = vadd.f32 %v2165_v46, %v2098_v4  ;;  %v2973_v46 = vld [vmem:[%s5113_s8 + $0x60] sm:$0xf] }
 0x491   : > { %v4663_v40 = vpop.permute.xlu2 %2012  ;;  %858 = vmatmul.bf16.vlgmr.msrb.gmra.mxu1 %v3423_v27 }
 0x492   : > { %817 = vmatpush.bf16.msra.mxu2 %v2763_v61  ;;  %v3023_v61 = vld [vmem:[%s5113_s8 + $0xd0] sm:$0xf0]  ;;  %2423 = vmatpush.bf16.msra.mxu1 %v3050_v2  ;;  %v2167_v45 = vadd.f32 %v2166_v53, %v2099_v54  ;;  %v2102_v4 = vmul.f32 %v4663_v40, %v1650_v49  ;;  %v1652_v40 = vld [vmem:[%s5106_s1 + $0x1e0] sm:$0xff]  ;;  %v3121_v53 = vld [vmem:[%s5113_s8 + $0x74] sm:$0xf0] }
 0x494   : > { %v1849_v30 = vpop.permute.xlu0 %1848  ;;  %v2168_v62 = vadd.f32 %v2167_v45, %v2100_v6  ;;  %v3116_v6 = vld [vmem:[%s5113_s8 + $0x4c] sm:$0xf0]  ;;  %v3117_v45 = vld [vmem:[%s5113_s8 + $0x54] sm:$0xf0] }
 0x496   : > { %818 = vmatpush.bf16.msra.mxu2 %v2739_v20 }
 0x499   : > { %v4671_v38 = vpop.permute.xlu1 %2006  ;;  %819 = vmatmul.bf16.vlgmr.msra.gmra.mxu2 %v3423_v27 }
 0x49a   : > { %2384 = vmatpush.bf16.msrb.mxu2 %v3038_v13  ;;  %v2101_v36 = vmul.f32 %v4671_v38, %v1649_v1  ;;  %v3126_v38 = vld [vmem:[%s5113_s8 + $0xa4] sm:$0xf]  ;;  %v3015_v13 = vld [vmem:[%s5113_s8 + $0xb8] sm:$0xf0] }
 0x49b   : > { %v3018_v11 = vor.u32 %v3127_v33, %v3015_v13  ;;  %v2983_v1 = vld [vmem:[%s5113_s8 + $0x78] sm:$0xf0]  ;;  %v3111_v33 = vld [vmem:[%s5113_s8 + $0x2c] sm:$0xf] }
 0x49c   : > { %v2951_v13 = vld [vmem:[%s5113_s8 + $0x38] sm:$0xf0] }
 0x49d   : > { %v4644_v35 = vpop.f32.mrf.mxu1 }
 0x49e   : > { %v808_v63 = vadd.f32 %v4644_v35, %v534_v22  ;;  %v2770_v35 = vld [vmem:[%s5109_s4 + $0x40] sm:$0xf]  ;;  %2385 = vmatpush.bf16.msrb.mxu2 %v3022_v43 }
 0x49f   : > { %v2771_v22 = vor.u32 %v3068_v19, %v2770_v35  ;;  %v3029_v35 = vld [vmem:[%s5113_s8 + $0xc8] sm:$0xf]  ;;  %v3133_v19 = vld [vmem:[%s5113_s8 + $0xd4] sm:$0xf0] }
 0x4a0   : > { %v2920_v12 = vmul.f32 -1.442695, %v808_v63  ;;  %v3046_v63 = vor.u32 %v3137_v41, %v3045_v10  ;;  %v3030_v34 = vor.u32 %v3133_v19, %v3029_v35  ;;  %v2169_v41 = vadd.f32 %v2168_v62, %v2101_v36  ;;  %v3123_v35 = vld [vmem:[%s5113_s8 + $0x8c] sm:$0xf]  ;;  %v2999_v19 = vld [vmem:[%s5113_s8 + $0x98] sm:$0xf0] }
 0x4a1   : > { %v4736_v3 = vpop.permute.xlu2 %2018  ;;  %843 = vmatpush.bf16.msrb.mxu0 %v2771_v22  ;;  %v3115_v36 = vld [vmem:[%s5113_s8 + $0x4c] sm:$0xf] }
 0x4a2   : > { %3233 = vpow2.f32 %v2920_v12 }
 0x4a5   : > { %v809_v15 = vpop.f32.mrf.mxu1  ;;  %844 = vmatpush.bf16.msrb.mxu0 %v2747_v59  ;;  %v3129_v59 = vld [vmem:[%s5113_s8 + $0xb4] sm:$0xf0] }
 0x4a6   : > { %v3064_v15 = vld [vmem:[%s5109_s4 + $0x3c] sm:$0xf] }
 0x4a7   : > { %v2767_v5 = vor.u32 %v3064_v15, %v2764_v44  ;;  %v3130_v15 = vld [vmem:[%s5113_s8 + $0xc4] sm:$0xf]  ;;  %v2070_v44 = vmul.f32 %v1819_v50, %v1618_v21 }
 0x4a8   : > { %v3026_v50 = vor.u32 %v3130_v15, %v3023_v61  ;;  %845 = vmatmul.bf16.vlgmr.msrb.gmra.mxu0 %v3423_v27  ;;  %v3234_v12 = vpop.eup %3233  ;;  %v2997_v15 = vld [vmem:[%s5113_s8 + $0x88] sm:$0xf] }
 0x4a9   : > { %v4758_v25 = vpop.permute.xlu1 %1824  ;;  %830 = vmatpush.bf16.msra.mxu3 %v2767_v5  ;;  %v2133_v5 = vadd.f32 %v2132_v55, %v2070_v44  ;;  %2410 = vmatpush.bf16.msra.mxu0 %v3046_v63  ;;  %v4929_v51 = vadd.f32 1.0, %v3234_v12  ;;  %v2075_v63 = vmul.f32 %v1849_v30, %v1623_v26  ;;  %v3125_v44 = vld [vmem:[%s5113_s8 + $0x94] sm:$0xf0]  ;;  %v2959_v12 = vld [vmem:[%s5113_s8 + $0x50] sm:$0xf0] }
 0x4aa   : > { %v2071_v28 = vmul.f32 %v4758_v25, %v1619_v7  ;;  %v3031_v25 = vld [vmem:[%s5113_s8 + $0xd8] sm:$0xf0]  ;;  %v2998_v61 = vor.u32 %v3125_v44, %v2997_v15  ;;  %v2965_v26 = vld [vmem:[%s5113_s8 + $0x48] sm:$0xf]  ;;  %v2925_v44 = vld [vmem:[%s5113_s8] sm:$0xf] }
 0x4ab   : > { %v3034_v37 = vor.u32 %v3131_v60, %v3031_v25  ;;  %3235 = vrcp.f32 %v4929_v51  ;;  %v3002_v60 = vor.u32 %v3123_v35, %v2999_v19  ;;  %v3120_v25 = vld [vmem:[%s5113_s8 + $0x6c] sm:$0xf0]  ;;  %v2933_v35 = vld [vmem:[%s5113_s8 + $0x8] sm:$0xf]  ;;  %v3109_v19 = vld [vmem:[%s5113_s8 + $0x14] sm:$0xf0]  ;;  %vm872_vm2 = vweird.f32 %v4929_v51 }
 0x4ac   : > { %v2134_v18 = vadd.f32 %v2133_v5, %v2071_v28  ;;  %v2103_v28 = vmul.f32 %v4736_v3, %v1651_v32  ;;  %v1653_v3 = vld [vmem:[%s5106_s1 + $0x1e8] sm:$0xff]  ;;  %v3118_v5 = vld [vmem:[%s5113_s8 + $0x64] sm:$0xf]  ;;  %v2974_v8 = vor.u32 %v3120_v25, %v2973_v46  ;;  %v2943_v32 = vld [vmem:[%s5113_s8 + $0x30] sm:$0xf0] }
 0x4ad   : > { %831 = vmatpush.bf16.msra.mxu3 %v2743_v58  ;;  %2411 = vmatpush.bf16.msra.mxu0 %v3030_v34  ;;  %v3013_v58 = vld [vmem:[%s5113_s8 + $0xa8] sm:$0xf] }
 0x4ae   : > { %2424 = vmatpush.bf16.msra.mxu1 %v3034_v37  ;;  %v3014_v55 = vor.u32 %v3129_v59, %v3013_v58  ;;  %v2981_v34 = vld [vmem:[%s5113_s8 + $0x68] sm:$0xf]  ;;  %v3119_v37 = vld [vmem:[%s5113_s8 + $0x6c] sm:$0xf] }
 0x4af   : > { %v2986_v54 = vor.u32 %v3119_v37, %v2983_v1 }
 0x4b0   : > { %832 = vmatmul.bf16.vlgmr.msra.gmra.mxu3 %v3423_v27  ;;  %v3005_v27 = vld [vmem:[%s5113_s8 + $0xa0] sm:$0xf] }
 0x4b1   : > { %v4827_v52 = vpop.permute.xlu2 %1836  ;;  %2397 = vmatpush.bf16.msrb.mxu3 %v3042_v0  ;;  %v3122_v0 = vld [vmem:[%s5113_s8 + $0x84] sm:$0xf]  ;;  %2412 = vmatpush.bf16.msra.mxu0 %v3014_v55  ;;  %v5022_v30 = vpop.eup %3235  ;;  %v3113_v55 = vld [vmem:[%s5113_s8 + $0x34] sm:$0xf0] }
 0x4b2   : > { %v2073_v20 = vmul.f32 %v4827_v52, %v1621_v42  ;;  %v3006_v52 = vor.u32 %v3128_v57, %v3005_v27  ;;  %2425 = vmatpush.bf16.msra.mxu1 %v3018_v11  ;;  %v2994_v2 = vor.u32 %v3122_v0, %v2991_v39  ;;  %v2957_v42 = vld [vmem:[%s5113_s8 + $0x40] sm:$0xf]  ;;  %v1654_v27 = vld [vmem:[%s5106_s1 + $0x1f0] sm:$0xff]  ;;  %vm873_vm3 = vweird.f32 %v5022_v30 }
 0x4b3   : > { %v2958_v57 = vor.u32 %v3116_v6, %v2957_v42  ;;  %v878_v42 = vand.u32 2147483648, %v4929_v51  ;;  %vm874_vm4 = vmor %vm872_vm2, %vm873_vm3 }
 0x4b4   : > { %2386 = vmatpush.bf16.msrb.mxu2 %v3006_v52  ;;  %v3112_v52 = vld [vmem:[%s5113_s8 + $0x2c] sm:$0xf0] }
 0x4b5   : > { %2398 = vmatpush.bf16.msrb.mxu3 %v3026_v50  ;;  %v2975_v50 = vld [vmem:[%s5113_s8 + $0x70] sm:$0xf0]  ;;  %2413 = vmatpush.bf16.msra.mxu0 %v2998_v61 }
 0x4b6   : > { %2426 = vmatpush.bf16.msra.mxu1 %v3002_v60  ;;  %v2927_v61 = vld [vmem:[%s5113_s8 + $0x10] sm:$0xf0]  ;;  %v2935_v60 = vld [vmem:[%s5113_s8 + $0x18] sm:$0xf0] }
 0x4b9   : > { %v1831_v24 = vpop.permute.xlu1 %1830 }
 0x4ba   : > { %v2072_v22 = vmul.f32 %v1831_v24, %v1620_v17  ;;  %v3007_v17 = vld [vmem:[%s5113_s8 + $0xb0] sm:$0xf0]  ;;  %v3124_v24 = vld [vmem:[%s5113_s8 + $0x8c] sm:$0xf0]  ;;  %2427 = vmatpush.bf16.msra.mxu1 %v2986_v54 }
 0x4bb   : > { %v3010_v10 = vor.u32 %v3126_v38, %v3007_v17  ;;  %v2990_v23 = vor.u32 %v3124_v24, %v2989_v9  ;;  %v2967_v38 = vld [vmem:[%s5113_s8 + $0x58] sm:$0xf0]  ;;  %v3110_v17 = vld [vmem:[%s5113_s8 + $0x24] sm:$0xf] }
 0x4bc   : > { %v2135_v7 = vadd.f32 %v2134_v18, %v2072_v22  ;;  %v2170_v22 = vadd.f32 %v2169_v41, %v2102_v4  ;;  %v2978_v18 = vor.u32 %v3118_v5, %v2975_v50  ;;  %v2970_v59 = vor.u32 %v3115_v36, %v2967_v38  ;;  %v1655_v9 = vld [vmem:[%s5106_s1 + $0x1f8] sm:$0xff]  ;;  %v3108_v4 = vld [vmem:[%s5113_s8 + $0xc] sm:$0xf0] }
 0x4bd   : > { %2399 = vmatpush.bf16.msrb.mxu3 %v3010_v10  ;;  %2387 = vmatpush.bf16.msrb.mxu2 %v2990_v23  ;;  %v2949_v10 = vld [vmem:[%s5113_s8 + $0x28] sm:$0xf]  ;;  %v868_v41 = vmul.f32 %v5022_v30, %v4929_v51  ;;  %v2946_v39 = vor.u32 %v3110_v17, %v2943_v32  ;;  %v2926_v5 = vor.u32 %v3108_v4, %v2925_v44  ;;  %v537_v17 = vperm.slane %v4680_v56, 4  ;;  %v2190_v44 = vld [vmem:[%s2189_s18] sm:$0xff] }
 0x4be   : > { %v2136_v14 = vadd.f32 %v2135_v7, %v2073_v20  ;;  %v3114_v7 = vld [vmem:[%s5113_s8 + $0x44] sm:$0xf]  ;;  %v2104_v20 = vmul.f32 %v4877_v29, %v1652_v40  ;;  %v2941_v29 = vld [vmem:[%s5113_s8 + $0x20] sm:$0xf]  ;;  %v2950_v15 = vor.u32 %v3113_v55, %v2949_v10  ;;  %2428 = vmatpush.bf16.msra.mxu1 %v2970_v59  ;;  %v536_v59 = vperm.slane %v4680_v56, 3 }
 0x4bf   : > { %v2962_v62 = vor.u32 %v3114_v7, %v2959_v12  ;;  %v869_v25 = vsub.f32 1.0, %v868_v41  ;;  %v879_v12 = vor.u32 1.1754944e-38, %v878_v42 }
 0x4c1   : > { %v1843_v21 = vpop.permute.xlu2 %1842  ;;  %2400 = vmatpush.bf16.msrb.mxu3 %v2994_v2  ;;  %2388 = vmatpush.bf16.msrb.mxu2 %v2974_v8  ;;  %v2954_v2 = vor.u32 %v3111_v33, %v2951_v13  ;;  %v2934_v8 = vor.u32 %v3109_v19, %v2933_v35  ;;  %v535_v33 = vperm.slane %v4680_v56, 2 }
 0x4c2   : > { %v2074_v48 = vmul.f32 %v1843_v21, %v1622_v31  ;;  %v2171_v31 = vadd.f32 %v2170_v22, %v2103_v28  ;;  %v2982_v21 = vor.u32 %v3121_v53, %v2981_v34  ;;  %v3106_v28 = vld [vmem:[%s5113_s8 + $0x4] sm:$0xf]  ;;  %v870_v53 = vmul.f32 %v5022_v30, %v869_v25 }
 0x4c3   : > { %2429 = vmatpush.bf16.msra.mxu1 %v2954_v2 }
 0x4c4   : > { %v2137_v47 = vadd.f32 %v2136_v14, %v2074_v48  ;;  %2414 = vmatpush.bf16.msra.mxu0 %v2982_v21  ;;  %v2966_v14 = vor.u32 %v3117_v45, %v2965_v26  ;;  %v2172_v58 = vadd.f32 %v2171_v31, %v2104_v20  ;;  %v871_v31 = vadd.f32 %v5022_v30, %v870_v53 }
 0x4c5   : > { %2401 = vmatpush.bf16.msrb.mxu3 %v2978_v18  ;;  %2389 = vmatpush.bf16.msrb.mxu2 %v2958_v57  ;;  %v876_v21 = vand.u32 2147483647, %v4929_v51 }
 0x4c6   : > { %v2138_v43 = vadd.f32 %v2137_v47, %v2075_v63  ;;  %v2942_v63 = vor.u32 %v3112_v52, %v2941_v29  ;;  %v875_v26 = vsel %vm874_vm4, %v5022_v30, %v871_v31 }
 0x4c7   : > { %vm877_vm5 = vcmp.eq.f32.partialorder %v876_v21, 8.507059e+37 }
 0x4c8   : > { %v2139_v48 = vrot.slane %v2138_v43, 4  ;;  %2415 = vmatpush.bf16.msra.mxu0 %v2966_v14  ;;  %v880_v20 = vsel %vm877_vm5, %v879_v12, %v875_v26 }
 0x4c9   : > { %v2031_v16 = vpop.permute.xlu1 %2030  ;;  %2402 = vmatpush.bf16.msrb.mxu3 %v2962_v62  ;;  %2390 = vmatpush.bf16.msrb.mxu2 %v2942_v63 }
 0x4ca   : > { %v2105_v49 = vmul.f32 %v2031_v16, %v1653_v3  ;;  %v2140_v47 = vadd.f32 %v2139_v48, %v2138_v43  ;;  %v3107_v3 = vld [vmem:[%s5113_s8 + $0xc] sm:$0xf]  ;;  %v2930_v16 = vor.u32 %v3106_v28, %v2927_v61 }
 0x4cb   : > { %v2938_v50 = vor.u32 %v3107_v3, %v2935_v60 }
 0x4cc   : > { %v2173_v11 = vadd.f32 %v2172_v58, %v2105_v49  ;;  %v2141_v22 = vrot.slane %v2140_v47, 2  ;;  %2416 = vmatpush.bf16.msra.mxu0 %v2950_v15  ;;  %v538_v58 = vperm.slane %v4680_v56, 5 }
 0x4cd   : > { %2403 = vmatpush.bf16.msrb.mxu3 %v2946_v39  ;;  %2391 = vmatpush.bf16.msrb.mxu2 %v2926_v5 }
 0x4ce   : > { %v2142_v18 = vadd.f32 %v2141_v22, %v2140_v47  ;;  %2430 = vmatpush.bf16.msra.mxu1 %v2938_v50 }
 0x4d0   : > { %2417 = vmatpush.bf16.msra.mxu0 %v2934_v8  ;;  %v2143_v54 = vrot.slane %v2142_v18, 1 }
 0x4d1   : > { %v2043_v24 = vpop.permute.xlu2 %2042  ;;  %2404 = vmatpush.bf16.msrb.mxu3 %v2930_v16 }
 0x4d2   : > { %v2107_v46 = vmul.f32 %v2043_v24, %v1655_v9  ;;  %v2144_v45 = vadd.f32 %v2143_v54, %v2142_v18 }
 0x4d9   : > { %v2037_v0 = vpop.permute.xlu1 %2036 }
 0x4da   : > { %v2106_v23 = vmul.f32 %v2037_v0, %v1654_v27 }
 0x4dc   : > { %v2174_v40 = vadd.f32 %v2173_v11, %v2106_v23 }
 0x4de   : > { %v2175_v43 = vadd.f32 %v2174_v40, %v2107_v46 }
 0x4e0   : > { %v2176_v34 = vrot.slane %v2175_v43, 4 }
 0x4e2   : > { %v2177_v37 = vadd.f32 %v2176_v34, %v2175_v43 }
 0x4e4   : > { %v2178_v1 = vrot.slane %v2177_v37, 2 }
 0x4e6   : > { %v2179_v6 = vadd.f32 %v2178_v1, %v2177_v37 }
 0x4e8   : > { %v2180_v7 = vrot.slane %v2179_v6, 1 }
 0x4ea   : > { %v2181_v36 = vadd.f32 %v2180_v7, %v2179_v6 }
 0x4ec   : > { %v2184_v48 = vsel %vm1565_vm15, %v2181_v36, %v2144_v45 }
 0x4ed   : > { %v2186_v49 = vmul.f32 %v2184_v48, %v880_v20 }
 0x4ef   : > { %v2191_v27 = vpack.c.bf16 %v2186_v49, %v2186_v49 }
 0x4f1   : > { %2392 = vmatmul.bf16.vlgmr.msrb.gmra.mxu2 %v2191_v27  ;;  %2405 = vmatmul.bf16.vlgmr.msrb.gmra.mxu3 %v2191_v27 }
 0x4f2   : > { %2418 = vmatmul.bf16.vlgmr.msra.gmra.mxu0 %v2191_v27  ;;  %2431 = vmatmul.bf16.vlgmr.msra.gmra.mxu1 %v2191_v27 }
 0x50e   : > { %v859_v57 = vpop.f32.mrf.mxu1 }
 0x50f   : > { %v860_v10 = vadd.f32 %v859_v57, %v538_v58 }
 0x511   : > { %v2456_v11 = vrot.slane %v860_v10, 2 }
 0x516   : > { %v861_v29 = vpop.f32.mrf.mxu1 }
 0x51c   : > { %v820_v62 = vpop.f32.mrf.mxu2 }
 0x51d   : > { %v821_v24 = vadd.f32 %v820_v62, %v535_v33 }
 0x524   : > { %v822_v52 = vpop.f32.mrf.mxu2 }
 0x525   : > { %v846_v51 = vpop.f32.mrf.mxu0 }
 0x526   : > { %v847_v32 = vadd.f32 %v846_v51, %v537_v17 }
 0x528   : > { %v2455_v47 = vrot.slane %v847_v32, 4 }
 0x52a   : > { %v2458_v56 = vsel %vm2444_vm6, %v2455_v47, %v2456_v11 }
 0x52d   : > { %v848_v14 = vpop.f32.mrf.mxu0 }
 0x533   : > { %v833_v38 = vpop.f32.mrf.mxu3 }
 0x534   : > { %v834_v55 = vadd.f32 %v833_v38, %v536_v59 }
 0x536   : > { %v2454_v9 = vrot.slane %v834_v55, 6 }
 0x538   : > { %v2457_v4 = vsel %vm1572_vm1, %v821_v24, %v2454_v9 }
 0x539   : > { %v2459_v40 = vsel %vm2446_vm7, %v2457_v4, %v2458_v56 }
 0x53b   : > { %v835_v30 = vpop.f32.mrf.mxu3 }
 0x53c   : > { %v481_v30 = vld [vmem:[#allocation3] sm:$0x3] }
 0x56f   : > { %v2419_v13 = vpop.f32.mrf.mxu0  ;;  %v2432_v41 = vpop.f32.mrf.mxu1 }
 0x570   : > { %v2441_v0 = vrot.slane %v2419_v13, 4  ;;  %v2442_v63 = vrot.slane %v2432_v41, 2 }
 0x572   : > { %v2445_v28 = vsel %vm2444_vm6, %v2441_v0, %v2442_v63 }
 0x574   : > { %v2393_v23 = vpop.f32.mrf.mxu2  ;;  %v2406_v39 = vpop.f32.mrf.mxu3 }
 0x575   : > { %v2440_v15 = vrot.slane %v2406_v39, 6 }
 0x577   : > { %v2443_v2 = vsel %vm1572_vm1, %v2393_v23, %v2440_v15  ;;  %v2421_v61 = vpop.f32.mrf.mxu0  ;;  %v2434_v35 = vpop.f32.mrf.mxu1 }
 0x578   : > { %v2447_v19 = vsel %vm2446_vm7, %v2443_v2, %v2445_v28 }
 0x579   : > { %v2449_v46 = vadd.f32 %v2447_v19, %v2190_v44 }
 0x57b   : > { %v2461_v3 = vadd.f32 %v2459_v40, %v2449_v46 }
 0x57c   : > { %v2395_v60 = vpop.f32.mrf.mxu2  ;;  %v2408_v25 = vpop.f32.mrf.mxu3 }
 0x57d   : > { %v3051_v5 = vmul.f32 -1.442695, %v2461_v3  ;;  %v2482_v22 = vrot.slane %v2461_v3, 2  ;;  %v2506_v43 = vrot.slane %v2461_v3, 6  ;;  %v2503_v6 = vrot.slane %v2461_v3, 4 }
 0x57f   : > { %3237 = vpow2.f32 %v3051_v5  ;;  %v3052_v16 = vmul.f32 -1.442695, %v2482_v22  ;;  %v3053_v8 = vmul.f32 -1.442695, %v2506_v43 }
 0x581   : > { %3239 = vpow2.f32 %v3052_v16 }
 0x582   : > { %3241 = vpow2.f32 %v3053_v8 }
 0x585   : > { %v3238_v50 = vpop.eup %3237 }
 0x586   : > { %v2465_v34 = vadd.f32 1.0, %v3238_v50 }
 0x587   : > { %v3240_v53 = vpop.eup %3239 }
 0x588   : > { %v3242_v18 = vpop.eup %3241  ;;  %3243 = vrcp.f32 %v2465_v34  ;;  %v2487_v37 = vadd.f32 1.0, %v3240_v53  ;;  %v2477_v45 = vand.u32 2147483648, %v2465_v34  ;;  %v2475_v20 = vand.u32 2147483647, %v2465_v34 }
 0x589   : > { %v2511_v1 = vadd.f32 1.0, %v3242_v18  ;;  %vm2471_vm9 = vweird.f32 %v2465_v34 }
 0x58a   : > { %3245 = vrcp.f32 %v2487_v37  ;;  %v2499_v27 = vand.u32 2147483648, %v2487_v37  ;;  %v2497_v57 = vand.u32 2147483647, %v2487_v37  ;;  %v2478_v62 = vor.u32 1.1754944e-38, %v2477_v45 }
 0x58b   : > { %3247 = vrcp.f32 %v2511_v1  ;;  %vm2476_vm12 = vcmp.eq.f32.partialorder %v2475_v20, 8.507059e+37  ;;  %vm2493_vm13 = vweird.f32 %v2487_v37  ;;  %v2523_v47 = vand.u32 2147483648, %v2511_v1 }
 0x58c   : > { %3249 = vtanh.f32 %v2503_v6  ;;  %v2500_v17 = vor.u32 1.1754944e-38, %v2499_v27  ;;  %vm2498_vm15 = vcmp.eq.f32.partialorder %v2497_v57, 8.507059e+37  ;;  %vm2517_vm1 = vweird.f32 %v2511_v1 }
 0x58d   : > { %v2521_v11 = vand.u32 2147483647, %v2511_v1  ;;  %v2524_v24 = vor.u32 1.1754944e-38, %v2523_v47 }
 0x58e   : > { %v3244_v42 = vpop.eup %3243 }
 0x58f   : > { %v2467_v31 = vmul.f32 %v3244_v42, %v2465_v34  ;;  %vm2472_vm8 = vweird.f32 %v3244_v42  ;;  %vm2522_vm3 = vcmp.eq.f32.partialorder %v2521_v11, 8.507059e+37 }
 0x590   : > { %v3246_v21 = vpop.eup %3245  ;;  %vm2473_vm10 = vmor %vm2471_vm9, %vm2472_vm8 }
 0x591   : > { %v2468_v54 = vsub.f32 1.0, %v2467_v31  ;;  %v3248_v7 = vpop.eup %3247  ;;  %v2489_v12 = vmul.f32 %v3246_v21, %v2487_v37  ;;  %vm2494_vm11 = vweird.f32 %v3246_v21 }
 0x592   : > { %v2513_v36 = vmul.f32 %v3248_v7, %v2511_v1  ;;  %vm2495_vm14 = vmor %vm2493_vm13, %vm2494_vm11  ;;  %v3250_v59 = vpop.eup %3249  ;;  %vm2518_vm0 = vweird.f32 %v3248_v7 }
 0x593   : > { %v2469_v26 = vmul.f32 %v3244_v42, %v2468_v54  ;;  %v2490_v48 = vsub.f32 1.0, %v2489_v12  ;;  %vm2519_vm2 = vmor %vm2517_vm1, %vm2518_vm0 }
 0x594   : > { %v2514_v14 = vsub.f32 1.0, %v2513_v36 }
 0x595   : > { %v2470_v49 = vadd.f32 %v3244_v42, %v2469_v26  ;;  %v2491_v51 = vmul.f32 %v3246_v21, %v2490_v48 }
 0x596   : > { %v2515_v10 = vmul.f32 %v3248_v7, %v2514_v14 }
 0x597   : > { %v2474_v38 = vsel %vm2473_vm10, %v3244_v42, %v2470_v49  ;;  %v2492_v29 = vadd.f32 %v3246_v21, %v2491_v51 }
 0x598   : > { %v2479_v52 = vsel %vm2476_vm12, %v2478_v62, %v2474_v38  ;;  %v2516_v41 = vadd.f32 %v3248_v7, %v2515_v10 }
 0x599   : > { %v2496_v58 = vsel %vm2495_vm14, %v3246_v21, %v2492_v29  ;;  %v2528_v33 = vmul.f32 %v3250_v59, %v2479_v52 }
 0x59a   : > { %v2501_v32 = vsel %vm2498_vm15, %v2500_v17, %v2496_v58  ;;  %v2520_v9 = vsel %vm2519_vm2, %v3248_v7, %v2516_v41 }
 0x59b   : > { %v2527_v55 = vmul.f32 %v2501_v32, %v481_v30  ;;  %v2525_v63 = vsel %vm2522_vm3, %v2524_v24, %v2520_v9 }
 0x59d   : > { %v2529_v13 = vadd.f32 %v2528_v33, %v2527_v55 }
 0x59f   : > { %3251 = vtanh.f32 %v2529_v13  ;;  %2533 = vst [vmem:[#allocation3] sm:$0x3] %v2529_v13 }
 0x5a5   : > { %v3252_v0 = vpop.eup %3251 }
 0x5a6   : > { %v2531_v23 = vmul.f32 %v3252_v0, %v2525_v63 }
 0x5a8   : > { %2532 = vst [vmem:[#allocation2] sm:$0x3] %v2531_v23 }
 0x5a9   : > { %2534 = vst [vmem:[%s3361_s23] sm:$0x3] %v2531_v23 }
 0x5aa PF: > { %s22_s17 = sadd.s32 1, %s3276_s17   ;;  %s5116_s15 = smov %s3272_s16 }
 0x5ab   : > { %p19_p6 = scmp.ge.s32.totalorder %s22_s17, 10   ;;  %s5117_s16 = smov %s5119_s7 }
 0x5ad   :  { %21 = sbr.rel (!%p19_p6) target bundleno = 2 (0x2), region = 112 }

</bundles_post_ra>
